<compile_context>
chip_gen: v7x
topology: tpu7x:2x2x1
jax: 0.10.0
libtpu: 0.0.40
codegen_flags: <defaults>
</compile_context>

<pallas_src>
import functools
import math

import jax
import jax.numpy as jnp
from jax.experimental import pallas as pl
from jax.experimental.pallas import tpu as pltpu

BN_SCALE = 1.0 / math.sqrt(1.0 + 1e-5)  # BatchNorm2d eval mode, default running stats
_LANE = 128


def _round_up(x, m):
    return (x + m - 1) // m * m


# ----------------------------------------------------------------------------
# Generation-aware VMEM budgeting
# ----------------------------------------------------------------------------
_VMEM_PLAN = None


def _vmem_plan():
    """Returns (tile_budget_bytes, vmem_limit_bytes) for the current TPU generation."""
    global _VMEM_PLAN
    if _VMEM_PLAN is not None:
        return _VMEM_PLAN
    cap = None
    try:
        info = pltpu.get_tpu_info()
        cap = int(getattr(info, "vmem_capacity_bytes", 0)) or None
    except Exception:
        cap = None
    kind = ""
    try:
        kind = jax.devices()[0].device_kind.lower()
    except Exception:
        pass
    if cap is not None and cap >= 100 * 2 ** 20 and "v7" not in kind:
        _VMEM_PLAN = (64 * 2 ** 20, 96 * 2 ** 20)   # v5e / v6e: 128 MiB VMEM per TC
    else:
        _VMEM_PLAN = (28 * 2 ** 20, 50 * 2 ** 20)   # v7x (64 MiB per TC) or unknown
    return _VMEM_PLAN


def _plan_tiles(m, k, n_p, mn_nbytes, out_nbytes):
    """Pick (tm, tk, kp, mp) under the per-generation VMEM tile budget.

    Preferences: whole (padded) weight resident (single K step -> weight streamed once
    per pallas_call, no acc scratch); >=2 row tiles (keeps both TensorCores busy on
    2-TC chips); largest row tile that fits (less per-grid-step overhead); 256-aligned
    K tiles (v6e/v7x 256x256 MXUs)."""
    budget, _ = _vmem_plan()
    kp128 = _round_up(max(k, 1), _LANE)
    m8 = _round_up(m, 8)

    def cost(tm, tk, kp):
        c = 2 * tm * tk * 2                       # A blocks (bf16, double-buffered)
        c += 2 * tk * n_p * 2                     # B (weight) blocks
        c += 2 * _LANE * 4                        # bias
        c += 2 * tm * n_p * (mn_nbytes + out_nbytes)   # epilogue inputs + out
        if kp != tk:
            c += tm * n_p * 4                     # f32 accumulator scratch
        return c

    def pick_tm(tk, kp):
        cands = [t for t in (512, 256, 128, 64, 32, 16, 8) if t <= m8] or [8]
        fit = [t for t in cands if cost(t, tk, kp) <= budget]
        if not fit:
            return None
        pool = [t for t in fit if -(-m8 // t) >= 2] or fit   # prefer >=2 row tiles
        exact = [t for t in pool if m8 % t == 0]             # prefer no row padding
        return (exact or pool)[0]

    # 1) whole weight resident (single K grid step) if it fits with a decent row tile
    probe = min(64, ([t for t in (64, 32, 16, 8) if t <= m8] or [8])[0])
    if cost(probe, kp128, kp128) <= budget:
        tm = pick_tm(kp128, kp128)
        if tm is not None:
            return tm, kp128, kp128, _round_up(m8, tm)
    # 2) K-tiled: prefer 256-aligned K tiles, then 384/128
    for tk in (512, 256, 384, 128):
        if tk >= kp128:
            continue
        kp = _round_up(kp128, tk)
        tm = pick_tm(tk, kp)
        if tm is not None:
            return tm, tk, kp, _round_up(m8, tm)
    # 3) minimal fallback
    return 8, _LANE, kp128, _round_up(m8, 8)


# ----------------------------------------------------------------------------
# Pallas kernel: K-tiled matmul with f32 accumulator and fused epilogue
# ----------------------------------------------------------------------------
def _mm_kernel(*refs, pre_relu, act, gru, res, has_init, single_k):
    """refs = [A(tm,tk) bf16, B(tk,Np) bf16, bias(1,cout) f32]
              + [init(tm,cout)]            if has_init   (acc initial value)
              + [u(tm,cout), h(tm,cout)]   if gru
              + [residual(tm,cout)]        if res
              + [out(tm,cout)] (+ acc scratch(tm,cout) f32 if not single_k)"""
    a_ref, b_ref, bias_ref = refs[0], refs[1], refs[2]
    idx = 3
    init_ref = u_ref = h_ref = r_ref = None
    if has_init:
        init_ref = refs[idx]
        idx += 1
    if gru:
        u_ref, h_ref = refs[idx], refs[idx + 1]
        idx += 2
    if res:
        r_ref = refs[idx]
        idx += 1
    o_ref = refs[idx]
    acc_ref = None if single_k else refs[idx + 1]
    n_out = o_ref.shape[-1]

    a = a_ref[...]
    if pre_relu:
        a = jnp.maximum(a, 0)          # ReLU on the conv input (positive BN scale folded)
    part = jnp.dot(a, b_ref[...], preferred_element_type=jnp.float32)
    if n_out != part.shape[-1]:
        part = part[:, :n_out]         # drop the 128-padding columns of the weight

    def epilogue(acc):
        acc = acc + bias_ref[...].astype(jnp.float32)
        if gru:                        # fused ConvGRU update, all f32
            cand = jnp.maximum(acc, 0.0)
            uu = u_ref[...].astype(jnp.float32)
            acc = uu * h_ref[...].astype(jnp.float32) + (1.0 - uu) * cand
        elif act == "sigmoid":
            acc = jax.nn.sigmoid(acc)
        elif act == "relu":
            acc = jnp.maximum(acc, 0.0)
        if res:
            acc = acc + r_ref[...].astype(jnp.float32)
        o_ref[...] = acc.astype(o_ref.dtype)

    if single_k:                       # weight-resident: no scratch, no k branches
        acc = part
        if has_init:
            acc = acc + init_ref[...].astype(jnp.float32)
        epilogue(acc)
    else:
        k = pl.program_id(1)

        @pl.when(k == 0)
        def _():                       # write first dot (+ precomputed init) directly
            first = part
            if has_init:
                first = first + init_ref[...].astype(jnp.float32)
            acc_ref[...] = first

        @pl.when(k > 0)
        def _():
            acc_ref[...] += part

        @pl.when(k == pl.num_programs(1) - 1)
        def _():
            epilogue(acc_ref[...])


def matmul_fused(a, pp, *, pre_relu=False, act=None, u=None, hprev=None,
                 residual=None, init=None, out_dtype=jnp.float32):
    """a: (M, K) activations; pp: prepared params {'w': (Kp,Np) bf16, 'b': (1,cout) f32,
    'cout': int}.  Returns (M, cout) in out_dtype with the requested fused epilogue."""
    wp, bp, cout = pp["w"], pp["b"], pp["cout"]
    m, k = a.shape
    kp_w, n_p = wp.shape

    mn_in = [t for t in (init, u, hprev, residual) if t is not None]
    mn_nbytes = sum(jnp.dtype(t.dtype).itemsize for t in mn_in)
    out_nbytes = jnp.dtype(out_dtype).itemsize
    tm, tk, kp, mp = _plan_tiles(m, k, n_p, mn_nbytes, out_nbytes)

    a = a.astype(jnp.bfloat16)
    if (mp, kp) != (m, k):
        a = jnp.pad(a, ((0, mp - m), (0, kp - k)))
    w = wp if kp == kp_w else jnp.pad(wp, ((0, kp - kp_w), (0, 0)))  # constant-folded

    def pad_rows(t):
        if t.shape[0] != mp:
            t = jnp.pad(t, ((0, mp - t.shape[0]), (0, 0)))
        return t

    gru = u is not None
    res = residual is not None
    has_init = init is not None
    single_k = kp == tk

    inputs = [a, w, bp]
    in_specs = [
        pl.BlockSpec((tm, tk), lambda i, kk: (i, kk)),
        pl.BlockSpec((tk, n_p), lambda i, kk: (kk, 0)),
        pl.BlockSpec((1, cout), lambda i, kk: (0, 0)),
    ]
    mn_spec = pl.BlockSpec((tm, cout), lambda i, kk: (i, 0))  # lane-tight MN blocks
    for t in ([init] if has_init else []) + ([u, hprev] if gru else []) \
            + ([residual] if res else []):
        inputs.append(pad_rows(t))
        in_specs.append(mn_spec)

    _, vmem_limit = _vmem_plan()
    out = pl.pallas_call(
        functools.partial(_mm_kernel, pre_relu=pre_relu, act=act, gru=gru, res=res,
                          has_init=has_init, single_k=single_k),
        out_shape=jax.ShapeDtypeStruct((mp, cout), out_dtype),
        grid_spec=pltpu.PrefetchScalarGridSpec(
            num_scalar_prefetch=0,
            grid=(mp // tm, kp // tk),
            in_specs=in_specs,
            out_specs=mn_spec,
            scratch_shapes=([] if single_k
                            else [pltpu.VMEM((tm, cout), jnp.float32)]),
        ),
        compiler_params=pltpu.CompilerParams(
            dimension_semantics=("parallel", "arbitrary"),
            vmem_limit_bytes=vmem_limit,
        ),
    )(*inputs)
    if mp != m:
        out = out[:m]
    return out


# ----------------------------------------------------------------------------
# Conv wrappers (im2col glue in JAX, matmul + epilogue in Pallas)
# ----------------------------------------------------------------------------
def _im2col3(x):
    """x: (B, H, W, C) -> (B*H*W, 9*C) bf16, tap-major layout (kh*3+kw)*C + c."""
    # TODO(synk): replace the host-side 9x im2col with an in-kernel halo'd 9-tap
    # accumulation (manual DMA) to cut activation HBM reads another ~9x.
    b, h, w, c = x.shape
    xp = jnp.pad(x.astype(jnp.bfloat16), ((0, 0), (1, 1), (1, 1), (0, 0)))
    cols = jnp.concatenate(
        [xp[:, dy:dy + h, dx:dx + w, :] for dy in range(3) for dx in range(3)],
        axis=-1)
    return cols.reshape(b * h * w, 9 * c)


def conv3x3(x, pp, *, pre_relu=False, act=None, residual=None, init=None,
            out_dtype=jnp.float32):
    n, h, w, _ = x.shape
    y = matmul_fused(_im2col3(x), pp, pre_relu=pre_relu, act=act, residual=residual,
                     init=init, out_dtype=out_dtype)
    return y.reshape(n, h, w, pp["cout"])


def conv1x1(x, pp, *, pre_relu=False, act=None, residual=None, out_dtype=jnp.float32):
    n, h, w, c = x.shape
    a = x.astype(jnp.bfloat16).reshape(n * h * w, c)
    y = matmul_fused(a, pp, pre_relu=pre_relu, act=act, residual=residual,
                     out_dtype=out_dtype)
    return y.reshape(n, h, w, pp["cout"])


def upsample2x_nhwc(x):
    return jnp.repeat(jnp.repeat(x, 2, axis=1), 2, axis=2)


# ----------------------------------------------------------------------------
# Parameter construction (spectral norm + BN-fold + MXU-layout packing, done once)
# ----------------------------------------------------------------------------
def spectral_normalize(w, n_iter=30):
    m = w.reshape(w.shape[0], -1)
    v = jnp.ones((m.shape[1],), w.dtype) / math.sqrt(m.shape[1])
    for _ in range(n_iter):
        u = m @ v
        u = u / (jnp.linalg.norm(u) + 1e-12)
        v = m.T @ u
        v = v / (jnp.linalg.norm(v) + 1e-12)
    sigma = u @ (m @ v)
    return w / sigma


def conv_params(key, cout, cin, ksize, sn=True):
    kw, kb = jax.random.split(key)
    w = jax.random.normal(kw, (cout, cin, ksize, ksize), jnp.float32) / math.sqrt(
        cin * ksize * ksize)
    b = 0.01 * jax.random.normal(kb, (cout,), jnp.float32)
    if sn:
        w = spectral_normalize(w)
    return w, b


def _prep_matmul_weights(wm, bias):
    """wm: (K, Cout) f32 -> 128-padded bf16 (Kp, Np); bias -> (1, Cout) f32."""
    k, cout = wm.shape
    kp = _round_up(k, _LANE)
    n_p = _round_up(cout, _LANE)
    wp = jnp.pad(wm, ((0, kp - k), (0, n_p - cout))).astype(jnp.bfloat16)
    bp = bias.reshape(1, -1).astype(jnp.float32)
    return {"w": wp, "b": bp, "cout": cout}


def _prep_conv3x3(w, b, scale=1.0):
    cout, cin = w.shape[0], w.shape[1]
    wm = jnp.transpose(w * scale, (2, 3, 1, 0)).reshape(9 * cin, cout)
    return _prep_matmul_weights(wm, b)


def _prep_conv1x1(w, b, scale=1.0):
    cout, cin = w.shape[0], w.shape[1]
    wm = (w * scale).reshape(cout, cin).T
    return _prep_matmul_weights(wm, b)


def _prep_gru_split(w, b, chs1):
    """Split a ConvGRU conv over concat([x, h]) into an x-part (K=9*chs1, carries the
    bias, computed once per frame, time-batched) and an h-part (K=9*chs2, zero bias,
    run per step with the x-term as the accumulator's initial value)."""
    cout, cin = w.shape[0], w.shape[1]
    wx = jnp.transpose(w[:, :chs1], (2, 3, 1, 0)).reshape(9 * chs1, cout)
    wh = jnp.transpose(w[:, chs1:], (2, 3, 1, 0)).reshape(9 * (cin - chs1), cout)
    return (_prep_matmul_weights(wx, b),
            _prep_matmul_weights(wh, jnp.zeros_like(b)))


def _prep_subpixel_conv3x3(w, b, scale=1.0):
    """3x3 SAME conv fused with a preceding nearest-neighbour 2x upsample.
    Runs at LOW resolution; output columns are phase-major: (py*2+px)*cout + o,
    pixel-shuffled back to high resolution by the caller."""
    cout, cin = w.shape[0], w.shape[1]
    w = (w * scale).astype(jnp.float32)
    # low-res relative offset of kernel tap kh for output phase py (floor((py+kh-1)/2))
    off = {(0, 0): -1, (0, 1): 0, (0, 2): 0, (1, 0): 0, (1, 1): 0, (1, 2): 1}
    wsub = jnp.zeros((3, 3, cin, 4, cout), jnp.float32)
    for py in range(2):
        for px in range(2):
            ph = py * 2 + px
            for kh in range(3):
                for kw in range(3):
                    ry, rx = off[(py, kh)] + 1, off[(px, kw)] + 1
                    wsub = wsub.at[ry, rx, :, ph, :].add(w[:, :, kh, kw].T)
    wm = wsub.reshape(9 * cin, 4 * cout)
    return _prep_matmul_weights(wm, jnp.tile(b, 4))


# ----------------------------------------------------------------------------
# Sampler module (JAX/Pallas)
# ----------------------------------------------------------------------------
class Sampler:
    # TODO(synk): ConvGRU/GBlock/Up_GBlock source not provided; standard DGMR
    # definitions (sigmoid gates, ReLU candidate, BN->ReLU->conv blocks) are used.
    def __init__(self, in_channels, base_channels=24, up_step=4, key=None):
        if key is None:
            key = jax.random.PRNGKey(0)
        self.up_steps = up_step
        self.steps = []
        base_c = base_channels
        for i in range(up_step):
            chs1 = base_c * 2 ** (up_step - i + 1) * in_channels
            chs2 = base_c * 2 ** (up_step - i) * in_channels
            keys = jax.random.split(key, 9)
            key = keys[0]
            wr, br = conv_params(keys[1], chs2, chs1 + chs2, 3)
            wu, bu = conv_params(keys[2], chs2, chs1 + chs2, 3)
            wc, bc = conv_params(keys[3], chs2, chs1 + chs2, 3)
            ru_x, ru_h = _prep_gru_split(jnp.concatenate([wr, wu], axis=0),
                                         jnp.concatenate([br, bu], axis=0), chs1)
            c_x, c_h = _prep_gru_split(wc, bc, chs1)
            p = {
                "chs1": chs1, "chs2": chs2,
                "gru_ru_x": ru_x, "gru_ru_h": ru_h,   # fused r/u gate conv, split x/h
                "gru_c_x": c_x, "gru_c_h": c_h,       # candidate conv, split x/h
                "c1x1": _prep_conv1x1(*conv_params(keys[4], chs1, chs2, 1)),
                # BN scale folded into the (spectral-normalized) conv weights
                "gb_w1": _prep_conv3x3(*conv_params(keys[5], chs1, chs1, 3),
                                       scale=BN_SCALE),
                "gb_w2": _prep_conv3x3(*conv_params(keys[6], chs1, chs1, 3),
                                       scale=BN_SCALE),
                "up_sk": _prep_conv1x1(*conv_params(keys[7], chs1 // 2, chs1, 1)),
                # 2x upsample folded into the conv (sub-pixel phases, low-res compute)
                "up_w1": _prep_subpixel_conv3x3(
                    *conv_params(keys[8], chs1 // 2, chs1, 3), scale=BN_SCALE),
            }
            key, k2 = jax.random.split(key)
            p["up_w2"] = _prep_conv3x3(*conv_params(k2, chs1 // 2, chs1 // 2, 3),
                                       scale=BN_SCALE)
            self.steps.append(p)
        key, klast = jax.random.split(key)
        chs2_last = base_c * 2 * in_channels
        self.last_conv = _prep_conv1x1(*conv_params(klast, 4, chs2_last, 1))

    # ---- sub-blocks ---------------------------------------------------------
    def _convgru(self, p, frames_stacked, n_frames, shared_x, h0):
        """frames_stacked: (F*N, H, W, chs1) with F==1 (same latent every step) or
        F==n_frames.  The x-path of both GRU convs is hoisted out of the sequential
        loop and computed in one time-batched matmul; the per-step h-path matmul is
        seeded with it (accumulator initial value), so the serial loop only streams
        the 9*chs2-deep h weights.  Recurrent state h stays f32."""
        nb, hh, ww, chs2 = h0.shape
        m = nb * hh * ww
        cols_x = _im2col3(frames_stacked)
        xg = matmul_fused(cols_x, p["gru_ru_x"])      # x-term (+bias) of the r/u gates
        xc = matmul_fused(cols_x, p["gru_c_x"])       # x-term (+bias) of the candidate
        h = h0
        outs = []
        for t in range(n_frames):
            o = 0 if shared_x else t * m
            xg_t, xc_t = xg[o:o + m], xc[o:o + m]
            cols_h = _im2col3(h)
            gates = matmul_fused(cols_h, p["gru_ru_h"], act="sigmoid", init=xg_t)
            r = gates[:, :chs2].reshape(nb, hh, ww, chs2)
            u = gates[:, chs2:]
            cols_rh = _im2col3(r * h)
            # fused epilogue: h = u*h + (1-u)*relu(conv([x, r*h]) + b)
            h = matmul_fused(cols_rh, p["gru_c_h"], u=u, hprev=h.reshape(m, chs2),
                             init=xc_t).reshape(nb, hh, ww, chs2)
            outs.append(h)
        return outs

    def _gblock(self, p, x):
        nb, hh, ww, c = x.shape
        y = conv3x3(x, p["gb_w1"], pre_relu=True, out_dtype=jnp.bfloat16)
        return conv3x3(y, p["gb_w2"], pre_relu=True,
                       residual=x.reshape(nb * hh * ww, c),
                       out_dtype=jnp.bfloat16)

    def _up_gblock(self, p, x):
        nb, hh, ww, _ = x.shape
        # 1x1 skip conv commutes with nearest upsampling -> run at low res, upsample after
        sc = upsample2x_nhwc(conv1x1(x, p["up_sk"]))           # f32 residual
        # main path: BN->ReLU->(2x upsample ∘ 3x3 conv) computed at LOW res (sub-pixel)
        pc = p["up_w1"]["cout"] // 4
        y = conv3x3(x, p["up_w1"], pre_relu=True, out_dtype=jnp.bfloat16)
        y = y.reshape(nb, hh, ww, 2, 2, pc)
        y = jnp.transpose(y, (0, 1, 3, 2, 4, 5)).reshape(nb, 2 * hh, 2 * ww, pc)
        n2, h2, w2, c2 = sc.shape
        return conv3x3(y, p["up_w2"], pre_relu=True,
                       residual=sc.reshape(n2 * h2 * w2, c2),
                       out_dtype=jnp.bfloat16)

    # ---- forward ------------------------------------------------------------
    def __call__(self, latents, init_states, pred_step):
        lat = latents
        if lat.shape[0] == 1:
            lat = jnp.repeat(lat, init_states[0].shape[0], axis=0)
        x0 = jnp.transpose(lat, (0, 2, 3, 1))        # NCHW -> NHWC
        nb = x0.shape[0]
        frames_stacked, shared = x0, True            # stage-0 latent repeated over time

        x = None
        for i in range(self.up_steps):
            p = self.steps[i]
            h0 = jnp.transpose(init_states[self.up_steps - 1 - i], (0, 2, 3, 1))
            frames = self._convgru(p, frames_stacked, pred_step, shared, h0)
            # all remaining layers are per-frame -> batch the T frames along rows
            x = jnp.concatenate(frames, axis=0)      # (T*N, H, W, chs2), t-major
            x = conv1x1(x, p["c1x1"])                # f32 (residual source for GBlock)
            x = self._gblock(p, x)
            x = self._up_gblock(p, x)
            frames_stacked, shared = x, False

        # ReLU -> 1x1 conv (fused, lane-tight 4-col output) -> PixelShuffle(2) in NHWC
        y = conv1x1(x, self.last_conv, pre_relu=True)          # (T*N, Hf, Wf, 4) f32
        tn, hf, wf, _ = y.shape
        y = y.reshape(tn, hf, wf, 2, 2)                        # (.., py, px)
        y = jnp.transpose(y, (0, 1, 3, 2, 4)).reshape(tn, 2 * hf, 2 * wf)
        y = y.reshape(pred_step, nb, 1, 2 * hf, 2 * wf)
        return jnp.transpose(y, (1, 0, 2, 3, 4))               # (N, T, 1, 2Hf, 2Wf)


# ----------------------------------------------------------------------------
if __name__ == "__main__":
    in_channels = 1
    base_channels = 2
    up_steps = 2
    N = 2
    H0 = W0 = 4
    pred_step = 3

    key = jax.random.PRNGKey(0)
    k_lat, k_s0, k_s1, k_params = jax.random.split(key, 4)

    chs1_0 = base_channels * 2 ** (up_steps + 1) * in_channels  # latent channels = 16
    latents = jax.random.normal(k_lat, (N, chs1_0, H0, W0), jnp.float32)

    # init_states[up_steps-1-i] is used at step i with chs2(i) channels at that
    # step's spatial resolution.
    init_states = []
    for j, kk in zip(range(up_steps), (k_s0, k_s1)):
        i = up_steps - 1 - j
        chs2_i = base_channels * 2 ** (up_steps - i) * in_channels
        Hi = H0 * 2 ** i
        init_states.append(jax.random.normal(kk, (N, chs2_i, Hi, Hi), jnp.float32))

    model = Sampler(in_channels, base_channels=base_channels, up_step=up_steps,
                    key=k_params)

    fwd = jax.jit(lambda lat, s0, s1: model(lat, [s0, s1], pred_step))
    out = fwd(latents, init_states[0], init_states[1])
    out = jax.block_until_ready(out)

    expected = (N, pred_step, 1, H0 * 2 ** (up_steps + 1), W0 * 2 ** (up_steps + 1))
    assert out.shape == expected, (out.shape, expected)
    assert bool(jnp.all(jnp.isfinite(out)))
    print("KERNEL_OK")
</pallas_src>

<mosaic_0001>
module attributes {stable_mosaic.version = 11 : i64} {
  func.func @_mm_kernel(%arg0: i32, %arg1: i32, %arg2: memref<16x256xbf16, #tpu.memory_space<vmem>>, %arg3: memref<256x128xbf16, #tpu.memory_space<vmem>>, %arg4: memref<1x16xf32, #tpu.memory_space<vmem>>, %arg5: memref<16x16xf32, #tpu.memory_space<vmem>>) attributes {dimension_semantics = [#tpu.dimension_semantics<parallel>, #tpu.dimension_semantics<arbitrary>], iteration_bounds = array<i64: 2, 1>, scalar_prefetch = 0 : i64, scratch_operands = 0 : i64, tpu.core_type = #tpu.core_type<tc>, window_params = [{transform_indices = @transform_0, window_bounds = array<i64: 16, 256>}, {transform_indices = @transform_1, window_bounds = array<i64: 256, 128>}, {pipeline_mode = #tpu.pipeline_mode<synchronous>, transform_indices = @transform_2, window_bounds = array<i64: 1, 16>}, {transform_indices = @transform_3, window_bounds = array<i64: 16, 16>}]} {
    %c0 = arith.constant 0 : index
    %c0_0 = arith.constant 0 : index
    %0 = vector.load %arg2[%c0, %c0_0] : memref<16x256xbf16, #tpu.memory_space<vmem>>, vector<16x256xbf16>
    %c0_1 = arith.constant 0 : index
    %c0_2 = arith.constant 0 : index
    %1 = vector.load %arg3[%c0_1, %c0_2] : memref<256x128xbf16, #tpu.memory_space<vmem>>, vector<256x128xbf16>
    %cst = arith.constant dense<0.000000e+00> : vector<16x128xf32>
    %2 = tpu.matmul %0, %1, %cst {dimension_numbers = #tpu.dot_dimension_numbers<[1], [0], [0], [1], [0, 0, 1, 1], [], []>} : vector<16x256xbf16>, vector<256x128xbf16>, vector<16x128xf32> -> vector<16x128xf32>
    %3 = vector.extract_strided_slice %2 {offsets = [0, 0], sizes = [16, 16], strides = [1, 1]} : vector<16x128xf32> to vector<16x16xf32>
    %c0_3 = arith.constant 0 : index
    %c0_4 = arith.constant 0 : index
    %4 = vector.load %arg4[%c0_3, %c0_4] : memref<1x16xf32, #tpu.memory_space<vmem>>, vector<1x16xf32>
    %5 = vector.broadcast %4 : vector<1x16xf32> to vector<16x16xf32>
    %6 = arith.addf %3, %5 : vector<16x16xf32>
    %c0_5 = arith.constant 0 : index
    %c0_6 = arith.constant 0 : index
    %7 = vector.load %arg5[%c0_5, %c0_6] : memref<16x16xf32, #tpu.memory_space<vmem>>, vector<16x16xf32>
    tpu.vector_store %arg5[%c0_5, %c0_6], %6 {strides = array<i32>} : memref<16x16xf32, #tpu.memory_space<vmem>>, vector<16x16xf32>,
    return
  }
  func.func @transform_0(%arg0: i32, %arg1: i32) -> (i32, i32) {
    %c0_i32 = arith.constant 0 : i32
    return %arg0, %arg1 : i32, i32
  }
  func.func @transform_1(%arg0: i32, %arg1: i32) -> (i32, i32) {
    %c0_i32 = arith.constant 0 : i32
    %c0_i32_0 = arith.constant 0 : i32
    return %arg1, %c0_i32 : i32, i32
  }
  func.func @transform_2(%arg0: i32, %arg1: i32) -> (i32, i32) {
    %c0_i32 = arith.constant 0 : i32
    %c0_i32_0 = arith.constant 0 : i32
    %c0_i32_1 = arith.constant 0 : i32
    return %c0_i32, %c0_i32_0 : i32, i32
  }
  func.func @transform_3(%arg0: i32, %arg1: i32) -> (i32, i32) {
    %c0_i32 = arith.constant 0 : i32
    %c0_i32_0 = arith.constant 0 : i32
    return %arg0, %c0_i32 : i32, i32
  }
}

module attributes {stable_mosaic.version = 11 : i64} {
  func.func @_mm_kernel(%arg0: i32, %arg1: i32, %arg2: memref<16x128xbf16, #tpu.memory_space<vmem>>, %arg3: memref<128x128xbf16, #tpu.memory_space<vmem>>, %arg4: memref<1x16xf32, #tpu.memory_space<vmem>>, %arg5: memref<16x16xf32, #tpu.memory_space<vmem>>, %arg6: memref<16x16xf32, #tpu.memory_space<vmem>>) attributes {dimension_semantics = [#tpu.dimension_semantics<parallel>, #tpu.dimension_semantics<arbitrary>], iteration_bounds = array<i64: 2, 1>, scalar_prefetch = 0 : i64, scratch_operands = 0 : i64, tpu.core_type = #tpu.core_type<tc>, window_params = [{transform_indices = @transform_0, window_bounds = array<i64: 16, 128>}, {transform_indices = @transform_1, window_bounds = array<i64: 128, 128>}, {pipeline_mode = #tpu.pipeline_mode<synchronous>, transform_indices = @transform_2, window_bounds = array<i64: 1, 16>}, {transform_indices = @transform_3, window_bounds = array<i64: 16, 16>}, {transform_indices = @transform_4, window_bounds = array<i64: 16, 16>}]} {
    %c0 = arith.constant 0 : index
    %c0_0 = arith.constant 0 : index
    %0 = vector.load %arg2[%c0, %c0_0] : memref<16x128xbf16, #tpu.memory_space<vmem>>, vector<16x128xbf16>
    %c0_1 = arith.constant 0 : index
    %c0_2 = arith.constant 0 : index
    %1 = vector.load %arg3[%c0_1, %c0_2] : memref<128x128xbf16, #tpu.memory_space<vmem>>, vector<128x128xbf16>
    %cst = arith.constant dense<0.000000e+00> : vector<16x128xf32>
    %2 = tpu.matmul %0, %1, %cst {dimension_numbers = #tpu.dot_dimension_numbers<[1], [0], [0], [1], [0, 0, 1, 1], [], []>} : vector<16x128xbf16>, vector<128x128xbf16>, vector<16x128xf32> -> vector<16x128xf32>
    %3 = vector.extract_strided_slice %2 {offsets = [0, 0], sizes = [16, 16], strides = [1, 1]} : vector<16x128xf32> to vector<16x16xf32>
    %c0_3 = arith.constant 0 : index
    %c0_4 = arith.constant 0 : index
    %4 = vector.load %arg5[%c0_3, %c0_4] : memref<16x16xf32, #tpu.memory_space<vmem>>, vector<16x16xf32>
    %5 = arith.addf %3, %4 : vector<16x16xf32>
    %c0_5 = arith.constant 0 : index
    %c0_6 = arith.constant 0 : index
    %6 = vector.load %arg4[%c0_5, %c0_6] : memref<1x16xf32, #tpu.memory_space<vmem>>, vector<1x16xf32>
    %7 = vector.broadcast %6 : vector<1x16xf32> to vector<16x16xf32>
    %8 = arith.addf %5, %7 : vector<16x16xf32>
    %9 = arith.negf %8 : vector<16x16xf32>
    %10 = math.exp %9 : vector<16x16xf32>
    %cst_7 = arith.constant 1.000000e+00 : f32
    %11 = vector.broadcast %cst_7 : f32 to vector<16x16xf32>
    %12 = arith.addf %11, %10 : vector<16x16xf32>
    %13 = arith.divf %11, %12 : vector<16x16xf32>
    %c0_8 = arith.constant 0 : index
    %c0_9 = arith.constant 0 : index
    %14 = vector.load %arg6[%c0_8, %c0_9] : memref<16x16xf32, #tpu.memory_space<vmem>>, vector<16x16xf32>
    tpu.vector_store %arg6[%c0_8, %c0_9], %13 {strides = array<i32>} : memref<16x16xf32, #tpu.memory_space<vmem>>, vector<16x16xf32>,
    return
  }
  func.func @transform_0(%arg0: i32, %arg1: i32) -> (i32, i32) {
    %c0_i32 = arith.constant 0 : i32
    return %arg0, %arg1 : i32, i32
  }
  func.func @transform_1(%arg0: i32, %arg1: i32) -> (i32, i32) {
    %c0_i32 = arith.constant 0 : i32
    %c0_i32_0 = arith.constant 0 : i32
    return %arg1, %c0_i32 : i32, i32
  }
  func.func @transform_2(%arg0: i32, %arg1: i32) -> (i32, i32) {
    %c0_i32 = arith.constant 0 : i32
    %c0_i32_0 = arith.constant 0 : i32
    %c0_i32_1 = arith.constant 0 : i32
    return %c0_i32, %c0_i32_0 : i32, i32
  }
  func.func @transform_3(%arg0: i32, %arg1: i32) -> (i32, i32) {
    %c0_i32 = arith.constant 0 : i32
    %c0_i32_0 = arith.constant 0 : i32
    return %arg0, %c0_i32 : i32, i32
  }
  func.func @transform_4(%arg0: i32, %arg1: i32) -> (i32, i32) {
    %c0_i32 = arith.constant 0 : i32
    %c0_i32_0 = arith.constant 0 : i32
    return %arg0, %c0_i32 : i32, i32
  }
}

module attributes {stable_mosaic.version = 11 : i64} {
  func.func @_mm_kernel(%arg0: i32, %arg1: i32, %arg2: memref<16x256xbf16, #tpu.memory_space<vmem>>, %arg3: memref<256x128xbf16, #tpu.memory_space<vmem>>, %arg4: memref<1x8xf32, #tpu.memory_space<vmem>>, %arg5: memref<16x8xf32, #tpu.memory_space<vmem>>) attributes {dimension_semantics = [#tpu.dimension_semantics<parallel>, #tpu.dimension_semantics<arbitrary>], iteration_bounds = array<i64: 2, 1>, scalar_prefetch = 0 : i64, scratch_operands = 0 : i64, tpu.core_type = #tpu.core_type<tc>, window_params = [{transform_indices = @transform_0, window_bounds = array<i64: 16, 256>}, {transform_indices = @transform_1, window_bounds = array<i64: 256, 128>}, {pipeline_mode = #tpu.pipeline_mode<synchronous>, transform_indices = @transform_2, window_bounds = array<i64: 1, 8>}, {transform_indices = @transform_3, window_bounds = array<i64: 16, 8>}]} {
    %c0 = arith.constant 0 : index
    %c0_0 = arith.constant 0 : index
    %0 = vector.load %arg2[%c0, %c0_0] : memref<16x256xbf16, #tpu.memory_space<vmem>>, vector<16x256xbf16>
    %c0_1 = arith.constant 0 : index
    %c0_2 = arith.constant 0 : index
    %1 = vector.load %arg3[%c0_1, %c0_2] : memref<256x128xbf16, #tpu.memory_space<vmem>>, vector<256x128xbf16>
    %cst = arith.constant dense<0.000000e+00> : vector<16x128xf32>
    %2 = tpu.matmul %0, %1, %cst {dimension_numbers = #tpu.dot_dimension_numbers<[1], [0], [0], [1], [0, 0, 1, 1], [], []>} : vector<16x256xbf16>, vector<256x128xbf16>, vector<16x128xf32> -> vector<16x128xf32>
    %3 = vector.extract_strided_slice %2 {offsets = [0, 0], sizes = [16, 8], strides = [1, 1]} : vector<16x128xf32> to vector<16x8xf32>
    %c0_3 = arith.constant 0 : index
    %c0_4 = arith.constant 0 : index
    %4 = vector.load %arg4[%c0_3, %c0_4] : memref<1x8xf32, #tpu.memory_space<vmem>>, vector<1x8xf32>
    %5 = vector.broadcast %4 : vector<1x8xf32> to vector<16x8xf32>
    %6 = arith.addf %3, %5 : vector<16x8xf32>
    %c0_5 = arith.constant 0 : index
    %c0_6 = arith.constant 0 : index
    %7 = vector.load %arg5[%c0_5, %c0_6] : memref<16x8xf32, #tpu.memory_space<vmem>>, vector<16x8xf32>
    tpu.vector_store %arg5[%c0_5, %c0_6], %6 {strides = array<i32>} : memref<16x8xf32, #tpu.memory_space<vmem>>, vector<16x8xf32>,
    return
  }
  func.func @transform_0(%arg0: i32, %arg1: i32) -> (i32, i32) {
    %c0_i32 = arith.constant 0 : i32
    return %arg0, %arg1 : i32, i32
  }
  func.func @transform_1(%arg0: i32, %arg1: i32) -> (i32, i32) {
    %c0_i32 = arith.constant 0 : i32
    %c0_i32_0 = arith.constant 0 : i32
    return %arg1, %c0_i32 : i32, i32
  }
  func.func @transform_2(%arg0: i32, %arg1: i32) -> (i32, i32) {
    %c0_i32 = arith.constant 0 : i32
    %c0_i32_0 = arith.constant 0 : i32
    %c0_i32_1 = arith.constant 0 : i32
    return %c0_i32, %c0_i32_0 : i32, i32
  }
  func.func @transform_3(%arg0: i32, %arg1: i32) -> (i32, i32) {
    %c0_i32 = arith.constant 0 : i32
    %c0_i32_0 = arith.constant 0 : i32
    return %arg0, %c0_i32 : i32, i32
  }
}

module attributes {stable_mosaic.version = 11 : i64} {
  func.func @_mm_kernel(%arg0: i32, %arg1: i32, %arg2: memref<16x128xbf16, #tpu.memory_space<vmem>>, %arg3: memref<128x128xbf16, #tpu.memory_space<vmem>>, %arg4: memref<1x8xf32, #tpu.memory_space<vmem>>, %arg5: memref<16x8xf32, #tpu.memory_space<vmem>>, %arg6: memref<16x8xf32, #tpu.memory_space<vmem>>, %arg7: memref<16x8xf32, #tpu.memory_space<vmem>>, %arg8: memref<16x8xf32, #tpu.memory_space<vmem>>) attributes {dimension_semantics = [#tpu.dimension_semantics<parallel>, #tpu.dimension_semantics<arbitrary>], iteration_bounds = array<i64: 2, 1>, scalar_prefetch = 0 : i64, scratch_operands = 0 : i64, tpu.core_type = #tpu.core_type<tc>, window_params = [{transform_indices = @transform_0, window_bounds = array<i64: 16, 128>}, {transform_indices = @transform_1, window_bounds = array<i64: 128, 128>}, {pipeline_mode = #tpu.pipeline_mode<synchronous>, transform_indices = @transform_2, window_bounds = array<i64: 1, 8>}, {transform_indices = @transform_3, window_bounds = array<i64: 16, 8>}, {transform_indices = @transform_4, window_bounds = array<i64: 16, 8>}, {transform_indices = @transform_5, window_bounds = array<i64: 16, 8>}, {transform_indices = @transform_6, window_bounds = array<i64: 16, 8>}]} {
    %c0 = arith.constant 0 : index
    %c0_0 = arith.constant 0 : index
    %0 = vector.load %arg2[%c0, %c0_0] : memref<16x128xbf16, #tpu.memory_space<vmem>>, vector<16x128xbf16>
    %c0_1 = arith.constant 0 : index
    %c0_2 = arith.constant 0 : index
    %1 = vector.load %arg3[%c0_1, %c0_2] : memref<128x128xbf16, #tpu.memory_space<vmem>>, vector<128x128xbf16>
    %cst = arith.constant dense<0.000000e+00> : vector<16x128xf32>
    %2 = tpu.matmul %0, %1, %cst {dimension_numbers = #tpu.dot_dimension_numbers<[1], [0], [0], [1], [0, 0, 1, 1], [], []>} : vector<16x128xbf16>, vector<128x128xbf16>, vector<16x128xf32> -> vector<16x128xf32>
    %3 = vector.extract_strided_slice %2 {offsets = [0, 0], sizes = [16, 8], strides = [1, 1]} : vector<16x128xf32> to vector<16x8xf32>
    %c0_3 = arith.constant 0 : index
    %c0_4 = arith.constant 0 : index
    %4 = vector.load %arg5[%c0_3, %c0_4] : memref<16x8xf32, #tpu.memory_space<vmem>>, vector<16x8xf32>
    %5 = arith.addf %3, %4 : vector<16x8xf32>
    %c0_5 = arith.constant 0 : index
    %c0_6 = arith.constant 0 : index
    %6 = vector.load %arg4[%c0_5, %c0_6] : memref<1x8xf32, #tpu.memory_space<vmem>>, vector<1x8xf32>
    %7 = vector.broadcast %6 : vector<1x8xf32> to vector<16x8xf32>
    %8 = arith.addf %5, %7 : vector<16x8xf32>
    %cst_7 = arith.constant 0.000000e+00 : f32
    %9 = vector.broadcast %cst_7 : f32 to vector<16x8xf32>
    %10 = arith.maximumf %8, %9 : vector<16x8xf32>
    %c0_8 = arith.constant 0 : index
    %c0_9 = arith.constant 0 : index
    %11 = vector.load %arg6[%c0_8, %c0_9] : memref<16x8xf32, #tpu.memory_space<vmem>>, vector<16x8xf32>
    %c0_10 = arith.constant 0 : index
    %c0_11 = arith.constant 0 : index
    %12 = vector.load %arg7[%c0_10, %c0_11] : memref<16x8xf32, #tpu.memory_space<vmem>>, vector<16x8xf32>
    %13 = arith.mulf %11, %12 : vector<16x8xf32>
    %cst_12 = arith.constant 1.000000e+00 : f32
    %14 = vector.broadcast %cst_12 : f32 to vector<16x8xf32>
    %15 = arith.subf %14, %11 : vector<16x8xf32>
    %16 = arith.mulf %15, %10 : vector<16x8xf32>
    %17 = arith.addf %13, %16 : vector<16x8xf32>
    %c0_13 = arith.constant 0 : index
    %c0_14 = arith.constant 0 : index
    %18 = vector.load %arg8[%c0_13, %c0_14] : memref<16x8xf32, #tpu.memory_space<vmem>>, vector<16x8xf32>
    tpu.vector_store %arg8[%c0_13, %c0_14], %17 {strides = array<i32>} : memref<16x8xf32, #tpu.memory_space<vmem>>, vector<16x8xf32>,
    return
  }
  func.func @transform_0(%arg0: i32, %arg1: i32) -> (i32, i32) {
    %c0_i32 = arith.constant 0 : i32
    return %arg0, %arg1 : i32, i32
  }
  func.func @transform_1(%arg0: i32, %arg1: i32) -> (i32, i32) {
    %c0_i32 = arith.constant 0 : i32
    %c0_i32_0 = arith.constant 0 : i32
    return %arg1, %c0_i32 : i32, i32
  }
  func.func @transform_2(%arg0: i32, %arg1: i32) -> (i32, i32) {
    %c0_i32 = arith.constant 0 : i32
    %c0_i32_0 = arith.constant 0 : i32
    %c0_i32_1 = arith.constant 0 : i32
    return %c0_i32, %c0_i32_0 : i32, i32
  }
  func.func @transform_3(%arg0: i32, %arg1: i32) -> (i32, i32) {
    %c0_i32 = arith.constant 0 : i32
    %c0_i32_0 = arith.constant 0 : i32
    return %arg0, %c0_i32 : i32, i32
  }
  func.func @transform_4(%arg0: i32, %arg1: i32) -> (i32, i32) {
    %c0_i32 = arith.constant 0 : i32
    %c0_i32_0 = arith.constant 0 : i32
    return %arg0, %c0_i32 : i32, i32
  }
  func.func @transform_5(%arg0: i32, %arg1: i32) -> (i32, i32) {
    %c0_i32 = arith.constant 0 : i32
    %c0_i32_0 = arith.constant 0 : i32
    return %arg0, %c0_i32 : i32, i32
  }
  func.func @transform_6(%arg0: i32, %arg1: i32) -> (i32, i32) {
    %c0_i32 = arith.constant 0 : i32
    %c0_i32_0 = arith.constant 0 : i32
    return %arg0, %c0_i32 : i32, i32
  }
}

module attributes {stable_mosaic.version = 11 : i64} {
  func.func @_mm_kernel(%arg0: i32, %arg1: i32, %arg2: memref<16x128xbf16, #tpu.memory_space<vmem>>, %arg3: memref<128x128xbf16, #tpu.memory_space<vmem>>, %arg4: memref<1x16xf32, #tpu.memory_space<vmem>>, %arg5: memref<16x16xf32, #tpu.memory_space<vmem>>, %arg6: memref<16x16xf32, #tpu.memory_space<vmem>>) attributes {dimension_semantics = [#tpu.dimension_semantics<parallel>, #tpu.dimension_semantics<arbitrary>], iteration_bounds = array<i64: 2, 1>, scalar_prefetch = 0 : i64, scratch_operands = 0 : i64, tpu.core_type = #tpu.core_type<tc>, window_params = [{transform_indices = @transform_0, window_bounds = array<i64: 16, 128>}, {transform_indices = @transform_1, window_bounds = array<i64: 128, 128>}, {pipeline_mode = #tpu.pipeline_mode<synchronous>, transform_indices = @transform_2, window_bounds = array<i64: 1, 16>}, {transform_indices = @transform_3, window_bounds = array<i64: 16, 16>}, {transform_indices = @transform_4, window_bounds = array<i64: 16, 16>}]} {
    %c0 = arith.constant 0 : index
    %c0_0 = arith.constant 0 : index
    %0 = vector.load %arg2[%c0, %c0_0] : memref<16x128xbf16, #tpu.memory_space<vmem>>, vector<16x128xbf16>
    %c0_1 = arith.constant 0 : index
    %c0_2 = arith.constant 0 : index
    %1 = vector.load %arg3[%c0_1, %c0_2] : memref<128x128xbf16, #tpu.memory_space<vmem>>, vector<128x128xbf16>
    %cst = arith.constant dense<0.000000e+00> : vector<16x128xf32>
    %2 = tpu.matmul %0, %1, %cst {dimension_numbers = #tpu.dot_dimension_numbers<[1], [0], [0], [1], [0, 0, 1, 1], [], []>} : vector<16x128xbf16>, vector<128x128xbf16>, vector<16x128xf32> -> vector<16x128xf32>
    %3 = vector.extract_strided_slice %2 {offsets = [0, 0], sizes = [16, 16], strides = [1, 1]} : vector<16x128xf32> to vector<16x16xf32>
    %c0_3 = arith.constant 0 : index
    %c0_4 = arith.constant 0 : index
    %4 = vector.load %arg5[%c0_3, %c0_4] : memref<16x16xf32, #tpu.memory_space<vmem>>, vector<16x16xf32>
    %5 = arith.addf %3, %4 : vector<16x16xf32>
    %c0_5 = arith.constant 0 : index
    %c0_6 = arith.constant 0 : index
    %6 = vector.load %arg4[%c0_5, %c0_6] : memref<1x16xf32, #tpu.memory_space<vmem>>, vector<1x16xf32>
    %7 = vector.broadcast %6 : vector<1x16xf32> to vector<16x16xf32>
    %8 = arith.addf %5, %7 : vector<16x16xf32>
    %9 = arith.negf %8 : vector<16x16xf32>
    %10 = math.exp %9 : vector<16x16xf32>
    %cst_7 = arith.constant 1.000000e+00 : f32
    %11 = vector.broadcast %cst_7 : f32 to vector<16x16xf32>
    %12 = arith.addf %11, %10 : vector<16x16xf32>
    %13 = arith.divf %11, %12 : vector<16x16xf32>
    %c0_8 = arith.constant 0 : index
    %c0_9 = arith.constant 0 : index
    %14 = vector.load %arg6[%c0_8, %c0_9] : memref<16x16xf32, #tpu.memory_space<vmem>>, vector<16x16xf32>
    tpu.vector_store %arg6[%c0_8, %c0_9], %13 {strides = array<i32>} : memref<16x16xf32, #tpu.memory_space<vmem>>, vector<16x16xf32>,
    return
  }
  func.func @transform_0(%arg0: i32, %arg1: i32) -> (i32, i32) {
    %c0_i32 = arith.constant 0 : i32
    return %arg0, %arg1 : i32, i32
  }
  func.func @transform_1(%arg0: i32, %arg1: i32) -> (i32, i32) {
    %c0_i32 = arith.constant 0 : i32
    %c0_i32_0 = arith.constant 0 : i32
    return %arg1, %c0_i32 : i32, i32
  }
  func.func @transform_2(%arg0: i32, %arg1: i32) -> (i32, i32) {
    %c0_i32 = arith.constant 0 : i32
    %c0_i32_0 = arith.constant 0 : i32
    %c0_i32_1 = arith.constant 0 : i32
    return %c0_i32, %c0_i32_0 : i32, i32
  }
  func.func @transform_3(%arg0: i32, %arg1: i32) -> (i32, i32) {
    %c0_i32 = arith.constant 0 : i32
    %c0_i32_0 = arith.constant 0 : i32
    return %arg0, %c0_i32 : i32, i32
  }
  func.func @transform_4(%arg0: i32, %arg1: i32) -> (i32, i32) {
    %c0_i32 = arith.constant 0 : i32
    %c0_i32_0 = arith.constant 0 : i32
    return %arg0, %c0_i32 : i32, i32
  }
}

module attributes {stable_mosaic.version = 11 : i64} {
  func.func @_mm_kernel(%arg0: i32, %arg1: i32, %arg2: memref<16x128xbf16, #tpu.memory_space<vmem>>, %arg3: memref<128x128xbf16, #tpu.memory_space<vmem>>, %arg4: memref<1x8xf32, #tpu.memory_space<vmem>>, %arg5: memref<16x8xf32, #tpu.memory_space<vmem>>, %arg6: memref<16x8xf32, #tpu.memory_space<vmem>>, %arg7: memref<16x8xf32, #tpu.memory_space<vmem>>, %arg8: memref<16x8xf32, #tpu.memory_space<vmem>>) attributes {dimension_semantics = [#tpu.dimension_semantics<parallel>, #tpu.dimension_semantics<arbitrary>], iteration_bounds = array<i64: 2, 1>, scalar_prefetch = 0 : i64, scratch_operands = 0 : i64, tpu.core_type = #tpu.core_type<tc>, window_params = [{transform_indices = @transform_0, window_bounds = array<i64: 16, 128>}, {transform_indices = @transform_1, window_bounds = array<i64: 128, 128>}, {pipeline_mode = #tpu.pipeline_mode<synchronous>, transform_indices = @transform_2, window_bounds = array<i64: 1, 8>}, {transform_indices = @transform_3, window_bounds = array<i64: 16, 8>}, {transform_indices = @transform_4, window_bounds = array<i64: 16, 8>}, {transform_indices = @transform_5, window_bounds = array<i64: 16, 8>}, {transform_indices = @transform_6, window_bounds = array<i64: 16, 8>}]} {
    %c0 = arith.constant 0 : index
    %c0_0 = arith.constant 0 : index
    %0 = vector.load %arg2[%c0, %c0_0] : memref<16x128xbf16, #tpu.memory_space<vmem>>, vector<16x128xbf16>
    %c0_1 = arith.constant 0 : index
    %c0_2 = arith.constant 0 : index
    %1 = vector.load %arg3[%c0_1, %c0_2] : memref<128x128xbf16, #tpu.memory_space<vmem>>, vector<128x128xbf16>
    %cst = arith.constant dense<0.000000e+00> : vector<16x128xf32>
    %2 = tpu.matmul %0, %1, %cst {dimension_numbers = #tpu.dot_dimension_numbers<[1], [0], [0], [1], [0, 0, 1, 1], [], []>} : vector<16x128xbf16>, vector<128x128xbf16>, vector<16x128xf32> -> vector<16x128xf32>
    %3 = vector.extract_strided_slice %2 {offsets = [0, 0], sizes = [16, 8], strides = [1, 1]} : vector<16x128xf32> to vector<16x8xf32>
    %c0_3 = arith.constant 0 : index
    %c0_4 = arith.constant 0 : index
    %4 = vector.load %arg5[%c0_3, %c0_4] : memref<16x8xf32, #tpu.memory_space<vmem>>, vector<16x8xf32>
    %5 = arith.addf %3, %4 : vector<16x8xf32>
    %c0_5 = arith.constant 0 : index
    %c0_6 = arith.constant 0 : index
    %6 = vector.load %arg4[%c0_5, %c0_6] : memref<1x8xf32, #tpu.memory_space<vmem>>, vector<1x8xf32>
    %7 = vector.broadcast %6 : vector<1x8xf32> to vector<16x8xf32>
    %8 = arith.addf %5, %7 : vector<16x8xf32>
    %cst_7 = arith.constant 0.000000e+00 : f32
    %9 = vector.broadcast %cst_7 : f32 to vector<16x8xf32>
    %10 = arith.maximumf %8, %9 : vector<16x8xf32>
    %c0_8 = arith.constant 0 : index
    %c0_9 = arith.constant 0 : index
    %11 = vector.load %arg6[%c0_8, %c0_9] : memref<16x8xf32, #tpu.memory_space<vmem>>, vector<16x8xf32>
    %c0_10 = arith.constant 0 : index
    %c0_11 = arith.constant 0 : index
    %12 = vector.load %arg7[%c0_10, %c0_11] : memref<16x8xf32, #tpu.memory_space<vmem>>, vector<16x8xf32>
    %13 = arith.mulf %11, %12 : vector<16x8xf32>
    %cst_12 = arith.constant 1.000000e+00 : f32
    %14 = vector.broadcast %cst_12 : f32 to vector<16x8xf32>
    %15 = arith.subf %14, %11 : vector<16x8xf32>
    %16 = arith.mulf %15, %10 : vector<16x8xf32>
    %17 = arith.addf %13, %16 : vector<16x8xf32>
    %c0_13 = arith.constant 0 : index
    %c0_14 = arith.constant 0 : index
    %18 = vector.load %arg8[%c0_13, %c0_14] : memref<16x8xf32, #tpu.memory_space<vmem>>, vector<16x8xf32>
    tpu.vector_store %arg8[%c0_13, %c0_14], %17 {strides = array<i32>} : memref<16x8xf32, #tpu.memory_space<vmem>>, vector<16x8xf32>,
    return
  }
  func.func @transform_0(%arg0: i32, %arg1: i32) -> (i32, i32) {
    %c0_i32 = arith.constant 0 : i32
    return %arg0, %arg1 : i32, i32
  }
  func.func @transform_1(%arg0: i32, %arg1: i32) -> (i32, i32) {
    %c0_i32 = arith.constant 0 : i32
    %c0_i32_0 = arith.constant 0 : i32
    return %arg1, %c0_i32 : i32, i32
  }
  func.func @transform_2(%arg0: i32, %arg1: i32) -> (i32, i32) {
    %c0_i32 = arith.constant 0 : i32
    %c0_i32_0 = arith.constant 0 : i32
    %c0_i32_1 = arith.constant 0 : i32
    return %c0_i32, %c0_i32_0 : i32, i32
  }
  func.func @transform_3(%arg0: i32, %arg1: i32) -> (i32, i32) {
    %c0_i32 = arith.constant 0 : i32
    %c0_i32_0 = arith.constant 0 : i32
    return %arg0, %c0_i32 : i32, i32
  }
  func.func @transform_4(%arg0: i32, %arg1: i32) -> (i32, i32) {
    %c0_i32 = arith.constant 0 : i32
    %c0_i32_0 = arith.constant 0 : i32
    return %arg0, %c0_i32 : i32, i32
  }
  func.func @transform_5(%arg0: i32, %arg1: i32) -> (i32, i32) {
    %c0_i32 = arith.constant 0 : i32
    %c0_i32_0 = arith.constant 0 : i32
    return %arg0, %c0_i32 : i32, i32
  }
  func.func @transform_6(%arg0: i32, %arg1: i32) -> (i32, i32) {
    %c0_i32 = arith.constant 0 : i32
    %c0_i32_0 = arith.constant 0 : i32
    return %arg0, %c0_i32 : i32, i32
  }
}

module attributes {stable_mosaic.version = 11 : i64} {
  func.func @_mm_kernel(%arg0: i32, %arg1: i32, %arg2: memref<32x128xbf16, #tpu.memory_space<vmem>>, %arg3: memref<128x128xbf16, #tpu.memory_space<vmem>>, %arg4: memref<1x16xf32, #tpu.memory_space<vmem>>, %arg5: memref<32x16xf32, #tpu.memory_space<vmem>>) attributes {dimension_semantics = [#tpu.dimension_semantics<parallel>, #tpu.dimension_semantics<arbitrary>], iteration_bounds = array<i64: 3, 1>, scalar_prefetch = 0 : i64, scratch_operands = 0 : i64, tpu.core_type = #tpu.core_type<tc>, window_params = [{transform_indices = @transform_0, window_bounds = array<i64: 32, 128>}, {transform_indices = @transform_1, window_bounds = array<i64: 128, 128>}, {pipeline_mode = #tpu.pipeline_mode<synchronous>, transform_indices = @transform_2, window_bounds = array<i64: 1, 16>}, {transform_indices = @transform_3, window_bounds = array<i64: 32, 16>}]} {
    %c0 = arith.constant 0 : index
    %c0_0 = arith.constant 0 : index
    %0 = vector.load %arg2[%c0, %c0_0] : memref<32x128xbf16, #tpu.memory_space<vmem>>, vector<32x128xbf16>
    %c0_1 = arith.constant 0 : index
    %c0_2 = arith.constant 0 : index
    %1 = vector.load %arg3[%c0_1, %c0_2] : memref<128x128xbf16, #tpu.memory_space<vmem>>, vector<128x128xbf16>
    %cst = arith.constant dense<0.000000e+00> : vector<32x128xf32>
    %2 = tpu.matmul %0, %1, %cst {dimension_numbers = #tpu.dot_dimension_numbers<[1], [0], [0], [1], [0, 0, 1, 1], [], []>} : vector<32x128xbf16>, vector<128x128xbf16>, vector<32x128xf32> -> vector<32x128xf32>
    %3 = vector.extract_strided_slice %2 {offsets = [0, 0], sizes = [32, 16], strides = [1, 1]} : vector<32x128xf32> to vector<32x16xf32>
    %c0_3 = arith.constant 0 : index
    %c0_4 = arith.constant 0 : index
    %4 = vector.load %arg4[%c0_3, %c0_4] : memref<1x16xf32, #tpu.memory_space<vmem>>, vector<1x16xf32>
    %5 = vector.broadcast %4 : vector<1x16xf32> to vector<32x16xf32>
    %6 = arith.addf %3, %5 : vector<32x16xf32>
    %c0_5 = arith.constant 0 : index
    %c0_6 = arith.constant 0 : index
    %7 = vector.load %arg5[%c0_5, %c0_6] : memref<32x16xf32, #tpu.memory_space<vmem>>, vector<32x16xf32>
    tpu.vector_store %arg5[%c0_5, %c0_6], %6 {strides = array<i32>} : memref<32x16xf32, #tpu.memory_space<vmem>>, vector<32x16xf32>,
    return
  }
  func.func @transform_0(%arg0: i32, %arg1: i32) -> (i32, i32) {
    %c0_i32 = arith.constant 0 : i32
    return %arg0, %arg1 : i32, i32
  }
  func.func @transform_1(%arg0: i32, %arg1: i32) -> (i32, i32) {
    %c0_i32 = arith.constant 0 : i32
    %c0_i32_0 = arith.constant 0 : i32
    return %arg1, %c0_i32 : i32, i32
  }
  func.func @transform_2(%arg0: i32, %arg1: i32) -> (i32, i32) {
    %c0_i32 = arith.constant 0 : i32
    %c0_i32_0 = arith.constant 0 : i32
    %c0_i32_1 = arith.constant 0 : i32
    return %c0_i32, %c0_i32_0 : i32, i32
  }
  func.func @transform_3(%arg0: i32, %arg1: i32) -> (i32, i32) {
    %c0_i32 = arith.constant 0 : i32
    %c0_i32_0 = arith.constant 0 : i32
    return %arg0, %c0_i32 : i32, i32
  }
}

module attributes {stable_mosaic.version = 11 : i64} {
  func.func @_mm_kernel(%arg0: i32, %arg1: i32, %arg2: memref<32x256xbf16, #tpu.memory_space<vmem>>, %arg3: memref<256x128xbf16, #tpu.memory_space<vmem>>, %arg4: memref<1x16xf32, #tpu.memory_space<vmem>>, %arg5: memref<32x16xbf16, #tpu.memory_space<vmem>>) attributes {dimension_semantics = [#tpu.dimension_semantics<parallel>, #tpu.dimension_semantics<arbitrary>], iteration_bounds = array<i64: 3, 1>, scalar_prefetch = 0 : i64, scratch_operands = 0 : i64, tpu.core_type = #tpu.core_type<tc>, window_params = [{transform_indices = @transform_0, window_bounds = array<i64: 32, 256>}, {transform_indices = @transform_1, window_bounds = array<i64: 256, 128>}, {pipeline_mode = #tpu.pipeline_mode<synchronous>, transform_indices = @transform_2, window_bounds = array<i64: 1, 16>}, {transform_indices = @transform_3, window_bounds = array<i64: 32, 16>}]} {
    %c0 = arith.constant 0 : index
    %c0_0 = arith.constant 0 : index
    %0 = vector.load %arg2[%c0, %c0_0] : memref<32x256xbf16, #tpu.memory_space<vmem>>, vector<32x256xbf16>
    %cst = arith.constant 0.000000e+00 : bf16
    %1 = vector.broadcast %cst : bf16 to vector<32x256xbf16>
    %2 = arith.maximumf %0, %1 : vector<32x256xbf16>
    %c0_1 = arith.constant 0 : index
    %c0_2 = arith.constant 0 : index
    %3 = vector.load %arg3[%c0_1, %c0_2] : memref<256x128xbf16, #tpu.memory_space<vmem>>, vector<256x128xbf16>
    %cst_3 = arith.constant dense<0.000000e+00> : vector<32x128xf32>
    %4 = tpu.matmul %2, %3, %cst_3 {dimension_numbers = #tpu.dot_dimension_numbers<[1], [0], [0], [1], [0, 0, 1, 1], [], []>} : vector<32x256xbf16>, vector<256x128xbf16>, vector<32x128xf32> -> vector<32x128xf32>
    %5 = vector.extract_strided_slice %4 {offsets = [0, 0], sizes = [32, 16], strides = [1, 1]} : vector<32x128xf32> to vector<32x16xf32>
    %c0_4 = arith.constant 0 : index
    %c0_5 = arith.constant 0 : index
    %6 = vector.load %arg4[%c0_4, %c0_5] : memref<1x16xf32, #tpu.memory_space<vmem>>, vector<1x16xf32>
    %7 = vector.broadcast %6 : vector<1x16xf32> to vector<32x16xf32>
    %8 = arith.addf %5, %7 : vector<32x16xf32>
    %9 = arith.truncf %8 : vector<32x16xf32> to vector<32x16xbf16>
    %c0_6 = arith.constant 0 : index
    %c0_7 = arith.constant 0 : index
    %10 = vector.load %arg5[%c0_6, %c0_7] : memref<32x16xbf16, #tpu.memory_space<vmem>>, vector<32x16xbf16>
    tpu.vector_store %arg5[%c0_6, %c0_7], %9 {strides = array<i32>} : memref<32x16xbf16, #tpu.memory_space<vmem>>, vector<32x16xbf16>,
    return
  }
  func.func @transform_0(%arg0: i32, %arg1: i32) -> (i32, i32) {
    %c0_i32 = arith.constant 0 : i32
    return %arg0, %arg1 : i32, i32
  }
  func.func @transform_1(%arg0: i32, %arg1: i32) -> (i32, i32) {
    %c0_i32 = arith.constant 0 : i32
    %c0_i32_0 = arith.constant 0 : i32
    return %arg1, %c0_i32 : i32, i32
  }
  func.func @transform_2(%arg0: i32, %arg1: i32) -> (i32, i32) {
    %c0_i32 = arith.constant 0 : i32
    %c0_i32_0 = arith.constant 0 : i32
    %c0_i32_1 = arith.constant 0 : i32
    return %c0_i32, %c0_i32_0 : i32, i32
  }
  func.func @transform_3(%arg0: i32, %arg1: i32) -> (i32, i32) {
    %c0_i32 = arith.constant 0 : i32
    %c0_i32_0 = arith.constant 0 : i32
    return %arg0, %c0_i32 : i32, i32
  }
}

module attributes {stable_mosaic.version = 11 : i64} {
  func.func @_mm_kernel(%arg0: i32, %arg1: i32, %arg2: memref<32x256xbf16, #tpu.memory_space<vmem>>, %arg3: memref<256x128xbf16, #tpu.memory_space<vmem>>, %arg4: memref<1x16xf32, #tpu.memory_space<vmem>>, %arg5: memref<32x16xf32, #tpu.memory_space<vmem>>, %arg6: memref<32x16xbf16, #tpu.memory_space<vmem>>) attributes {dimension_semantics = [#tpu.dimension_semantics<parallel>, #tpu.dimension_semantics<arbitrary>], iteration_bounds = array<i64: 3, 1>, scalar_prefetch = 0 : i64, scratch_operands = 0 : i64, tpu.core_type = #tpu.core_type<tc>, window_params = [{transform_indices = @transform_0, window_bounds = array<i64: 32, 256>}, {transform_indices = @transform_1, window_bounds = array<i64: 256, 128>}, {pipeline_mode = #tpu.pipeline_mode<synchronous>, transform_indices = @transform_2, window_bounds = array<i64: 1, 16>}, {transform_indices = @transform_3, window_bounds = array<i64: 32, 16>}, {transform_indices = @transform_4, window_bounds = array<i64: 32, 16>}]} {
    %c0 = arith.constant 0 : index
    %c0_0 = arith.constant 0 : index
    %0 = vector.load %arg2[%c0, %c0_0] : memref<32x256xbf16, #tpu.memory_space<vmem>>, vector<32x256xbf16>
    %cst = arith.constant 0.000000e+00 : bf16
    %1 = vector.broadcast %cst : bf16 to vector<32x256xbf16>
    %2 = arith.maximumf %0, %1 : vector<32x256xbf16>
    %c0_1 = arith.constant 0 : index
    %c0_2 = arith.constant 0 : index
    %3 = vector.load %arg3[%c0_1, %c0_2] : memref<256x128xbf16, #tpu.memory_space<vmem>>, vector<256x128xbf16>
    %cst_3 = arith.constant dense<0.000000e+00> : vector<32x128xf32>
    %4 = tpu.matmul %2, %3, %cst_3 {dimension_numbers = #tpu.dot_dimension_numbers<[1], [0], [0], [1], [0, 0, 1, 1], [], []>} : vector<32x256xbf16>, vector<256x128xbf16>, vector<32x128xf32> -> vector<32x128xf32>
    %5 = vector.extract_strided_slice %4 {offsets = [0, 0], sizes = [32, 16], strides = [1, 1]} : vector<32x128xf32> to vector<32x16xf32>
    %c0_4 = arith.constant 0 : index
    %c0_5 = arith.constant 0 : index
    %6 = vector.load %arg4[%c0_4, %c0_5] : memref<1x16xf32, #tpu.memory_space<vmem>>, vector<1x16xf32>
    %7 = vector.broadcast %6 : vector<1x16xf32> to vector<32x16xf32>
    %8 = arith.addf %5, %7 : vector<32x16xf32>
    %c0_6 = arith.constant 0 : index
    %c0_7 = arith.constant 0 : index
    %9 = vector.load %arg5[%c0_6, %c0_7] : memref<32x16xf32, #tpu.memory_space<vmem>>, vector<32x16xf32>
    %10 = arith.addf %8, %9 : vector<32x16xf32>
    %11 = arith.truncf %10 : vector<32x16xf32> to vector<32x16xbf16>
    %c0_8 = arith.constant 0 : index
    %c0_9 = arith.constant 0 : index
    %12 = vector.load %arg6[%c0_8, %c0_9] : memref<32x16xbf16, #tpu.memory_space<vmem>>, vector<32x16xbf16>
    tpu.vector_store %arg6[%c0_8, %c0_9], %11 {strides = array<i32>} : memref<32x16xbf16, #tpu.memory_space<vmem>>, vector<32x16xbf16>,
    return
  }
  func.func @transform_0(%arg0: i32, %arg1: i32) -> (i32, i32) {
    %c0_i32 = arith.constant 0 : i32
    return %arg0, %arg1 : i32, i32
  }
  func.func @transform_1(%arg0: i32, %arg1: i32) -> (i32, i32) {
    %c0_i32 = arith.constant 0 : i32
    %c0_i32_0 = arith.constant 0 : i32
    return %arg1, %c0_i32 : i32, i32
  }
  func.func @transform_2(%arg0: i32, %arg1: i32) -> (i32, i32) {
    %c0_i32 = arith.constant 0 : i32
    %c0_i32_0 = arith.constant 0 : i32
    %c0_i32_1 = arith.constant 0 : i32
    return %c0_i32, %c0_i32_0 : i32, i32
  }
  func.func @transform_3(%arg0: i32, %arg1: i32) -> (i32, i32) {
    %c0_i32 = arith.constant 0 : i32
    %c0_i32_0 = arith.constant 0 : i32
    return %arg0, %c0_i32 : i32, i32
  }
  func.func @transform_4(%arg0: i32, %arg1: i32) -> (i32, i32) {
    %c0_i32 = arith.constant 0 : i32
    %c0_i32_0 = arith.constant 0 : i32
    return %arg0, %c0_i32 : i32, i32
  }
}

module attributes {stable_mosaic.version = 11 : i64} {
  func.func @_mm_kernel(%arg0: i32, %arg1: i32, %arg2: memref<32x256xbf16, #tpu.memory_space<vmem>>, %arg3: memref<256x128xbf16, #tpu.memory_space<vmem>>, %arg4: memref<1x32xf32, #tpu.memory_space<vmem>>, %arg5: memref<32x32xbf16, #tpu.memory_space<vmem>>) attributes {dimension_semantics = [#tpu.dimension_semantics<parallel>, #tpu.dimension_semantics<arbitrary>], iteration_bounds = array<i64: 3, 1>, scalar_prefetch = 0 : i64, scratch_operands = 0 : i64, tpu.core_type = #tpu.core_type<tc>, window_params = [{transform_indices = @transform_0, window_bounds = array<i64: 32, 256>}, {transform_indices = @transform_1, window_bounds = array<i64: 256, 128>}, {pipeline_mode = #tpu.pipeline_mode<synchronous>, transform_indices = @transform_2, window_bounds = array<i64: 1, 32>}, {transform_indices = @transform_3, window_bounds = array<i64: 32, 32>}]} {
    %c0 = arith.constant 0 : index
    %c0_0 = arith.constant 0 : index
    %0 = vector.load %arg2[%c0, %c0_0] : memref<32x256xbf16, #tpu.memory_space<vmem>>, vector<32x256xbf16>
    %cst = arith.constant 0.000000e+00 : bf16
    %1 = vector.broadcast %cst : bf16 to vector<32x256xbf16>
    %2 = arith.maximumf %0, %1 : vector<32x256xbf16>
    %c0_1 = arith.constant 0 : index
    %c0_2 = arith.constant 0 : index
    %3 = vector.load %arg3[%c0_1, %c0_2] : memref<256x128xbf16, #tpu.memory_space<vmem>>, vector<256x128xbf16>
    %cst_3 = arith.constant dense<0.000000e+00> : vector<32x128xf32>
    %4 = tpu.matmul %2, %3, %cst_3 {dimension_numbers = #tpu.dot_dimension_numbers<[1], [0], [0], [1], [0, 0, 1, 1], [], []>} : vector<32x256xbf16>, vector<256x128xbf16>, vector<32x128xf32> -> vector<32x128xf32>
    %5 = vector.extract_strided_slice %4 {offsets = [0, 0], sizes = [32, 32], strides = [1, 1]} : vector<32x128xf32> to vector<32x32xf32>
    %c0_4 = arith.constant 0 : index
    %c0_5 = arith.constant 0 : index
    %6 = vector.load %arg4[%c0_4, %c0_5] : memref<1x32xf32, #tpu.memory_space<vmem>>, vector<1x32xf32>
    %7 = vector.broadcast %6 : vector<1x32xf32> to vector<32x32xf32>
    %8 = arith.addf %5, %7 : vector<32x32xf32>
    %9 = arith.truncf %8 : vector<32x32xf32> to vector<32x32xbf16>
    %c0_6 = arith.constant 0 : index
    %c0_7 = arith.constant 0 : index
    %10 = vector.load %arg5[%c0_6, %c0_7] : memref<32x32xbf16, #tpu.memory_space<vmem>>, vector<32x32xbf16>
    tpu.vector_store %arg5[%c0_6, %c0_7], %9 {strides = array<i32>} : memref<32x32xbf16, #tpu.memory_space<vmem>>, vector<32x32xbf16>,
    return
  }
  func.func @transform_0(%arg0: i32, %arg1: i32) -> (i32, i32) {
    %c0_i32 = arith.constant 0 : i32
    return %arg0, %arg1 : i32, i32
  }
  func.func @transform_1(%arg0: i32, %arg1: i32) -> (i32, i32) {
    %c0_i32 = arith.constant 0 : i32
    %c0_i32_0 = arith.constant 0 : i32
    return %arg1, %c0_i32 : i32, i32
  }
  func.func @transform_2(%arg0: i32, %arg1: i32) -> (i32, i32) {
    %c0_i32 = arith.constant 0 : i32
    %c0_i32_0 = arith.constant 0 : i32
    %c0_i32_1 = arith.constant 0 : i32
    return %c0_i32, %c0_i32_0 : i32, i32
  }
  func.func @transform_3(%arg0: i32, %arg1: i32) -> (i32, i32) {
    %c0_i32 = arith.constant 0 : i32
    %c0_i32_0 = arith.constant 0 : i32
    return %arg0, %c0_i32 : i32, i32
  }
}

module attributes {stable_mosaic.version = 11 : i64} {
  func.func @_mm_kernel(%arg0: i32, %arg1: i32, %arg2: memref<32x128xbf16, #tpu.memory_space<vmem>>, %arg3: memref<128x128xbf16, #tpu.memory_space<vmem>>, %arg4: memref<1x8xf32, #tpu.memory_space<vmem>>, %arg5: memref<32x8xf32, #tpu.memory_space<vmem>>) attributes {dimension_semantics = [#tpu.dimension_semantics<parallel>, #tpu.dimension_semantics<arbitrary>], iteration_bounds = array<i64: 3, 1>, scalar_prefetch = 0 : i64, scratch_operands = 0 : i64, tpu.core_type = #tpu.core_type<tc>, window_params = [{transform_indices = @transform_0, window_bounds = array<i64: 32, 128>}, {transform_indices = @transform_1, window_bounds = array<i64: 128, 128>}, {pipeline_mode = #tpu.pipeline_mode<synchronous>, transform_indices = @transform_2, window_bounds = array<i64: 1, 8>}, {transform_indices = @transform_3, window_bounds = array<i64: 32, 8>}]} {
    %c0 = arith.constant 0 : index
    %c0_0 = arith.constant 0 : index
    %0 = vector.load %arg2[%c0, %c0_0] : memref<32x128xbf16, #tpu.memory_space<vmem>>, vector<32x128xbf16>
    %c0_1 = arith.constant 0 : index
    %c0_2 = arith.constant 0 : index
    %1 = vector.load %arg3[%c0_1, %c0_2] : memref<128x128xbf16, #tpu.memory_space<vmem>>, vector<128x128xbf16>
    %cst = arith.constant dense<0.000000e+00> : vector<32x128xf32>
    %2 = tpu.matmul %0, %1, %cst {dimension_numbers = #tpu.dot_dimension_numbers<[1], [0], [0], [1], [0, 0, 1, 1], [], []>} : vector<32x128xbf16>, vector<128x128xbf16>, vector<32x128xf32> -> vector<32x128xf32>
    %3 = vector.extract_strided_slice %2 {offsets = [0, 0], sizes = [32, 8], strides = [1, 1]} : vector<32x128xf32> to vector<32x8xf32>
    %c0_3 = arith.constant 0 : index
    %c0_4 = arith.constant 0 : index
    %4 = vector.load %arg4[%c0_3, %c0_4] : memref<1x8xf32, #tpu.memory_space<vmem>>, vector<1x8xf32>
    %5 = vector.broadcast %4 : vector<1x8xf32> to vector<32x8xf32>
    %6 = arith.addf %3, %5 : vector<32x8xf32>
    %c0_5 = arith.constant 0 : index
    %c0_6 = arith.constant 0 : index
    %7 = vector.load %arg5[%c0_5, %c0_6] : memref<32x8xf32, #tpu.memory_space<vmem>>, vector<32x8xf32>
    tpu.vector_store %arg5[%c0_5, %c0_6], %6 {strides = array<i32>} : memref<32x8xf32, #tpu.memory_space<vmem>>, vector<32x8xf32>,
    return
  }
  func.func @transform_0(%arg0: i32, %arg1: i32) -> (i32, i32) {
    %c0_i32 = arith.constant 0 : i32
    return %arg0, %arg1 : i32, i32
  }
  func.func @transform_1(%arg0: i32, %arg1: i32) -> (i32, i32) {
    %c0_i32 = arith.constant 0 : i32
    %c0_i32_0 = arith.constant 0 : i32
    return %arg1, %c0_i32 : i32, i32
  }
  func.func @transform_2(%arg0: i32, %arg1: i32) -> (i32, i32) {
    %c0_i32 = arith.constant 0 : i32
    %c0_i32_0 = arith.constant 0 : i32
    %c0_i32_1 = arith.constant 0 : i32
    return %c0_i32, %c0_i32_0 : i32, i32
  }
  func.func @transform_3(%arg0: i32, %arg1: i32) -> (i32, i32) {
    %c0_i32 = arith.constant 0 : i32
    %c0_i32_0 = arith.constant 0 : i32
    return %arg0, %c0_i32 : i32, i32
  }
}

module attributes {stable_mosaic.version = 11 : i64} {
  func.func @_mm_kernel(%arg0: i32, %arg1: i32, %arg2: memref<128x128xbf16, #tpu.memory_space<vmem>>, %arg3: memref<128x128xbf16, #tpu.memory_space<vmem>>, %arg4: memref<1x8xf32, #tpu.memory_space<vmem>>, %arg5: memref<128x8xf32, #tpu.memory_space<vmem>>, %arg6: memref<128x8xbf16, #tpu.memory_space<vmem>>) attributes {dimension_semantics = [#tpu.dimension_semantics<parallel>, #tpu.dimension_semantics<arbitrary>], iteration_bounds = array<i64: 3, 1>, scalar_prefetch = 0 : i64, scratch_operands = 0 : i64, tpu.core_type = #tpu.core_type<tc>, window_params = [{transform_indices = @transform_0, window_bounds = array<i64: 128, 128>}, {transform_indices = @transform_1, window_bounds = array<i64: 128, 128>}, {pipeline_mode = #tpu.pipeline_mode<synchronous>, transform_indices = @transform_2, window_bounds = array<i64: 1, 8>}, {transform_indices = @transform_3, window_bounds = array<i64: 128, 8>}, {transform_indices = @transform_4, window_bounds = array<i64: 128, 8>}]} {
    %c0 = arith.constant 0 : index
    %c0_0 = arith.constant 0 : index
    %0 = vector.load %arg2[%c0, %c0_0] : memref<128x128xbf16, #tpu.memory_space<vmem>>, vector<128x128xbf16>
    %cst = arith.constant 0.000000e+00 : bf16
    %1 = vector.broadcast %cst : bf16 to vector<128x128xbf16>
    %2 = arith.maximumf %0, %1 : vector<128x128xbf16>
    %c0_1 = arith.constant 0 : index
    %c0_2 = arith.constant 0 : index
    %3 = vector.load %arg3[%c0_1, %c0_2] : memref<128x128xbf16, #tpu.memory_space<vmem>>, vector<128x128xbf16>
    %cst_3 = arith.constant dense<0.000000e+00> : vector<128x128xf32>
    %4 = tpu.matmul %2, %3, %cst_3 {dimension_numbers = #tpu.dot_dimension_numbers<[1], [0], [0], [1], [0, 0, 1, 1], [], []>} : vector<128x128xbf16>, vector<128x128xbf16>, vector<128x128xf32> -> vector<128x128xf32>
    %5 = vector.extract_strided_slice %4 {offsets = [0, 0], sizes = [128, 8], strides = [1, 1]} : vector<128x128xf32> to vector<128x8xf32>
    %c0_4 = arith.constant 0 : index
    %c0_5 = arith.constant 0 : index
    %6 = vector.load %arg4[%c0_4, %c0_5] : memref<1x8xf32, #tpu.memory_space<vmem>>, vector<1x8xf32>
    %7 = vector.broadcast %6 : vector<1x8xf32> to vector<128x8xf32>
    %8 = arith.addf %5, %7 : vector<128x8xf32>
    %c0_6 = arith.constant 0 : index
    %c0_7 = arith.constant 0 : index
    %9 = vector.load %arg5[%c0_6, %c0_7] : memref<128x8xf32, #tpu.memory_space<vmem>>, vector<128x8xf32>
    %10 = arith.addf %8, %9 : vector<128x8xf32>
    %11 = arith.truncf %10 : vector<128x8xf32> to vector<128x8xbf16>
    %c0_8 = arith.constant 0 : index
    %c0_9 = arith.constant 0 : index
    %12 = vector.load %arg6[%c0_8, %c0_9] : memref<128x8xbf16, #tpu.memory_space<vmem>>, vector<128x8xbf16>
    tpu.vector_store %arg6[%c0_8, %c0_9], %11 {strides = array<i32>} : memref<128x8xbf16, #tpu.memory_space<vmem>>, vector<128x8xbf16>,
    return
  }
  func.func @transform_0(%arg0: i32, %arg1: i32) -> (i32, i32) {
    %c0_i32 = arith.constant 0 : i32
    return %arg0, %arg1 : i32, i32
  }
  func.func @transform_1(%arg0: i32, %arg1: i32) -> (i32, i32) {
    %c0_i32 = arith.constant 0 : i32
    %c0_i32_0 = arith.constant 0 : i32
    return %arg1, %c0_i32 : i32, i32
  }
  func.func @transform_2(%arg0: i32, %arg1: i32) -> (i32, i32) {
    %c0_i32 = arith.constant 0 : i32
    %c0_i32_0 = arith.constant 0 : i32
    %c0_i32_1 = arith.constant 0 : i32
    return %c0_i32, %c0_i32_0 : i32, i32
  }
  func.func @transform_3(%arg0: i32, %arg1: i32) -> (i32, i32) {
    %c0_i32 = arith.constant 0 : i32
    %c0_i32_0 = arith.constant 0 : i32
    return %arg0, %c0_i32 : i32, i32
  }
  func.func @transform_4(%arg0: i32, %arg1: i32) -> (i32, i32) {
    %c0_i32 = arith.constant 0 : i32
    %c0_i32_0 = arith.constant 0 : i32
    return %arg0, %c0_i32 : i32, i32
  }
}

module attributes {stable_mosaic.version = 11 : i64} {
  func.func @_mm_kernel(%arg0: i32, %arg1: i32, %arg2: memref<128x128xbf16, #tpu.memory_space<vmem>>, %arg3: memref<128x128xbf16, #tpu.memory_space<vmem>>, %arg4: memref<1x8xf32, #tpu.memory_space<vmem>>, %arg5: memref<128x8xf32, #tpu.memory_space<vmem>>) attributes {dimension_semantics = [#tpu.dimension_semantics<parallel>, #tpu.dimension_semantics<arbitrary>], iteration_bounds = array<i64: 3, 1>, scalar_prefetch = 0 : i64, scratch_operands = 0 : i64, tpu.core_type = #tpu.core_type<tc>, window_params = [{transform_indices = @transform_0, window_bounds = array<i64: 128, 128>}, {transform_indices = @transform_1, window_bounds = array<i64: 128, 128>}, {pipeline_mode = #tpu.pipeline_mode<synchronous>, transform_indices = @transform_2, window_bounds = array<i64: 1, 8>}, {transform_indices = @transform_3, window_bounds = array<i64: 128, 8>}]} {
    %c0 = arith.constant 0 : index
    %c0_0 = arith.constant 0 : index
    %0 = vector.load %arg2[%c0, %c0_0] : memref<128x128xbf16, #tpu.memory_space<vmem>>, vector<128x128xbf16>
    %c0_1 = arith.constant 0 : index
    %c0_2 = arith.constant 0 : index
    %1 = vector.load %arg3[%c0_1, %c0_2] : memref<128x128xbf16, #tpu.memory_space<vmem>>, vector<128x128xbf16>
    %cst = arith.constant dense<0.000000e+00> : vector<128x128xf32>
    %2 = tpu.matmul %0, %1, %cst {dimension_numbers = #tpu.dot_dimension_numbers<[1], [0], [0], [1], [0, 0, 1, 1], [], []>} : vector<128x128xbf16>, vector<128x128xbf16>, vector<128x128xf32> -> vector<128x128xf32>
    %3 = vector.extract_strided_slice %2 {offsets = [0, 0], sizes = [128, 8], strides = [1, 1]} : vector<128x128xf32> to vector<128x8xf32>
    %c0_3 = arith.constant 0 : index
    %c0_4 = arith.constant 0 : index
    %4 = vector.load %arg4[%c0_3, %c0_4] : memref<1x8xf32, #tpu.memory_space<vmem>>, vector<1x8xf32>
    %5 = vector.broadcast %4 : vector<1x8xf32> to vector<128x8xf32>
    %6 = arith.addf %3, %5 : vector<128x8xf32>
    %c0_5 = arith.constant 0 : index
    %c0_6 = arith.constant 0 : index
    %7 = vector.load %arg5[%c0_5, %c0_6] : memref<128x8xf32, #tpu.memory_space<vmem>>, vector<128x8xf32>
    tpu.vector_store %arg5[%c0_5, %c0_6], %6 {strides = array<i32>} : memref<128x8xf32, #tpu.memory_space<vmem>>, vector<128x8xf32>,
    return
  }
  func.func @transform_0(%arg0: i32, %arg1: i32) -> (i32, i32) {
    %c0_i32 = arith.constant 0 : i32
    return %arg0, %arg1 : i32, i32
  }
  func.func @transform_1(%arg0: i32, %arg1: i32) -> (i32, i32) {
    %c0_i32 = arith.constant 0 : i32
    %c0_i32_0 = arith.constant 0 : i32
    return %arg1, %c0_i32 : i32, i32
  }
  func.func @transform_2(%arg0: i32, %arg1: i32) -> (i32, i32) {
    %c0_i32 = arith.constant 0 : i32
    %c0_i32_0 = arith.constant 0 : i32
    %c0_i32_1 = arith.constant 0 : i32
    return %c0_i32, %c0_i32_0 : i32, i32
  }
  func.func @transform_3(%arg0: i32, %arg1: i32) -> (i32, i32) {
    %c0_i32 = arith.constant 0 : i32
    %c0_i32_0 = arith.constant 0 : i32
    return %arg0, %c0_i32 : i32, i32
  }
}

module attributes {stable_mosaic.version = 11 : i64} {
  func.func @_mm_kernel(%arg0: i32, %arg1: i32, %arg2: memref<64x128xbf16, #tpu.memory_space<vmem>>, %arg3: memref<128x128xbf16, #tpu.memory_space<vmem>>, %arg4: memref<1x8xf32, #tpu.memory_space<vmem>>, %arg5: memref<64x8xf32, #tpu.memory_space<vmem>>, %arg6: memref<64x8xf32, #tpu.memory_space<vmem>>) attributes {dimension_semantics = [#tpu.dimension_semantics<parallel>, #tpu.dimension_semantics<arbitrary>], iteration_bounds = array<i64: 2, 1>, scalar_prefetch = 0 : i64, scratch_operands = 0 : i64, tpu.core_type = #tpu.core_type<tc>, window_params = [{transform_indices = @transform_0, window_bounds = array<i64: 64, 128>}, {transform_indices = @transform_1, window_bounds = array<i64: 128, 128>}, {pipeline_mode = #tpu.pipeline_mode<synchronous>, transform_indices = @transform_2, window_bounds = array<i64: 1, 8>}, {transform_indices = @transform_3, window_bounds = array<i64: 64, 8>}, {transform_indices = @transform_4, window_bounds = array<i64: 64, 8>}]} {
    %c0 = arith.constant 0 : index
    %c0_0 = arith.constant 0 : index
    %0 = vector.load %arg2[%c0, %c0_0] : memref<64x128xbf16, #tpu.memory_space<vmem>>, vector<64x128xbf16>
    %c0_1 = arith.constant 0 : index
    %c0_2 = arith.constant 0 : index
    %1 = vector.load %arg3[%c0_1, %c0_2] : memref<128x128xbf16, #tpu.memory_space<vmem>>, vector<128x128xbf16>
    %cst = arith.constant dense<0.000000e+00> : vector<64x128xf32>
    %2 = tpu.matmul %0, %1, %cst {dimension_numbers = #tpu.dot_dimension_numbers<[1], [0], [0], [1], [0, 0, 1, 1], [], []>} : vector<64x128xbf16>, vector<128x128xbf16>, vector<64x128xf32> -> vector<64x128xf32>
    %3 = vector.extract_strided_slice %2 {offsets = [0, 0], sizes = [64, 8], strides = [1, 1]} : vector<64x128xf32> to vector<64x8xf32>
    %c0_3 = arith.constant 0 : index
    %c0_4 = arith.constant 0 : index
    %4 = vector.load %arg5[%c0_3, %c0_4] : memref<64x8xf32, #tpu.memory_space<vmem>>, vector<64x8xf32>
    %5 = arith.addf %3, %4 : vector<64x8xf32>
    %c0_5 = arith.constant 0 : index
    %c0_6 = arith.constant 0 : index
    %6 = vector.load %arg4[%c0_5, %c0_6] : memref<1x8xf32, #tpu.memory_space<vmem>>, vector<1x8xf32>
    %7 = vector.broadcast %6 : vector<1x8xf32> to vector<64x8xf32>
    %8 = arith.addf %5, %7 : vector<64x8xf32>
    %9 = arith.negf %8 : vector<64x8xf32>
    %10 = math.exp %9 : vector<64x8xf32>
    %cst_7 = arith.constant 1.000000e+00 : f32
    %11 = vector.broadcast %cst_7 : f32 to vector<64x8xf32>
    %12 = arith.addf %11, %10 : vector<64x8xf32>
    %13 = arith.divf %11, %12 : vector<64x8xf32>
    %c0_8 = arith.constant 0 : index
    %c0_9 = arith.constant 0 : index
    %14 = vector.load %arg6[%c0_8, %c0_9] : memref<64x8xf32, #tpu.memory_space<vmem>>, vector<64x8xf32>
    tpu.vector_store %arg6[%c0_8, %c0_9], %13 {strides = array<i32>} : memref<64x8xf32, #tpu.memory_space<vmem>>, vector<64x8xf32>,
    return
  }
  func.func @transform_0(%arg0: i32, %arg1: i32) -> (i32, i32) {
    %c0_i32 = arith.constant 0 : i32
    return %arg0, %arg1 : i32, i32
  }
  func.func @transform_1(%arg0: i32, %arg1: i32) -> (i32, i32) {
    %c0_i32 = arith.constant 0 : i32
    %c0_i32_0 = arith.constant 0 : i32
    return %arg1, %c0_i32 : i32, i32
  }
  func.func @transform_2(%arg0: i32, %arg1: i32) -> (i32, i32) {
    %c0_i32 = arith.constant 0 : i32
    %c0_i32_0 = arith.constant 0 : i32
    %c0_i32_1 = arith.constant 0 : i32
    return %c0_i32, %c0_i32_0 : i32, i32
  }
  func.func @transform_3(%arg0: i32, %arg1: i32) -> (i32, i32) {
    %c0_i32 = arith.constant 0 : i32
    %c0_i32_0 = arith.constant 0 : i32
    return %arg0, %c0_i32 : i32, i32
  }
  func.func @transform_4(%arg0: i32, %arg1: i32) -> (i32, i32) {
    %c0_i32 = arith.constant 0 : i32
    %c0_i32_0 = arith.constant 0 : i32
    return %arg0, %c0_i32 : i32, i32
  }
}

module attributes {stable_mosaic.version = 11 : i64} {
  func.func @_mm_kernel(%arg0: i32, %arg1: i32, %arg2: memref<128x128xbf16, #tpu.memory_space<vmem>>, %arg3: memref<128x128xbf16, #tpu.memory_space<vmem>>, %arg4: memref<1x4xf32, #tpu.memory_space<vmem>>, %arg5: memref<128x4xf32, #tpu.memory_space<vmem>>) attributes {dimension_semantics = [#tpu.dimension_semantics<parallel>, #tpu.dimension_semantics<arbitrary>], iteration_bounds = array<i64: 3, 1>, scalar_prefetch = 0 : i64, scratch_operands = 0 : i64, tpu.core_type = #tpu.core_type<tc>, window_params = [{transform_indices = @transform_0, window_bounds = array<i64: 128, 128>}, {transform_indices = @transform_1, window_bounds = array<i64: 128, 128>}, {pipeline_mode = #tpu.pipeline_mode<synchronous>, transform_indices = @transform_2, window_bounds = array<i64: 1, 4>}, {transform_indices = @transform_3, window_bounds = array<i64: 128, 4>}]} {
    %c0 = arith.constant 0 : index
    %c0_0 = arith.constant 0 : index
    %0 = vector.load %arg2[%c0, %c0_0] : memref<128x128xbf16, #tpu.memory_space<vmem>>, vector<128x128xbf16>
    %c0_1 = arith.constant 0 : index
    %c0_2 = arith.constant 0 : index
    %1 = vector.load %arg3[%c0_1, %c0_2] : memref<128x128xbf16, #tpu.memory_space<vmem>>, vector<128x128xbf16>
    %cst = arith.constant dense<0.000000e+00> : vector<128x128xf32>
    %2 = tpu.matmul %0, %1, %cst {dimension_numbers = #tpu.dot_dimension_numbers<[1], [0], [0], [1], [0, 0, 1, 1], [], []>} : vector<128x128xbf16>, vector<128x128xbf16>, vector<128x128xf32> -> vector<128x128xf32>
    %3 = vector.extract_strided_slice %2 {offsets = [0, 0], sizes = [128, 4], strides = [1, 1]} : vector<128x128xf32> to vector<128x4xf32>
    %c0_3 = arith.constant 0 : index
    %c0_4 = arith.constant 0 : index
    %4 = vector.load %arg4[%c0_3, %c0_4] : memref<1x4xf32, #tpu.memory_space<vmem>>, vector<1x4xf32>
    %5 = vector.broadcast %4 : vector<1x4xf32> to vector<128x4xf32>
    %6 = arith.addf %3, %5 : vector<128x4xf32>
    %c0_5 = arith.constant 0 : index
    %c0_6 = arith.constant 0 : index
    %7 = vector.load %arg5[%c0_5, %c0_6] : memref<128x4xf32, #tpu.memory_space<vmem>>, vector<128x4xf32>
    tpu.vector_store %arg5[%c0_5, %c0_6], %6 {strides = array<i32>} : memref<128x4xf32, #tpu.memory_space<vmem>>, vector<128x4xf32>,
    return
  }
  func.func @transform_0(%arg0: i32, %arg1: i32) -> (i32, i32) {
    %c0_i32 = arith.constant 0 : i32
    return %arg0, %arg1 : i32, i32
  }
  func.func @transform_1(%arg0: i32, %arg1: i32) -> (i32, i32) {
    %c0_i32 = arith.constant 0 : i32
    %c0_i32_0 = arith.constant 0 : i32
    return %arg1, %c0_i32 : i32, i32
  }
  func.func @transform_2(%arg0: i32, %arg1: i32) -> (i32, i32) {
    %c0_i32 = arith.constant 0 : i32
    %c0_i32_0 = arith.constant 0 : i32
    %c0_i32_1 = arith.constant 0 : i32
    return %c0_i32, %c0_i32_0 : i32, i32
  }
  func.func @transform_3(%arg0: i32, %arg1: i32) -> (i32, i32) {
    %c0_i32 = arith.constant 0 : i32
    %c0_i32_0 = arith.constant 0 : i32
    return %arg0, %c0_i32 : i32, i32
  }
}

module attributes {stable_mosaic.version = 11 : i64} {
  func.func @_mm_kernel(%arg0: i32, %arg1: i32, %arg2: memref<64x128xbf16, #tpu.memory_space<vmem>>, %arg3: memref<128x128xbf16, #tpu.memory_space<vmem>>, %arg4: memref<1x4xf32, #tpu.memory_space<vmem>>, %arg5: memref<64x4xf32, #tpu.memory_space<vmem>>, %arg6: memref<64x4xf32, #tpu.memory_space<vmem>>, %arg7: memref<64x4xf32, #tpu.memory_space<vmem>>, %arg8: memref<64x4xf32, #tpu.memory_space<vmem>>) attributes {dimension_semantics = [#tpu.dimension_semantics<parallel>, #tpu.dimension_semantics<arbitrary>], iteration_bounds = array<i64: 2, 1>, scalar_prefetch = 0 : i64, scratch_operands = 0 : i64, tpu.core_type = #tpu.core_type<tc>, window_params = [{transform_indices = @transform_0, window_bounds = array<i64: 64, 128>}, {transform_indices = @transform_1, window_bounds = array<i64: 128, 128>}, {pipeline_mode = #tpu.pipeline_mode<synchronous>, transform_indices = @transform_2, window_bounds = array<i64: 1, 4>}, {transform_indices = @transform_3, window_bounds = array<i64: 64, 4>}, {transform_indices = @transform_4, window_bounds = array<i64: 64, 4>}, {transform_indices = @transform_5, window_bounds = array<i64: 64, 4>}, {transform_indices = @transform_6, window_bounds = array<i64: 64, 4>}]} {
    %c0 = arith.constant 0 : index
    %c0_0 = arith.constant 0 : index
    %0 = vector.load %arg2[%c0, %c0_0] : memref<64x128xbf16, #tpu.memory_space<vmem>>, vector<64x128xbf16>
    %c0_1 = arith.constant 0 : index
    %c0_2 = arith.constant 0 : index
    %1 = vector.load %arg3[%c0_1, %c0_2] : memref<128x128xbf16, #tpu.memory_space<vmem>>, vector<128x128xbf16>
    %cst = arith.constant dense<0.000000e+00> : vector<64x128xf32>
    %2 = tpu.matmul %0, %1, %cst {dimension_numbers = #tpu.dot_dimension_numbers<[1], [0], [0], [1], [0, 0, 1, 1], [], []>} : vector<64x128xbf16>, vector<128x128xbf16>, vector<64x128xf32> -> vector<64x128xf32>
    %3 = vector.extract_strided_slice %2 {offsets = [0, 0], sizes = [64, 4], strides = [1, 1]} : vector<64x128xf32> to vector<64x4xf32>
    %c0_3 = arith.constant 0 : index
    %c0_4 = arith.constant 0 : index
    %4 = vector.load %arg5[%c0_3, %c0_4] : memref<64x4xf32, #tpu.memory_space<vmem>>, vector<64x4xf32>
    %5 = arith.addf %3, %4 : vector<64x4xf32>
    %c0_5 = arith.constant 0 : index
    %c0_6 = arith.constant 0 : index
    %6 = vector.load %arg4[%c0_5, %c0_6] : memref<1x4xf32, #tpu.memory_space<vmem>>, vector<1x4xf32>
    %7 = vector.broadcast %6 : vector<1x4xf32> to vector<64x4xf32>
    %8 = arith.addf %5, %7 : vector<64x4xf32>
    %cst_7 = arith.constant 0.000000e+00 : f32
    %9 = vector.broadcast %cst_7 : f32 to vector<64x4xf32>
    %10 = arith.maximumf %8, %9 : vector<64x4xf32>
    %c0_8 = arith.constant 0 : index
    %c0_9 = arith.constant 0 : index
    %11 = vector.load %arg6[%c0_8, %c0_9] : memref<64x4xf32, #tpu.memory_space<vmem>>, vector<64x4xf32>
    %c0_10 = arith.constant 0 : index
    %c0_11 = arith.constant 0 : index
    %12 = vector.load %arg7[%c0_10, %c0_11] : memref<64x4xf32, #tpu.memory_space<vmem>>, vector<64x4xf32>
    %13 = arith.mulf %11, %12 : vector<64x4xf32>
    %cst_12 = arith.constant 1.000000e+00 : f32
    %14 = vector.broadcast %cst_12 : f32 to vector<64x4xf32>
    %15 = arith.subf %14, %11 : vector<64x4xf32>
    %16 = arith.mulf %15, %10 : vector<64x4xf32>
    %17 = arith.addf %13, %16 : vector<64x4xf32>
    %c0_13 = arith.constant 0 : index
    %c0_14 = arith.constant 0 : index
    %18 = vector.load %arg8[%c0_13, %c0_14] : memref<64x4xf32, #tpu.memory_space<vmem>>, vector<64x4xf32>
    tpu.vector_store %arg8[%c0_13, %c0_14], %17 {strides = array<i32>} : memref<64x4xf32, #tpu.memory_space<vmem>>, vector<64x4xf32>,
    return
  }
  func.func @transform_0(%arg0: i32, %arg1: i32) -> (i32, i32) {
    %c0_i32 = arith.constant 0 : i32
    return %arg0, %arg1 : i32, i32
  }
  func.func @transform_1(%arg0: i32, %arg1: i32) -> (i32, i32) {
    %c0_i32 = arith.constant 0 : i32
    %c0_i32_0 = arith.constant 0 : i32
    return %arg1, %c0_i32 : i32, i32
  }
  func.func @transform_2(%arg0: i32, %arg1: i32) -> (i32, i32) {
    %c0_i32 = arith.constant 0 : i32
    %c0_i32_0 = arith.constant 0 : i32
    %c0_i32_1 = arith.constant 0 : i32
    return %c0_i32, %c0_i32_0 : i32, i32
  }
  func.func @transform_3(%arg0: i32, %arg1: i32) -> (i32, i32) {
    %c0_i32 = arith.constant 0 : i32
    %c0_i32_0 = arith.constant 0 : i32
    return %arg0, %c0_i32 : i32, i32
  }
  func.func @transform_4(%arg0: i32, %arg1: i32) -> (i32, i32) {
    %c0_i32 = arith.constant 0 : i32
    %c0_i32_0 = arith.constant 0 : i32
    return %arg0, %c0_i32 : i32, i32
  }
  func.func @transform_5(%arg0: i32, %arg1: i32) -> (i32, i32) {
    %c0_i32 = arith.constant 0 : i32
    %c0_i32_0 = arith.constant 0 : i32
    return %arg0, %c0_i32 : i32, i32
  }
  func.func @transform_6(%arg0: i32, %arg1: i32) -> (i32, i32) {
    %c0_i32 = arith.constant 0 : i32
    %c0_i32_0 = arith.constant 0 : i32
    return %arg0, %c0_i32 : i32, i32
  }
}

module attributes {stable_mosaic.version = 11 : i64} {
  func.func @_mm_kernel(%arg0: i32, %arg1: i32, %arg2: memref<128x128xbf16, #tpu.memory_space<vmem>>, %arg3: memref<128x128xbf16, #tpu.memory_space<vmem>>, %arg4: memref<1x16xf32, #tpu.memory_space<vmem>>, %arg5: memref<128x16xbf16, #tpu.memory_space<vmem>>) attributes {dimension_semantics = [#tpu.dimension_semantics<parallel>, #tpu.dimension_semantics<arbitrary>], iteration_bounds = array<i64: 3, 1>, scalar_prefetch = 0 : i64, scratch_operands = 0 : i64, tpu.core_type = #tpu.core_type<tc>, window_params = [{transform_indices = @transform_0, window_bounds = array<i64: 128, 128>}, {transform_indices = @transform_1, window_bounds = array<i64: 128, 128>}, {pipeline_mode = #tpu.pipeline_mode<synchronous>, transform_indices = @transform_2, window_bounds = array<i64: 1, 16>}, {transform_indices = @transform_3, window_bounds = array<i64: 128, 16>}]} {
    %c0 = arith.constant 0 : index
    %c0_0 = arith.constant 0 : index
    %0 = vector.load %arg2[%c0, %c0_0] : memref<128x128xbf16, #tpu.memory_space<vmem>>, vector<128x128xbf16>
    %cst = arith.constant 0.000000e+00 : bf16
    %1 = vector.broadcast %cst : bf16 to vector<128x128xbf16>
    %2 = arith.maximumf %0, %1 : vector<128x128xbf16>
    %c0_1 = arith.constant 0 : index
    %c0_2 = arith.constant 0 : index
    %3 = vector.load %arg3[%c0_1, %c0_2] : memref<128x128xbf16, #tpu.memory_space<vmem>>, vector<128x128xbf16>
    %cst_3 = arith.constant dense<0.000000e+00> : vector<128x128xf32>
    %4 = tpu.matmul %2, %3, %cst_3 {dimension_numbers = #tpu.dot_dimension_numbers<[1], [0], [0], [1], [0, 0, 1, 1], [], []>} : vector<128x128xbf16>, vector<128x128xbf16>, vector<128x128xf32> -> vector<128x128xf32>
    %5 = vector.extract_strided_slice %4 {offsets = [0, 0], sizes = [128, 16], strides = [1, 1]} : vector<128x128xf32> to vector<128x16xf32>
    %c0_4 = arith.constant 0 : index
    %c0_5 = arith.constant 0 : index
    %6 = vector.load %arg4[%c0_4, %c0_5] : memref<1x16xf32, #tpu.memory_space<vmem>>, vector<1x16xf32>
    %7 = vector.broadcast %6 : vector<1x16xf32> to vector<128x16xf32>
    %8 = arith.addf %5, %7 : vector<128x16xf32>
    %9 = arith.truncf %8 : vector<128x16xf32> to vector<128x16xbf16>
    %c0_6 = arith.constant 0 : index
    %c0_7 = arith.constant 0 : index
    %10 = vector.load %arg5[%c0_6, %c0_7] : memref<128x16xbf16, #tpu.memory_space<vmem>>, vector<128x16xbf16>
    tpu.vector_store %arg5[%c0_6, %c0_7], %9 {strides = array<i32>} : memref<128x16xbf16, #tpu.memory_space<vmem>>, vector<128x16xbf16>,
    return
  }
  func.func @transform_0(%arg0: i32, %arg1: i32) -> (i32, i32) {
    %c0_i32 = arith.constant 0 : i32
    return %arg0, %arg1 : i32, i32
  }
  func.func @transform_1(%arg0: i32, %arg1: i32) -> (i32, i32) {
    %c0_i32 = arith.constant 0 : i32
    %c0_i32_0 = arith.constant 0 : i32
    return %arg1, %c0_i32 : i32, i32
  }
  func.func @transform_2(%arg0: i32, %arg1: i32) -> (i32, i32) {
    %c0_i32 = arith.constant 0 : i32
    %c0_i32_0 = arith.constant 0 : i32
    %c0_i32_1 = arith.constant 0 : i32
    return %c0_i32, %c0_i32_0 : i32, i32
  }
  func.func @transform_3(%arg0: i32, %arg1: i32) -> (i32, i32) {
    %c0_i32 = arith.constant 0 : i32
    %c0_i32_0 = arith.constant 0 : i32
    return %arg0, %c0_i32 : i32, i32
  }
}

module attributes {stable_mosaic.version = 11 : i64} {
  func.func @_mm_kernel(%arg0: i32, %arg1: i32, %arg2: memref<128x128xbf16, #tpu.memory_space<vmem>>, %arg3: memref<128x128xbf16, #tpu.memory_space<vmem>>, %arg4: memref<1x8xf32, #tpu.memory_space<vmem>>, %arg5: memref<128x8xbf16, #tpu.memory_space<vmem>>) attributes {dimension_semantics = [#tpu.dimension_semantics<parallel>, #tpu.dimension_semantics<arbitrary>], iteration_bounds = array<i64: 3, 1>, scalar_prefetch = 0 : i64, scratch_operands = 0 : i64, tpu.core_type = #tpu.core_type<tc>, window_params = [{transform_indices = @transform_0, window_bounds = array<i64: 128, 128>}, {transform_indices = @transform_1, window_bounds = array<i64: 128, 128>}, {pipeline_mode = #tpu.pipeline_mode<synchronous>, transform_indices = @transform_2, window_bounds = array<i64: 1, 8>}, {transform_indices = @transform_3, window_bounds = array<i64: 128, 8>}]} {
    %c0 = arith.constant 0 : index
    %c0_0 = arith.constant 0 : index
    %0 = vector.load %arg2[%c0, %c0_0] : memref<128x128xbf16, #tpu.memory_space<vmem>>, vector<128x128xbf16>
    %cst = arith.constant 0.000000e+00 : bf16
    %1 = vector.broadcast %cst : bf16 to vector<128x128xbf16>
    %2 = arith.maximumf %0, %1 : vector<128x128xbf16>
    %c0_1 = arith.constant 0 : index
    %c0_2 = arith.constant 0 : index
    %3 = vector.load %arg3[%c0_1, %c0_2] : memref<128x128xbf16, #tpu.memory_space<vmem>>, vector<128x128xbf16>
    %cst_3 = arith.constant dense<0.000000e+00> : vector<128x128xf32>
    %4 = tpu.matmul %2, %3, %cst_3 {dimension_numbers = #tpu.dot_dimension_numbers<[1], [0], [0], [1], [0, 0, 1, 1], [], []>} : vector<128x128xbf16>, vector<128x128xbf16>, vector<128x128xf32> -> vector<128x128xf32>
    %5 = vector.extract_strided_slice %4 {offsets = [0, 0], sizes = [128, 8], strides = [1, 1]} : vector<128x128xf32> to vector<128x8xf32>
    %c0_4 = arith.constant 0 : index
    %c0_5 = arith.constant 0 : index
    %6 = vector.load %arg4[%c0_4, %c0_5] : memref<1x8xf32, #tpu.memory_space<vmem>>, vector<1x8xf32>
    %7 = vector.broadcast %6 : vector<1x8xf32> to vector<128x8xf32>
    %8 = arith.addf %5, %7 : vector<128x8xf32>
    %9 = arith.truncf %8 : vector<128x8xf32> to vector<128x8xbf16>
    %c0_6 = arith.constant 0 : index
    %c0_7 = arith.constant 0 : index
    %10 = vector.load %arg5[%c0_6, %c0_7] : memref<128x8xbf16, #tpu.memory_space<vmem>>, vector<128x8xbf16>
    tpu.vector_store %arg5[%c0_6, %c0_7], %9 {strides = array<i32>} : memref<128x8xbf16, #tpu.memory_space<vmem>>, vector<128x8xbf16>,
    return
  }
  func.func @transform_0(%arg0: i32, %arg1: i32) -> (i32, i32) {
    %c0_i32 = arith.constant 0 : i32
    return %arg0, %arg1 : i32, i32
  }
  func.func @transform_1(%arg0: i32, %arg1: i32) -> (i32, i32) {
    %c0_i32 = arith.constant 0 : i32
    %c0_i32_0 = arith.constant 0 : i32
    return %arg1, %c0_i32 : i32, i32
  }
  func.func @transform_2(%arg0: i32, %arg1: i32) -> (i32, i32) {
    %c0_i32 = arith.constant 0 : i32
    %c0_i32_0 = arith.constant 0 : i32
    %c0_i32_1 = arith.constant 0 : i32
    return %c0_i32, %c0_i32_0 : i32, i32
  }
  func.func @transform_3(%arg0: i32, %arg1: i32) -> (i32, i32) {
    %c0_i32 = arith.constant 0 : i32
    %c0_i32_0 = arith.constant 0 : i32
    return %arg0, %c0_i32 : i32, i32
  }
}

module attributes {stable_mosaic.version = 11 : i64} {
  func.func @_mm_kernel(%arg0: i32, %arg1: i32, %arg2: memref<512x128xbf16, #tpu.memory_space<vmem>>, %arg3: memref<128x128xbf16, #tpu.memory_space<vmem>>, %arg4: memref<1x4xf32, #tpu.memory_space<vmem>>, %arg5: memref<512x4xf32, #tpu.memory_space<vmem>>, %arg6: memref<512x4xbf16, #tpu.memory_space<vmem>>) attributes {dimension_semantics = [#tpu.dimension_semantics<parallel>, #tpu.dimension_semantics<arbitrary>], iteration_bounds = array<i64: 3, 1>, scalar_prefetch = 0 : i64, scratch_operands = 0 : i64, tpu.core_type = #tpu.core_type<tc>, window_params = [{transform_indices = @transform_0, window_bounds = array<i64: 512, 128>}, {transform_indices = @transform_1, window_bounds = array<i64: 128, 128>}, {pipeline_mode = #tpu.pipeline_mode<synchronous>, transform_indices = @transform_2, window_bounds = array<i64: 1, 4>}, {transform_indices = @transform_3, window_bounds = array<i64: 512, 4>}, {transform_indices = @transform_4, window_bounds = array<i64: 512, 4>}]} {
    %c0 = arith.constant 0 : index
    %c0_0 = arith.constant 0 : index
    %0 = vector.load %arg2[%c0, %c0_0] : memref<512x128xbf16, #tpu.memory_space<vmem>>, vector<512x128xbf16>
    %cst = arith.constant 0.000000e+00 : bf16
    %1 = vector.broadcast %cst : bf16 to vector<512x128xbf16>
    %2 = arith.maximumf %0, %1 : vector<512x128xbf16>
    %c0_1 = arith.constant 0 : index
    %c0_2 = arith.constant 0 : index
    %3 = vector.load %arg3[%c0_1, %c0_2] : memref<128x128xbf16, #tpu.memory_space<vmem>>, vector<128x128xbf16>
    %cst_3 = arith.constant dense<0.000000e+00> : vector<512x128xf32>
    %4 = tpu.matmul %2, %3, %cst_3 {dimension_numbers = #tpu.dot_dimension_numbers<[1], [0], [0], [1], [0, 0, 1, 1], [], []>} : vector<512x128xbf16>, vector<128x128xbf16>, vector<512x128xf32> -> vector<512x128xf32>
    %5 = vector.extract_strided_slice %4 {offsets = [0, 0], sizes = [512, 4], strides = [1, 1]} : vector<512x128xf32> to vector<512x4xf32>
    %c0_4 = arith.constant 0 : index
    %c0_5 = arith.constant 0 : index
    %6 = vector.load %arg4[%c0_4, %c0_5] : memref<1x4xf32, #tpu.memory_space<vmem>>, vector<1x4xf32>
    %7 = vector.broadcast %6 : vector<1x4xf32> to vector<512x4xf32>
    %8 = arith.addf %5, %7 : vector<512x4xf32>
    %c0_6 = arith.constant 0 : index
    %c0_7 = arith.constant 0 : index
    %9 = vector.load %arg5[%c0_6, %c0_7] : memref<512x4xf32, #tpu.memory_space<vmem>>, vector<512x4xf32>
    %10 = arith.addf %8, %9 : vector<512x4xf32>
    %11 = arith.truncf %10 : vector<512x4xf32> to vector<512x4xbf16>
    %c0_8 = arith.constant 0 : index
    %c0_9 = arith.constant 0 : index
    %12 = vector.load %arg6[%c0_8, %c0_9] : memref<512x4xbf16, #tpu.memory_space<vmem>>, vector<512x4xbf16>
    tpu.vector_store %arg6[%c0_8, %c0_9], %11 {strides = array<i32>} : memref<512x4xbf16, #tpu.memory_space<vmem>>, vector<512x4xbf16>,
    return
  }
  func.func @transform_0(%arg0: i32, %arg1: i32) -> (i32, i32) {
    %c0_i32 = arith.constant 0 : i32
    return %arg0, %arg1 : i32, i32
  }
  func.func @transform_1(%arg0: i32, %arg1: i32) -> (i32, i32) {
    %c0_i32 = arith.constant 0 : i32
    %c0_i32_0 = arith.constant 0 : i32
    return %arg1, %c0_i32 : i32, i32
  }
  func.func @transform_2(%arg0: i32, %arg1: i32) -> (i32, i32) {
    %c0_i32 = arith.constant 0 : i32
    %c0_i32_0 = arith.constant 0 : i32
    %c0_i32_1 = arith.constant 0 : i32
    return %c0_i32, %c0_i32_0 : i32, i32
  }
  func.func @transform_3(%arg0: i32, %arg1: i32) -> (i32, i32) {
    %c0_i32 = arith.constant 0 : i32
    %c0_i32_0 = arith.constant 0 : i32
    return %arg0, %c0_i32 : i32, i32
  }
  func.func @transform_4(%arg0: i32, %arg1: i32) -> (i32, i32) {
    %c0_i32 = arith.constant 0 : i32
    %c0_i32_0 = arith.constant 0 : i32
    return %arg0, %c0_i32 : i32, i32
  }
}

module attributes {stable_mosaic.version = 11 : i64} {
  func.func @_mm_kernel(%arg0: i32, %arg1: i32, %arg2: memref<512x128xbf16, #tpu.memory_space<vmem>>, %arg3: memref<128x128xbf16, #tpu.memory_space<vmem>>, %arg4: memref<1x4xf32, #tpu.memory_space<vmem>>, %arg5: memref<512x4xf32, #tpu.memory_space<vmem>>) attributes {dimension_semantics = [#tpu.dimension_semantics<parallel>, #tpu.dimension_semantics<arbitrary>], iteration_bounds = array<i64: 3, 1>, scalar_prefetch = 0 : i64, scratch_operands = 0 : i64, tpu.core_type = #tpu.core_type<tc>, window_params = [{transform_indices = @transform_0, window_bounds = array<i64: 512, 128>}, {transform_indices = @transform_1, window_bounds = array<i64: 128, 128>}, {pipeline_mode = #tpu.pipeline_mode<synchronous>, transform_indices = @transform_2, window_bounds = array<i64: 1, 4>}, {transform_indices = @transform_3, window_bounds = array<i64: 512, 4>}]} {
    %c0 = arith.constant 0 : index
    %c0_0 = arith.constant 0 : index
    %0 = vector.load %arg2[%c0, %c0_0] : memref<512x128xbf16, #tpu.memory_space<vmem>>, vector<512x128xbf16>
    %cst = arith.constant 0.000000e+00 : bf16
    %1 = vector.broadcast %cst : bf16 to vector<512x128xbf16>
    %2 = arith.maximumf %0, %1 : vector<512x128xbf16>
    %c0_1 = arith.constant 0 : index
    %c0_2 = arith.constant 0 : index
    %3 = vector.load %arg3[%c0_1, %c0_2] : memref<128x128xbf16, #tpu.memory_space<vmem>>, vector<128x128xbf16>
    %cst_3 = arith.constant dense<0.000000e+00> : vector<512x128xf32>
    %4 = tpu.matmul %2, %3, %cst_3 {dimension_numbers = #tpu.dot_dimension_numbers<[1], [0], [0], [1], [0, 0, 1, 1], [], []>} : vector<512x128xbf16>, vector<128x128xbf16>, vector<512x128xf32> -> vector<512x128xf32>
    %5 = vector.extract_strided_slice %4 {offsets = [0, 0], sizes = [512, 4], strides = [1, 1]} : vector<512x128xf32> to vector<512x4xf32>
    %c0_4 = arith.constant 0 : index
    %c0_5 = arith.constant 0 : index
    %6 = vector.load %arg4[%c0_4, %c0_5] : memref<1x4xf32, #tpu.memory_space<vmem>>, vector<1x4xf32>
    %7 = vector.broadcast %6 : vector<1x4xf32> to vector<512x4xf32>
    %8 = arith.addf %5, %7 : vector<512x4xf32>
    %c0_6 = arith.constant 0 : index
    %c0_7 = arith.constant 0 : index
    %9 = vector.load %arg5[%c0_6, %c0_7] : memref<512x4xf32, #tpu.memory_space<vmem>>, vector<512x4xf32>
    tpu.vector_store %arg5[%c0_6, %c0_7], %8 {strides = array<i32>} : memref<512x4xf32, #tpu.memory_space<vmem>>, vector<512x4xf32>,
    return
  }
  func.func @transform_0(%arg0: i32, %arg1: i32) -> (i32, i32) {
    %c0_i32 = arith.constant 0 : i32
    return %arg0, %arg1 : i32, i32
  }
  func.func @transform_1(%arg0: i32, %arg1: i32) -> (i32, i32) {
    %c0_i32 = arith.constant 0 : i32
    %c0_i32_0 = arith.constant 0 : i32
    return %arg1, %c0_i32 : i32, i32
  }
  func.func @transform_2(%arg0: i32, %arg1: i32) -> (i32, i32) {
    %c0_i32 = arith.constant 0 : i32
    %c0_i32_0 = arith.constant 0 : i32
    %c0_i32_1 = arith.constant 0 : i32
    return %c0_i32, %c0_i32_0 : i32, i32
  }
  func.func @transform_3(%arg0: i32, %arg1: i32) -> (i32, i32) {
    %c0_i32 = arith.constant 0 : i32
    %c0_i32_0 = arith.constant 0 : i32
    return %arg0, %c0_i32 : i32, i32
  }
}

</mosaic_0001>

<bundles_post_ra>
// kernel: _lambda_.31
= control target key start
LH: loop header
LB: loop body
LE: loop exit
PB: predicated region body
PF: predicated region fallthrough
CT: control target
= control target key end

     0   :  { %9 = vsyncpa [#allocation3], 0  ;;  %s704_s15 = smov 0   ;;  %s706_s16 = smov 0   ;;  %s789_s0 = inlined_call_operand.vmem [shape: bf16[32,128], index: 0, kind: input, shape index: {}]   ;;  %s790_s1 = inlined_call_operand.hbm [shape: bf16[128,128], index: 1, kind: input, shape index: {}]   ;;  %s791_s2 = inlined_call_operand.vmem [shape: f32[1,16], index: 2, kind: input, shape index: {}]   ;;  %s792_s3 = inlined_call_operand.vmem [shape: f32[32,16], index: 3, kind: input, shape index: {}]   ;;  %s793_s4 = inlined_call_operand.vmem [shape: f32[32,16], index: 4, kind: output, shape index: {}]  }
   0x1   :  { %s708_s17 = smov 0  }
   0x2 LB: > { %s506_s18 = sadd.s32 4294967295, %s672_s17   ;;  %s27_s19 = sadd.s32 1, %s668_s16  ;;  %s672_s17 = sphi %s708_s17, %s15_s17   ;;  %s668_s16 = sphi %s706_s16, %s803_s16   ;;  %s664_s15 = sphi %s704_s15, %s802_s15  }
   0x3   : > { %p29_p0 = scmp.ge.s32.totalorder %s27_s19, 2  ;;  %p508_p1 = scmp.ge.s32.totalorder %s672_s17, 1 }
   0x4   : > { %p159_p2 = scmp.lt.s32.totalorder %s672_s17, 3  ;;  %p729_p4 = scmp.eq.s32.totalorder %s506_s18, 0 }
   0x5   : > { %s805_s19 = smov (%p29_p0, %s27_s19), 0  ;;  %s674_s22 = smov [#allocation2]  }
   0x6   : > { %p725_p3 = pnand %p508_p1, %p159_p2  ;;  %s174_s23 = sshll.u32 %s674_s22, 4  ;;  %s175_s23 = int_to_ptr.vmem [resolvable:$true] %s174_s23 }
   0x7   : > { %s798_s21 = scalar_select %p729_p4, 1, 0 }
   0x8   : > { %s797_s20 = scalar_select %p725_p3, 1, 0 }
   0x9   : > { %p566_p5 = pneg %p725_p3  ;;  %s618_s27 = scalar_lea.hbm %s790_s1, 1024 }
   0xa   : > { %p619_p7 = scmp.ne.s32.totalorder %s790_s1, %s618_s27  ;;  %p625_p11 = scmp.lt.u32.totalorder %s618_s27, %s790_s1 }
   0xb   : > { %p737_p6 = pnand %p729_p4, %p566_p5 }
   0xd   : > { %p620_p8 = pneg %p737_p6 }
   0xf   : > { %p621_p9 = pnand %p620_p8, %p619_p7 }
  0x11   : > { %p622_p10 = pneg %p621_p9 }
  0x13   : > { %p627_p12 = pnand %p625_p11, %p622_p10 }
  0x15   : > { %630 = shalt.err (!%p627_p12)
}
  0x16   : > { %s631_s6 = scalar_lea.vmem %s175_s23, 1024  ;;  %p639_p2 = scmp.lt.s32.totalorder %s175_s23, %s175_s23 }
  0x17   : > { %p632_p13 = scmp.ne.s32.totalorder %s175_s23, %s631_s6  ;;  %p640_p5 = scmp.lt.s32.totalorder %s631_s6, %s631_s6 }
  0x19   : > { %p634_p0 = pnand %p632_p13, %p620_p8  ;;  %p641_p4 = por %p640_p5, %p639_p2 }
  0x1b   : > { %p635_p1 = pneg %p634_p0 }
  0x1d   : > { %p642_p3 = pnand %p641_p4, %p635_p1 }
  0x1f   : > { %645 = shalt.err (!%p642_p3)
}
  0x20   : > { %s675_s7 = smov 64   ;;  %s676_s8 = smov 4  }
  0x21   : > { %569 = dma.hbm_to_vmem [thread:$0]  (!%p737_p6), %s790_s1, 1024, %s175_s23, [#allocation3], %s675_s7, %s675_s7, %s676_s8  }
  0x22   : > { %p800_p7 = scmp.ne.s32.totalorder %s797_s20, 0 }
  0x23   : > { %p801_p9 = scmp.ne.s32.totalorder (!%p800_p7), %s798_s21, 0 }
  0x24   : > { %214 = sbr.rel (%p800_p7) target bundleno = 322 (0x142), region = 36 }
  0x2b   : > { %659 = dma.done.wait (%p801_p9), [#allocation3], 1024  }
  0x2c   : > { %661 = vsyncadd (%p801_p9), [#allocation3], 4294966272  ;;  %s513_s11 = sshll.u32 %s664_s15, 1  ;;  %v677_v0 = vmov 0.0   ;;  %vm678_vm0 = vmmov 0   ;;  %v601_v1 = vld [vmem:[#allocation2] sm:$0xff]  }
  0x2d   : > { %542 = vmatprep.subr.bf16.mxu0 %v677_v0  ;;  %558 = vmatprep.mubr.msk.bf16.mxu0 %vm678_vm0, %v677_v0  ;;  %p249_p3 = scmp.lt.s32.totalorder %s513_s11, 3  ;;  %v602_v2 = vld [vmem:[#allocation2 + $0x8] sm:$0xff]   ;;  %v603_v3 = vld [vmem:[#allocation2 + $0x10] sm:$0xff]   ;;  %v604_v4 = vld [vmem:[#allocation2 + $0x18] sm:$0xff]   ;;  %vm409_vm1 = vcmask 130048  }
  0x2e   : > { %543 = vmatpush3.bf16.msra.mxu0 %v601_v1  ;;  %v605_v5 = vld [vmem:[#allocation2 + $0x20] sm:$0xff]   ;;  %v606_v6 = vld [vmem:[#allocation2 + $0x28] sm:$0xff]   ;;  %v607_v7 = vld [vmem:[#allocation2 + $0x30] sm:$0xff]  }
  0x2f   : > { %s807_s11 = smov (!%p249_p3, %s513_s11), 3  ;;  %544 = vmatprep.subr.bf16.mxu0 %v677_v0  ;;  %v608_v8 = vld [vmem:[#allocation2 + $0x38] sm:$0xff]   ;;  %v528_v12 = vld [vmem:[%s791_s2] ss:$0 sm:$0xff] }
  0x30   : > { %s514_s12 = sshll.u32 %s807_s11, 2  ;;  %s516_s18 = sshll.u32 %s807_s11, 3 }
  0x31   : > { %s255_s15 = scalar_lea.vmem %s789_s0, %s514_s12  ;;  %s262_s22 = scalar_lea.vmem %s792_s3, %s516_s18 }
  0x32   : > { %545 = vmatpush3.bf16.msra.mxu0 %v602_v2  ;;  %v609_v9 = vld [vmem:[%s255_s15] sm:$0xff]   ;;  %v385_v13 = vld [vmem:[%s262_s22 + $0x8] sm:$0xff]  ;;  %s268_s27 = scalar_lea.vmem %s793_s4, %s516_s18 }
  0x33   : > { %546 = vmatprep.subr.bf16.mxu0 %v677_v0  ;;  %v384_v10 = vld [vmem:[%s262_s22] sm:$0xff] }
  0x36   : > { %547 = vmatpush3.bf16.msra.mxu0 %v603_v3 }
  0x37   : > { %548 = vmatprep.subr.bf16.mxu0 %v677_v0 }
  0x3a   : > { %549 = vmatpush3.bf16.msra.mxu0 %v604_v4 }
  0x3b   : > { %550 = vmatprep.subr.bf16.mxu0 %v677_v0 }
  0x3e   : > { %551 = vmatpush3.bf16.msra.mxu0 %v605_v5 }
  0x3f   : > { %552 = vmatprep.subr.bf16.mxu0 %v677_v0 }
  0x42   : > { %553 = vmatpush3.bf16.msra.mxu0 %v606_v6 }
  0x43   : > { %554 = vmatprep.subr.bf16.mxu0 %v677_v0 }
  0x46   : > { %555 = vmatpush3.bf16.msra.mxu0 %v607_v7 }
  0x47   : > { %556 = vmatprep.subr.bf16.mxu0 %v677_v0 }
  0x4a   : > { %557 = vmatpush3.bf16.msra.mxu0 %v608_v8 }
  0x4d   : > { %559 = vmatmul.mubr.bf16.vlgmr.msra.gmra.mrb[0].mxu0 %v609_v9 }
 0x120   : > { %v377_v11 = vpop.f32.mrb[0].mxu0 }
 0x121   : > { %v386_v14 = vadd.f32 %v384_v10, %v377_v11  ;;  %v560_v15 = vpop.f32.mrb[1].mxu0 }
 0x122   : > { %v380_v16 = vpop.f32.mrb[2].mxu0 }
 0x123   : > { %v395_v17 = vadd.f32 %v528_v12, %v386_v14  ;;  %v387_v18 = vadd.f32 %v385_v13, %v380_v16  ;;  %v561_v19 = vpop.f32.mrb[3].mxu0 }
 0x125   : > { %v529_v20 = vmul.f32 -1.442695, %v395_v17  ;;  %v396_v21 = vadd.f32 %v528_v12, %v387_v18 }
 0x127   : > { %610 = vpow2.f32 %v529_v20  ;;  %v530_v22 = vmul.f32 -1.442695, %v396_v21 }
 0x129   : > { %612 = vpow2.f32 %v530_v22 }
 0x131   : > { %v611_v23 = vpop.eup %610 }
 0x132   : > { %v403_v24 = vadd.f32 1.0, %v611_v23 }
 0x133   : > { %v613_v25 = vpop.eup %612 }
 0x134   : > { %614 = vrcp.f32 %v403_v24  ;;  %v404_v26 = vadd.f32 1.0, %v613_v25 }
 0x136   : > { %616 = vrcp.f32 %v404_v26 }
 0x13e   : > { %v615_v27 = vpop.eup %614 }
 0x13f   : > { %410 = vst.msk [vmem:[%s268_s27] sm:$0xff] %vm409_vm1, %v615_v27 }
 0x140   : > { %v617_v28 = vpop.eup %616 }
 0x141   : > { %411 = vst.msk [vmem:[%s268_s27 + $0x8] sm:$0xff] %vm409_vm1, %v617_v28 }
 0x142 PF: > { %s15_s17 = sadd.s32 1, %s672_s17   ;;  %s802_s15 = smov %s668_s16 }
 0x143   : > { %p12_p4 = scmp.ge.s32.totalorder %s15_s17, 4   ;;  %s803_s16 = smov %s805_s19 }
 0x145   :  { %14 = sbr.rel (!%p12_p4) target bundleno = 2 (0x2), region = 75 }
 0x14c   :  { %434 = vsyncpa [#allocation3], 1 }
 0x14d   :  { %436 = vsyncpa [#allocation3 + $0x1], 1 }

// kernel: _lambda_.29
= control target key start
LH: loop header
LB: loop body
LE: loop exit
PB: predicated region body
PF: predicated region fallthrough
CT: control target
= control target key end

     0   :  { %8 = vsyncpa [#allocation3], 0  ;;  %s887_s0 = inlined_call_operand.vmem [shape: bf16[32,256], index: 0, kind: input, shape index: {}]   ;;  %s888_s1 = inlined_call_operand.hbm [shape: bf16[256,128], index: 1, kind: input, shape index: {}]   ;;  %s889_s2 = inlined_call_operand.hbm [shape: f32[1,16], index: 2, kind: input, shape index: {}]   ;;  %s890_s3 = inlined_call_operand.vmem [shape: f32[32,16], index: 3, kind: output, shape index: {}]  }
   0x1   :  { %9 = vsyncpa [#allocation5], 0  ;;  %s767_s12 = smov 0   ;;  %s769_s13 = smov 0  }
   0x2   :  { %s771_s14 = smov 0  }
   0x3 LB: > { %s531_s15 = sadd.s32 4294967295, %s741_s14   ;;  %s27_s16 = sadd.s32 1, %s737_s13  ;;  %s741_s14 = sphi %s771_s14, %s15_s14   ;;  %s737_s13 = sphi %s769_s13, %s900_s13   ;;  %s733_s12 = sphi %s767_s12, %s899_s12  }
   0x4   : > { %p29_p0 = scmp.ge.s32.totalorder %s27_s16, 2  ;;  %p533_p1 = scmp.ge.s32.totalorder %s741_s14, 1 }
   0x5   : > { %p133_p2 = scmp.lt.s32.totalorder %s741_s14, 3  ;;  %p792_p4 = scmp.eq.s32.totalorder %s531_s15, 0 }
   0x6   : > { %s902_s16 = smov (%p29_p0, %s27_s16), 0  ;;  %s743_s19 = smov [#allocation2]  }
   0x7   : > { %p788_p3 = pnand %p533_p1, %p133_p2  ;;  %s148_s20 = sshll.u32 %s743_s19, 4  ;;  %s149_s20 = int_to_ptr.vmem [resolvable:$true] %s148_s20 }
   0x8   : > { %s895_s18 = scalar_select %p792_p4, 1, 0 }
   0x9   : > { %s894_s17 = scalar_select %p788_p3, 1, 0 }
   0xa   : > { %p597_p5 = pneg %p788_p3  ;;  %s744_s22 = smov [#allocation4]  }
   0xb   : > { %s162_s23 = sshll.u32 %s744_s22, 4  ;;  %s655_s26 = scalar_lea.hbm %s888_s1, 2048  ;;  %s804_s23 = int_to_ptr.vmem [resolvable:$true] %s162_s23 }
   0xc   : > { %p800_p6 = pnand %p792_p4, %p597_p5  ;;  %p656_p7 = scmp.ne.s32.totalorder %s888_s1, %s655_s26 }
   0xd   : > { %p662_p11 = scmp.lt.u32.totalorder %s655_s26, %s888_s1 }
   0xe   : > { %p657_p8 = pneg %p800_p6 }
  0x10   : > { %p658_p9 = pnand %p657_p8, %p656_p7 }
  0x12   : > { %p659_p10 = pneg %p658_p9 }
  0x14   : > { %p664_p12 = pnand %p662_p11, %p659_p10 }
  0x16   : > { %667 = shalt.err (!%p664_p12)
}
  0x17   : > { %s668_s4 = scalar_lea.vmem %s149_s20, 2048  ;;  %p676_p2 = scmp.lt.s32.totalorder %s149_s20, %s149_s20 }
  0x18   : > { %p669_p13 = scmp.ne.s32.totalorder %s149_s20, %s668_s4  ;;  %p677_p5 = scmp.lt.s32.totalorder %s668_s4, %s668_s4 }
  0x1a   : > { %p671_p0 = pnand %p669_p13, %p657_p8  ;;  %p678_p4 = por %p677_p5, %p676_p2 }
  0x1c   : > { %p672_p1 = pneg %p671_p0 }
  0x1e   : > { %p679_p3 = pnand %p678_p4, %p672_p1 }
  0x20   : > { %682 = shalt.err (!%p679_p3)
}
  0x21   : > { %s745_s5 = smov 64   ;;  %s746_s6 = smov 4  }
  0x22   : > { %600 = dma.hbm_to_vmem [thread:$0]  (!%p800_p6), %s888_s1, 2048, %s149_s20, [#allocation3], %s745_s5, %s745_s5, %s746_s6  }
  0x23   : > { %s683_s11 = scalar_lea.hbm %s889_s2, 16 }
  0x24   : > { %p684_p7 = scmp.ne.s32.totalorder %s889_s2, %s683_s11  ;;  %p690_p9 = scmp.lt.u32.totalorder %s683_s11, %s889_s2 }
  0x26   : > { %p686_p3 = pnand %p684_p7, %p657_p8 }
  0x28   : > { %p687_p4 = pneg %p686_p3 }
  0x2a   : > { %p692_p10 = pnand %p690_p9, %p687_p4 }
  0x2c   : > { %695 = shalt.err (!%p692_p10)
}
  0x2d   : > { %s696_s20 = scalar_lea.vmem %s804_s23, 16  ;;  %s703_s25 = scalar_lea.vmem %s804_s23, 32 }
  0x2e   : > { %p697_p11 = scmp.ne.s32.totalorder %s804_s23, %s696_s20  ;;  %p704_p0 = scmp.lt.s32.totalorder %s804_s23, %s804_s23 }
  0x2f   : > { %p705_p1 = scmp.lt.s32.totalorder %s703_s25, %s696_s20 }
  0x30   : > { %p699_p12 = pnand %p697_p11, %p657_p8 }
  0x31   : > { %p706_p2 = por %p705_p1, %p704_p0 }
  0x32   : > { %p700_p13 = pneg %p699_p12 }
  0x34   : > { %p707_p5 = pnand %p706_p2, %p700_p13 }
  0x36   : > { %710 = shalt.err (!%p707_p5)
}
  0x37   : > { %603 = dma.hbm_to_vmem [thread:$0]  (!%p800_p6), %s889_s2, 16, %s804_s23, [#allocation5]  }
  0x38   : > { %p897_p7 = scmp.ne.s32.totalorder %s894_s17, 0 }
  0x39   : > { %p898_p8 = scmp.ne.s32.totalorder (!%p897_p7), %s895_s18, 0 }
  0x3a   : > { %190 = sbr.rel (%p897_p7) target bundleno = 321 (0x141), region = 32 }
  0x41   : > { %724 = dma.done.wait (%p898_p8), [#allocation3], 2048  }
  0x42   : > { %726 = vsyncadd (%p898_p8), [#allocation3], 4294965248 }
  0x43   : > { %728 = dma.done.wait (%p898_p8), [#allocation5], 16  }
  0x44   : > { %730 = vsyncadd (%p898_p8), [#allocation5], 4294967280  ;;  %v636_v0 = vld [vmem:[#allocation2 + $0x40] sm:$0xff]   ;;  %s540_s21 = sshll.u32 %s733_s12, 1  ;;  %v638_v2 = vld [vmem:[#allocation2 + $0x48] sm:$0xff]   ;;  %vm433_vm0 = vcmask 130048  }
  0x45   : > { %v637_v1 = vld [vmem:[#allocation2] sm:$0xff]   ;;  %567 = vmatprep.subr.bf16.mxu0 %v636_v0  ;;  %v639_v3 = vld [vmem:[#allocation2 + $0x8] sm:$0xff]   ;;  %p225_p6 = scmp.lt.s32.totalorder %s540_s21, 3  ;;  %v640_v4 = vld [vmem:[#allocation2 + $0x50] sm:$0xff]  }
  0x46   : > { %568 = vmatpush3.bf16.msra.mxu0 %v637_v1  ;;  %v641_v5 = vld [vmem:[#allocation2 + $0x10] sm:$0xff]   ;;  %v642_v6 = vld [vmem:[#allocation2 + $0x58] sm:$0xff]   ;;  %v644_v8 = vld [vmem:[#allocation2 + $0x60] sm:$0xff]  }
  0x47   : > { %569 = vmatprep.subr.bf16.mxu0 %v638_v2  ;;  %s904_s21 = smov (!%p225_p6, %s540_s21), 3  ;;  %v643_v7 = vld [vmem:[#allocation2 + $0x18] sm:$0xff]   ;;  %v645_v9 = vld [vmem:[#allocation2 + $0x20] sm:$0xff]   ;;  %v646_v10 = vld [vmem:[#allocation2 + $0x68] sm:$0xff]  }
  0x48   : > { %s566_s17 = sshll.u32 %s904_s21, 3  ;;  %v647_v12 = vld [vmem:[#allocation2 + $0x28] sm:$0xff]   ;;  %v648_v13 = vld [vmem:[#allocation2 + $0x70] sm:$0xff]   ;;  %v650_v15 = vld [vmem:[#allocation2 + $0x78] sm:$0xff]  }
  0x49   : > { %s232_s23 = scalar_lea.vmem %s887_s0, %s566_s17  ;;  %v649_v14 = vld [vmem:[#allocation2 + $0x30] sm:$0xff]   ;;  %v651_v16 = vld [vmem:[#allocation2 + $0x38] sm:$0xff]   ;;  %v563_v20 = vld [vmem:[#allocation4] ss:$0 sm:$0xff]  ;;  %s240_s30 = scalar_lea.vmem %s890_s3, %s566_s17 }
  0x4a   : > { %570 = vmatpush3.bf16.msra.mxu0 %v639_v3  ;;  %v654_v11 = vld [vmem:[%s232_s23 + $0x4] ss:$8 sps:$4 sm:$0xff]   ;;  %v652_v17 = vld [vmem:[%s232_s23] ss:$8 sps:$4 sm:$0xff]  }
  0x4b   : > { %571 = vmatprep.subr.bf16.mxu0 %v640_v4  ;;  %415 = vmatprep.mubr.bf16.mxu0 %v654_v11 }
  0x4e   : > { %572 = vmatpush3.bf16.msra.mxu0 %v641_v5 }
  0x4f   : > { %573 = vmatprep.subr.bf16.mxu0 %v642_v6 }
  0x52   : > { %574 = vmatpush3.bf16.msra.mxu0 %v643_v7 }
  0x53   : > { %575 = vmatprep.subr.bf16.mxu0 %v644_v8 }
  0x56   : > { %576 = vmatpush3.bf16.msra.mxu0 %v645_v9 }
  0x57   : > { %577 = vmatprep.subr.bf16.mxu0 %v646_v10 }
  0x5a   : > { %578 = vmatpush3.bf16.msra.mxu0 %v647_v12 }
  0x5b   : > { %579 = vmatprep.subr.bf16.mxu0 %v648_v13 }
  0x5e   : > { %580 = vmatpush3.bf16.msra.mxu0 %v649_v14 }
  0x5f   : > { %581 = vmatprep.subr.bf16.mxu0 %v650_v15 }
  0x62   : > { %582 = vmatpush3.bf16.msra.mxu0 %v651_v16 }
  0x65   : > { %416 = vmatmul.mubr.bf16.vlgmr.msra.gmra.mrb[0].mxu0 %v652_v17 }
 0x138   : > { %v583_v18 = vpop.f32.mrb[0].mxu0 }
 0x139   : > { %v584_v19 = vpop.f32.mrb[1].mxu0 }
 0x13a   : > { %v585_v21 = vadd.f32 %v584_v19, %v583_v18  ;;  %v586_v22 = vpop.f32.mrb[2].mxu0 }
 0x13b   : > { %v587_v23 = vpop.f32.mrb[3].mxu0 }
 0x13c   : > { %v431_v24 = vadd.f32 %v585_v21, %v563_v20  ;;  %v588_v25 = vadd.f32 %v587_v23, %v586_v22 }
 0x13e   : > { %434 = vst.msk [vmem:[%s240_s30] sm:$0xff] %vm433_vm0, %v431_v24  ;;  %v432_v26 = vadd.f32 %v588_v25, %v563_v20 }
 0x140   : > { %435 = vst.msk [vmem:[%s240_s30 + $0x8] sm:$0xff] %vm433_vm0, %v432_v26 }
 0x141 PF: > { %s15_s14 = sadd.s32 1, %s741_s14   ;;  %s899_s12 = smov %s737_s13 }
 0x142   : > { %p12_p3 = scmp.ge.s32.totalorder %s15_s14, 4   ;;  %s900_s13 = smov %s902_s16 }
 0x144   :  { %14 = sbr.rel (!%p12_p3) target bundleno = 3 (0x3), region = 72 }
 0x14b   :  { %458 = vsyncpa [#allocation3], 1 }
 0x14c   :  { %460 = vsyncpa [#allocation3 + $0x1], 1 }
 0x14d   :  { %461 = vsyncpa [#allocation5], 1 }

// kernel: _lambda_.30
= control target key start
LH: loop header
LB: loop body
LE: loop exit
PB: predicated region body
PF: predicated region fallthrough
CT: control target
= control target key end

     0   :  { %8 = vsyncpa [#allocation3], 0  ;;  %s887_s0 = inlined_call_operand.vmem [shape: bf16[32,256], index: 0, kind: input, shape index: {}]   ;;  %s888_s1 = inlined_call_operand.hbm [shape: bf16[256,128], index: 1, kind: input, shape index: {}]   ;;  %s889_s2 = inlined_call_operand.hbm [shape: f32[1,8], index: 2, kind: input, shape index: {}]   ;;  %s890_s3 = inlined_call_operand.vmem [shape: f32[32,8], index: 3, kind: output, shape index: {}]  }
   0x1   :  { %9 = vsyncpa [#allocation5], 0  ;;  %s767_s12 = smov 0   ;;  %s769_s13 = smov 0  }
   0x2   :  { %s771_s14 = smov 0  }
   0x3 LB: > { %s531_s15 = sadd.s32 4294967295, %s741_s14   ;;  %s27_s16 = sadd.s32 1, %s737_s13  ;;  %s741_s14 = sphi %s771_s14, %s15_s14   ;;  %s737_s13 = sphi %s769_s13, %s900_s13   ;;  %s733_s12 = sphi %s767_s12, %s899_s12  }
   0x4   : > { %p29_p0 = scmp.ge.s32.totalorder %s27_s16, 2  ;;  %p533_p1 = scmp.ge.s32.totalorder %s741_s14, 1 }
   0x5   : > { %p133_p2 = scmp.lt.s32.totalorder %s741_s14, 3  ;;  %p792_p4 = scmp.eq.s32.totalorder %s531_s15, 0 }
   0x6   : > { %s902_s16 = smov (%p29_p0, %s27_s16), 0  ;;  %s743_s19 = smov [#allocation2]  }
   0x7   : > { %p788_p3 = pnand %p533_p1, %p133_p2  ;;  %s148_s20 = sshll.u32 %s743_s19, 4  ;;  %s149_s20 = int_to_ptr.vmem [resolvable:$true] %s148_s20 }
   0x8   : > { %s895_s18 = scalar_select %p792_p4, 1, 0 }
   0x9   : > { %s894_s17 = scalar_select %p788_p3, 1, 0 }
   0xa   : > { %p597_p5 = pneg %p788_p3  ;;  %s744_s22 = smov [#allocation4]  }
   0xb   : > { %s162_s23 = sshll.u32 %s744_s22, 4  ;;  %s655_s26 = scalar_lea.hbm %s888_s1, 2048  ;;  %s804_s23 = int_to_ptr.vmem [resolvable:$true] %s162_s23 }
   0xc   : > { %p800_p6 = pnand %p792_p4, %p597_p5  ;;  %p656_p7 = scmp.ne.s32.totalorder %s888_s1, %s655_s26 }
   0xd   : > { %p662_p11 = scmp.lt.u32.totalorder %s655_s26, %s888_s1 }
   0xe   : > { %p657_p8 = pneg %p800_p6 }
  0x10   : > { %p658_p9 = pnand %p657_p8, %p656_p7 }
  0x12   : > { %p659_p10 = pneg %p658_p9 }
  0x14   : > { %p664_p12 = pnand %p662_p11, %p659_p10 }
  0x16   : > { %667 = shalt.err (!%p664_p12)
}
  0x17   : > { %s668_s4 = scalar_lea.vmem %s149_s20, 2048  ;;  %p676_p2 = scmp.lt.s32.totalorder %s149_s20, %s149_s20 }
  0x18   : > { %p669_p13 = scmp.ne.s32.totalorder %s149_s20, %s668_s4  ;;  %p677_p5 = scmp.lt.s32.totalorder %s668_s4, %s668_s4 }
  0x1a   : > { %p671_p0 = pnand %p669_p13, %p657_p8  ;;  %p678_p4 = por %p677_p5, %p676_p2 }
  0x1c   : > { %p672_p1 = pneg %p671_p0 }
  0x1e   : > { %p679_p3 = pnand %p678_p4, %p672_p1 }
  0x20   : > { %682 = shalt.err (!%p679_p3)
}
  0x21   : > { %s745_s5 = smov 64   ;;  %s746_s6 = smov 4  }
  0x22   : > { %600 = dma.hbm_to_vmem [thread:$0]  (!%p800_p6), %s888_s1, 2048, %s149_s20, [#allocation3], %s745_s5, %s745_s5, %s746_s6  }
  0x23   : > { %s683_s11 = scalar_lea.hbm %s889_s2, 16 }
  0x24   : > { %p684_p7 = scmp.ne.s32.totalorder %s889_s2, %s683_s11  ;;  %p690_p9 = scmp.lt.u32.totalorder %s683_s11, %s889_s2 }
  0x26   : > { %p686_p3 = pnand %p684_p7, %p657_p8 }
  0x28   : > { %p687_p4 = pneg %p686_p3 }
  0x2a   : > { %p692_p10 = pnand %p690_p9, %p687_p4 }
  0x2c   : > { %695 = shalt.err (!%p692_p10)
}
  0x2d   : > { %s696_s20 = scalar_lea.vmem %s804_s23, 16  ;;  %s703_s25 = scalar_lea.vmem %s804_s23, 32 }
  0x2e   : > { %p697_p11 = scmp.ne.s32.totalorder %s804_s23, %s696_s20  ;;  %p704_p0 = scmp.lt.s32.totalorder %s804_s23, %s804_s23 }
  0x2f   : > { %p705_p1 = scmp.lt.s32.totalorder %s703_s25, %s696_s20 }
  0x30   : > { %p699_p12 = pnand %p697_p11, %p657_p8 }
  0x31   : > { %p706_p2 = por %p705_p1, %p704_p0 }
  0x32   : > { %p700_p13 = pneg %p699_p12 }
  0x34   : > { %p707_p5 = pnand %p706_p2, %p700_p13 }
  0x36   : > { %710 = shalt.err (!%p707_p5)
}
  0x37   : > { %603 = dma.hbm_to_vmem [thread:$0]  (!%p800_p6), %s889_s2, 16, %s804_s23, [#allocation5]  }
  0x38   : > { %p897_p7 = scmp.ne.s32.totalorder %s894_s17, 0 }
  0x39   : > { %p898_p8 = scmp.ne.s32.totalorder (!%p897_p7), %s895_s18, 0 }
  0x3a   : > { %190 = sbr.rel (%p897_p7) target bundleno = 321 (0x141), region = 32 }
  0x41   : > { %724 = dma.done.wait (%p898_p8), [#allocation3], 2048  }
  0x42   : > { %726 = vsyncadd (%p898_p8), [#allocation3], 4294965248 }
  0x43   : > { %728 = dma.done.wait (%p898_p8), [#allocation5], 16  }
  0x44   : > { %730 = vsyncadd (%p898_p8), [#allocation5], 4294967280  ;;  %v636_v0 = vld [vmem:[#allocation2 + $0x40] sm:$0xff]   ;;  %s540_s21 = sshll.u32 %s733_s12, 1  ;;  %v638_v2 = vld [vmem:[#allocation2 + $0x48] sm:$0xff]   ;;  %vm433_vm0 = vcmask 64512  }
  0x45   : > { %v637_v1 = vld [vmem:[#allocation2] sm:$0xff]   ;;  %567 = vmatprep.subr.bf16.mxu0 %v636_v0  ;;  %v639_v3 = vld [vmem:[#allocation2 + $0x8] sm:$0xff]   ;;  %p225_p6 = scmp.lt.s32.totalorder %s540_s21, 3  ;;  %v640_v4 = vld [vmem:[#allocation2 + $0x50] sm:$0xff]  }
  0x46   : > { %568 = vmatpush3.bf16.msra.mxu0 %v637_v1  ;;  %v641_v5 = vld [vmem:[#allocation2 + $0x10] sm:$0xff]   ;;  %v642_v6 = vld [vmem:[#allocation2 + $0x58] sm:$0xff]   ;;  %v644_v8 = vld [vmem:[#allocation2 + $0x60] sm:$0xff]  }
  0x47   : > { %569 = vmatprep.subr.bf16.mxu0 %v638_v2  ;;  %s904_s21 = smov (!%p225_p6, %s540_s21), 3  ;;  %v643_v7 = vld [vmem:[#allocation2 + $0x18] sm:$0xff]   ;;  %v645_v9 = vld [vmem:[#allocation2 + $0x20] sm:$0xff]   ;;  %v646_v10 = vld [vmem:[#allocation2 + $0x68] sm:$0xff]  }
  0x48   : > { %s566_s17 = sshll.u32 %s904_s21, 3  ;;  %v647_v12 = vld [vmem:[#allocation2 + $0x28] sm:$0xff]   ;;  %v648_v13 = vld [vmem:[#allocation2 + $0x70] sm:$0xff]   ;;  %v650_v15 = vld [vmem:[#allocation2 + $0x78] sm:$0xff]  }
  0x49   : > { %s232_s23 = scalar_lea.vmem %s887_s0, %s566_s17  ;;  %v649_v14 = vld [vmem:[#allocation2 + $0x30] sm:$0xff]   ;;  %v651_v16 = vld [vmem:[#allocation2 + $0x38] sm:$0xff]   ;;  %v563_v20 = vld [vmem:[#allocation4] ss:$0 sm:$0xff]  ;;  %s240_s30 = scalar_lea.vmem %s890_s3, %s566_s17 }
  0x4a   : > { %570 = vmatpush3.bf16.msra.mxu0 %v639_v3  ;;  %v654_v11 = vld [vmem:[%s232_s23 + $0x4] ss:$8 sps:$4 sm:$0xff]   ;;  %v652_v17 = vld [vmem:[%s232_s23] ss:$8 sps:$4 sm:$0xff]  }
  0x4b   : > { %571 = vmatprep.subr.bf16.mxu0 %v640_v4  ;;  %415 = vmatprep.mubr.bf16.mxu0 %v654_v11 }
  0x4e   : > { %572 = vmatpush3.bf16.msra.mxu0 %v641_v5 }
  0x4f   : > { %573 = vmatprep.subr.bf16.mxu0 %v642_v6 }
  0x52   : > { %574 = vmatpush3.bf16.msra.mxu0 %v643_v7 }
  0x53   : > { %575 = vmatprep.subr.bf16.mxu0 %v644_v8 }
  0x56   : > { %576 = vmatpush3.bf16.msra.mxu0 %v645_v9 }
  0x57   : > { %577 = vmatprep.subr.bf16.mxu0 %v646_v10 }
  0x5a   : > { %578 = vmatpush3.bf16.msra.mxu0 %v647_v12 }
  0x5b   : > { %579 = vmatprep.subr.bf16.mxu0 %v648_v13 }
  0x5e   : > { %580 = vmatpush3.bf16.msra.mxu0 %v649_v14 }
  0x5f   : > { %581 = vmatprep.subr.bf16.mxu0 %v650_v15 }
  0x62   : > { %582 = vmatpush3.bf16.msra.mxu0 %v651_v16 }
  0x65   : > { %416 = vmatmul.mubr.bf16.vlgmr.msra.gmra.mrb[0].mxu0 %v652_v17 }
 0x138   : > { %v583_v18 = vpop.f32.mrb[0].mxu0 }
 0x139   : > { %v584_v19 = vpop.f32.mrb[1].mxu0 }
 0x13a   : > { %v585_v21 = vadd.f32 %v584_v19, %v583_v18  ;;  %v586_v22 = vpop.f32.mrb[2].mxu0 }
 0x13b   : > { %v587_v23 = vpop.f32.mrb[3].mxu0 }
 0x13c   : > { %v431_v24 = vadd.f32 %v585_v21, %v563_v20  ;;  %v588_v25 = vadd.f32 %v587_v23, %v586_v22 }
 0x13e   : > { %434 = vst.msk [vmem:[%s240_s30] sm:$0xff] %vm433_vm0, %v431_v24  ;;  %v432_v26 = vadd.f32 %v588_v25, %v563_v20 }
 0x140   : > { %435 = vst.msk [vmem:[%s240_s30 + $0x8] sm:$0xff] %vm433_vm0, %v432_v26 }
 0x141 PF: > { %s15_s14 = sadd.s32 1, %s741_s14   ;;  %s899_s12 = smov %s737_s13 }
 0x142   : > { %p12_p3 = scmp.ge.s32.totalorder %s15_s14, 4   ;;  %s900_s13 = smov %s902_s16 }
 0x144   :  { %14 = sbr.rel (!%p12_p3) target bundleno = 3 (0x3), region = 72 }
 0x14b   :  { %458 = vsyncpa [#allocation3], 1 }
 0x14c   :  { %460 = vsyncpa [#allocation3 + $0x1], 1 }
 0x14d   :  { %461 = vsyncpa [#allocation5], 1 }

// kernel: _lambda_.32
= control target key start
LH: loop header
LB: loop body
LE: loop exit
PB: predicated region body
PF: predicated region fallthrough
CT: control target
= control target key end

     0   :  { %11 = vsyncpa [#allocation3], 0  ;;  %s1135_s0 = inlined_call_operand.vmem [shape: bf16[32,128], index: 0, kind: input, shape index: {}]   ;;  %s1136_s1 = inlined_call_operand.hbm [shape: bf16[128,128], index: 1, kind: input, shape index: {}]   ;;  %s1137_s2 = inlined_call_operand.vmem [shape: f32[1,8], index: 2, kind: input, shape index: {}]   ;;  %s1138_s3 = inlined_call_operand.vmem [shape: f32[32,8], index: 3, kind: input, shape index: {}]   ;;  %s1139_s4 = inlined_call_operand.vmem [shape: f32[32,8], index: 4, kind: input, shape index: {}]   ;;  %s1140_s5 = inlined_call_operand.hbm [shape: f32[32,8], index: 5, kind: input, shape index: {}]   ;;  %s1141_s6 = inlined_call_operand.vmem [shape: f32[32,8], index: 6, kind: output, shape index: {}]  }
   0x1   :  { %12 = vsyncpa [#allocation5], 0 }
   0x2   :  { %14 = vsyncpa [#allocation5 + $0x1], 0  ;;  %s959_s21 = smov 0   ;;  %s961_s22 = smov 0  }
   0x3   :  { %s963_s23 = smov 0   ;;  %s965_s24 = smov 0  }
   0x4   :  { %s967_s25 = smov 0   ;;  %s969_s26 = smov 0  }
   0x5 LB: > { %s660_s27 = sadd.s32 4294967295, %s914_s26   ;;  %p179_p0 = scmp.ne.s32.totalorder %s898_s22, %s894_s21  ;;  %s914_s26 = sphi %s969_s26, %s20_s26   ;;  %s910_s25 = sphi %s967_s25, %s1158_s25   ;;  %s906_s24 = sphi %s965_s24, %s1157_s24   ;;  %s902_s23 = sphi %s963_s23, %s1156_s23   ;;  %s898_s22 = sphi %s961_s22, %s1155_s22   ;;  %s894_s21 = sphi %s959_s21, %s1154_s21  }
   0x6   : > { %p989_p1 = scmp.eq.s32.totalorder %s660_s27, 0  ;;  %p662_p2 = scmp.ge.s32.totalorder %s914_s26, 1 }
   0x7   : > { %p216_p3 = scmp.lt.s32.totalorder %s914_s26, 3  ;;  %s916_s7 = smov [#allocation2]  }
   0x8   : > { %s1146_s28 = scalar_select %p989_p1, 1, 0 }
   0x9   : > { %p997_p4 = por %p989_p1, %p179_p0  ;;  %p1001_p5 = pnand %p662_p2, %p216_p3 }
   0xa   : > { %s231_s8 = sshll.u32 %s916_s7, 4  ;;  %s32_s10 = sadd.s32 1, %s910_s25  ;;  %s232_s8 = int_to_ptr.vmem [resolvable:$true] %s231_s8 }
   0xb   : > { %s1147_s29 = scalar_select %p997_p4, 1, 0 }
   0xc   : > { %s1148_s30 = scalar_select %p1001_p5, 1, 0 }
   0xd   : > { %p727_p6 = pneg %p1001_p5  ;;  %s802_s13 = scalar_lea.hbm %s1136_s1, 1024 }
   0xe   : > { %p803_p8 = scmp.ne.s32.totalorder %s1136_s1, %s802_s13  ;;  %p809_p12 = scmp.lt.u32.totalorder %s802_s13, %s1136_s1 }
   0xf   : > { %p1009_p7 = pnand %p727_p6, %p989_p1 }
  0x11   : > { %p804_p9 = pneg %p1009_p7 }
  0x13   : > { %p805_p10 = pnand %p804_p9, %p803_p8 }
  0x15   : > { %p806_p11 = pneg %p805_p10 }
  0x17   : > { %p811_p13 = pnand %p809_p12, %p806_p11 }
  0x19   : > { %814 = shalt.err (!%p811_p13)
}
  0x1a   : > { %s815_s18 = scalar_lea.vmem %s232_s8, 1024  ;;  %p823_p6 = scmp.lt.s32.totalorder %s232_s8, %s232_s8 }
  0x1b   : > { %p816_p0 = scmp.ne.s32.totalorder %s232_s8, %s815_s18  ;;  %p824_p4 = scmp.lt.s32.totalorder %s815_s18, %s815_s18 }
  0x1d   : > { %p818_p2 = pnand %p816_p0, %p804_p9  ;;  %p825_p1 = por %p824_p4, %p823_p6 }
  0x1f   : > { %p819_p3 = pneg %p818_p2 }
  0x21   : > { %p826_p5 = pnand %p825_p1, %p819_p3 }
  0x23   : > { %829 = shalt.err (!%p826_p5)
}
  0x24   : > { %s917_s19 = smov 64   ;;  %s918_s20 = smov 4  }
  0x25   : > { %730 = dma.hbm_to_vmem [thread:$0]  (!%p1009_p7), %s1136_s1, 1024, %s232_s8, [#allocation3], %s917_s19, %s917_s19, %s918_s20  }
  0x26   : > { %p34_p4 = scmp.ge.s32.totalorder %s32_s10, 2  ;;  %s166_s7 = sadd.s32 1, %s902_s23 }
  0x27   : > { %p173_p1 = scmp.ne.s32.totalorder %s902_s23, %s898_s22  ;;  %p174_p5 = scmp.eq.s32.totalorder %s914_s26, 0 }
  0x28   : > { %s1160_s10 = smov (%p34_p4, %s32_s10), 0  ;;  %p736_p9 = scmp.lt.s32.totalorder %s914_s26, 2 }
  0x29   : > { %p175_p8 = por %p174_p5, %p173_p1  ;;  %s163_s11 = ssub.s32 %s910_s25, %s1160_s10 }
  0x2a   : > { %s278_s12 = sand.u32 1, %s902_s23   ;;  %p164_p10 = scmp.eq.s32.totalorder %s163_s11, 0 }
  0x2b   : > { %s665_s13 = sshll.u32 %s278_s12, 4  ;;  %s691_s14 = sshll.u32 %s910_s25, 8 }
  0x2c   : > { %s1042_s15 = scalar_select %p164_p10, %s902_s23, %s166_s7  }
  0x2d   : > { %s1047_s8 = scalar_lea.hbm %s1140_s5, %s691_s14  ;;  %s282_s17 = scalar_lea.vmem [#allocation4], %s665_s13 }
  0x2e   : > { %s289_s18 = sshll.u32 %s282_s17, 4  ;;  %p1049_p7 = pnand %p736_p9, %p175_p8  ;;  %s1053_s18 = int_to_ptr.vmem [resolvable:$true] %s289_s18 }
  0x2f   : > { %s1055_s20 = scalar_lea.sflag [#allocation5], %s278_s12  ;;  %s830_s21 = scalar_lea.hbm %s1047_s8, 256 }
  0x30   : > { %p831_p11 = scmp.ne.s32.totalorder %s1047_s8, %s830_s21  ;;  %p832_p12 = pneg %p1049_p7 }
  0x31   : > { %s835_s11 = scalar_lea.hbm %s1140_s5, 512  ;;  %p836_p2 = scmp.lt.u32.totalorder %s1047_s8, %s1140_s5 }
  0x32   : > { %p833_p13 = pnand %p832_p12, %p831_p11  ;;  %p837_p3 = scmp.lt.u32.totalorder %s835_s11, %s830_s21 }
  0x33   : > { %p839_p4 = scmp.lt.u32.totalorder %s830_s21, %s1047_s8 }
  0x34   : > { %p834_p0 = pneg %p833_p13  ;;  %p838_p6 = por %p837_p3, %p836_p2 }
  0x36   : > { %p840_p1 = por %p839_p4, %p838_p6 }
  0x38   : > { %p841_p5 = pnand %p840_p1, %p834_p0 }
  0x3a   : > { %844 = shalt.err (!%p841_p5)
}
  0x3b   : > { %s845_s12 = scalar_lea.vmem %s1053_s18, 256  ;;  %s919_s9 = smov [#allocation4]  }
  0x3c   : > { %p846_p8 = scmp.ne.s32.totalorder %s1053_s18, %s845_s12  ;;  %s850_s16 = sshll.u32 %s919_s9, 4  ;;  %s851_s16 = int_to_ptr.vmem [resolvable:$false] %s850_s16 }
  0x3d   : > { %s852_s17 = scalar_lea.vmem %s851_s16, 512  ;;  %p853_p11 = scmp.lt.s32.totalorder %s1053_s18, %s851_s16 }
  0x3e   : > { %p848_p9 = pnand %p846_p8, %p832_p12  ;;  %p854_p13 = scmp.lt.s32.totalorder %s852_s17, %s845_s12 }
  0x40   : > { %p849_p10 = pneg %p848_p9  ;;  %p855_p2 = por %p854_p13, %p853_p11 }
  0x42   : > { %p856_p3 = pnand %p855_p2, %p849_p10 }
  0x44   : > { %859 = shalt.err (!%p856_p3)
}
  0x45   : > { %s920_s21 = smov 128   ;;  %s921_s27 = smov 8  }
  0x46   : > { %734 = dma.hbm_to_vmem [thread:$0]  (!%p1049_p7), %s1047_s8, 256, %s1053_s18, %s1055_s20, %s920_s21, %s920_s21, %s921_s27  }
  0x47   : > { %p1151_p12 = scmp.ne.s32.totalorder %s1148_s30, 0 }
  0x48   : > { %p1152_p0 = scmp.ne.s32.totalorder (!%p1151_p12), %s1146_s28, 0 }
  0x49   : > { %301 = sbr.rel (%p1151_p12) target bundleno = 343 (0x157), region = 44 }
  0x50   : > { %885 = dma.done.wait (%p1152_p0), [#allocation3], 1024  }
  0x51   : > { %887 = vsyncadd (%p1152_p0), [#allocation3], 4294966272  ;;  %s307_s7 = sand.u32 1, %s898_s22   ;;  %p1153_p6 = scmp.ne.s32.totalorder %s1147_s29, 0 }
  0x52   : > { %s1090_s11 = sshll.u32 %s307_s7, 4  ;;  %s308_s13 = scalar_lea.sflag [#allocation5], %s307_s7 }
  0x53   : > { %s311_s14 = scalar_lea.vmem [#allocation4], %s1090_s11 }
  0x54   : > { %889 = dma.done.wait (%p1153_p6), %s308_s13, 256  }
  0x55   : > { %891 = vsyncadd (%p1153_p6), %s308_s13, 4294967040  ;;  %s671_s30 = sshll.u32 %s906_s24, 1  ;;  %v922_v0 = vmov 0.0   ;;  %vm923_vm0 = vmmov 0   ;;  %v793_v1 = vld [vmem:[#allocation2] sm:$0xff]   ;;  %v794_v2 = vld [vmem:[#allocation2 + $0x8] sm:$0xff]  }
  0x56   : > { %701 = vmatprep.subr.bf16.mxu0 %v922_v0  ;;  %717 = vmatprep.mubr.msk.bf16.mxu0 %vm923_vm0, %v922_v0  ;;  %p359_p7 = scmp.lt.s32.totalorder %s671_s30, 3  ;;  %v795_v3 = vld [vmem:[#allocation2 + $0x10] sm:$0xff]   ;;  %v796_v4 = vld [vmem:[#allocation2 + $0x18] sm:$0xff]   ;;  %v797_v5 = vld [vmem:[#allocation2 + $0x20] sm:$0xff]   ;;  %vm528_vm1 = vcmask 64512  }
  0x57   : > { %702 = vmatpush3.bf16.msra.mxu0 %v793_v1  ;;  %v798_v6 = vld [vmem:[#allocation2 + $0x28] sm:$0xff]   ;;  %v799_v7 = vld [vmem:[#allocation2 + $0x30] sm:$0xff]   ;;  %v800_v8 = vld [vmem:[#allocation2 + $0x38] sm:$0xff]  }
  0x58   : > { %s1162_s30 = smov (!%p359_p7, %s671_s30), 3  ;;  %703 = vmatprep.subr.bf16.mxu0 %v922_v0  ;;  %v688_v12 = vld [vmem:[%s1137_s2] ss:$0 sm:$0xff]  ;;  %v519_v24 = vld [vmem:[%s311_s14 + $0x8] sm:$0xff] }
  0x59   : > { %s672_s28 = sshll.u32 %s1162_s30, 2  ;;  %s674_s24 = sshll.u32 %s1162_s30, 3  ;;  %v518_v17 = vld [vmem:[%s311_s14] sm:$0xff] }
  0x5a   : > { %s365_s29 = scalar_lea.vmem %s1135_s0, %s672_s28  ;;  %s372_s12 = scalar_lea.vmem %s1138_s3, %s674_s24 }
  0x5b   : > { %704 = vmatpush3.bf16.msra.mxu0 %v794_v2  ;;  %v801_v9 = vld [vmem:[%s365_s29] sm:$0xff]   ;;  %s378_s17 = scalar_lea.vmem %s1139_s4, %s674_s24  ;;  %v502_v14 = vld [vmem:[%s372_s12 + $0x8] sm:$0xff]  ;;  %s385_s30 = scalar_lea.vmem %s1141_s6, %s674_s24 }
  0x5c   : > { %705 = vmatprep.subr.bf16.mxu0 %v922_v0  ;;  %v501_v10 = vld [vmem:[%s372_s12] sm:$0xff]  ;;  %v517_v19 = vld [vmem:[%s378_s17 + $0x8] sm:$0xff] }
  0x5d   : > { %v516_v13 = vld [vmem:[%s378_s17] sm:$0xff]  ;;  %v523_v28 = vsub.f32 1.0, %v517_v19  ;;  %v521_v31 = vmul.f32 %v519_v24, %v517_v19 }
  0x5e   : > { %v522_v21 = vsub.f32 1.0, %v516_v13  ;;  %v520_v26 = vmul.f32 %v518_v17, %v516_v13 }
  0x5f   : > { %706 = vmatpush3.bf16.msra.mxu0 %v795_v3 }
  0x60   : > { %707 = vmatprep.subr.bf16.mxu0 %v922_v0 }
  0x63   : > { %708 = vmatpush3.bf16.msra.mxu0 %v796_v4 }
  0x64   : > { %709 = vmatprep.subr.bf16.mxu0 %v922_v0 }
  0x67   : > { %710 = vmatpush3.bf16.msra.mxu0 %v797_v5 }
  0x68   : > { %711 = vmatprep.subr.bf16.mxu0 %v922_v0 }
  0x6b   : > { %712 = vmatpush3.bf16.msra.mxu0 %v798_v6 }
  0x6c   : > { %713 = vmatprep.subr.bf16.mxu0 %v922_v0 }
  0x6f   : > { %714 = vmatpush3.bf16.msra.mxu0 %v799_v7 }
  0x70   : > { %715 = vmatprep.subr.bf16.mxu0 %v922_v0 }
  0x73   : > { %716 = vmatpush3.bf16.msra.mxu0 %v800_v8 }
  0x76   : > { %718 = vmatmul.mubr.bf16.vlgmr.msra.gmra.mrb[0].mxu0 %v801_v9 }
 0x149   : > { %v494_v11 = vpop.f32.mrb[0].mxu0 }
 0x14a   : > { %v503_v15 = vadd.f32 %v501_v10, %v494_v11  ;;  %v719_v16 = vpop.f32.mrb[1].mxu0 }
 0x14b   : > { %v497_v18 = vpop.f32.mrb[2].mxu0 }
 0x14c   : > { %v512_v20 = vadd.f32 %v688_v12, %v503_v15  ;;  %v504_v22 = vadd.f32 %v502_v14, %v497_v18  ;;  %v720_v23 = vpop.f32.mrb[3].mxu0 }
 0x14e   : > { %v514_v25 = vmax.f32 %v512_v20, 0.0  ;;  %v513_v27 = vadd.f32 %v688_v12, %v504_v22 }
 0x150   : > { %v524_v29 = vmul.f32 %v522_v21, %v514_v25  ;;  %v515_v30 = vmax.f32 %v513_v27, 0.0 }
 0x152   : > { %v526_v32 = vadd.f32 %v524_v29, %v520_v26  ;;  %v525_v33 = vmul.f32 %v523_v28, %v515_v30 }
 0x154   : > { %529 = vst.msk [vmem:[%s385_s30] sm:$0xff] %vm528_vm1, %v526_v32  ;;  %v527_v34 = vadd.f32 %v525_v33, %v521_v31 }
 0x156   : > { %530 = vst.msk [vmem:[%s385_s30 + $0x8] sm:$0xff] %vm528_vm1, %v527_v34 }
 0x157 PF: > { %s20_s26 = sadd.s32 1, %s914_s26   ;;  %s1154_s21 = smov %s898_s22 }
 0x158   : > { %p17_p4 = scmp.ge.s32.totalorder %s20_s26, 4   ;;  %s1155_s22 = smov %s902_s23 }
 0x159   : > { %s1156_s23 = smov %s1042_s15  ;;  %s1157_s24 = smov %s910_s25 }
 0x15a   : > { %s1158_s25 = smov %s1160_s10  ;;  %19 = sbr.rel (!%p17_p4) target bundleno = 5 (0x5), region = 99 }
 0x161   :  { %553 = vsyncpa [#allocation3], 1 }
 0x162   :  { %555 = vsyncpa [#allocation3 + $0x1], 1 }
 0x163   :  { %556 = vsyncpa [#allocation5], 1 }
 0x164   :  { %558 = vsyncpa [#allocation5 + $0x1], 1 }

// kernel: _lambda_.34
= control target key start
LH: loop header
LB: loop body
LE: loop exit
PB: predicated region body
PF: predicated region fallthrough
CT: control target
= control target key end

     0   :  { %s782_s21 = smov 0   ;;  %s784_s22 = smov 0   ;;  %s851_s0 = inlined_call_operand.vmem [shape: bf16[32,128], index: 0, kind: input, shape index: {}]   ;;  %s852_s1 = inlined_call_operand.vmem [shape: bf16[128,128], index: 1, kind: input, shape index: {}]   ;;  %s853_s2 = inlined_call_operand.vmem [shape: f32[1,8], index: 2, kind: input, shape index: {}]   ;;  %s854_s3 = inlined_call_operand.vmem [shape: f32[32,8], index: 3, kind: input, shape index: {}]   ;;  %s855_s4 = inlined_call_operand.vmem [shape: f32[32,8], index: 4, kind: input, shape index: {}]   ;;  %s856_s5 = inlined_call_operand.vmem [shape: f32[32,8], index: 5, kind: input, shape index: {}]   ;;  %s857_s6 = inlined_call_operand.vmem [shape: f32[32,8], index: 6, kind: output, shape index: {}]  }
   0x1   :  { %s786_s23 = smov 0  }
   0x2 LB: > { %s28_s24 = sadd.s32 1, %s739_s22  ;;  %p634_p0 = scmp.ge.s32.totalorder %s743_s23, 1  ;;  %s743_s23 = sphi %s786_s23, %s16_s23   ;;  %s739_s22 = sphi %s784_s22, %s859_s22   ;;  %s735_s21 = sphi %s782_s21, %s858_s21  }
   0x3   : > { %p30_p1 = scmp.ge.s32.totalorder %s28_s24, 2  ;;  %p274_p2 = scmp.lt.s32.totalorder %s743_s23, 3 }
   0x5   : > { %s861_s24 = smov (%p30_p1, %s28_s24), 0  ;;  %p275_p3 = pnand %p634_p0, %p274_p2 }
   0x6   : > { %v712_v0 = vld [vmem:[%s852_s1] sm:$0xff] (!%p275_p3)   ;;  %v745_v1 = vmov (!%p275_p3), 0.0   ;;  %v713_v2 = vld [vmem:[%s852_s1 + $0x8] sm:$0xff] (!%p275_p3)   ;;  %vm746_vm0 = vmmov (!%p275_p3), 0   ;;  %s635_s29 = sshll.u32 (!%p275_p3), %s735_s21, 1  ;;  %v714_v3 = vld [vmem:[%s852_s1 + $0x10] sm:$0xff] (!%p275_p3)  }
   0x7   : > { %278 = sbr.rel (%p275_p3) target bundleno = 264 (0x108), region = 44  ;;  %666 = vmatprep.subr.bf16.mxu0 (!%p275_p3), %v745_v1  ;;  %682 = vmatprep.mubr.msk.bf16.mxu0 (!%p275_p3), %vm746_vm0, %v745_v1  ;;  %p328_p4 = scmp.lt.s32.totalorder (!%p275_p3), %s635_s29, 3  ;;  %v715_v4 = vld [vmem:[%s852_s1 + $0x18] sm:$0xff] (!%p275_p3)   ;;  %v716_v5 = vld [vmem:[%s852_s1 + $0x20] sm:$0xff] (!%p275_p3)   ;;  %v717_v6 = vld [vmem:[%s852_s1 + $0x28] sm:$0xff] (!%p275_p3)   ;;  %vm507_vm1 = vcmask (!%p275_p3), 64512  }
   0x8   : > { %667 = vmatpush3.bf16.msra.mxu0 (!%p275_p3), %v712_v0  ;;  %v718_v7 = vld [vmem:[%s852_s1 + $0x30] sm:$0xff] (!%p275_p3)   ;;  %v719_v8 = vld [vmem:[%s852_s1 + $0x38] sm:$0xff] (!%p275_p3)   ;;  %v654_v12 = vld [vmem:[%s853_s2] ss:$0 sm:$0xff] (!%p275_p3) }
   0x9   : > { %668 = vmatprep.subr.bf16.mxu0 (!%p275_p3), %v745_v1 }
   0xc   : > { %669 = vmatpush3.bf16.msra.mxu0 (!%p275_p3), %v713_v2 }
   0xd   : > { %670 = vmatprep.subr.bf16.mxu0 (!%p275_p3), %v745_v1 }
   0xe   : > { %s863_s29 = smov (!%p328_p4, %s635_s29), 3 }
   0xf   : > { %s636_s8 = sshll.u32 %s863_s29, 2  ;;  %s638_s25 = sshll.u32 %s863_s29, 3 }
  0x10   : > { %s334_s11 = scalar_lea.vmem %s851_s0, %s636_s8  ;;  %671 = vmatpush3.bf16.msra.mxu0 %v714_v3  ;;  %s346_s28 = scalar_lea.vmem %s854_s3, %s638_s25 }
  0x11   : > { %672 = vmatprep.subr.bf16.mxu0 %v745_v1  ;;  %v720_v9 = vld [vmem:[%s334_s11] sm:$0xff]   ;;  %s352_s8 = scalar_lea.vmem %s855_s4, %s638_s25  ;;  %s358_s12 = scalar_lea.vmem %s856_s5, %s638_s25  ;;  %v481_v14 = vld [vmem:[%s346_s28 + $0x8] sm:$0xff] }
  0x12   : > { %v480_v10 = vld [vmem:[%s346_s28] sm:$0xff]  ;;  %v496_v19 = vld [vmem:[%s352_s8 + $0x8] sm:$0xff]  ;;  %s364_s15 = scalar_lea.vmem %s857_s6, %s638_s25 }
  0x13   : > { %v495_v13 = vld [vmem:[%s352_s8] sm:$0xff]  ;;  %v498_v24 = vld [vmem:[%s358_s12 + $0x8] sm:$0xff]  ;;  %v502_v28 = vsub.f32 1.0, %v496_v19 }
  0x14   : > { %673 = vmatpush3.bf16.msra.mxu0 %v715_v4  ;;  %v497_v17 = vld [vmem:[%s358_s12] sm:$0xff]  ;;  %v501_v21 = vsub.f32 1.0, %v495_v13  ;;  %v500_v31 = vmul.f32 %v498_v24, %v496_v19 }
  0x15   : > { %674 = vmatprep.subr.bf16.mxu0 %v745_v1  ;;  %v499_v26 = vmul.f32 %v497_v17, %v495_v13 }
  0x18   : > { %675 = vmatpush3.bf16.msra.mxu0 %v716_v5 }
  0x19   : > { %676 = vmatprep.subr.bf16.mxu0 %v745_v1 }
  0x1c   : > { %677 = vmatpush3.bf16.msra.mxu0 %v717_v6 }
  0x1d   : > { %678 = vmatprep.subr.bf16.mxu0 %v745_v1 }
  0x20   : > { %679 = vmatpush3.bf16.msra.mxu0 %v718_v7 }
  0x21   : > { %680 = vmatprep.subr.bf16.mxu0 %v745_v1 }
  0x24   : > { %681 = vmatpush3.bf16.msra.mxu0 %v719_v8 }
  0x27   : > { %683 = vmatmul.mubr.bf16.vlgmr.msra.gmra.mrb[0].mxu0 %v720_v9 }
  0xfa   : > { %v473_v11 = vpop.f32.mrb[0].mxu0 }
  0xfb   : > { %v482_v15 = vadd.f32 %v480_v10, %v473_v11  ;;  %v684_v16 = vpop.f32.mrb[1].mxu0 }
  0xfc   : > { %v476_v18 = vpop.f32.mrb[2].mxu0 }
  0xfd   : > { %v491_v20 = vadd.f32 %v654_v12, %v482_v15  ;;  %v483_v22 = vadd.f32 %v481_v14, %v476_v18  ;;  %v685_v23 = vpop.f32.mrb[3].mxu0 }
  0xff   : > { %v493_v25 = vmax.f32 %v491_v20, 0.0  ;;  %v492_v27 = vadd.f32 %v654_v12, %v483_v22 }
 0x101   : > { %v503_v29 = vmul.f32 %v501_v21, %v493_v25  ;;  %v494_v30 = vmax.f32 %v492_v27, 0.0 }
 0x103   : > { %v505_v32 = vadd.f32 %v503_v29, %v499_v26  ;;  %v504_v33 = vmul.f32 %v502_v28, %v494_v30 }
 0x105   : > { %508 = vst.msk [vmem:[%s364_s15] sm:$0xff] %vm507_vm1, %v505_v32  ;;  %v506_v34 = vadd.f32 %v504_v33, %v500_v31 }
 0x107   : > { %509 = vst.msk [vmem:[%s364_s15 + $0x8] sm:$0xff] %vm507_vm1, %v506_v34 }
 0x108 PF: > { %s16_s23 = sadd.s32 1, %s743_s23   ;;  %s858_s21 = smov %s739_s22 }
 0x109   : > { %p13_p5 = scmp.ge.s32.totalorder %s16_s23, 4   ;;  %s859_s22 = smov %s861_s24 }
 0x10b   :  { %15 = sbr.rel (!%p13_p5) target bundleno = 2 (0x2), region = 86 }

// kernel: _lambda_.35
= control target key start
LH: loop header
LB: loop body
LE: loop exit
PB: predicated region body
PF: predicated region fallthrough
CT: control target
= control target key end

     0   :  { %s654_s15 = smov 0   ;;  %s656_s16 = smov 0   ;;  %s721_s0 = inlined_call_operand.vmem [shape: bf16[32,128], index: 0, kind: input, shape index: {}]   ;;  %s722_s1 = inlined_call_operand.vmem [shape: bf16[128,128], index: 1, kind: input, shape index: {}]   ;;  %s723_s2 = inlined_call_operand.vmem [shape: f32[1,16], index: 2, kind: input, shape index: {}]   ;;  %s724_s3 = inlined_call_operand.vmem [shape: f32[32,16], index: 3, kind: input, shape index: {}]   ;;  %s725_s4 = inlined_call_operand.vmem [shape: f32[32,16], index: 4, kind: output, shape index: {}]  }
   0x1   :  { %s658_s17 = smov 0  }
   0x2 LB: > { %s26_s18 = sadd.s32 1, %s621_s16  ;;  %p510_p0 = scmp.ge.s32.totalorder %s625_s17, 1  ;;  %s625_s17 = sphi %s658_s17, %s14_s17   ;;  %s621_s16 = sphi %s656_s16, %s727_s16   ;;  %s617_s15 = sphi %s654_s15, %s726_s15  }
   0x3   : > { %p28_p1 = scmp.ge.s32.totalorder %s26_s18, 2  ;;  %p202_p2 = scmp.lt.s32.totalorder %s625_s17, 3 }
   0x5   : > { %s729_s18 = smov (%p28_p1, %s26_s18), 0  ;;  %p203_p3 = pnand %p510_p0, %p202_p2 }
   0x6   : > { %v586_v0 = vld [vmem:[%s722_s1] sm:$0xff] (!%p203_p3)   ;;  %v627_v1 = vmov (!%p203_p3), 0.0   ;;  %v587_v2 = vld [vmem:[%s722_s1 + $0x8] sm:$0xff] (!%p203_p3)   ;;  %vm628_vm0 = vmmov (!%p203_p3), 0   ;;  %s511_s23 = sshll.u32 (!%p203_p3), %s617_s15, 1  ;;  %v588_v3 = vld [vmem:[%s722_s1 + $0x10] sm:$0xff] (!%p203_p3)  }
   0x7   : > { %206 = sbr.rel (%p203_p3) target bundleno = 284 (0x11c), region = 36  ;;  %540 = vmatprep.subr.bf16.mxu0 (!%p203_p3), %v627_v1  ;;  %556 = vmatprep.mubr.msk.bf16.mxu0 (!%p203_p3), %vm628_vm0, %v627_v1  ;;  %p242_p4 = scmp.lt.s32.totalorder (!%p203_p3), %s511_s23, 3  ;;  %v589_v4 = vld [vmem:[%s722_s1 + $0x18] sm:$0xff] (!%p203_p3)   ;;  %v590_v5 = vld [vmem:[%s722_s1 + $0x20] sm:$0xff] (!%p203_p3)   ;;  %v591_v6 = vld [vmem:[%s722_s1 + $0x28] sm:$0xff] (!%p203_p3)   ;;  %vm407_vm1 = vcmask (!%p203_p3), 130048  }
   0x8   : > { %541 = vmatpush3.bf16.msra.mxu0 (!%p203_p3), %v586_v0  ;;  %v592_v7 = vld [vmem:[%s722_s1 + $0x30] sm:$0xff] (!%p203_p3)   ;;  %v593_v8 = vld [vmem:[%s722_s1 + $0x38] sm:$0xff] (!%p203_p3)   ;;  %v526_v12 = vld [vmem:[%s723_s2] ss:$0 sm:$0xff] (!%p203_p3) }
   0x9   : > { %542 = vmatprep.subr.bf16.mxu0 (!%p203_p3), %v627_v1 }
   0xc   : > { %543 = vmatpush3.bf16.msra.mxu0 (!%p203_p3), %v587_v2 }
   0xd   : > { %544 = vmatprep.subr.bf16.mxu0 (!%p203_p3), %v627_v1 }
   0xe   : > { %s731_s23 = smov (!%p242_p4, %s511_s23), 3 }
   0xf   : > { %s512_s26 = sshll.u32 %s731_s23, 2  ;;  %s514_s14 = sshll.u32 %s731_s23, 3 }
  0x10   : > { %s248_s29 = scalar_lea.vmem %s721_s0, %s512_s26  ;;  %545 = vmatpush3.bf16.msra.mxu0 %v588_v3  ;;  %s260_s20 = scalar_lea.vmem %s724_s3, %s514_s14 }
  0x11   : > { %546 = vmatprep.subr.bf16.mxu0 %v627_v1  ;;  %v594_v9 = vld [vmem:[%s248_s29] sm:$0xff]   ;;  %v383_v13 = vld [vmem:[%s260_s20 + $0x8] sm:$0xff]  ;;  %s266_s25 = scalar_lea.vmem %s725_s4, %s514_s14 }
  0x12   : > { %v382_v10 = vld [vmem:[%s260_s20] sm:$0xff] }
  0x14   : > { %547 = vmatpush3.bf16.msra.mxu0 %v589_v4 }
  0x15   : > { %548 = vmatprep.subr.bf16.mxu0 %v627_v1 }
  0x18   : > { %549 = vmatpush3.bf16.msra.mxu0 %v590_v5 }
  0x19   : > { %550 = vmatprep.subr.bf16.mxu0 %v627_v1 }
  0x1c   : > { %551 = vmatpush3.bf16.msra.mxu0 %v591_v6 }
  0x1d   : > { %552 = vmatprep.subr.bf16.mxu0 %v627_v1 }
  0x20   : > { %553 = vmatpush3.bf16.msra.mxu0 %v592_v7 }
  0x21   : > { %554 = vmatprep.subr.bf16.mxu0 %v627_v1 }
  0x24   : > { %555 = vmatpush3.bf16.msra.mxu0 %v593_v8 }
  0x27   : > { %557 = vmatmul.mubr.bf16.vlgmr.msra.gmra.mrb[0].mxu0 %v594_v9 }
  0xfa   : > { %v375_v11 = vpop.f32.mrb[0].mxu0 }
  0xfb   : > { %v384_v14 = vadd.f32 %v382_v10, %v375_v11  ;;  %v558_v15 = vpop.f32.mrb[1].mxu0 }
  0xfc   : > { %v378_v16 = vpop.f32.mrb[2].mxu0 }
  0xfd   : > { %v393_v17 = vadd.f32 %v526_v12, %v384_v14  ;;  %v385_v18 = vadd.f32 %v383_v13, %v378_v16  ;;  %v559_v19 = vpop.f32.mrb[3].mxu0 }
  0xff   : > { %v527_v20 = vmul.f32 -1.442695, %v393_v17  ;;  %v394_v21 = vadd.f32 %v526_v12, %v385_v18 }
 0x101   : > { %595 = vpow2.f32 %v527_v20  ;;  %v528_v22 = vmul.f32 -1.442695, %v394_v21 }
 0x103   : > { %597 = vpow2.f32 %v528_v22 }
 0x10b   : > { %v596_v23 = vpop.eup %595 }
 0x10c   : > { %v401_v24 = vadd.f32 1.0, %v596_v23 }
 0x10d   : > { %v598_v25 = vpop.eup %597 }
 0x10e   : > { %599 = vrcp.f32 %v401_v24  ;;  %v402_v26 = vadd.f32 1.0, %v598_v25 }
 0x110   : > { %601 = vrcp.f32 %v402_v26 }
 0x118   : > { %v600_v27 = vpop.eup %599 }
 0x119   : > { %408 = vst.msk [vmem:[%s266_s25] sm:$0xff] %vm407_vm1, %v600_v27 }
 0x11a   : > { %v602_v28 = vpop.eup %601 }
 0x11b   : > { %409 = vst.msk [vmem:[%s266_s25 + $0x8] sm:$0xff] %vm407_vm1, %v602_v28 }
 0x11c PF: > { %s14_s17 = sadd.s32 1, %s625_s17   ;;  %s726_s15 = smov %s621_s16 }
 0x11d   : > { %p11_p5 = scmp.ge.s32.totalorder %s14_s17, 4   ;;  %s727_s16 = smov %s729_s18 }
 0x11f   :  { %13 = sbr.rel (!%p11_p5) target bundleno = 2 (0x2), region = 72 }

// kernel: _lambda_.37
= control target key start
LH: loop header
LB: loop body
LE: loop exit
PB: predicated region body
PF: predicated region fallthrough
CT: control target
= control target key end

     0   :  { %s579_s12 = smov 0   ;;  %s581_s13 = smov 0   ;;  %s643_s0 = inlined_call_operand.vmem [shape: bf16[96,128], index: 0, kind: input, shape index: {}]   ;;  %s644_s1 = inlined_call_operand.vmem [shape: bf16[128,128], index: 1, kind: input, shape index: {}]   ;;  %s645_s2 = inlined_call_operand.vmem [shape: f32[1,16], index: 2, kind: input, shape index: {}]   ;;  %s646_s3 = inlined_call_operand.vmem [shape: f32[96,16], index: 3, kind: output, shape index: {}]  }
   0x1   :  { %s583_s14 = smov 0  }
   0x2 LB: > { %s25_s15 = sadd.s32 1, %s553_s13  ;;  %p453_p0 = scmp.ge.s32.totalorder %s557_s14, 1  ;;  %s557_s14 = sphi %s583_s14, %s13_s14   ;;  %s553_s13 = sphi %s581_s13, %s648_s13   ;;  %s549_s12 = sphi %s579_s12, %s647_s12  }
   0x3   : > { %p27_p1 = scmp.ge.s32.totalorder %s25_s15, 3  ;;  %p166_p2 = scmp.lt.s32.totalorder %s557_s14, 4 }
   0x5   : > { %s650_s15 = smov (%p27_p1, %s25_s15), 0  ;;  %p167_p3 = pnand %p453_p0, %p166_p2 }
   0x6   : > { %v525_v0 = vld [vmem:[%s644_s1] sm:$0xff] (!%p167_p3)   ;;  %s454_s18 = sshll.u32 (!%p167_p3), %s549_s12, 2  ;;  %v526_v1 = vld [vmem:[%s644_s1 + $0x8] sm:$0xff] (!%p167_p3)   ;;  %v527_v2 = vld [vmem:[%s644_s1 + $0x10] sm:$0xff] (!%p167_p3)   ;;  %vm360_vm0 = vcmask (!%p167_p3), 130048  }
   0x7   : > { %170 = sbr.rel (%p167_p3) target bundleno = 257 (0x101), region = 32  ;;  %p199_p4 = scmp.lt.s32.totalorder (!%p167_p3), %s454_s18, 11  ;;  %481 = vmatprep.subr.bf16.mxu0 (!%p167_p3), %v525_v0  ;;  %v528_v3 = vld [vmem:[%s644_s1 + $0x18] sm:$0xff] (!%p167_p3)   ;;  %v529_v5 = vld [vmem:[%s644_s1 + $0x20] sm:$0xff] (!%p167_p3)   ;;  %v530_v6 = vld [vmem:[%s644_s1 + $0x28] sm:$0xff] (!%p167_p3)  }
   0x8   : > { %482 = vmatpush3.bf16.msra.mxu0 (!%p167_p3), %v525_v0  ;;  %v531_v7 = vld [vmem:[%s644_s1 + $0x30] sm:$0xff] (!%p167_p3)   ;;  %v532_v8 = vld [vmem:[%s644_s1 + $0x38] sm:$0xff] (!%p167_p3)   ;;  %v468_v10 = vld [vmem:[%s645_s2] ss:$0 sm:$0xff] (!%p167_p3) }
   0x9   : > { %483 = vmatprep.subr.bf16.mxu0 (!%p167_p3), %v526_v1 }
   0xc   : > { %484 = vmatpush3.bf16.msra.mxu0 (!%p167_p3), %v526_v1 }
   0xd   : > { %485 = vmatprep.subr.bf16.mxu0 (!%p167_p3), %v527_v2 }
   0xe   : > { %s652_s18 = smov (!%p199_p4, %s454_s18), 11 }
   0xf   : > { %s455_s23 = sshll.u32 %s652_s18, 2  ;;  %s457_s10 = sshll.u32 %s652_s18, 3 }
  0x10   : > { %s205_s26 = scalar_lea.vmem %s643_s0, %s455_s23  ;;  %486 = vmatpush3.bf16.msra.mxu0 %v527_v2  ;;  %s217_s19 = scalar_lea.vmem %s646_s3, %s457_s10 }
  0x11   : > { %v533_v4 = vld [vmem:[%s205_s26] sm:$0xff]   ;;  %487 = vmatprep.subr.bf16.mxu0 %v528_v3  ;;  %v534_v9 = vld [vmem:[%s205_s26 + $0x8] sm:$0xff]  }
  0x12   : > { %497 = vmatprep.mubr.bf16.mxu0 %v533_v4 }
  0x14   : > { %488 = vmatpush3.bf16.msra.mxu0 %v528_v3 }
  0x15   : > { %489 = vmatprep.subr.bf16.mxu0 %v529_v5 }
  0x18   : > { %490 = vmatpush3.bf16.msra.mxu0 %v529_v5 }
  0x19   : > { %491 = vmatprep.subr.bf16.mxu0 %v530_v6 }
  0x1c   : > { %492 = vmatpush3.bf16.msra.mxu0 %v530_v6 }
  0x1d   : > { %493 = vmatprep.subr.bf16.mxu0 %v531_v7 }
  0x20   : > { %494 = vmatpush3.bf16.msra.mxu0 %v531_v7 }
  0x21   : > { %495 = vmatprep.subr.bf16.mxu0 %v532_v8 }
  0x24   : > { %496 = vmatpush3.bf16.msra.mxu0 %v532_v8 }
  0x27   : > { %498 = vmatmul.mubr.bf16.vlgmr.msra.gmra.mrb[0].mxu0 %v534_v9 }
  0xfa   : > { %v499_v11 = vpop.f32.mrb[0].mxu0 }
  0xfb   : > { %v358_v12 = vadd.f32 %v499_v11, %v468_v10  ;;  %v334_v13 = vpop.f32.mrb[1].mxu0 }
  0xfc   : > { %v356_v14 = vadd.f32 %v468_v10, %v334_v13  ;;  %v500_v15 = vpop.f32.mrb[2].mxu0 }
  0xfd   : > { %363 = vst.msk [vmem:[%s217_s19 + $0x10] sm:$0xff] %vm360_vm0, %v358_v12  ;;  %v359_v16 = vadd.f32 %v500_v15, %v468_v10  ;;  %v337_v17 = vpop.f32.mrb[3].mxu0 }
  0xfe   : > { %361 = vst.msk [vmem:[%s217_s19] sm:$0xff] %vm360_vm0, %v356_v14  ;;  %v357_v18 = vadd.f32 %v468_v10, %v337_v17 }
  0xff   : > { %364 = vst.msk [vmem:[%s217_s19 + $0x18] sm:$0xff] %vm360_vm0, %v359_v16 }
 0x100   : > { %362 = vst.msk [vmem:[%s217_s19 + $0x8] sm:$0xff] %vm360_vm0, %v357_v18 }
 0x101 PF: > { %s13_s14 = sadd.s32 1, %s557_s14   ;;  %s647_s12 = smov %s553_s13 }
 0x102   : > { %p10_p5 = scmp.ge.s32.totalorder %s13_s14, 5   ;;  %s648_s13 = smov %s650_s15 }
 0x104   :  { %12 = sbr.rel (!%p10_p5) target bundleno = 2 (0x2), region = 65 }

// kernel: _lambda_.38
= control target key start
LH: loop header
LB: loop body
LE: loop exit
PB: predicated region body
PF: predicated region fallthrough
CT: control target
= control target key end

     0   :  { %s724_s12 = smov 0   ;;  %s726_s13 = smov 0   ;;  %s812_s0 = inlined_call_operand.vmem [shape: bf16[96,256], index: 0, kind: input, shape index: {}]   ;;  %s813_s1 = inlined_call_operand.vmem [shape: bf16[256,128], index: 1, kind: input, shape index: {}]   ;;  %s814_s2 = inlined_call_operand.vmem [shape: f32[1,16], index: 2, kind: input, shape index: {}]   ;;  %s815_s3 = inlined_call_operand.vmem [shape: bf16[96,16], index: 3, kind: output, shape index: {}]  }
   0x1   :  { %s728_s14 = smov 0  }
   0x2 LB: > { %s25_s15 = sadd.s32 1, %s697_s13  ;;  %p556_p0 = scmp.ge.s32.totalorder %s701_s14, 1  ;;  %s701_s14 = sphi %s728_s14, %s13_s14   ;;  %s697_s13 = sphi %s726_s13, %s817_s13   ;;  %s693_s12 = sphi %s724_s12, %s816_s12  }
   0x3   : > { %p27_p1 = scmp.ge.s32.totalorder %s25_s15, 3  ;;  %p169_p2 = scmp.lt.s32.totalorder %s701_s14, 4 }
   0x5   : > { %s819_s15 = smov (%p27_p1, %s25_s15), 0  ;;  %p170_p3 = pnand %p556_p0, %p169_p2 }
   0x6   : > { %v663_v0 = vld [vmem:[%s813_s1 + $0x40] sm:$0xff] (!%p170_p3)   ;;  %s557_s18 = sshll.u32 (!%p170_p3), %s693_s12, 2  ;;  %v665_v2 = vld [vmem:[%s813_s1 + $0x48] sm:$0xff] (!%p170_p3)   ;;  %v667_v4 = vld [vmem:[%s813_s1 + $0x50] sm:$0xff] (!%p170_p3)   ;;  %v703_v14 = vmov (!%p170_p3), 0   ;;  %vm460_vm0 = vcmask (!%p170_p3), 125952  }
   0x7   : > { %173 = sbr.rel (%p170_p3) target bundleno = 261 (0x105), region = 32  ;;  %v664_v1 = vld [vmem:[%s813_s1] sm:$0xff] (!%p170_p3)   ;;  %594 = vmatprep.subr.bf16.mxu0 (!%p170_p3), %v663_v0  ;;  %622 = vmatprep.subr.bf16.mxu1 (!%p170_p3), %v663_v0  ;;  %p205_p4 = scmp.lt.s32.totalorder (!%p170_p3), %s557_s18, 11  ;;  %v666_v3 = vld [vmem:[%s813_s1 + $0x8] sm:$0xff] (!%p170_p3)   ;;  %v668_v5 = vld [vmem:[%s813_s1 + $0x10] sm:$0xff] (!%p170_p3)  }
   0x8   : > { %595 = vmatpush3.bf16.msra.mxu0 (!%p170_p3), %v664_v1  ;;  %630 = vmatpush3.bf16.msra.mxu1 (!%p170_p3), %v664_v1  ;;  %v669_v6 = vld [vmem:[%s813_s1 + $0x58] sm:$0xff] (!%p170_p3)   ;;  %v671_v8 = vld [vmem:[%s813_s1 + $0x60] sm:$0xff] (!%p170_p3)   ;;  %v673_v10 = vld [vmem:[%s813_s1 + $0x68] sm:$0xff] (!%p170_p3)  }
   0x9   : > { %596 = vmatprep.subr.bf16.mxu0 (!%p170_p3), %v665_v2  ;;  %623 = vmatprep.subr.bf16.mxu1 (!%p170_p3), %v665_v2  ;;  %v670_v7 = vld [vmem:[%s813_s1 + $0x18] sm:$0xff] (!%p170_p3)   ;;  %v672_v9 = vld [vmem:[%s813_s1 + $0x20] sm:$0xff] (!%p170_p3)   ;;  %v674_v20 = vld [vmem:[%s813_s1 + $0x28] sm:$0xff] (!%p170_p3)  }
   0xa   : > { %v675_v22 = vld [vmem:[%s813_s1 + $0x70] sm:$0xff] (!%p170_p3)   ;;  %v677_v25 = vld [vmem:[%s813_s1 + $0x78] sm:$0xff] (!%p170_p3)   ;;  %v582_v32 = vld [vmem:[%s814_s2] ss:$0 sm:$0xff] (!%p170_p3) }
   0xb   : > { %v676_v24 = vld [vmem:[%s813_s1 + $0x30] sm:$0xff] (!%p170_p3)   ;;  %v678_v26 = vld [vmem:[%s813_s1 + $0x38] sm:$0xff] (!%p170_p3)  }
   0xc   : > { %597 = vmatpush3.bf16.msra.mxu0 (!%p170_p3), %v666_v3  ;;  %631 = vmatpush3.bf16.msra.mxu1 (!%p170_p3), %v666_v3 }
   0xd   : > { %598 = vmatprep.subr.bf16.mxu0 (!%p170_p3), %v667_v4  ;;  %624 = vmatprep.subr.bf16.mxu1 (!%p170_p3), %v667_v4 }
   0xe   : > { %s821_s18 = smov (!%p205_p4, %s557_s18), 11 }
   0xf   : > { %s589_s4 = sshll.u32 %s821_s18, 3  ;;  %s561_s5 = sshll.u32 %s821_s18, 2 }
  0x10   : > { %599 = vmatpush3.bf16.msra.mxu0 %v668_v5  ;;  %632 = vmatpush3.bf16.msra.mxu1 %v668_v5  ;;  %s212_s11 = scalar_lea.vmem %s812_s0, %s589_s4  ;;  %s225_s8 = scalar_lea.vmem %s815_s3, %s561_s5 }
  0x11   : > { %600 = vmatprep.subr.bf16.mxu0 %v669_v6  ;;  %625 = vmatprep.subr.bf16.mxu1 %v669_v6  ;;  %v228_v11 = vld [vmem:[%s212_s11] sm:$0xff]  ;;  %v229_v12 = vld [vmem:[%s212_s11 + $0x8] sm:$0xff]  ;;  %v230_v13 = vld [vmem:[%s212_s11 + $0x10] sm:$0xff] }
  0x12   : > { %v232_v15 = vmax.bf16 %v703_v14, %v228_v11  ;;  %v233_v16 = vmax.bf16 %v703_v14, %v229_v12  ;;  %v231_v17 = vld [vmem:[%s212_s11 + $0x18] sm:$0xff]  ;;  %v234_v18 = vmax.bf16 %v703_v14, %v230_v13 }
  0x13   : > { %v235_v19 = vmax.bf16 %v703_v14, %v231_v17 }
  0x14   : > { %601 = vmatpush3.bf16.msra.mxu0 %v670_v7  ;;  %633 = vmatpush3.bf16.msra.mxu1 %v670_v7  ;;  %v563_v21 = vcombine.high %v232_v15, %v233_v16  ;;  %v562_v27 = vcombine.low %v232_v15, %v233_v16 }
  0x15   : > { %602 = vmatprep.subr.bf16.mxu0 %v671_v8  ;;  %626 = vmatprep.subr.bf16.mxu1 %v671_v8  ;;  %v565_v23 = vcombine.high %v234_v18, %v235_v19  ;;  %v564_v28 = vcombine.low %v234_v18, %v235_v19 }
  0x16   : > { %416 = vmatprep.mubr.bf16.mxu0 %v563_v21 }
  0x17   : > { %424 = vmatprep.mubr.bf16.mxu1 %v565_v23 }
  0x18   : > { %603 = vmatpush3.bf16.msra.mxu0 %v672_v9  ;;  %634 = vmatpush3.bf16.msra.mxu1 %v672_v9 }
  0x19   : > { %604 = vmatprep.subr.bf16.mxu0 %v673_v10  ;;  %627 = vmatprep.subr.bf16.mxu1 %v673_v10 }
  0x1c   : > { %605 = vmatpush3.bf16.msra.mxu0 %v674_v20  ;;  %635 = vmatpush3.bf16.msra.mxu1 %v674_v20 }
  0x1d   : > { %606 = vmatprep.subr.bf16.mxu0 %v675_v22  ;;  %628 = vmatprep.subr.bf16.mxu1 %v675_v22 }
  0x20   : > { %607 = vmatpush3.bf16.msra.mxu0 %v676_v24  ;;  %636 = vmatpush3.bf16.msra.mxu1 %v676_v24 }
  0x21   : > { %608 = vmatprep.subr.bf16.mxu0 %v677_v25  ;;  %629 = vmatprep.subr.bf16.mxu1 %v677_v25 }
  0x24   : > { %609 = vmatpush3.bf16.msra.mxu0 %v678_v26  ;;  %637 = vmatpush3.bf16.msra.mxu1 %v678_v26 }
  0x27   : > { %417 = vmatmul.mubr.bf16.vlgmr.msra.gmra.mrb[0].mxu0 %v562_v27  ;;  %425 = vmatmul.mubr.bf16.vlgmr.msra.gmra.mrb[0].mxu1 %v564_v28 }
  0xfa   : > { %v610_v29 = vpop.f32.mrb[0].mxu0  ;;  %v616_v30 = vpop.f32.mrb[0].mxu1 }
  0xfb   : > { %v611_v31 = vpop.f32.mrb[1].mxu0  ;;  %v617_v33 = vpop.f32.mrb[1].mxu1 }
  0xfc   : > { %v612_v34 = vadd.f32 %v611_v31, %v610_v29  ;;  %v618_v35 = vadd.f32 %v617_v33, %v616_v30  ;;  %v613_v36 = vpop.f32.mrb[2].mxu0  ;;  %v619_v37 = vpop.f32.mrb[2].mxu1 }
  0xfd   : > { %v614_v38 = vpop.f32.mrb[3].mxu0  ;;  %v620_v39 = vpop.f32.mrb[3].mxu1 }
  0xfe   : > { %v440_v40 = vadd.f32 %v612_v34, %v582_v32  ;;  %v442_v41 = vadd.f32 %v618_v35, %v582_v32  ;;  %v615_v42 = vadd.f32 %v614_v38, %v613_v36  ;;  %v621_v43 = vadd.f32 %v620_v39, %v619_v37 }
 0x100   : > { %v590_v44 = vpack.c.bf16 %v440_v40, %v440_v40  ;;  %v592_v45 = vpack.c.bf16 %v442_v41, %v442_v41  ;;  %v441_v46 = vadd.f32 %v615_v42, %v582_v32  ;;  %v443_v47 = vadd.f32 %v621_v43, %v582_v32 }
 0x102   : > { %461 = vst.msk [vmem:[%s225_s8] sm:$0xf] %vm460_vm0, %v590_v44  ;;  %463 = vst.msk [vmem:[%s225_s8 + $0x8] sm:$0xf] %vm460_vm0, %v592_v45  ;;  %v591_v48 = vpack.c.bf16 %v441_v46, %v441_v46  ;;  %v593_v49 = vpack.c.bf16 %v443_v47, %v443_v47 }
 0x104   : > { %462 = vst.msk [vmem:[%s225_s8 + $0x4] sm:$0xf] %vm460_vm0, %v591_v48  ;;  %464 = vst.msk [vmem:[%s225_s8 + $0xc] sm:$0xf] %vm460_vm0, %v593_v49 }
 0x105 PF: > { %s13_s14 = sadd.s32 1, %s701_s14   ;;  %s816_s12 = smov %s697_s13 }
 0x106   : > { %p10_p5 = scmp.ge.s32.totalorder %s13_s14, 5   ;;  %s817_s13 = smov %s819_s15 }
 0x108   :  { %12 = sbr.rel (!%p10_p5) target bundleno = 2 (0x2), region = 65 }

// kernel: _lambda_.39
= control target key start
LH: loop header
LB: loop body
LE: loop exit
PB: predicated region body
PF: predicated region fallthrough
CT: control target
= control target key end

     0   :  { %s800_s15 = smov 0   ;;  %s802_s16 = smov 0   ;;  %s895_s0 = inlined_call_operand.vmem [shape: bf16[96,256], index: 0, kind: input, shape index: {}]   ;;  %s896_s1 = inlined_call_operand.vmem [shape: bf16[256,128], index: 1, kind: input, shape index: {}]   ;;  %s897_s2 = inlined_call_operand.vmem [shape: f32[1,16], index: 2, kind: input, shape index: {}]   ;;  %s898_s3 = inlined_call_operand.vmem [shape: f32[96,16], index: 3, kind: input, shape index: {}]   ;;  %s899_s4 = inlined_call_operand.vmem [shape: bf16[96,16], index: 4, kind: output, shape index: {}]  }
   0x1   :  { %s804_s17 = smov 0  }
   0x2 LB: > { %s26_s18 = sadd.s32 1, %s768_s16  ;;  %p625_p0 = scmp.ge.s32.totalorder %s772_s17, 1  ;;  %s772_s17 = sphi %s804_s17, %s14_s17   ;;  %s768_s16 = sphi %s802_s16, %s901_s16   ;;  %s764_s15 = sphi %s800_s15, %s900_s15  }
   0x3   : > { %p28_p1 = scmp.ge.s32.totalorder %s26_s18, 3  ;;  %p205_p2 = scmp.lt.s32.totalorder %s772_s17, 4 }
   0x5   : > { %s903_s18 = smov (%p28_p1, %s26_s18), 0  ;;  %p206_p3 = pnand %p625_p0, %p205_p2 }
   0x6   : > { %v734_v0 = vld [vmem:[%s896_s1 + $0x40] sm:$0xff] (!%p206_p3)   ;;  %s626_s21 = sshll.u32 (!%p206_p3), %s764_s15, 2  ;;  %v736_v2 = vld [vmem:[%s896_s1 + $0x48] sm:$0xff] (!%p206_p3)   ;;  %v738_v4 = vld [vmem:[%s896_s1 + $0x50] sm:$0xff] (!%p206_p3)   ;;  %v774_v14 = vmov (!%p206_p3), 0   ;;  %vm517_vm0 = vcmask (!%p206_p3), 125952  }
   0x7   : > { %209 = sbr.rel (%p206_p3) target bundleno = 263 (0x107), region = 36  ;;  %v735_v1 = vld [vmem:[%s896_s1] sm:$0xff] (!%p206_p3)   ;;  %665 = vmatprep.subr.bf16.mxu0 (!%p206_p3), %v734_v0  ;;  %693 = vmatprep.subr.bf16.mxu1 (!%p206_p3), %v734_v0  ;;  %p248_p4 = scmp.lt.s32.totalorder (!%p206_p3), %s626_s21, 11  ;;  %v737_v3 = vld [vmem:[%s896_s1 + $0x8] sm:$0xff] (!%p206_p3)   ;;  %v739_v5 = vld [vmem:[%s896_s1 + $0x10] sm:$0xff] (!%p206_p3)  }
   0x8   : > { %666 = vmatpush3.bf16.msra.mxu0 (!%p206_p3), %v735_v1  ;;  %701 = vmatpush3.bf16.msra.mxu1 (!%p206_p3), %v735_v1  ;;  %v740_v6 = vld [vmem:[%s896_s1 + $0x58] sm:$0xff] (!%p206_p3)   ;;  %v742_v8 = vld [vmem:[%s896_s1 + $0x60] sm:$0xff] (!%p206_p3)   ;;  %v744_v10 = vld [vmem:[%s896_s1 + $0x68] sm:$0xff] (!%p206_p3)  }
   0x9   : > { %667 = vmatprep.subr.bf16.mxu0 (!%p206_p3), %v736_v2  ;;  %694 = vmatprep.subr.bf16.mxu1 (!%p206_p3), %v736_v2  ;;  %v741_v7 = vld [vmem:[%s896_s1 + $0x18] sm:$0xff] (!%p206_p3)   ;;  %v743_v9 = vld [vmem:[%s896_s1 + $0x20] sm:$0xff] (!%p206_p3)   ;;  %v745_v20 = vld [vmem:[%s896_s1 + $0x28] sm:$0xff] (!%p206_p3)  }
   0xa   : > { %v746_v22 = vld [vmem:[%s896_s1 + $0x70] sm:$0xff] (!%p206_p3)   ;;  %v748_v25 = vld [vmem:[%s896_s1 + $0x78] sm:$0xff] (!%p206_p3)   ;;  %v653_v32 = vld [vmem:[%s897_s2] ss:$0 sm:$0xff] (!%p206_p3) }
   0xb   : > { %v747_v24 = vld [vmem:[%s896_s1 + $0x30] sm:$0xff] (!%p206_p3)   ;;  %v749_v26 = vld [vmem:[%s896_s1 + $0x38] sm:$0xff] (!%p206_p3)  }
   0xc   : > { %668 = vmatpush3.bf16.msra.mxu0 (!%p206_p3), %v737_v3  ;;  %702 = vmatpush3.bf16.msra.mxu1 (!%p206_p3), %v737_v3 }
   0xd   : > { %669 = vmatprep.subr.bf16.mxu0 (!%p206_p3), %v738_v4  ;;  %695 = vmatprep.subr.bf16.mxu1 (!%p206_p3), %v738_v4 }
   0xe   : > { %s905_s21 = smov (!%p248_p4, %s626_s21), 11 }
   0xf   : > { %s660_s8 = sshll.u32 %s905_s21, 3  ;;  %s632_s14 = sshll.u32 %s905_s21, 2 }
  0x10   : > { %670 = vmatpush3.bf16.msra.mxu0 %v739_v5  ;;  %703 = vmatpush3.bf16.msra.mxu1 %v739_v5  ;;  %s255_s15 = scalar_lea.vmem %s895_s0, %s660_s8  ;;  %s268_s11 = scalar_lea.vmem %s898_s3, %s660_s8 }
  0x11   : > { %671 = vmatprep.subr.bf16.mxu0 %v740_v6  ;;  %696 = vmatprep.subr.bf16.mxu1 %v740_v6  ;;  %v277_v11 = vld [vmem:[%s255_s15] sm:$0xff]  ;;  %v278_v12 = vld [vmem:[%s255_s15 + $0x8] sm:$0xff]  ;;  %v279_v13 = vld [vmem:[%s255_s15 + $0x10] sm:$0xff]  ;;  %s274_s19 = scalar_lea.vmem %s899_s4, %s632_s14 }
  0x12   : > { %v281_v15 = vmax.bf16 %v774_v14, %v277_v11  ;;  %v282_v16 = vmax.bf16 %v774_v14, %v278_v12  ;;  %v280_v17 = vld [vmem:[%s255_s15 + $0x18] sm:$0xff]  ;;  %v283_v18 = vmax.bf16 %v774_v14, %v279_v13  ;;  %v493_v38 = vld [vmem:[%s268_s11] sm:$0xff]  ;;  %v495_v39 = vld [vmem:[%s268_s11 + $0x10] sm:$0xff] }
  0x13   : > { %v284_v19 = vmax.bf16 %v774_v14, %v280_v17  ;;  %v494_v46 = vld [vmem:[%s268_s11 + $0x8] sm:$0xff]  ;;  %v496_v47 = vld [vmem:[%s268_s11 + $0x18] sm:$0xff] }
  0x14   : > { %672 = vmatpush3.bf16.msra.mxu0 %v741_v7  ;;  %704 = vmatpush3.bf16.msra.mxu1 %v741_v7  ;;  %v634_v21 = vcombine.high %v281_v15, %v282_v16  ;;  %v633_v27 = vcombine.low %v281_v15, %v282_v16 }
  0x15   : > { %673 = vmatprep.subr.bf16.mxu0 %v742_v8  ;;  %697 = vmatprep.subr.bf16.mxu1 %v742_v8  ;;  %v636_v23 = vcombine.high %v283_v18, %v284_v19  ;;  %v635_v28 = vcombine.low %v283_v18, %v284_v19 }
  0x16   : > { %465 = vmatprep.mubr.bf16.mxu0 %v634_v21 }
  0x17   : > { %473 = vmatprep.mubr.bf16.mxu1 %v636_v23 }
  0x18   : > { %674 = vmatpush3.bf16.msra.mxu0 %v743_v9  ;;  %705 = vmatpush3.bf16.msra.mxu1 %v743_v9 }
  0x19   : > { %675 = vmatprep.subr.bf16.mxu0 %v744_v10  ;;  %698 = vmatprep.subr.bf16.mxu1 %v744_v10 }
  0x1c   : > { %676 = vmatpush3.bf16.msra.mxu0 %v745_v20  ;;  %706 = vmatpush3.bf16.msra.mxu1 %v745_v20 }
  0x1d   : > { %677 = vmatprep.subr.bf16.mxu0 %v746_v22  ;;  %699 = vmatprep.subr.bf16.mxu1 %v746_v22 }
  0x20   : > { %678 = vmatpush3.bf16.msra.mxu0 %v747_v24  ;;  %707 = vmatpush3.bf16.msra.mxu1 %v747_v24 }
  0x21   : > { %679 = vmatprep.subr.bf16.mxu0 %v748_v25  ;;  %700 = vmatprep.subr.bf16.mxu1 %v748_v25 }
  0x24   : > { %680 = vmatpush3.bf16.msra.mxu0 %v749_v26  ;;  %708 = vmatpush3.bf16.msra.mxu1 %v749_v26 }
  0x27   : > { %466 = vmatmul.mubr.bf16.vlgmr.msra.gmra.mrb[0].mxu0 %v633_v27  ;;  %474 = vmatmul.mubr.bf16.vlgmr.msra.gmra.mrb[0].mxu1 %v635_v28 }
  0xfa   : > { %v681_v29 = vpop.f32.mrb[0].mxu0  ;;  %v687_v30 = vpop.f32.mrb[0].mxu1 }
  0xfb   : > { %v682_v31 = vpop.f32.mrb[1].mxu0  ;;  %v688_v33 = vpop.f32.mrb[1].mxu1 }
  0xfc   : > { %v683_v34 = vadd.f32 %v682_v31, %v681_v29  ;;  %v689_v35 = vadd.f32 %v688_v33, %v687_v30  ;;  %v684_v36 = vpop.f32.mrb[2].mxu0  ;;  %v690_v37 = vpop.f32.mrb[2].mxu1 }
  0xfd   : > { %v685_v40 = vpop.f32.mrb[3].mxu0  ;;  %v691_v41 = vpop.f32.mrb[3].mxu1 }
  0xfe   : > { %v489_v42 = vadd.f32 %v683_v34, %v653_v32  ;;  %v491_v43 = vadd.f32 %v689_v35, %v653_v32  ;;  %v686_v44 = vadd.f32 %v685_v40, %v684_v36  ;;  %v692_v45 = vadd.f32 %v691_v41, %v690_v37 }
 0x100   : > { %v497_v48 = vadd.f32 %v493_v38, %v489_v42  ;;  %v499_v49 = vadd.f32 %v495_v39, %v491_v43  ;;  %v490_v50 = vadd.f32 %v686_v44, %v653_v32  ;;  %v492_v51 = vadd.f32 %v692_v45, %v653_v32 }
 0x102   : > { %v661_v52 = vpack.c.bf16 %v497_v48, %v497_v48  ;;  %v663_v53 = vpack.c.bf16 %v499_v49, %v499_v49  ;;  %v498_v54 = vadd.f32 %v494_v46, %v490_v50  ;;  %v500_v55 = vadd.f32 %v496_v47, %v492_v51 }
 0x104   : > { %518 = vst.msk [vmem:[%s274_s19] sm:$0xf] %vm517_vm0, %v661_v52  ;;  %520 = vst.msk [vmem:[%s274_s19 + $0x8] sm:$0xf] %vm517_vm0, %v663_v53  ;;  %v662_v56 = vpack.c.bf16 %v498_v54, %v498_v54  ;;  %v664_v57 = vpack.c.bf16 %v500_v55, %v500_v55 }
 0x106   : > { %519 = vst.msk [vmem:[%s274_s19 + $0x4] sm:$0xf] %vm517_vm0, %v662_v56  ;;  %521 = vst.msk [vmem:[%s274_s19 + $0xc] sm:$0xf] %vm517_vm0, %v664_v57 }
 0x107 PF: > { %s14_s17 = sadd.s32 1, %s772_s17   ;;  %s900_s15 = smov %s768_s16 }
 0x108   : > { %p11_p5 = scmp.ge.s32.totalorder %s14_s17, 5   ;;  %s901_s16 = smov %s903_s18 }
 0x10a   :  { %13 = sbr.rel (!%p11_p5) target bundleno = 2 (0x2), region = 72 }

// kernel: _lambda_.41
= control target key start
LH: loop header
LB: loop body
LE: loop exit
PB: predicated region body
PF: predicated region fallthrough
CT: control target
= control target key end

     0   :  { %s724_s12 = smov 0   ;;  %s726_s13 = smov 0   ;;  %s812_s0 = inlined_call_operand.vmem [shape: bf16[96,256], index: 0, kind: input, shape index: {}]   ;;  %s813_s1 = inlined_call_operand.vmem [shape: bf16[256,128], index: 1, kind: input, shape index: {}]   ;;  %s814_s2 = inlined_call_operand.vmem [shape: f32[1,32], index: 2, kind: input, shape index: {}]   ;;  %s815_s3 = inlined_call_operand.vmem [shape: bf16[96,32], index: 3, kind: output, shape index: {}]  }
   0x1   :  { %s728_s14 = smov 0  }
   0x2 LB: > { %s25_s15 = sadd.s32 1, %s697_s13  ;;  %p556_p0 = scmp.ge.s32.totalorder %s701_s14, 1  ;;  %s701_s14 = sphi %s728_s14, %s13_s14   ;;  %s697_s13 = sphi %s726_s13, %s817_s13   ;;  %s693_s12 = sphi %s724_s12, %s816_s12  }
   0x3   : > { %p27_p1 = scmp.ge.s32.totalorder %s25_s15, 3  ;;  %p169_p2 = scmp.lt.s32.totalorder %s701_s14, 4 }
   0x5   : > { %s819_s15 = smov (%p27_p1, %s25_s15), 0  ;;  %p170_p3 = pnand %p556_p0, %p169_p2 }
   0x6   : > { %v663_v0 = vld [vmem:[%s813_s1 + $0x40] sm:$0xff] (!%p170_p3)   ;;  %s557_s18 = sshll.u32 (!%p170_p3), %s693_s12, 2  ;;  %v665_v2 = vld [vmem:[%s813_s1 + $0x48] sm:$0xff] (!%p170_p3)   ;;  %v667_v4 = vld [vmem:[%s813_s1 + $0x50] sm:$0xff] (!%p170_p3)   ;;  %v703_v14 = vmov (!%p170_p3), 0   ;;  %vm460_vm0 = vcmask (!%p170_p3), 257024  }
   0x7   : > { %173 = sbr.rel (%p170_p3) target bundleno = 261 (0x105), region = 32  ;;  %v664_v1 = vld [vmem:[%s813_s1] sm:$0xff] (!%p170_p3)   ;;  %594 = vmatprep.subr.bf16.mxu0 (!%p170_p3), %v663_v0  ;;  %622 = vmatprep.subr.bf16.mxu1 (!%p170_p3), %v663_v0  ;;  %p205_p4 = scmp.lt.s32.totalorder (!%p170_p3), %s557_s18, 11  ;;  %v666_v3 = vld [vmem:[%s813_s1 + $0x8] sm:$0xff] (!%p170_p3)   ;;  %v668_v5 = vld [vmem:[%s813_s1 + $0x10] sm:$0xff] (!%p170_p3)  }
   0x8   : > { %595 = vmatpush3.bf16.msra.mxu0 (!%p170_p3), %v664_v1  ;;  %630 = vmatpush3.bf16.msra.mxu1 (!%p170_p3), %v664_v1  ;;  %v669_v6 = vld [vmem:[%s813_s1 + $0x58] sm:$0xff] (!%p170_p3)   ;;  %v671_v8 = vld [vmem:[%s813_s1 + $0x60] sm:$0xff] (!%p170_p3)   ;;  %v673_v10 = vld [vmem:[%s813_s1 + $0x68] sm:$0xff] (!%p170_p3)  }
   0x9   : > { %596 = vmatprep.subr.bf16.mxu0 (!%p170_p3), %v665_v2  ;;  %623 = vmatprep.subr.bf16.mxu1 (!%p170_p3), %v665_v2  ;;  %v670_v7 = vld [vmem:[%s813_s1 + $0x18] sm:$0xff] (!%p170_p3)   ;;  %v672_v9 = vld [vmem:[%s813_s1 + $0x20] sm:$0xff] (!%p170_p3)   ;;  %v674_v20 = vld [vmem:[%s813_s1 + $0x28] sm:$0xff] (!%p170_p3)  }
   0xa   : > { %v675_v22 = vld [vmem:[%s813_s1 + $0x70] sm:$0xff] (!%p170_p3)   ;;  %v677_v25 = vld [vmem:[%s813_s1 + $0x78] sm:$0xff] (!%p170_p3)   ;;  %v582_v32 = vld [vmem:[%s814_s2] ss:$0 sm:$0xff] (!%p170_p3) }
   0xb   : > { %v676_v24 = vld [vmem:[%s813_s1 + $0x30] sm:$0xff] (!%p170_p3)   ;;  %v678_v26 = vld [vmem:[%s813_s1 + $0x38] sm:$0xff] (!%p170_p3)  }
   0xc   : > { %597 = vmatpush3.bf16.msra.mxu0 (!%p170_p3), %v666_v3  ;;  %631 = vmatpush3.bf16.msra.mxu1 (!%p170_p3), %v666_v3 }
   0xd   : > { %598 = vmatprep.subr.bf16.mxu0 (!%p170_p3), %v667_v4  ;;  %624 = vmatprep.subr.bf16.mxu1 (!%p170_p3), %v667_v4 }
   0xe   : > { %s821_s18 = smov (!%p205_p4, %s557_s18), 11 }
   0xf   : > { %s589_s4 = sshll.u32 %s821_s18, 3  ;;  %s561_s5 = sshll.u32 %s821_s18, 2 }
  0x10   : > { %599 = vmatpush3.bf16.msra.mxu0 %v668_v5  ;;  %632 = vmatpush3.bf16.msra.mxu1 %v668_v5  ;;  %s212_s11 = scalar_lea.vmem %s812_s0, %s589_s4  ;;  %s225_s8 = scalar_lea.vmem %s815_s3, %s561_s5 }
  0x11   : > { %600 = vmatprep.subr.bf16.mxu0 %v669_v6  ;;  %625 = vmatprep.subr.bf16.mxu1 %v669_v6  ;;  %v228_v11 = vld [vmem:[%s212_s11] sm:$0xff]  ;;  %v229_v12 = vld [vmem:[%s212_s11 + $0x8] sm:$0xff]  ;;  %v230_v13 = vld [vmem:[%s212_s11 + $0x10] sm:$0xff] }
  0x12   : > { %v232_v15 = vmax.bf16 %v703_v14, %v228_v11  ;;  %v233_v16 = vmax.bf16 %v703_v14, %v229_v12  ;;  %v231_v17 = vld [vmem:[%s212_s11 + $0x18] sm:$0xff]  ;;  %v234_v18 = vmax.bf16 %v703_v14, %v230_v13 }
  0x13   : > { %v235_v19 = vmax.bf16 %v703_v14, %v231_v17 }
  0x14   : > { %601 = vmatpush3.bf16.msra.mxu0 %v670_v7  ;;  %633 = vmatpush3.bf16.msra.mxu1 %v670_v7  ;;  %v563_v21 = vcombine.high %v232_v15, %v233_v16  ;;  %v562_v27 = vcombine.low %v232_v15, %v233_v16 }
  0x15   : > { %602 = vmatprep.subr.bf16.mxu0 %v671_v8  ;;  %626 = vmatprep.subr.bf16.mxu1 %v671_v8  ;;  %v565_v23 = vcombine.high %v234_v18, %v235_v19  ;;  %v564_v28 = vcombine.low %v234_v18, %v235_v19 }
  0x16   : > { %416 = vmatprep.mubr.bf16.mxu0 %v563_v21 }
  0x17   : > { %424 = vmatprep.mubr.bf16.mxu1 %v565_v23 }
  0x18   : > { %603 = vmatpush3.bf16.msra.mxu0 %v672_v9  ;;  %634 = vmatpush3.bf16.msra.mxu1 %v672_v9 }
  0x19   : > { %604 = vmatprep.subr.bf16.mxu0 %v673_v10  ;;  %627 = vmatprep.subr.bf16.mxu1 %v673_v10 }
  0x1c   : > { %605 = vmatpush3.bf16.msra.mxu0 %v674_v20  ;;  %635 = vmatpush3.bf16.msra.mxu1 %v674_v20 }
  0x1d   : > { %606 = vmatprep.subr.bf16.mxu0 %v675_v22  ;;  %628 = vmatprep.subr.bf16.mxu1 %v675_v22 }
  0x20   : > { %607 = vmatpush3.bf16.msra.mxu0 %v676_v24  ;;  %636 = vmatpush3.bf16.msra.mxu1 %v676_v24 }
  0x21   : > { %608 = vmatprep.subr.bf16.mxu0 %v677_v25  ;;  %629 = vmatprep.subr.bf16.mxu1 %v677_v25 }
  0x24   : > { %609 = vmatpush3.bf16.msra.mxu0 %v678_v26  ;;  %637 = vmatpush3.bf16.msra.mxu1 %v678_v26 }
  0x27   : > { %417 = vmatmul.mubr.bf16.vlgmr.msra.gmra.mrb[0].mxu0 %v562_v27  ;;  %425 = vmatmul.mubr.bf16.vlgmr.msra.gmra.mrb[0].mxu1 %v564_v28 }
  0xfa   : > { %v610_v29 = vpop.f32.mrb[0].mxu0  ;;  %v616_v30 = vpop.f32.mrb[0].mxu1 }
  0xfb   : > { %v611_v31 = vpop.f32.mrb[1].mxu0  ;;  %v617_v33 = vpop.f32.mrb[1].mxu1 }
  0xfc   : > { %v612_v34 = vadd.f32 %v611_v31, %v610_v29  ;;  %v618_v35 = vadd.f32 %v617_v33, %v616_v30  ;;  %v613_v36 = vpop.f32.mrb[2].mxu0  ;;  %v619_v37 = vpop.f32.mrb[2].mxu1 }
  0xfd   : > { %v614_v38 = vpop.f32.mrb[3].mxu0  ;;  %v620_v39 = vpop.f32.mrb[3].mxu1 }
  0xfe   : > { %v440_v40 = vadd.f32 %v612_v34, %v582_v32  ;;  %v442_v41 = vadd.f32 %v618_v35, %v582_v32  ;;  %v615_v42 = vadd.f32 %v614_v38, %v613_v36  ;;  %v621_v43 = vadd.f32 %v620_v39, %v619_v37 }
 0x100   : > { %v590_v44 = vpack.c.bf16 %v440_v40, %v440_v40  ;;  %v592_v45 = vpack.c.bf16 %v442_v41, %v442_v41  ;;  %v441_v46 = vadd.f32 %v615_v42, %v582_v32  ;;  %v443_v47 = vadd.f32 %v621_v43, %v582_v32 }
 0x102   : > { %461 = vst.msk [vmem:[%s225_s8] sm:$0xf] %vm460_vm0, %v590_v44  ;;  %463 = vst.msk [vmem:[%s225_s8 + $0x8] sm:$0xf] %vm460_vm0, %v592_v45  ;;  %v591_v48 = vpack.c.bf16 %v441_v46, %v441_v46  ;;  %v593_v49 = vpack.c.bf16 %v443_v47, %v443_v47 }
 0x104   : > { %462 = vst.msk [vmem:[%s225_s8 + $0x4] sm:$0xf] %vm460_vm0, %v591_v48  ;;  %464 = vst.msk [vmem:[%s225_s8 + $0xc] sm:$0xf] %vm460_vm0, %v593_v49 }
 0x105 PF: > { %s13_s14 = sadd.s32 1, %s701_s14   ;;  %s816_s12 = smov %s697_s13 }
 0x106   : > { %p10_p5 = scmp.ge.s32.totalorder %s13_s14, 5   ;;  %s817_s13 = smov %s819_s15 }
 0x108   :  { %12 = sbr.rel (!%p10_p5) target bundleno = 2 (0x2), region = 65 }

// kernel: _lambda_.40
= control target key start
LH: loop header
LB: loop body
LE: loop exit
PB: predicated region body
PF: predicated region fallthrough
CT: control target
= control target key end

     0   :  { %s579_s12 = smov 0   ;;  %s581_s13 = smov 0   ;;  %s643_s0 = inlined_call_operand.vmem [shape: bf16[96,128], index: 0, kind: input, shape index: {}]   ;;  %s644_s1 = inlined_call_operand.vmem [shape: bf16[128,128], index: 1, kind: input, shape index: {}]   ;;  %s645_s2 = inlined_call_operand.vmem [shape: f32[1,8], index: 2, kind: input, shape index: {}]   ;;  %s646_s3 = inlined_call_operand.vmem [shape: f32[96,8], index: 3, kind: output, shape index: {}]  }
   0x1   :  { %s583_s14 = smov 0  }
   0x2 LB: > { %s25_s15 = sadd.s32 1, %s553_s13  ;;  %p453_p0 = scmp.ge.s32.totalorder %s557_s14, 1  ;;  %s557_s14 = sphi %s583_s14, %s13_s14   ;;  %s553_s13 = sphi %s581_s13, %s648_s13   ;;  %s549_s12 = sphi %s579_s12, %s647_s12  }
   0x3   : > { %p27_p1 = scmp.ge.s32.totalorder %s25_s15, 3  ;;  %p166_p2 = scmp.lt.s32.totalorder %s557_s14, 4 }
   0x5   : > { %s650_s15 = smov (%p27_p1, %s25_s15), 0  ;;  %p167_p3 = pnand %p453_p0, %p166_p2 }
   0x6   : > { %v525_v0 = vld [vmem:[%s644_s1] sm:$0xff] (!%p167_p3)   ;;  %s454_s18 = sshll.u32 (!%p167_p3), %s549_s12, 2  ;;  %v526_v1 = vld [vmem:[%s644_s1 + $0x8] sm:$0xff] (!%p167_p3)   ;;  %v527_v2 = vld [vmem:[%s644_s1 + $0x10] sm:$0xff] (!%p167_p3)   ;;  %vm360_vm0 = vcmask (!%p167_p3), 64512  }
   0x7   : > { %170 = sbr.rel (%p167_p3) target bundleno = 257 (0x101), region = 32  ;;  %p199_p4 = scmp.lt.s32.totalorder (!%p167_p3), %s454_s18, 11  ;;  %481 = vmatprep.subr.bf16.mxu0 (!%p167_p3), %v525_v0  ;;  %v528_v3 = vld [vmem:[%s644_s1 + $0x18] sm:$0xff] (!%p167_p3)   ;;  %v529_v5 = vld [vmem:[%s644_s1 + $0x20] sm:$0xff] (!%p167_p3)   ;;  %v530_v6 = vld [vmem:[%s644_s1 + $0x28] sm:$0xff] (!%p167_p3)  }
   0x8   : > { %482 = vmatpush3.bf16.msra.mxu0 (!%p167_p3), %v525_v0  ;;  %v531_v7 = vld [vmem:[%s644_s1 + $0x30] sm:$0xff] (!%p167_p3)   ;;  %v532_v8 = vld [vmem:[%s644_s1 + $0x38] sm:$0xff] (!%p167_p3)   ;;  %v468_v10 = vld [vmem:[%s645_s2] ss:$0 sm:$0xff] (!%p167_p3) }
   0x9   : > { %483 = vmatprep.subr.bf16.mxu0 (!%p167_p3), %v526_v1 }
   0xc   : > { %484 = vmatpush3.bf16.msra.mxu0 (!%p167_p3), %v526_v1 }
   0xd   : > { %485 = vmatprep.subr.bf16.mxu0 (!%p167_p3), %v527_v2 }
   0xe   : > { %s652_s18 = smov (!%p199_p4, %s454_s18), 11 }
   0xf   : > { %s455_s23 = sshll.u32 %s652_s18, 2  ;;  %s457_s10 = sshll.u32 %s652_s18, 3 }
  0x10   : > { %s205_s26 = scalar_lea.vmem %s643_s0, %s455_s23  ;;  %486 = vmatpush3.bf16.msra.mxu0 %v527_v2  ;;  %s217_s19 = scalar_lea.vmem %s646_s3, %s457_s10 }
  0x11   : > { %v533_v4 = vld [vmem:[%s205_s26] sm:$0xff]   ;;  %487 = vmatprep.subr.bf16.mxu0 %v528_v3  ;;  %v534_v9 = vld [vmem:[%s205_s26 + $0x8] sm:$0xff]  }
  0x12   : > { %497 = vmatprep.mubr.bf16.mxu0 %v533_v4 }
  0x14   : > { %488 = vmatpush3.bf16.msra.mxu0 %v528_v3 }
  0x15   : > { %489 = vmatprep.subr.bf16.mxu0 %v529_v5 }
  0x18   : > { %490 = vmatpush3.bf16.msra.mxu0 %v529_v5 }
  0x19   : > { %491 = vmatprep.subr.bf16.mxu0 %v530_v6 }
  0x1c   : > { %492 = vmatpush3.bf16.msra.mxu0 %v530_v6 }
  0x1d   : > { %493 = vmatprep.subr.bf16.mxu0 %v531_v7 }
  0x20   : > { %494 = vmatpush3.bf16.msra.mxu0 %v531_v7 }
  0x21   : > { %495 = vmatprep.subr.bf16.mxu0 %v532_v8 }
  0x24   : > { %496 = vmatpush3.bf16.msra.mxu0 %v532_v8 }
  0x27   : > { %498 = vmatmul.mubr.bf16.vlgmr.msra.gmra.mrb[0].mxu0 %v534_v9 }
  0xfa   : > { %v499_v11 = vpop.f32.mrb[0].mxu0 }
  0xfb   : > { %v358_v12 = vadd.f32 %v499_v11, %v468_v10  ;;  %v334_v13 = vpop.f32.mrb[1].mxu0 }
  0xfc   : > { %v356_v14 = vadd.f32 %v468_v10, %v334_v13  ;;  %v500_v15 = vpop.f32.mrb[2].mxu0 }
  0xfd   : > { %363 = vst.msk [vmem:[%s217_s19 + $0x10] sm:$0xff] %vm360_vm0, %v358_v12  ;;  %v359_v16 = vadd.f32 %v500_v15, %v468_v10  ;;  %v337_v17 = vpop.f32.mrb[3].mxu0 }
  0xfe   : > { %361 = vst.msk [vmem:[%s217_s19] sm:$0xff] %vm360_vm0, %v356_v14  ;;  %v357_v18 = vadd.f32 %v468_v10, %v337_v17 }
  0xff   : > { %364 = vst.msk [vmem:[%s217_s19 + $0x18] sm:$0xff] %vm360_vm0, %v359_v16 }
 0x100   : > { %362 = vst.msk [vmem:[%s217_s19 + $0x8] sm:$0xff] %vm360_vm0, %v357_v18 }
 0x101 PF: > { %s13_s14 = sadd.s32 1, %s557_s14   ;;  %s647_s12 = smov %s553_s13 }
 0x102   : > { %p10_p5 = scmp.ge.s32.totalorder %s13_s14, 5   ;;  %s648_s13 = smov %s650_s15 }
 0x104   :  { %12 = sbr.rel (!%p10_p5) target bundleno = 2 (0x2), region = 65 }

// kernel: _lambda_.42
= control target key start
LH: loop header
LB: loop body
LE: loop exit
PB: predicated region body
PF: predicated region fallthrough
CT: control target
= control target key end

     0   :  { %s951_s15 = smov 0   ;;  %s953_s16 = smov 0   ;;  %s1126_s0 = inlined_call_operand.vmem [shape: bf16[384,128], index: 0, kind: input, shape index: {}]   ;;  %s1127_s1 = inlined_call_operand.vmem [shape: bf16[128,128], index: 1, kind: input, shape index: {}]   ;;  %s1128_s2 = inlined_call_operand.vmem [shape: f32[1,8], index: 2, kind: input, shape index: {}]   ;;  %s1129_s3 = inlined_call_operand.vmem [shape: f32[384,8], index: 3, kind: input, shape index: {}]   ;;  %s1130_s4 = inlined_call_operand.vmem [shape: bf16[384,8], index: 4, kind: output, shape index: {}]  }
   0x1   :  { %s955_s17 = smov 0  }
   0x2 LB: > { %s26_s18 = sadd.s32 1, %s919_s16  ;;  %p746_p0 = scmp.ge.s32.totalorder %s923_s17, 1  ;;  %s923_s17 = sphi %s955_s17, %s14_s17   ;;  %s919_s16 = sphi %s953_s16, %s1132_s16   ;;  %s915_s15 = sphi %s951_s15, %s1131_s15  }
   0x3   : > { %p28_p1 = scmp.ge.s32.totalorder %s26_s18, 3  ;;  %p202_p2 = scmp.lt.s32.totalorder %s923_s17, 4 }
   0x5   : > { %s1134_s18 = smov (%p28_p1, %s26_s18), 0  ;;  %p203_p3 = pnand %p746_p0, %p202_p2 }
   0x6   : > { %v893_v0 = vld [vmem:[%s1127_s1] sm:$0xff] (!%p203_p3)   ;;  %s747_s21 = sshll.u32 (!%p203_p3), %s915_s15, 4  ;;  %v894_v1 = vld [vmem:[%s1127_s1 + $0x8] sm:$0xff] (!%p203_p3)   ;;  %v895_v2 = vld [vmem:[%s1127_s1 + $0x10] sm:$0xff] (!%p203_p3)   ;;  %v925_v7 = vmov (!%p203_p3), 0   ;;  %vm629_vm0 = vcmask (!%p203_p3), 60416  }
   0x7   : > { %206 = sbr.rel (%p203_p3) target bundleno = 269 (0x10d), region = 36  ;;  %p242_p4 = scmp.lt.s32.totalorder (!%p203_p3), %s747_s21, 47  ;;  %820 = vmatprep.subr.bf16.mxu0 (!%p203_p3), %v893_v0  ;;  %852 = vmatprep.subr.bf16.mxu1 (!%p203_p3), %v893_v0  ;;  %v896_v3 = vld [vmem:[%s1127_s1 + $0x18] sm:$0xff] (!%p203_p3)   ;;  %v897_v14 = vld [vmem:[%s1127_s1 + $0x20] sm:$0xff] (!%p203_p3)   ;;  %v898_v16 = vld [vmem:[%s1127_s1 + $0x28] sm:$0xff] (!%p203_p3)  }
   0x8   : > { %821 = vmatpush3.bf16.msra.mxu0 (!%p203_p3), %v893_v0  ;;  %860 = vmatpush3.bf16.msra.mxu1 (!%p203_p3), %v893_v0  ;;  %v899_v17 = vld [vmem:[%s1127_s1 + $0x30] sm:$0xff] (!%p203_p3)   ;;  %v900_v18 = vld [vmem:[%s1127_s1 + $0x38] sm:$0xff] (!%p203_p3)   ;;  %v1044_v49 = vld [vmem:[%s1128_s2] ss:$0 sm:$0xff] (!%p203_p3) }
   0x9   : > { %822 = vmatprep.subr.bf16.mxu0 (!%p203_p3), %v894_v1  ;;  %853 = vmatprep.subr.bf16.mxu1 (!%p203_p3), %v894_v1 }
   0xc   : > { %823 = vmatpush3.bf16.msra.mxu0 (!%p203_p3), %v894_v1  ;;  %861 = vmatpush3.bf16.msra.mxu1 (!%p203_p3), %v894_v1 }
   0xd   : > { %824 = vmatprep.subr.bf16.mxu0 (!%p203_p3), %v895_v2  ;;  %854 = vmatprep.subr.bf16.mxu1 (!%p203_p3), %v895_v2 }
   0xe   : > { %s1136_s21 = smov (!%p242_p4, %s747_s21), 47 }
   0xf   : > { %s748_s26 = sshll.u32 %s1136_s21, 2  ;;  %s750_s14 = sshll.u32 %s1136_s21, 3 }
  0x10   : > { %s986_s29 = scalar_lea.vmem %s1126_s0, %s748_s26  ;;  %825 = vmatpush3.bf16.msra.mxu0 %v895_v2  ;;  %862 = vmatpush3.bf16.msra.mxu1 %v895_v2  ;;  %s1039_s20 = scalar_lea.vmem %s1129_s3, %s750_s14 }
  0x11   : > { %v269_v4 = vld [vmem:[%s986_s29] sm:$0xf]  ;;  %v270_v5 = vld [vmem:[%s986_s29 + $0x4] sm:$0xf]  ;;  %826 = vmatprep.subr.bf16.mxu0 %v896_v3  ;;  %855 = vmatprep.subr.bf16.mxu1 %v896_v3  ;;  %v271_v19 = vld [vmem:[%s986_s29 + $0x8] sm:$0xf]  ;;  %s1065_s27 = scalar_lea.vmem %s1130_s4, %s748_s26 }
  0x12   : > { %v277_v6 = vld [vmem:[%s986_s29 + $0x20] sm:$0xf]  ;;  %v285_v8 = vmax.bf16 %v925_v7, %v269_v4  ;;  %v286_v9 = vmax.bf16 %v925_v7, %v270_v5  ;;  %v278_v10 = vld [vmem:[%s986_s29 + $0x24] sm:$0xf]  ;;  %v272_v20 = vld [vmem:[%s986_s29 + $0xc] sm:$0xf]  ;;  %v287_v27 = vmax.bf16 %v925_v7, %v271_v19 }
  0x13   : > { %v293_v11 = vmax.bf16 %v925_v7, %v277_v6  ;;  %v294_v12 = vmax.bf16 %v925_v7, %v278_v10  ;;  %v279_v21 = vld [vmem:[%s986_s29 + $0x28] sm:$0xf]  ;;  %v280_v22 = vld [vmem:[%s986_s29 + $0x2c] sm:$0xf]  ;;  %v273_v23 = vld [vmem:[%s986_s29 + $0x10] sm:$0xf]  ;;  %v288_v28 = vmax.bf16 %v925_v7, %v272_v20 }
  0x14   : > { %v753_v13 = vcombine.low %v285_v8, %v286_v9  ;;  %827 = vmatpush3.bf16.msra.mxu0 %v896_v3  ;;  %863 = vmatpush3.bf16.msra.mxu1 %v896_v3  ;;  %v274_v24 = vld [vmem:[%s986_s29 + $0x14] sm:$0xf]  ;;  %v281_v25 = vld [vmem:[%s986_s29 + $0x30] sm:$0xf]  ;;  %v295_v29 = vmax.bf16 %v925_v7, %v279_v21  ;;  %v296_v30 = vmax.bf16 %v925_v7, %v280_v22  ;;  %v275_v37 = vld [vmem:[%s986_s29 + $0x18] sm:$0xf] }
  0x15   : > { %v757_v15 = vcombine.low %v293_v11, %v294_v12  ;;  %828 = vmatprep.subr.bf16.mxu0 %v897_v14  ;;  %856 = vmatprep.subr.bf16.mxu1 %v897_v14  ;;  %v282_v26 = vld [vmem:[%s986_s29 + $0x34] sm:$0xf]  ;;  %v289_v31 = vmax.bf16 %v925_v7, %v273_v23  ;;  %v290_v32 = vmax.bf16 %v925_v7, %v274_v24  ;;  %v276_v40 = vld [vmem:[%s986_s29 + $0x1c] sm:$0xf]  ;;  %v283_v41 = vld [vmem:[%s986_s29 + $0x38] sm:$0xf] }
  0x16   : > { %836 = vmatprep.mubr.bf16.mxu0 %v753_v13  ;;  %v297_v33 = vmax.bf16 %v925_v7, %v281_v25  ;;  %v298_v34 = vmax.bf16 %v925_v7, %v282_v26  ;;  %v754_v35 = vcombine.low %v287_v27, %v288_v28  ;;  %v758_v36 = vcombine.low %v295_v29, %v296_v30  ;;  %v284_v42 = vld [vmem:[%s986_s29 + $0x3c] sm:$0xf]  ;;  %v535_v51 = vld [vmem:[%s1039_s20 + $0x10] sm:$0xff]  ;;  %v533_v57 = vld [vmem:[%s1039_s20] sm:$0xff] }
  0x17   : > { %844 = vmatprep.mubr.bf16.mxu1 %v757_v15  ;;  %v755_v38 = vcombine.low %v289_v31, %v290_v32  ;;  %v291_v43 = vmax.bf16 %v925_v7, %v275_v37  ;;  %v292_v44 = vmax.bf16 %v925_v7, %v276_v40  ;;  %v299_v45 = vmax.bf16 %v925_v7, %v283_v41  ;;  %v543_v53 = vld [vmem:[%s1039_s20 + $0x50] sm:$0xff]  ;;  %v541_v59 = vld [vmem:[%s1039_s20 + $0x40] sm:$0xff]  ;;  %v536_v63 = vld [vmem:[%s1039_s20 + $0x18] sm:$0xff] }
  0x18   : > { %829 = vmatpush3.bf16.msra.mxu0 %v897_v14  ;;  %864 = vmatpush3.bf16.msra.mxu1 %v897_v14  ;;  %v759_v39 = vcombine.low %v297_v33, %v298_v34  ;;  %v300_v46 = vmax.bf16 %v925_v7, %v284_v42  ;;  %v544_v1 = vld [vmem:[%s1039_s20 + $0x58] sm:$0xff]  ;;  %v534_v7 = vld [vmem:[%s1039_s20 + $0x8] sm:$0xff]  ;;  %v539_v27 = vld [vmem:[%s1039_s20 + $0x30] sm:$0xff] }
  0x19   : > { %830 = vmatprep.subr.bf16.mxu0 %v898_v16  ;;  %857 = vmatprep.subr.bf16.mxu1 %v898_v16  ;;  %v756_v47 = vcombine.low %v291_v43, %v292_v44  ;;  %v542_v9 = vld [vmem:[%s1039_s20 + $0x48] sm:$0xff]  ;;  %v547_v29 = vld [vmem:[%s1039_s20 + $0x70] sm:$0xff]  ;;  %v537_v33 = vld [vmem:[%s1039_s20 + $0x20] sm:$0xff] }
  0x1a   : > { %v760_v48 = vcombine.low %v299_v45, %v300_v46  ;;  %v548_v41 = vld [vmem:[%s1039_s20 + $0x78] sm:$0xff] }
  0x1c   : > { %831 = vmatpush3.bf16.msra.mxu0 %v898_v16  ;;  %865 = vmatpush3.bf16.msra.mxu1 %v898_v16 }
  0x1d   : > { %832 = vmatprep.subr.bf16.mxu0 %v899_v17  ;;  %858 = vmatprep.subr.bf16.mxu1 %v899_v17 }
  0x20   : > { %833 = vmatpush3.bf16.msra.mxu0 %v899_v17  ;;  %866 = vmatpush3.bf16.msra.mxu1 %v899_v17 }
  0x21   : > { %834 = vmatprep.subr.bf16.mxu0 %v900_v18  ;;  %859 = vmatprep.subr.bf16.mxu1 %v900_v18 }
  0x24   : > { %835 = vmatpush3.bf16.msra.mxu0 %v900_v18  ;;  %867 = vmatpush3.bf16.msra.mxu1 %v900_v18 }
  0x27   : > { %837 = vmatmul.mubr.bf16.vlgmr.msra.gmra.mrb[0].mxu0 %v754_v35  ;;  %845 = vmatmul.mubr.bf16.vlgmr.msra.gmra.mrb[0].mxu1 %v758_v36  ;;  %v545_v35 = vld [vmem:[%s1039_s20 + $0x60] sm:$0xff] }
  0x28   : > { %840 = vmatprep.mubr.bf16.mxu0 %v755_v38  ;;  %848 = vmatprep.mubr.bf16.mxu1 %v759_v39  ;;  %v540_v39 = vld [vmem:[%s1039_s20 + $0x38] sm:$0xff] }
  0x2f   : > { %841 = vmatmul.mubr.bf16.gmra.mrb[4].mxu0 %v756_v47  ;;  %849 = vmatmul.mubr.bf16.gmra.mrb[4].mxu1 %v760_v48  ;;  %v538_v47 = vld [vmem:[%s1039_s20 + $0x28] sm:$0xff] }
  0xfa   : > { %v838_v50 = vpop.f32.mrb[0].mxu0  ;;  %v846_v52 = vpop.f32.mrb[0].mxu1 }
  0xfb   : > { %v519_v54 = vadd.f32 %v838_v50, %v1044_v49  ;;  %v527_v55 = vadd.f32 %v846_v52, %v1044_v49  ;;  %v447_v56 = vpop.f32.mrb[1].mxu0  ;;  %v479_v58 = vpop.f32.mrb[1].mxu1  ;;  %v546_v50 = vld [vmem:[%s1039_s20 + $0x68] sm:$0xff] }
  0xfc   : > { %v517_v60 = vadd.f32 %v1044_v49, %v447_v56  ;;  %v525_v61 = vadd.f32 %v1044_v49, %v479_v58  ;;  %v839_v62 = vpop.f32.mrb[2].mxu0  ;;  %v847_v0 = vpop.f32.mrb[2].mxu1 }
  0xfd   : > { %v551_v2 = vadd.f32 %v535_v51, %v519_v54  ;;  %v559_v3 = vadd.f32 %v543_v53, %v527_v55  ;;  %v520_v4 = vadd.f32 %v839_v62, %v1044_v49  ;;  %v528_v5 = vadd.f32 %v847_v0, %v1044_v49  ;;  %v450_v6 = vpop.f32.mrb[3].mxu0  ;;  %v482_v8 = vpop.f32.mrb[3].mxu1 }
  0xfe   : > { %v549_v10 = vadd.f32 %v533_v57, %v517_v60  ;;  %v557_v11 = vadd.f32 %v541_v59, %v525_v61  ;;  %v518_v12 = vadd.f32 %v1044_v49, %v450_v6  ;;  %v526_v13 = vadd.f32 %v1044_v49, %v482_v8 }
  0xff   : > { %v790_v14 = vpack.c.bf16 %v551_v2, %v551_v2  ;;  %v798_v15 = vpack.c.bf16 %v559_v3, %v559_v3  ;;  %v552_v16 = vadd.f32 %v536_v63, %v520_v4  ;;  %v560_v17 = vadd.f32 %v544_v1, %v528_v5 }
 0x100   : > { %v788_v18 = vpack.c.bf16 %v549_v10, %v549_v10  ;;  %v796_v19 = vpack.c.bf16 %v557_v11, %v557_v11  ;;  %v550_v20 = vadd.f32 %v534_v7, %v518_v12  ;;  %v558_v21 = vadd.f32 %v542_v9, %v526_v13 }
 0x101   : > { %632 = vst.msk [vmem:[%s1065_s27 + $0x8] sm:$0xf] %vm629_vm0, %v790_v14  ;;  %640 = vst.msk [vmem:[%s1065_s27 + $0x28] sm:$0xf] %vm629_vm0, %v798_v15  ;;  %v791_v22 = vpack.c.bf16 %v552_v16, %v552_v16  ;;  %v799_v23 = vpack.c.bf16 %v560_v17, %v560_v17 }
 0x102   : > { %630 = vst.msk [vmem:[%s1065_s27] sm:$0xf] %vm629_vm0, %v788_v18  ;;  %638 = vst.msk [vmem:[%s1065_s27 + $0x20] sm:$0xf] %vm629_vm0, %v796_v19  ;;  %v789_v24 = vpack.c.bf16 %v550_v20, %v550_v20  ;;  %v797_v25 = vpack.c.bf16 %v558_v21, %v558_v21  ;;  %v842_v26 = vpop.f32.mrb[4].mxu0  ;;  %v850_v28 = vpop.f32.mrb[4].mxu1 }
 0x103   : > { %633 = vst.msk [vmem:[%s1065_s27 + $0xc] sm:$0xf] %vm629_vm0, %v791_v22  ;;  %641 = vst.msk [vmem:[%s1065_s27 + $0x2c] sm:$0xf] %vm629_vm0, %v799_v23  ;;  %v523_v30 = vadd.f32 %v842_v26, %v1044_v49  ;;  %v531_v31 = vadd.f32 %v850_v28, %v1044_v49  ;;  %v463_v32 = vpop.f32.mrb[5].mxu0  ;;  %v495_v34 = vpop.f32.mrb[5].mxu1 }
 0x104   : > { %631 = vst.msk [vmem:[%s1065_s27 + $0x4] sm:$0xf] %vm629_vm0, %v789_v24  ;;  %639 = vst.msk [vmem:[%s1065_s27 + $0x24] sm:$0xf] %vm629_vm0, %v797_v25  ;;  %v521_v36 = vadd.f32 %v1044_v49, %v463_v32  ;;  %v529_v37 = vadd.f32 %v1044_v49, %v495_v34  ;;  %v843_v38 = vpop.f32.mrb[6].mxu0  ;;  %v851_v40 = vpop.f32.mrb[6].mxu1 }
 0x105   : > { %v555_v42 = vadd.f32 %v539_v27, %v523_v30  ;;  %v563_v43 = vadd.f32 %v547_v29, %v531_v31  ;;  %v524_v44 = vadd.f32 %v843_v38, %v1044_v49  ;;  %v532_v45 = vadd.f32 %v851_v40, %v1044_v49  ;;  %v466_v46 = vpop.f32.mrb[7].mxu0  ;;  %v498_v48 = vpop.f32.mrb[7].mxu1 }
 0x106   : > { %v553_v51 = vadd.f32 %v537_v33, %v521_v36  ;;  %v561_v52 = vadd.f32 %v545_v35, %v529_v37  ;;  %v522_v53 = vadd.f32 %v1044_v49, %v466_v46  ;;  %v530_v54 = vadd.f32 %v1044_v49, %v498_v48 }
 0x107   : > { %v794_v55 = vpack.c.bf16 %v555_v42, %v555_v42  ;;  %v802_v56 = vpack.c.bf16 %v563_v43, %v563_v43  ;;  %v556_v57 = vadd.f32 %v540_v39, %v524_v44  ;;  %v564_v58 = vadd.f32 %v548_v41, %v532_v45 }
 0x108   : > { %v792_v59 = vpack.c.bf16 %v553_v51, %v553_v51  ;;  %v800_v60 = vpack.c.bf16 %v561_v52, %v561_v52  ;;  %v554_v61 = vadd.f32 %v538_v47, %v522_v53  ;;  %v562_v62 = vadd.f32 %v546_v50, %v530_v54 }
 0x109   : > { %636 = vst.msk [vmem:[%s1065_s27 + $0x18] sm:$0xf] %vm629_vm0, %v794_v55  ;;  %644 = vst.msk [vmem:[%s1065_s27 + $0x38] sm:$0xf] %vm629_vm0, %v802_v56  ;;  %v795_v63 = vpack.c.bf16 %v556_v57, %v556_v57  ;;  %v803_v0 = vpack.c.bf16 %v564_v58, %v564_v58 }
 0x10a   : > { %634 = vst.msk [vmem:[%s1065_s27 + $0x10] sm:$0xf] %vm629_vm0, %v792_v59  ;;  %642 = vst.msk [vmem:[%s1065_s27 + $0x30] sm:$0xf] %vm629_vm0, %v800_v60  ;;  %v793_v49 = vpack.c.bf16 %v554_v61, %v554_v61  ;;  %v801_v1 = vpack.c.bf16 %v562_v62, %v562_v62 }
 0x10b   : > { %637 = vst.msk [vmem:[%s1065_s27 + $0x1c] sm:$0xf] %vm629_vm0, %v795_v63  ;;  %645 = vst.msk [vmem:[%s1065_s27 + $0x3c] sm:$0xf] %vm629_vm0, %v803_v0 }
 0x10c   : > { %635 = vst.msk [vmem:[%s1065_s27 + $0x14] sm:$0xf] %vm629_vm0, %v793_v49  ;;  %643 = vst.msk [vmem:[%s1065_s27 + $0x34] sm:$0xf] %vm629_vm0, %v801_v1 }
 0x10d PF: > { %s14_s17 = sadd.s32 1, %s923_s17   ;;  %s1131_s15 = smov %s919_s16 }
 0x10e   : > { %p11_p5 = scmp.ge.s32.totalorder %s14_s17, 5   ;;  %s1132_s16 = smov %s1134_s18 }
 0x110   :  { %13 = sbr.rel (!%p11_p5) target bundleno = 2 (0x2), region = 72 }

// kernel: _lambda_.43
= control target key start
LH: loop header
LB: loop body
LE: loop exit
PB: predicated region body
PF: predicated region fallthrough
CT: control target
= control target key end

     0   :  { %s745_s12 = smov 0   ;;  %s747_s13 = smov 0   ;;  %s853_s0 = inlined_call_operand.vmem [shape: bf16[384,128], index: 0, kind: input, shape index: {}]   ;;  %s854_s1 = inlined_call_operand.vmem [shape: bf16[128,128], index: 1, kind: input, shape index: {}]   ;;  %s855_s2 = inlined_call_operand.vmem [shape: f32[1,8], index: 2, kind: input, shape index: {}]   ;;  %s856_s3 = inlined_call_operand.vmem [shape: f32[384,8], index: 3, kind: output, shape index: {}]  }
   0x1   :  { %s749_s14 = smov 0  }
   0x2 LB: > { %s25_s15 = sadd.s32 1, %s719_s13  ;;  %p573_p0 = scmp.ge.s32.totalorder %s723_s14, 1  ;;  %s723_s14 = sphi %s749_s14, %s13_s14   ;;  %s719_s13 = sphi %s747_s13, %s858_s13   ;;  %s715_s12 = sphi %s745_s12, %s857_s12  }
   0x3   : > { %p27_p1 = scmp.ge.s32.totalorder %s25_s15, 3  ;;  %p166_p2 = scmp.lt.s32.totalorder %s723_s14, 4 }
   0x5   : > { %s860_s15 = smov (%p27_p1, %s25_s15), 0  ;;  %p167_p3 = pnand %p573_p0, %p166_p2 }
   0x6   : > { %v685_v0 = vld [vmem:[%s854_s1] sm:$0xff] (!%p167_p3)   ;;  %s574_s18 = sshll.u32 (!%p167_p3), %s715_s12, 4  ;;  %v686_v1 = vld [vmem:[%s854_s1 + $0x8] sm:$0xff] (!%p167_p3)   ;;  %v687_v2 = vld [vmem:[%s854_s1 + $0x10] sm:$0xff] (!%p167_p3)   ;;  %vm468_vm0 = vcmask (!%p167_p3), 64512  }
   0x7   : > { %170 = sbr.rel (%p167_p3) target bundleno = 265 (0x109), region = 32  ;;  %p199_p4 = scmp.lt.s32.totalorder (!%p167_p3), %s574_s18, 47  ;;  %613 = vmatprep.subr.bf16.mxu0 (!%p167_p3), %v685_v0  ;;  %645 = vmatprep.subr.bf16.mxu1 (!%p167_p3), %v685_v0  ;;  %v688_v3 = vld [vmem:[%s854_s1 + $0x18] sm:$0xff] (!%p167_p3)   ;;  %v689_v6 = vld [vmem:[%s854_s1 + $0x20] sm:$0xff] (!%p167_p3)   ;;  %v690_v7 = vld [vmem:[%s854_s1 + $0x28] sm:$0xff] (!%p167_p3)  }
   0x8   : > { %614 = vmatpush3.bf16.msra.mxu0 (!%p167_p3), %v685_v0  ;;  %653 = vmatpush3.bf16.msra.mxu1 (!%p167_p3), %v685_v0  ;;  %v691_v8 = vld [vmem:[%s854_s1 + $0x30] sm:$0xff] (!%p167_p3)   ;;  %v692_v9 = vld [vmem:[%s854_s1 + $0x38] sm:$0xff] (!%p167_p3)   ;;  %v594_v16 = vld [vmem:[%s855_s2] ss:$0 sm:$0xff] (!%p167_p3) }
   0x9   : > { %615 = vmatprep.subr.bf16.mxu0 (!%p167_p3), %v686_v1  ;;  %646 = vmatprep.subr.bf16.mxu1 (!%p167_p3), %v686_v1 }
   0xc   : > { %616 = vmatpush3.bf16.msra.mxu0 (!%p167_p3), %v686_v1  ;;  %654 = vmatpush3.bf16.msra.mxu1 (!%p167_p3), %v686_v1 }
   0xd   : > { %617 = vmatprep.subr.bf16.mxu0 (!%p167_p3), %v687_v2  ;;  %647 = vmatprep.subr.bf16.mxu1 (!%p167_p3), %v687_v2 }
   0xe   : > { %s862_s18 = smov (!%p199_p4, %s574_s18), 47 }
   0xf   : > { %s575_s23 = sshll.u32 %s862_s18, 2  ;;  %s577_s10 = sshll.u32 %s862_s18, 3 }
  0x10   : > { %s778_s26 = scalar_lea.vmem %s853_s0, %s575_s23  ;;  %618 = vmatpush3.bf16.msra.mxu0 %v687_v2  ;;  %655 = vmatpush3.bf16.msra.mxu1 %v687_v2  ;;  %s810_s19 = scalar_lea.vmem %s856_s3, %s577_s10 }
  0x11   : > { %v693_v4 = vld [vmem:[%s778_s26] sm:$0xff]   ;;  %619 = vmatprep.subr.bf16.mxu0 %v688_v3  ;;  %648 = vmatprep.subr.bf16.mxu1 %v688_v3  ;;  %v695_v10 = vld [vmem:[%s778_s26 + $0x8] sm:$0xff]   ;;  %v697_v12 = vld [vmem:[%s778_s26 + $0x10] sm:$0xff]  }
  0x12   : > { %v694_v5 = vld [vmem:[%s778_s26 + $0x20] sm:$0xff]   ;;  %629 = vmatprep.mubr.bf16.mxu0 %v693_v4  ;;  %v696_v11 = vld [vmem:[%s778_s26 + $0x28] sm:$0xff]   ;;  %v698_v13 = vld [vmem:[%s778_s26 + $0x30] sm:$0xff]  }
  0x13   : > { %637 = vmatprep.mubr.bf16.mxu1 %v694_v5  ;;  %v699_v14 = vld [vmem:[%s778_s26 + $0x18] sm:$0xff]  }
  0x14   : > { %620 = vmatpush3.bf16.msra.mxu0 %v688_v3  ;;  %656 = vmatpush3.bf16.msra.mxu1 %v688_v3  ;;  %v700_v15 = vld [vmem:[%s778_s26 + $0x38] sm:$0xff]  }
  0x15   : > { %621 = vmatprep.subr.bf16.mxu0 %v689_v6  ;;  %649 = vmatprep.subr.bf16.mxu1 %v689_v6 }
  0x18   : > { %622 = vmatpush3.bf16.msra.mxu0 %v689_v6  ;;  %657 = vmatpush3.bf16.msra.mxu1 %v689_v6 }
  0x19   : > { %623 = vmatprep.subr.bf16.mxu0 %v690_v7  ;;  %650 = vmatprep.subr.bf16.mxu1 %v690_v7 }
  0x1c   : > { %624 = vmatpush3.bf16.msra.mxu0 %v690_v7  ;;  %658 = vmatpush3.bf16.msra.mxu1 %v690_v7 }
  0x1d   : > { %625 = vmatprep.subr.bf16.mxu0 %v691_v8  ;;  %651 = vmatprep.subr.bf16.mxu1 %v691_v8 }
  0x20   : > { %626 = vmatpush3.bf16.msra.mxu0 %v691_v8  ;;  %659 = vmatpush3.bf16.msra.mxu1 %v691_v8 }
  0x21   : > { %627 = vmatprep.subr.bf16.mxu0 %v692_v9  ;;  %652 = vmatprep.subr.bf16.mxu1 %v692_v9 }
  0x24   : > { %628 = vmatpush3.bf16.msra.mxu0 %v692_v9  ;;  %660 = vmatpush3.bf16.msra.mxu1 %v692_v9 }
  0x27   : > { %630 = vmatmul.mubr.bf16.vlgmr.msra.gmra.mrb[0].mxu0 %v695_v10  ;;  %638 = vmatmul.mubr.bf16.vlgmr.msra.gmra.mrb[0].mxu1 %v696_v11 }
  0x28   : > { %633 = vmatprep.mubr.bf16.mxu0 %v697_v12  ;;  %641 = vmatprep.mubr.bf16.mxu1 %v698_v13 }
  0x2f   : > { %634 = vmatmul.mubr.bf16.gmra.mrb[4].mxu0 %v699_v14  ;;  %642 = vmatmul.mubr.bf16.gmra.mrb[4].mxu1 %v700_v15 }
  0xfa   : > { %v631_v17 = vpop.f32.mrb[0].mxu0  ;;  %v639_v18 = vpop.f32.mrb[0].mxu1 }
  0xfb   : > { %v454_v19 = vadd.f32 %v631_v17, %v594_v16  ;;  %v462_v20 = vadd.f32 %v639_v18, %v594_v16  ;;  %v382_v21 = vpop.f32.mrb[1].mxu0  ;;  %v414_v22 = vpop.f32.mrb[1].mxu1 }
  0xfc   : > { %v452_v23 = vadd.f32 %v594_v16, %v382_v21  ;;  %v460_v24 = vadd.f32 %v594_v16, %v414_v22  ;;  %v632_v25 = vpop.f32.mrb[2].mxu0  ;;  %v640_v26 = vpop.f32.mrb[2].mxu1 }
  0xfd   : > { %471 = vst.msk [vmem:[%s810_s19 + $0x10] sm:$0xff] %vm468_vm0, %v454_v19  ;;  %479 = vst.msk [vmem:[%s810_s19 + $0x50] sm:$0xff] %vm468_vm0, %v462_v20  ;;  %v455_v27 = vadd.f32 %v632_v25, %v594_v16  ;;  %v463_v28 = vadd.f32 %v640_v26, %v594_v16  ;;  %v385_v29 = vpop.f32.mrb[3].mxu0  ;;  %v417_v30 = vpop.f32.mrb[3].mxu1 }
  0xfe   : > { %469 = vst.msk [vmem:[%s810_s19] sm:$0xff] %vm468_vm0, %v452_v23  ;;  %477 = vst.msk [vmem:[%s810_s19 + $0x40] sm:$0xff] %vm468_vm0, %v460_v24  ;;  %v453_v31 = vadd.f32 %v594_v16, %v385_v29  ;;  %v461_v32 = vadd.f32 %v594_v16, %v417_v30 }
  0xff   : > { %472 = vst.msk [vmem:[%s810_s19 + $0x18] sm:$0xff] %vm468_vm0, %v455_v27  ;;  %480 = vst.msk [vmem:[%s810_s19 + $0x58] sm:$0xff] %vm468_vm0, %v463_v28 }
 0x100   : > { %470 = vst.msk [vmem:[%s810_s19 + $0x8] sm:$0xff] %vm468_vm0, %v453_v31  ;;  %478 = vst.msk [vmem:[%s810_s19 + $0x48] sm:$0xff] %vm468_vm0, %v461_v32 }
 0x102   : > { %v635_v33 = vpop.f32.mrb[4].mxu0  ;;  %v643_v34 = vpop.f32.mrb[4].mxu1 }
 0x103   : > { %v458_v35 = vadd.f32 %v635_v33, %v594_v16  ;;  %v466_v36 = vadd.f32 %v643_v34, %v594_v16  ;;  %v398_v37 = vpop.f32.mrb[5].mxu0  ;;  %v430_v38 = vpop.f32.mrb[5].mxu1 }
 0x104   : > { %v456_v39 = vadd.f32 %v594_v16, %v398_v37  ;;  %v464_v40 = vadd.f32 %v594_v16, %v430_v38  ;;  %v636_v41 = vpop.f32.mrb[6].mxu0  ;;  %v644_v42 = vpop.f32.mrb[6].mxu1 }
 0x105   : > { %475 = vst.msk [vmem:[%s810_s19 + $0x30] sm:$0xff] %vm468_vm0, %v458_v35  ;;  %483 = vst.msk [vmem:[%s810_s19 + $0x70] sm:$0xff] %vm468_vm0, %v466_v36  ;;  %v459_v43 = vadd.f32 %v636_v41, %v594_v16  ;;  %v467_v44 = vadd.f32 %v644_v42, %v594_v16  ;;  %v401_v45 = vpop.f32.mrb[7].mxu0  ;;  %v433_v46 = vpop.f32.mrb[7].mxu1 }
 0x106   : > { %473 = vst.msk [vmem:[%s810_s19 + $0x20] sm:$0xff] %vm468_vm0, %v456_v39  ;;  %481 = vst.msk [vmem:[%s810_s19 + $0x60] sm:$0xff] %vm468_vm0, %v464_v40  ;;  %v457_v47 = vadd.f32 %v594_v16, %v401_v45  ;;  %v465_v48 = vadd.f32 %v594_v16, %v433_v46 }
 0x107   : > { %476 = vst.msk [vmem:[%s810_s19 + $0x38] sm:$0xff] %vm468_vm0, %v459_v43  ;;  %484 = vst.msk [vmem:[%s810_s19 + $0x78] sm:$0xff] %vm468_vm0, %v467_v44 }
 0x108   : > { %474 = vst.msk [vmem:[%s810_s19 + $0x28] sm:$0xff] %vm468_vm0, %v457_v47  ;;  %482 = vst.msk [vmem:[%s810_s19 + $0x68] sm:$0xff] %vm468_vm0, %v465_v48 }
 0x109 PF: > { %s13_s14 = sadd.s32 1, %s723_s14   ;;  %s857_s12 = smov %s719_s13 }
 0x10a   : > { %p10_p5 = scmp.ge.s32.totalorder %s13_s14, 5   ;;  %s858_s13 = smov %s860_s15 }
 0x10c   :  { %12 = sbr.rel (!%p10_p5) target bundleno = 2 (0x2), region = 65 }

// kernel: _lambda_.45
= control target key start
LH: loop header
LB: loop body
LE: loop exit
PB: predicated region body
PF: predicated region fallthrough
CT: control target
= control target key end

     0   :  { %s817_s15 = smov 0   ;;  %s819_s16 = smov 0   ;;  %s902_s0 = inlined_call_operand.vmem [shape: bf16[128,128], index: 0, kind: input, shape index: {}]   ;;  %s903_s1 = inlined_call_operand.vmem [shape: bf16[128,128], index: 1, kind: input, shape index: {}]   ;;  %s904_s2 = inlined_call_operand.vmem [shape: f32[1,8], index: 2, kind: input, shape index: {}]   ;;  %s905_s3 = inlined_call_operand.vmem [shape: f32[128,8], index: 3, kind: input, shape index: {}]   ;;  %s906_s4 = inlined_call_operand.vmem [shape: f32[128,8], index: 4, kind: output, shape index: {}]  }
   0x1   :  { %s821_s17 = smov 0  }
   0x2 LB: > { %s26_s18 = sadd.s32 1, %s786_s16  ;;  %p618_p0 = scmp.ge.s32.totalorder %s790_s17, 1  ;;  %s790_s17 = sphi %s821_s17, %s14_s17   ;;  %s786_s16 = sphi %s819_s16, %s908_s16   ;;  %s782_s15 = sphi %s817_s15, %s907_s15  }
   0x3   : > { %p28_p1 = scmp.ge.s32.totalorder %s26_s18, 2  ;;  %p202_p2 = scmp.lt.s32.totalorder %s790_s17, 3 }
   0x5   : > { %s910_s18 = smov (%p28_p1, %s26_s18), 0  ;;  %p203_p3 = pnand %p618_p0, %p202_p2 }
   0x6   : > { %v724_v0 = vld [vmem:[%s903_s1] sm:$0xff] (!%p203_p3)   ;;  %s619_s21 = sshll.u32 (!%p203_p3), %s782_s15, 3  ;;  %v725_v1 = vld [vmem:[%s903_s1 + $0x8] sm:$0xff] (!%p203_p3)   ;;  %v726_v2 = vld [vmem:[%s903_s1 + $0x10] sm:$0xff] (!%p203_p3)   ;;  %vm509_vm0 = vcmask (!%p203_p3), 64512  }
   0x7   : > { %206 = sbr.rel (%p203_p3) target bundleno = 289 (0x121), region = 36  ;;  %p242_p4 = scmp.lt.s32.totalorder (!%p203_p3), %s619_s21, 15  ;;  %660 = vmatprep.subr.bf16.mxu0 (!%p203_p3), %v724_v0  ;;  %684 = vmatprep.subr.bf16.mxu1 (!%p203_p3), %v724_v0  ;;  %v727_v3 = vld [vmem:[%s903_s1 + $0x18] sm:$0xff] (!%p203_p3)   ;;  %v728_v6 = vld [vmem:[%s903_s1 + $0x20] sm:$0xff] (!%p203_p3)   ;;  %v729_v7 = vld [vmem:[%s903_s1 + $0x28] sm:$0xff] (!%p203_p3)  }
   0x8   : > { %661 = vmatpush3.bf16.msra.mxu0 (!%p203_p3), %v724_v0  ;;  %692 = vmatpush3.bf16.msra.mxu1 (!%p203_p3), %v724_v0  ;;  %v730_v8 = vld [vmem:[%s903_s1 + $0x30] sm:$0xff] (!%p203_p3)   ;;  %v731_v9 = vld [vmem:[%s903_s1 + $0x38] sm:$0xff] (!%p203_p3)   ;;  %v637_v17 = vld [vmem:[%s904_s2] ss:$0 sm:$0xff] (!%p203_p3) }
   0x9   : > { %662 = vmatprep.subr.bf16.mxu0 (!%p203_p3), %v725_v1  ;;  %685 = vmatprep.subr.bf16.mxu1 (!%p203_p3), %v725_v1 }
   0xc   : > { %663 = vmatpush3.bf16.msra.mxu0 (!%p203_p3), %v725_v1  ;;  %693 = vmatpush3.bf16.msra.mxu1 (!%p203_p3), %v725_v1 }
   0xd   : > { %664 = vmatprep.subr.bf16.mxu0 (!%p203_p3), %v726_v2  ;;  %686 = vmatprep.subr.bf16.mxu1 (!%p203_p3), %v726_v2 }
   0xe   : > { %s912_s21 = smov (!%p242_p4, %s619_s21), 15 }
   0xf   : > { %s620_s26 = sshll.u32 %s912_s21, 2  ;;  %s622_s14 = sshll.u32 %s912_s21, 3 }
  0x10   : > { %s850_s29 = scalar_lea.vmem %s902_s0, %s620_s26  ;;  %665 = vmatpush3.bf16.msra.mxu0 %v726_v2  ;;  %694 = vmatpush3.bf16.msra.mxu1 %v726_v2  ;;  %s260_s20 = scalar_lea.vmem %s905_s3, %s622_s14 }
  0x11   : > { %v732_v4 = vld [vmem:[%s850_s29] sm:$0xff]   ;;  %v733_v5 = vld [vmem:[%s850_s29 + $0x10] sm:$0xff]   ;;  %666 = vmatprep.subr.bf16.mxu0 %v727_v3  ;;  %687 = vmatprep.subr.bf16.mxu1 %v727_v3  ;;  %v734_v10 = vld [vmem:[%s850_s29 + $0x8] sm:$0xff]   ;;  %s266_s26 = scalar_lea.vmem %s906_s4, %s622_s14 }
  0x12   : > { %676 = vmatprep.mubr.bf16.mxu0 %v732_v4  ;;  %680 = vmatprep.mubr.bf16.mxu1 %v733_v5  ;;  %v735_v11 = vld [vmem:[%s850_s29 + $0x18] sm:$0xff]   ;;  %v432_v12 = vld [vmem:[%s260_s20 + $0x10] sm:$0xff]  ;;  %v430_v14 = vld [vmem:[%s260_s20] sm:$0xff] }
  0x13   : > { %v436_v13 = vld [vmem:[%s260_s20 + $0x30] sm:$0xff]  ;;  %v434_v15 = vld [vmem:[%s260_s20 + $0x20] sm:$0xff]  ;;  %v433_v19 = vld [vmem:[%s260_s20 + $0x18] sm:$0xff] }
  0x14   : > { %667 = vmatpush3.bf16.msra.mxu0 %v727_v3  ;;  %695 = vmatpush3.bf16.msra.mxu1 %v727_v3  ;;  %v437_v20 = vld [vmem:[%s260_s20 + $0x38] sm:$0xff]  ;;  %v431_v25 = vld [vmem:[%s260_s20 + $0x8] sm:$0xff] }
  0x15   : > { %668 = vmatprep.subr.bf16.mxu0 %v728_v6  ;;  %688 = vmatprep.subr.bf16.mxu1 %v728_v6  ;;  %v435_v26 = vld [vmem:[%s260_s20 + $0x28] sm:$0xff] }
  0x18   : > { %669 = vmatpush3.bf16.msra.mxu0 %v728_v6  ;;  %696 = vmatpush3.bf16.msra.mxu1 %v728_v6 }
  0x19   : > { %670 = vmatprep.subr.bf16.mxu0 %v729_v7  ;;  %689 = vmatprep.subr.bf16.mxu1 %v729_v7 }
  0x1c   : > { %671 = vmatpush3.bf16.msra.mxu0 %v729_v7  ;;  %697 = vmatpush3.bf16.msra.mxu1 %v729_v7 }
  0x1d   : > { %672 = vmatprep.subr.bf16.mxu0 %v730_v8  ;;  %690 = vmatprep.subr.bf16.mxu1 %v730_v8 }
  0x20   : > { %673 = vmatpush3.bf16.msra.mxu0 %v730_v8  ;;  %698 = vmatpush3.bf16.msra.mxu1 %v730_v8 }
  0x21   : > { %674 = vmatprep.subr.bf16.mxu0 %v731_v9  ;;  %691 = vmatprep.subr.bf16.mxu1 %v731_v9 }
  0x24   : > { %675 = vmatpush3.bf16.msra.mxu0 %v731_v9  ;;  %699 = vmatpush3.bf16.msra.mxu1 %v731_v9 }
  0x27   : > { %677 = vmatmul.mubr.bf16.vlgmr.msra.gmra.mrb[0].mxu0 %v734_v10  ;;  %681 = vmatmul.mubr.bf16.vlgmr.msra.gmra.mrb[0].mxu1 %v735_v11 }
  0xfa   : > { %v678_v16 = vpop.f32.mrb[0].mxu0  ;;  %v682_v18 = vpop.f32.mrb[0].mxu1 }
  0xfb   : > { %v440_v21 = vadd.f32 %v678_v16, %v432_v12  ;;  %v444_v22 = vadd.f32 %v682_v18, %v436_v13  ;;  %v399_v23 = vpop.f32.mrb[1].mxu0  ;;  %v415_v24 = vpop.f32.mrb[1].mxu1 }
  0xfc   : > { %v438_v27 = vadd.f32 %v430_v14, %v399_v23  ;;  %v442_v28 = vadd.f32 %v434_v15, %v415_v24  ;;  %v679_v29 = vpop.f32.mrb[2].mxu0  ;;  %v683_v30 = vpop.f32.mrb[2].mxu1 }
  0xfd   : > { %v455_v31 = vadd.f32 %v637_v17, %v440_v21  ;;  %v459_v32 = vadd.f32 %v637_v17, %v444_v22  ;;  %v441_v33 = vadd.f32 %v679_v29, %v433_v19  ;;  %v445_v34 = vadd.f32 %v683_v30, %v437_v20  ;;  %v402_v35 = vpop.f32.mrb[3].mxu0  ;;  %v418_v36 = vpop.f32.mrb[3].mxu1 }
  0xfe   : > { %v453_v37 = vadd.f32 %v637_v17, %v438_v27  ;;  %v457_v38 = vadd.f32 %v637_v17, %v442_v28  ;;  %v439_v39 = vadd.f32 %v431_v25, %v402_v35  ;;  %v443_v40 = vadd.f32 %v435_v26, %v418_v36 }
  0xff   : > { %v640_v41 = vmul.f32 -1.442695, %v455_v31  ;;  %v644_v42 = vmul.f32 -1.442695, %v459_v32  ;;  %v456_v43 = vadd.f32 %v637_v17, %v441_v33  ;;  %v460_v44 = vadd.f32 %v637_v17, %v445_v34 }
 0x100   : > { %v638_v45 = vmul.f32 -1.442695, %v453_v37  ;;  %v642_v46 = vmul.f32 -1.442695, %v457_v38  ;;  %v454_v47 = vadd.f32 %v637_v17, %v439_v39  ;;  %v458_v48 = vadd.f32 %v637_v17, %v443_v40 }
 0x101   : > { %736 = vpow2.f32 %v640_v41  ;;  %v641_v49 = vmul.f32 -1.442695, %v456_v43  ;;  %v645_v50 = vmul.f32 -1.442695, %v460_v44 }
 0x102   : > { %738 = vpow2.f32 %v644_v42  ;;  %v639_v51 = vmul.f32 -1.442695, %v454_v47  ;;  %v643_v52 = vmul.f32 -1.442695, %v458_v48 }
 0x103   : > { %740 = vpow2.f32 %v638_v45 }
 0x104   : > { %742 = vpow2.f32 %v642_v46 }
 0x105   : > { %744 = vpow2.f32 %v641_v49 }
 0x106   : > { %746 = vpow2.f32 %v645_v50 }
 0x107   : > { %748 = vpow2.f32 %v639_v51 }
 0x108   : > { %750 = vpow2.f32 %v643_v52 }
 0x10b   : > { %v737_v53 = vpop.eup %736 }
 0x10c   : > { %v739_v54 = vpop.eup %738  ;;  %v487_v55 = vadd.f32 1.0, %v737_v53 }
 0x10d   : > { %v741_v56 = vpop.eup %740  ;;  %v491_v57 = vadd.f32 1.0, %v739_v54 }
 0x10e   : > { %v743_v58 = vpop.eup %742  ;;  %752 = vrcp.f32 %v487_v55  ;;  %v485_v59 = vadd.f32 1.0, %v741_v56 }
 0x10f   : > { %v745_v60 = vpop.eup %744  ;;  %754 = vrcp.f32 %v491_v57  ;;  %v489_v61 = vadd.f32 1.0, %v743_v58 }
 0x110   : > { %v747_v62 = vpop.eup %746  ;;  %756 = vrcp.f32 %v485_v59  ;;  %v488_v63 = vadd.f32 1.0, %v745_v60 }
 0x111   : > { %v749_v0 = vpop.eup %748  ;;  %758 = vrcp.f32 %v489_v61  ;;  %v492_v1 = vadd.f32 1.0, %v747_v62 }
 0x112   : > { %v751_v2 = vpop.eup %750  ;;  %760 = vrcp.f32 %v488_v63  ;;  %v486_v3 = vadd.f32 1.0, %v749_v0 }
 0x113   : > { %762 = vrcp.f32 %v492_v1  ;;  %v490_v4 = vadd.f32 1.0, %v751_v2 }
 0x114   : > { %764 = vrcp.f32 %v486_v3 }
 0x115   : > { %766 = vrcp.f32 %v490_v4 }
 0x118   : > { %v753_v5 = vpop.eup %752 }
 0x119   : > { %v755_v6 = vpop.eup %754  ;;  %512 = vst.msk [vmem:[%s266_s26 + $0x10] sm:$0xff] %vm509_vm0, %v753_v5 }
 0x11a   : > { %v757_v7 = vpop.eup %756  ;;  %516 = vst.msk [vmem:[%s266_s26 + $0x30] sm:$0xff] %vm509_vm0, %v755_v6 }
 0x11b   : > { %v759_v8 = vpop.eup %758  ;;  %510 = vst.msk [vmem:[%s266_s26] sm:$0xff] %vm509_vm0, %v757_v7 }
 0x11c   : > { %v761_v9 = vpop.eup %760  ;;  %514 = vst.msk [vmem:[%s266_s26 + $0x20] sm:$0xff] %vm509_vm0, %v759_v8 }
 0x11d   : > { %v763_v10 = vpop.eup %762  ;;  %513 = vst.msk [vmem:[%s266_s26 + $0x18] sm:$0xff] %vm509_vm0, %v761_v9 }
 0x11e   : > { %v765_v11 = vpop.eup %764  ;;  %517 = vst.msk [vmem:[%s266_s26 + $0x38] sm:$0xff] %vm509_vm0, %v763_v10 }
 0x11f   : > { %v767_v12 = vpop.eup %766  ;;  %511 = vst.msk [vmem:[%s266_s26 + $0x8] sm:$0xff] %vm509_vm0, %v765_v11 }
 0x120   : > { %515 = vst.msk [vmem:[%s266_s26 + $0x28] sm:$0xff] %vm509_vm0, %v767_v12 }
 0x121 PF: > { %s14_s17 = sadd.s32 1, %s790_s17   ;;  %s907_s15 = smov %s786_s16 }
 0x122   : > { %p11_p5 = scmp.ge.s32.totalorder %s14_s17, 4   ;;  %s908_s16 = smov %s910_s18 }
 0x124   :  { %13 = sbr.rel (!%p11_p5) target bundleno = 2 (0x2), region = 72 }

// kernel: _lambda_.44
= control target key start
LH: loop header
LB: loop body
LE: loop exit
PB: predicated region body
PF: predicated region fallthrough
CT: control target
= control target key end

     0   :  { %s745_s12 = smov 0   ;;  %s747_s13 = smov 0   ;;  %s853_s0 = inlined_call_operand.vmem [shape: bf16[384,128], index: 0, kind: input, shape index: {}]   ;;  %s854_s1 = inlined_call_operand.vmem [shape: bf16[128,128], index: 1, kind: input, shape index: {}]   ;;  %s855_s2 = inlined_call_operand.vmem [shape: f32[1,4], index: 2, kind: input, shape index: {}]   ;;  %s856_s3 = inlined_call_operand.vmem [shape: f32[384,4], index: 3, kind: output, shape index: {}]  }
   0x1   :  { %s749_s14 = smov 0  }
   0x2 LB: > { %s25_s15 = sadd.s32 1, %s719_s13  ;;  %p573_p0 = scmp.ge.s32.totalorder %s723_s14, 1  ;;  %s723_s14 = sphi %s749_s14, %s13_s14   ;;  %s719_s13 = sphi %s747_s13, %s858_s13   ;;  %s715_s12 = sphi %s745_s12, %s857_s12  }
   0x3   : > { %p27_p1 = scmp.ge.s32.totalorder %s25_s15, 3  ;;  %p166_p2 = scmp.lt.s32.totalorder %s723_s14, 4 }
   0x5   : > { %s860_s15 = smov (%p27_p1, %s25_s15), 0  ;;  %p167_p3 = pnand %p573_p0, %p166_p2 }
   0x6   : > { %v685_v0 = vld [vmem:[%s854_s1] sm:$0xff] (!%p167_p3)   ;;  %s574_s18 = sshll.u32 (!%p167_p3), %s715_s12, 4  ;;  %v686_v1 = vld [vmem:[%s854_s1 + $0x8] sm:$0xff] (!%p167_p3)   ;;  %v687_v2 = vld [vmem:[%s854_s1 + $0x10] sm:$0xff] (!%p167_p3)   ;;  %vm468_vm0 = vcmask (!%p167_p3), 31744  }
   0x7   : > { %170 = sbr.rel (%p167_p3) target bundleno = 265 (0x109), region = 32  ;;  %p199_p4 = scmp.lt.s32.totalorder (!%p167_p3), %s574_s18, 47  ;;  %613 = vmatprep.subr.bf16.mxu0 (!%p167_p3), %v685_v0  ;;  %645 = vmatprep.subr.bf16.mxu1 (!%p167_p3), %v685_v0  ;;  %v688_v3 = vld [vmem:[%s854_s1 + $0x18] sm:$0xff] (!%p167_p3)   ;;  %v689_v6 = vld [vmem:[%s854_s1 + $0x20] sm:$0xff] (!%p167_p3)   ;;  %v690_v7 = vld [vmem:[%s854_s1 + $0x28] sm:$0xff] (!%p167_p3)  }
   0x8   : > { %614 = vmatpush3.bf16.msra.mxu0 (!%p167_p3), %v685_v0  ;;  %653 = vmatpush3.bf16.msra.mxu1 (!%p167_p3), %v685_v0  ;;  %v691_v8 = vld [vmem:[%s854_s1 + $0x30] sm:$0xff] (!%p167_p3)   ;;  %v692_v9 = vld [vmem:[%s854_s1 + $0x38] sm:$0xff] (!%p167_p3)   ;;  %v594_v16 = vld [vmem:[%s855_s2] ss:$0 sm:$0xff] (!%p167_p3) }
   0x9   : > { %615 = vmatprep.subr.bf16.mxu0 (!%p167_p3), %v686_v1  ;;  %646 = vmatprep.subr.bf16.mxu1 (!%p167_p3), %v686_v1 }
   0xc   : > { %616 = vmatpush3.bf16.msra.mxu0 (!%p167_p3), %v686_v1  ;;  %654 = vmatpush3.bf16.msra.mxu1 (!%p167_p3), %v686_v1 }
   0xd   : > { %617 = vmatprep.subr.bf16.mxu0 (!%p167_p3), %v687_v2  ;;  %647 = vmatprep.subr.bf16.mxu1 (!%p167_p3), %v687_v2 }
   0xe   : > { %s862_s18 = smov (!%p199_p4, %s574_s18), 47 }
   0xf   : > { %s575_s23 = sshll.u32 %s862_s18, 2  ;;  %s577_s10 = sshll.u32 %s862_s18, 3 }
  0x10   : > { %s778_s26 = scalar_lea.vmem %s853_s0, %s575_s23  ;;  %618 = vmatpush3.bf16.msra.mxu0 %v687_v2  ;;  %655 = vmatpush3.bf16.msra.mxu1 %v687_v2  ;;  %s810_s19 = scalar_lea.vmem %s856_s3, %s577_s10 }
  0x11   : > { %v693_v4 = vld [vmem:[%s778_s26] sm:$0xff]   ;;  %619 = vmatprep.subr.bf16.mxu0 %v688_v3  ;;  %648 = vmatprep.subr.bf16.mxu1 %v688_v3  ;;  %v695_v10 = vld [vmem:[%s778_s26 + $0x8] sm:$0xff]   ;;  %v697_v12 = vld [vmem:[%s778_s26 + $0x10] sm:$0xff]  }
  0x12   : > { %v694_v5 = vld [vmem:[%s778_s26 + $0x20] sm:$0xff]   ;;  %629 = vmatprep.mubr.bf16.mxu0 %v693_v4  ;;  %v696_v11 = vld [vmem:[%s778_s26 + $0x28] sm:$0xff]   ;;  %v698_v13 = vld [vmem:[%s778_s26 + $0x30] sm:$0xff]  }
  0x13   : > { %637 = vmatprep.mubr.bf16.mxu1 %v694_v5  ;;  %v699_v14 = vld [vmem:[%s778_s26 + $0x18] sm:$0xff]  }
  0x14   : > { %620 = vmatpush3.bf16.msra.mxu0 %v688_v3  ;;  %656 = vmatpush3.bf16.msra.mxu1 %v688_v3  ;;  %v700_v15 = vld [vmem:[%s778_s26 + $0x38] sm:$0xff]  }
  0x15   : > { %621 = vmatprep.subr.bf16.mxu0 %v689_v6  ;;  %649 = vmatprep.subr.bf16.mxu1 %v689_v6 }
  0x18   : > { %622 = vmatpush3.bf16.msra.mxu0 %v689_v6  ;;  %657 = vmatpush3.bf16.msra.mxu1 %v689_v6 }
  0x19   : > { %623 = vmatprep.subr.bf16.mxu0 %v690_v7  ;;  %650 = vmatprep.subr.bf16.mxu1 %v690_v7 }
  0x1c   : > { %624 = vmatpush3.bf16.msra.mxu0 %v690_v7  ;;  %658 = vmatpush3.bf16.msra.mxu1 %v690_v7 }
  0x1d   : > { %625 = vmatprep.subr.bf16.mxu0 %v691_v8  ;;  %651 = vmatprep.subr.bf16.mxu1 %v691_v8 }
  0x20   : > { %626 = vmatpush3.bf16.msra.mxu0 %v691_v8  ;;  %659 = vmatpush3.bf16.msra.mxu1 %v691_v8 }
  0x21   : > { %627 = vmatprep.subr.bf16.mxu0 %v692_v9  ;;  %652 = vmatprep.subr.bf16.mxu1 %v692_v9 }
  0x24   : > { %628 = vmatpush3.bf16.msra.mxu0 %v692_v9  ;;  %660 = vmatpush3.bf16.msra.mxu1 %v692_v9 }
  0x27   : > { %630 = vmatmul.mubr.bf16.vlgmr.msra.gmra.mrb[0].mxu0 %v695_v10  ;;  %638 = vmatmul.mubr.bf16.vlgmr.msra.gmra.mrb[0].mxu1 %v696_v11 }
  0x28   : > { %633 = vmatprep.mubr.bf16.mxu0 %v697_v12  ;;  %641 = vmatprep.mubr.bf16.mxu1 %v698_v13 }
  0x2f   : > { %634 = vmatmul.mubr.bf16.gmra.mrb[4].mxu0 %v699_v14  ;;  %642 = vmatmul.mubr.bf16.gmra.mrb[4].mxu1 %v700_v15 }
  0xfa   : > { %v631_v17 = vpop.f32.mrb[0].mxu0  ;;  %v639_v18 = vpop.f32.mrb[0].mxu1 }
  0xfb   : > { %v454_v19 = vadd.f32 %v631_v17, %v594_v16  ;;  %v462_v20 = vadd.f32 %v639_v18, %v594_v16  ;;  %v382_v21 = vpop.f32.mrb[1].mxu0  ;;  %v414_v22 = vpop.f32.mrb[1].mxu1 }
  0xfc   : > { %v452_v23 = vadd.f32 %v594_v16, %v382_v21  ;;  %v460_v24 = vadd.f32 %v594_v16, %v414_v22  ;;  %v632_v25 = vpop.f32.mrb[2].mxu0  ;;  %v640_v26 = vpop.f32.mrb[2].mxu1 }
  0xfd   : > { %471 = vst.msk [vmem:[%s810_s19 + $0x10] sm:$0xff] %vm468_vm0, %v454_v19  ;;  %479 = vst.msk [vmem:[%s810_s19 + $0x50] sm:$0xff] %vm468_vm0, %v462_v20  ;;  %v455_v27 = vadd.f32 %v632_v25, %v594_v16  ;;  %v463_v28 = vadd.f32 %v640_v26, %v594_v16  ;;  %v385_v29 = vpop.f32.mrb[3].mxu0  ;;  %v417_v30 = vpop.f32.mrb[3].mxu1 }
  0xfe   : > { %469 = vst.msk [vmem:[%s810_s19] sm:$0xff] %vm468_vm0, %v452_v23  ;;  %477 = vst.msk [vmem:[%s810_s19 + $0x40] sm:$0xff] %vm468_vm0, %v460_v24  ;;  %v453_v31 = vadd.f32 %v594_v16, %v385_v29  ;;  %v461_v32 = vadd.f32 %v594_v16, %v417_v30 }
  0xff   : > { %472 = vst.msk [vmem:[%s810_s19 + $0x18] sm:$0xff] %vm468_vm0, %v455_v27  ;;  %480 = vst.msk [vmem:[%s810_s19 + $0x58] sm:$0xff] %vm468_vm0, %v463_v28 }
 0x100   : > { %470 = vst.msk [vmem:[%s810_s19 + $0x8] sm:$0xff] %vm468_vm0, %v453_v31  ;;  %478 = vst.msk [vmem:[%s810_s19 + $0x48] sm:$0xff] %vm468_vm0, %v461_v32 }
 0x102   : > { %v635_v33 = vpop.f32.mrb[4].mxu0  ;;  %v643_v34 = vpop.f32.mrb[4].mxu1 }
 0x103   : > { %v458_v35 = vadd.f32 %v635_v33, %v594_v16  ;;  %v466_v36 = vadd.f32 %v643_v34, %v594_v16  ;;  %v398_v37 = vpop.f32.mrb[5].mxu0  ;;  %v430_v38 = vpop.f32.mrb[5].mxu1 }
 0x104   : > { %v456_v39 = vadd.f32 %v594_v16, %v398_v37  ;;  %v464_v40 = vadd.f32 %v594_v16, %v430_v38  ;;  %v636_v41 = vpop.f32.mrb[6].mxu0  ;;  %v644_v42 = vpop.f32.mrb[6].mxu1 }
 0x105   : > { %475 = vst.msk [vmem:[%s810_s19 + $0x30] sm:$0xff] %vm468_vm0, %v458_v35  ;;  %483 = vst.msk [vmem:[%s810_s19 + $0x70] sm:$0xff] %vm468_vm0, %v466_v36  ;;  %v459_v43 = vadd.f32 %v636_v41, %v594_v16  ;;  %v467_v44 = vadd.f32 %v644_v42, %v594_v16  ;;  %v401_v45 = vpop.f32.mrb[7].mxu0  ;;  %v433_v46 = vpop.f32.mrb[7].mxu1 }
 0x106   : > { %473 = vst.msk [vmem:[%s810_s19 + $0x20] sm:$0xff] %vm468_vm0, %v456_v39  ;;  %481 = vst.msk [vmem:[%s810_s19 + $0x60] sm:$0xff] %vm468_vm0, %v464_v40  ;;  %v457_v47 = vadd.f32 %v594_v16, %v401_v45  ;;  %v465_v48 = vadd.f32 %v594_v16, %v433_v46 }
 0x107   : > { %476 = vst.msk [vmem:[%s810_s19 + $0x38] sm:$0xff] %vm468_vm0, %v459_v43  ;;  %484 = vst.msk [vmem:[%s810_s19 + $0x78] sm:$0xff] %vm468_vm0, %v467_v44 }
 0x108   : > { %474 = vst.msk [vmem:[%s810_s19 + $0x28] sm:$0xff] %vm468_vm0, %v457_v47  ;;  %482 = vst.msk [vmem:[%s810_s19 + $0x68] sm:$0xff] %vm468_vm0, %v465_v48 }
 0x109 PF: > { %s13_s14 = sadd.s32 1, %s723_s14   ;;  %s857_s12 = smov %s719_s13 }
 0x10a   : > { %p10_p5 = scmp.ge.s32.totalorder %s13_s14, 5   ;;  %s858_s13 = smov %s860_s15 }
 0x10c   :  { %12 = sbr.rel (!%p10_p5) target bundleno = 2 (0x2), region = 65 }

// kernel: _lambda_.46
= control target key start
LH: loop header
LB: loop body
LE: loop exit
PB: predicated region body
PF: predicated region fallthrough
CT: control target
= control target key end

     0   :  { %s921_s21 = smov 0   ;;  %s923_s22 = smov 0   ;;  %s1069_s0 = inlined_call_operand.vmem [shape: bf16[128,128], index: 0, kind: input, shape index: {}]   ;;  %s1070_s1 = inlined_call_operand.vmem [shape: bf16[128,128], index: 1, kind: input, shape index: {}]   ;;  %s1071_s2 = inlined_call_operand.vmem [shape: f32[1,4], index: 2, kind: input, shape index: {}]   ;;  %s1072_s3 = inlined_call_operand.vmem [shape: f32[128,4], index: 3, kind: input, shape index: {}]   ;;  %s1073_s4 = inlined_call_operand.vmem [shape: f32[128,4], index: 4, kind: input, shape index: {}]   ;;  %s1074_s5 = inlined_call_operand.vmem [shape: f32[128,4], index: 5, kind: input, shape index: {}]   ;;  %s1075_s6 = inlined_call_operand.vmem [shape: f32[128,4], index: 6, kind: output, shape index: {}]  }
   0x1   :  { %s925_s23 = smov 0  }
   0x2 LB: > { %s28_s24 = sadd.s32 1, %s880_s22  ;;  %p748_p0 = scmp.ge.s32.totalorder %s884_s23, 1  ;;  %s884_s23 = sphi %s925_s23, %s16_s23   ;;  %s880_s22 = sphi %s923_s22, %s1077_s22   ;;  %s876_s21 = sphi %s921_s21, %s1076_s21  }
   0x3   : > { %p30_p1 = scmp.ge.s32.totalorder %s28_s24, 2  ;;  %p274_p2 = scmp.lt.s32.totalorder %s884_s23, 3 }
   0x5   : > { %s1079_s24 = smov (%p30_p1, %s28_s24), 0  ;;  %p275_p3 = pnand %p748_p0, %p274_p2 }
   0x6   : > { %v850_v0 = vld [vmem:[%s1070_s1] sm:$0xff] (!%p275_p3)   ;;  %s749_s27 = sshll.u32 (!%p275_p3), %s876_s21, 3  ;;  %v851_v1 = vld [vmem:[%s1070_s1 + $0x8] sm:$0xff] (!%p275_p3)   ;;  %v852_v2 = vld [vmem:[%s1070_s1 + $0x10] sm:$0xff] (!%p275_p3)   ;;  %vm615_vm0 = vcmask (!%p275_p3), 31744  }
   0x7   : > { %278 = sbr.rel (%p275_p3) target bundleno = 265 (0x109), region = 44  ;;  %p328_p4 = scmp.lt.s32.totalorder (!%p275_p3), %s749_s27, 15  ;;  %786 = vmatprep.subr.bf16.mxu0 (!%p275_p3), %v850_v0  ;;  %810 = vmatprep.subr.bf16.mxu1 (!%p275_p3), %v850_v0  ;;  %v853_v3 = vld [vmem:[%s1070_s1 + $0x18] sm:$0xff] (!%p275_p3)   ;;  %v854_v6 = vld [vmem:[%s1070_s1 + $0x20] sm:$0xff] (!%p275_p3)   ;;  %v855_v7 = vld [vmem:[%s1070_s1 + $0x28] sm:$0xff] (!%p275_p3)  }
   0x8   : > { %787 = vmatpush3.bf16.msra.mxu0 (!%p275_p3), %v850_v0  ;;  %818 = vmatpush3.bf16.msra.mxu1 (!%p275_p3), %v850_v0  ;;  %v856_v8 = vld [vmem:[%s1070_s1 + $0x30] sm:$0xff] (!%p275_p3)   ;;  %v857_v9 = vld [vmem:[%s1070_s1 + $0x38] sm:$0xff] (!%p275_p3)   ;;  %v771_v27 = vld [vmem:[%s1071_s2] ss:$0 sm:$0xff] (!%p275_p3) }
   0x9   : > { %788 = vmatprep.subr.bf16.mxu0 (!%p275_p3), %v851_v1  ;;  %811 = vmatprep.subr.bf16.mxu1 (!%p275_p3), %v851_v1 }
   0xc   : > { %789 = vmatpush3.bf16.msra.mxu0 (!%p275_p3), %v851_v1  ;;  %819 = vmatpush3.bf16.msra.mxu1 (!%p275_p3), %v851_v1 }
   0xd   : > { %790 = vmatprep.subr.bf16.mxu0 (!%p275_p3), %v852_v2  ;;  %812 = vmatprep.subr.bf16.mxu1 (!%p275_p3), %v852_v2 }
   0xe   : > { %s1081_s27 = smov (!%p328_p4, %s749_s27), 15 }
   0xf   : > { %s750_s8 = sshll.u32 %s1081_s27, 2  ;;  %s976_s25 = sshll.u32 %s1081_s27, 3 }
  0x10   : > { %s954_s11 = scalar_lea.vmem %s1069_s0, %s750_s8  ;;  %791 = vmatpush3.bf16.msra.mxu0 %v852_v2  ;;  %820 = vmatpush3.bf16.msra.mxu1 %v852_v2  ;;  %s982_s29 = scalar_lea.vmem %s1074_s5, %s976_s25 }
  0x11   : > { %v858_v4 = vld [vmem:[%s954_s11] sm:$0xff]   ;;  %v859_v5 = vld [vmem:[%s954_s11 + $0x10] sm:$0xff]   ;;  %792 = vmatprep.subr.bf16.mxu0 %v853_v3  ;;  %813 = vmatprep.subr.bf16.mxu1 %v853_v3  ;;  %v860_v10 = vld [vmem:[%s954_s11 + $0x8] sm:$0xff]   ;;  %s352_s8 = scalar_lea.vmem %s1073_s4, %s976_s25  ;;  %s992_s10 = scalar_lea.vmem %s1072_s3, %s976_s25 }
  0x12   : > { %802 = vmatprep.mubr.bf16.mxu0 %v858_v4  ;;  %806 = vmatprep.mubr.bf16.mxu1 %v859_v5  ;;  %v861_v11 = vld [vmem:[%s954_s11 + $0x18] sm:$0xff]   ;;  %v994_v12 = vld [vmem:[%s352_s8 + $0x10] sm:$0xff]  ;;  %v1000_v16 = vld [vmem:[%s352_s8] sm:$0xff]  ;;  %s364_s15 = scalar_lea.vmem %s1075_s6, %s976_s25 }
  0x13   : > { %v577_v13 = vld [vmem:[%s982_s29 + $0x10] sm:$0xff]  ;;  %v1002_v17 = vld [vmem:[%s352_s8 + $0x20] sm:$0xff]  ;;  %v1007_v21 = vld [vmem:[%s352_s8 + $0x18] sm:$0xff]  ;;  %v593_v23 = vsub.f32 1.0, %v994_v12  ;;  %v591_v31 = vsub.f32 1.0, %v1000_v16 }
  0x14   : > { %793 = vmatpush3.bf16.msra.mxu0 %v853_v3  ;;  %821 = vmatpush3.bf16.msra.mxu1 %v853_v3  ;;  %v997_v14 = vld [vmem:[%s352_s8 + $0x30] sm:$0xff]  ;;  %v575_v20 = vld [vmem:[%s982_s29] sm:$0xff]  ;;  %v1009_v22 = vld [vmem:[%s352_s8 + $0x38] sm:$0xff]  ;;  %v1020_v28 = vmul.f32 %v577_v13, %v994_v12  ;;  %v595_v32 = vsub.f32 1.0, %v1002_v17  ;;  %v594_v38 = vsub.f32 1.0, %v1007_v21 }
  0x15   : > { %794 = vmatprep.subr.bf16.mxu0 %v854_v6  ;;  %814 = vmatprep.subr.bf16.mxu1 %v854_v6  ;;  %v581_v15 = vld [vmem:[%s982_s29 + $0x30] sm:$0xff]  ;;  %v579_v24 = vld [vmem:[%s982_s29 + $0x20] sm:$0xff]  ;;  %v578_v25 = vld [vmem:[%s982_s29 + $0x18] sm:$0xff]  ;;  %v597_v29 = vsub.f32 1.0, %v997_v14  ;;  %v583_v36 = vmul.f32 %v575_v20, %v1000_v16  ;;  %v598_v39 = vsub.f32 1.0, %v1009_v22 }
  0x16   : > { %v530_v18 = vld [vmem:[%s992_s10 + $0x10] sm:$0xff]  ;;  %v1014_v26 = vld [vmem:[%s352_s8 + $0x8] sm:$0xff]  ;;  %v528_v30 = vld [vmem:[%s992_s10] sm:$0xff]  ;;  %v589_v35 = vmul.f32 %v581_v15, %v997_v14  ;;  %v587_v44 = vmul.f32 %v579_v24, %v1002_v17  ;;  %v586_v46 = vmul.f32 %v578_v25, %v1007_v21 }
  0x17   : > { %v534_v19 = vld [vmem:[%s992_s10 + $0x30] sm:$0xff]  ;;  %v582_v33 = vld [vmem:[%s982_s29 + $0x38] sm:$0xff]  ;;  %v1027_v34 = vld [vmem:[%s352_s8 + $0x28] sm:$0xff]  ;;  %v592_v48 = vsub.f32 1.0, %v1014_v26 }
  0x18   : > { %795 = vmatpush3.bf16.msra.mxu0 %v854_v6  ;;  %822 = vmatpush3.bf16.msra.mxu1 %v854_v6  ;;  %v532_v37 = vld [vmem:[%s992_s10 + $0x20] sm:$0xff]  ;;  %v576_v40 = vld [vmem:[%s982_s29 + $0x8] sm:$0xff]  ;;  %v531_v45 = vld [vmem:[%s992_s10 + $0x18] sm:$0xff]  ;;  %v590_v53 = vmul.f32 %v582_v33, %v1009_v22  ;;  %v596_v56 = vsub.f32 1.0, %v1027_v34 }
  0x19   : > { %796 = vmatprep.subr.bf16.mxu0 %v855_v7  ;;  %815 = vmatprep.subr.bf16.mxu1 %v855_v7  ;;  %v580_v41 = vld [vmem:[%s982_s29 + $0x28] sm:$0xff]  ;;  %v535_v47 = vld [vmem:[%s992_s10 + $0x38] sm:$0xff]  ;;  %v584_v61 = vmul.f32 %v576_v40, %v1014_v26 }
  0x1a   : > { %v529_v54 = vld [vmem:[%s992_s10 + $0x8] sm:$0xff]  ;;  %v588_v62 = vmul.f32 %v580_v41, %v1027_v34 }
  0x1b   : > { %v533_v55 = vld [vmem:[%s992_s10 + $0x28] sm:$0xff] }
  0x1c   : > { %797 = vmatpush3.bf16.msra.mxu0 %v855_v7  ;;  %823 = vmatpush3.bf16.msra.mxu1 %v855_v7 }
  0x1d   : > { %798 = vmatprep.subr.bf16.mxu0 %v856_v8  ;;  %816 = vmatprep.subr.bf16.mxu1 %v856_v8 }
  0x20   : > { %799 = vmatpush3.bf16.msra.mxu0 %v856_v8  ;;  %824 = vmatpush3.bf16.msra.mxu1 %v856_v8 }
  0x21   : > { %800 = vmatprep.subr.bf16.mxu0 %v857_v9  ;;  %817 = vmatprep.subr.bf16.mxu1 %v857_v9 }
  0x24   : > { %801 = vmatpush3.bf16.msra.mxu0 %v857_v9  ;;  %825 = vmatpush3.bf16.msra.mxu1 %v857_v9 }
  0x27   : > { %803 = vmatmul.mubr.bf16.vlgmr.msra.gmra.mrb[0].mxu0 %v860_v10  ;;  %807 = vmatmul.mubr.bf16.vlgmr.msra.gmra.mrb[0].mxu1 %v861_v11 }
  0xfa   : > { %v804_v42 = vpop.f32.mrb[0].mxu0  ;;  %v808_v43 = vpop.f32.mrb[0].mxu1 }
  0xfb   : > { %v538_v49 = vadd.f32 %v804_v42, %v530_v18  ;;  %v542_v50 = vadd.f32 %v808_v43, %v534_v19  ;;  %v497_v51 = vpop.f32.mrb[1].mxu0  ;;  %v513_v52 = vpop.f32.mrb[1].mxu1 }
  0xfc   : > { %v536_v57 = vadd.f32 %v528_v30, %v497_v51  ;;  %v540_v58 = vadd.f32 %v532_v37, %v513_v52  ;;  %v805_v59 = vpop.f32.mrb[2].mxu0  ;;  %v809_v60 = vpop.f32.mrb[2].mxu1 }
  0xfd   : > { %v553_v63 = vadd.f32 %v771_v27, %v538_v49  ;;  %v557_v0 = vadd.f32 %v771_v27, %v542_v50  ;;  %v539_v1 = vadd.f32 %v805_v59, %v531_v45  ;;  %v543_v2 = vadd.f32 %v809_v60, %v535_v47  ;;  %v500_v3 = vpop.f32.mrb[3].mxu0  ;;  %v516_v4 = vpop.f32.mrb[3].mxu1 }
  0xfe   : > { %v551_v5 = vadd.f32 %v771_v27, %v536_v57  ;;  %v555_v6 = vadd.f32 %v771_v27, %v540_v58  ;;  %v537_v7 = vadd.f32 %v529_v54, %v500_v3  ;;  %v541_v8 = vadd.f32 %v533_v55, %v516_v4 }
  0xff   : > { %v561_v9 = vmax.f32 %v553_v63, 0.0  ;;  %v565_v10 = vmax.f32 %v557_v0, 0.0  ;;  %v554_v11 = vadd.f32 %v771_v27, %v539_v1  ;;  %v558_v12 = vadd.f32 %v771_v27, %v543_v2 }
 0x100   : > { %v559_v13 = vmax.f32 %v551_v5, 0.0  ;;  %v563_v14 = vmax.f32 %v555_v6, 0.0  ;;  %v552_v15 = vadd.f32 %v771_v27, %v537_v7  ;;  %v556_v16 = vadd.f32 %v771_v27, %v541_v8 }
 0x101   : > { %v601_v17 = vmul.f32 %v593_v23, %v561_v9  ;;  %v605_v18 = vmul.f32 %v597_v29, %v565_v10  ;;  %v562_v19 = vmax.f32 %v554_v11, 0.0  ;;  %v566_v20 = vmax.f32 %v558_v12, 0.0 }
 0x102   : > { %v599_v21 = vmul.f32 %v591_v31, %v559_v13  ;;  %v603_v22 = vmul.f32 %v595_v32, %v563_v14  ;;  %v560_v24 = vmax.f32 %v552_v15, 0.0  ;;  %v564_v25 = vmax.f32 %v556_v16, 0.0 }
 0x103   : > { %v609_v26 = vadd.f32 %v601_v17, %v1020_v28  ;;  %v613_v30 = vadd.f32 %v605_v18, %v589_v35  ;;  %v602_v33 = vmul.f32 %v594_v38, %v562_v19  ;;  %v606_v34 = vmul.f32 %v598_v39, %v566_v20 }
 0x104   : > { %v607_v37 = vadd.f32 %v599_v21, %v583_v36  ;;  %v611_v40 = vadd.f32 %v603_v22, %v587_v44  ;;  %v600_v27 = vmul.f32 %v592_v48, %v560_v24  ;;  %v604_v23 = vmul.f32 %v596_v56, %v564_v25 }
 0x105   : > { %618 = vst.msk [vmem:[%s364_s15 + $0x10] sm:$0xff] %vm615_vm0, %v609_v26  ;;  %622 = vst.msk [vmem:[%s364_s15 + $0x30] sm:$0xff] %vm615_vm0, %v613_v30  ;;  %v610_v29 = vadd.f32 %v602_v33, %v586_v46  ;;  %v614_v41 = vadd.f32 %v606_v34, %v590_v53 }
 0x106   : > { %616 = vst.msk [vmem:[%s364_s15] sm:$0xff] %vm615_vm0, %v607_v37  ;;  %620 = vst.msk [vmem:[%s364_s15 + $0x20] sm:$0xff] %vm615_vm0, %v611_v40  ;;  %v608_v31 = vadd.f32 %v600_v27, %v584_v61  ;;  %v612_v32 = vadd.f32 %v604_v23, %v588_v62 }
 0x107   : > { %619 = vst.msk [vmem:[%s364_s15 + $0x18] sm:$0xff] %vm615_vm0, %v610_v29  ;;  %623 = vst.msk [vmem:[%s364_s15 + $0x38] sm:$0xff] %vm615_vm0, %v614_v41 }
 0x108   : > { %617 = vst.msk [vmem:[%s364_s15 + $0x8] sm:$0xff] %vm615_vm0, %v608_v31  ;;  %621 = vst.msk [vmem:[%s364_s15 + $0x28] sm:$0xff] %vm615_vm0, %v612_v32 }
 0x109 PF: > { %s16_s23 = sadd.s32 1, %s884_s23   ;;  %s1076_s21 = smov %s880_s22 }
 0x10a   : > { %p13_p5 = scmp.ge.s32.totalorder %s16_s23, 4   ;;  %s1077_s22 = smov %s1079_s24 }
 0x10c   :  { %15 = sbr.rel (!%p13_p5) target bundleno = 2 (0x2), region = 86 }

// kernel: _lambda_.55
= control target key start
LH: loop header
LB: loop body
LE: loop exit
PB: predicated region body
PF: predicated region fallthrough
CT: control target
= control target key end

     0   :  { %s851_s12 = smov 0   ;;  %s853_s13 = smov 0   ;;  %s986_s0 = inlined_call_operand.vmem [shape: bf16[384,128], index: 0, kind: input, shape index: {}]   ;;  %s987_s1 = inlined_call_operand.vmem [shape: bf16[128,128], index: 1, kind: input, shape index: {}]   ;;  %s988_s2 = inlined_call_operand.vmem [shape: f32[1,16], index: 2, kind: input, shape index: {}]   ;;  %s989_s3 = inlined_call_operand.vmem [shape: bf16[384,16], index: 3, kind: output, shape index: {}]  }
   0x1   :  { %s855_s14 = smov 0  }
   0x2 LB: > { %s25_s15 = sadd.s32 1, %s824_s13  ;;  %p653_p0 = scmp.ge.s32.totalorder %s828_s14, 1  ;;  %s828_s14 = sphi %s855_s14, %s13_s14   ;;  %s824_s13 = sphi %s853_s13, %s991_s13   ;;  %s820_s12 = sphi %s851_s12, %s990_s12  }
   0x3   : > { %p27_p1 = scmp.ge.s32.totalorder %s25_s15, 3  ;;  %p166_p2 = scmp.lt.s32.totalorder %s828_s14, 4 }
   0x5   : > { %s993_s15 = smov (%p27_p1, %s25_s15), 0  ;;  %p167_p3 = pnand %p653_p0, %p166_p2 }
   0x6   : > { %v798_v0 = vld [vmem:[%s987_s1] sm:$0xff] (!%p167_p3)   ;;  %s654_s18 = sshll.u32 (!%p167_p3), %s820_s12, 4  ;;  %v799_v1 = vld [vmem:[%s987_s1 + $0x8] sm:$0xff] (!%p167_p3)   ;;  %v800_v2 = vld [vmem:[%s987_s1 + $0x10] sm:$0xff] (!%p167_p3)   ;;  %v830_v7 = vmov (!%p167_p3), 0   ;;  %vm548_vm0 = vcmask (!%p167_p3), 125952  }
   0x7   : > { %170 = sbr.rel (%p167_p3) target bundleno = 267 (0x10b), region = 32  ;;  %p199_p4 = scmp.lt.s32.totalorder (!%p167_p3), %s654_s18, 47  ;;  %725 = vmatprep.subr.bf16.mxu0 (!%p167_p3), %v798_v0  ;;  %757 = vmatprep.subr.bf16.mxu1 (!%p167_p3), %v798_v0  ;;  %v801_v3 = vld [vmem:[%s987_s1 + $0x18] sm:$0xff] (!%p167_p3)   ;;  %v802_v14 = vld [vmem:[%s987_s1 + $0x20] sm:$0xff] (!%p167_p3)   ;;  %v803_v16 = vld [vmem:[%s987_s1 + $0x28] sm:$0xff] (!%p167_p3)  }
   0x8   : > { %726 = vmatpush3.bf16.msra.mxu0 (!%p167_p3), %v798_v0  ;;  %765 = vmatpush3.bf16.msra.mxu1 (!%p167_p3), %v798_v0  ;;  %v804_v17 = vld [vmem:[%s987_s1 + $0x30] sm:$0xff] (!%p167_p3)   ;;  %v805_v18 = vld [vmem:[%s987_s1 + $0x38] sm:$0xff] (!%p167_p3)   ;;  %v674_v49 = vld [vmem:[%s988_s2] ss:$0 sm:$0xff] (!%p167_p3) }
   0x9   : > { %727 = vmatprep.subr.bf16.mxu0 (!%p167_p3), %v799_v1  ;;  %758 = vmatprep.subr.bf16.mxu1 (!%p167_p3), %v799_v1 }
   0xc   : > { %728 = vmatpush3.bf16.msra.mxu0 (!%p167_p3), %v799_v1  ;;  %766 = vmatpush3.bf16.msra.mxu1 (!%p167_p3), %v799_v1 }
   0xd   : > { %729 = vmatprep.subr.bf16.mxu0 (!%p167_p3), %v800_v2  ;;  %759 = vmatprep.subr.bf16.mxu1 (!%p167_p3), %v800_v2 }
   0xe   : > { %s995_s18 = smov (!%p199_p4, %s654_s18), 47 }
   0xf   : > { %s655_s23 = sshll.u32 %s995_s18, 2 }
  0x10   : > { %s886_s26 = scalar_lea.vmem %s986_s0, %s655_s23  ;;  %730 = vmatpush3.bf16.msra.mxu0 %v800_v2  ;;  %767 = vmatpush3.bf16.msra.mxu1 %v800_v2  ;;  %s943_s17 = scalar_lea.vmem %s989_s3, %s655_s23 }
  0x11   : > { %v220_v4 = vld [vmem:[%s886_s26] sm:$0xf]  ;;  %v221_v5 = vld [vmem:[%s886_s26 + $0x4] sm:$0xf]  ;;  %731 = vmatprep.subr.bf16.mxu0 %v801_v3  ;;  %760 = vmatprep.subr.bf16.mxu1 %v801_v3  ;;  %v222_v19 = vld [vmem:[%s886_s26 + $0x8] sm:$0xf] }
  0x12   : > { %v228_v6 = vld [vmem:[%s886_s26 + $0x20] sm:$0xf]  ;;  %v236_v8 = vmax.bf16 %v830_v7, %v220_v4  ;;  %v237_v9 = vmax.bf16 %v830_v7, %v221_v5  ;;  %v229_v10 = vld [vmem:[%s886_s26 + $0x24] sm:$0xf]  ;;  %v223_v20 = vld [vmem:[%s886_s26 + $0xc] sm:$0xf]  ;;  %v238_v27 = vmax.bf16 %v830_v7, %v222_v19 }
  0x13   : > { %v244_v11 = vmax.bf16 %v830_v7, %v228_v6  ;;  %v245_v12 = vmax.bf16 %v830_v7, %v229_v10  ;;  %v230_v21 = vld [vmem:[%s886_s26 + $0x28] sm:$0xf]  ;;  %v231_v22 = vld [vmem:[%s886_s26 + $0x2c] sm:$0xf]  ;;  %v224_v23 = vld [vmem:[%s886_s26 + $0x10] sm:$0xf]  ;;  %v239_v28 = vmax.bf16 %v830_v7, %v223_v20 }
  0x14   : > { %v658_v13 = vcombine.low %v236_v8, %v237_v9  ;;  %732 = vmatpush3.bf16.msra.mxu0 %v801_v3  ;;  %768 = vmatpush3.bf16.msra.mxu1 %v801_v3  ;;  %v225_v24 = vld [vmem:[%s886_s26 + $0x14] sm:$0xf]  ;;  %v232_v25 = vld [vmem:[%s886_s26 + $0x30] sm:$0xf]  ;;  %v246_v29 = vmax.bf16 %v830_v7, %v230_v21  ;;  %v247_v30 = vmax.bf16 %v830_v7, %v231_v22  ;;  %v226_v37 = vld [vmem:[%s886_s26 + $0x18] sm:$0xf] }
  0x15   : > { %v662_v15 = vcombine.low %v244_v11, %v245_v12  ;;  %733 = vmatprep.subr.bf16.mxu0 %v802_v14  ;;  %761 = vmatprep.subr.bf16.mxu1 %v802_v14  ;;  %v233_v26 = vld [vmem:[%s886_s26 + $0x34] sm:$0xf]  ;;  %v240_v31 = vmax.bf16 %v830_v7, %v224_v23  ;;  %v241_v32 = vmax.bf16 %v830_v7, %v225_v24  ;;  %v227_v40 = vld [vmem:[%s886_s26 + $0x1c] sm:$0xf]  ;;  %v234_v41 = vld [vmem:[%s886_s26 + $0x38] sm:$0xf] }
  0x16   : > { %741 = vmatprep.mubr.bf16.mxu0 %v658_v13  ;;  %v248_v33 = vmax.bf16 %v830_v7, %v232_v25  ;;  %v249_v34 = vmax.bf16 %v830_v7, %v233_v26  ;;  %v659_v35 = vcombine.low %v238_v27, %v239_v28  ;;  %v663_v36 = vcombine.low %v246_v29, %v247_v30  ;;  %v235_v42 = vld [vmem:[%s886_s26 + $0x3c] sm:$0xf] }
  0x17   : > { %749 = vmatprep.mubr.bf16.mxu1 %v662_v15  ;;  %v660_v38 = vcombine.low %v240_v31, %v241_v32  ;;  %v242_v43 = vmax.bf16 %v830_v7, %v226_v37  ;;  %v243_v44 = vmax.bf16 %v830_v7, %v227_v40  ;;  %v250_v45 = vmax.bf16 %v830_v7, %v234_v41 }
  0x18   : > { %734 = vmatpush3.bf16.msra.mxu0 %v802_v14  ;;  %769 = vmatpush3.bf16.msra.mxu1 %v802_v14  ;;  %v664_v39 = vcombine.low %v248_v33, %v249_v34  ;;  %v251_v46 = vmax.bf16 %v830_v7, %v235_v42 }
  0x19   : > { %735 = vmatprep.subr.bf16.mxu0 %v803_v16  ;;  %762 = vmatprep.subr.bf16.mxu1 %v803_v16  ;;  %v661_v47 = vcombine.low %v242_v43, %v243_v44 }
  0x1a   : > { %v665_v48 = vcombine.low %v250_v45, %v251_v46 }
  0x1c   : > { %736 = vmatpush3.bf16.msra.mxu0 %v803_v16  ;;  %770 = vmatpush3.bf16.msra.mxu1 %v803_v16 }
  0x1d   : > { %737 = vmatprep.subr.bf16.mxu0 %v804_v17  ;;  %763 = vmatprep.subr.bf16.mxu1 %v804_v17 }
  0x20   : > { %738 = vmatpush3.bf16.msra.mxu0 %v804_v17  ;;  %771 = vmatpush3.bf16.msra.mxu1 %v804_v17 }
  0x21   : > { %739 = vmatprep.subr.bf16.mxu0 %v805_v18  ;;  %764 = vmatprep.subr.bf16.mxu1 %v805_v18 }
  0x24   : > { %740 = vmatpush3.bf16.msra.mxu0 %v805_v18  ;;  %772 = vmatpush3.bf16.msra.mxu1 %v805_v18 }
  0x27   : > { %742 = vmatmul.mubr.bf16.vlgmr.msra.gmra.mrb[0].mxu0 %v659_v35  ;;  %750 = vmatmul.mubr.bf16.vlgmr.msra.gmra.mrb[0].mxu1 %v663_v36 }
  0x28   : > { %745 = vmatprep.mubr.bf16.mxu0 %v660_v38  ;;  %753 = vmatprep.mubr.bf16.mxu1 %v664_v39 }
  0x2f   : > { %746 = vmatmul.mubr.bf16.gmra.mrb[4].mxu0 %v661_v47  ;;  %754 = vmatmul.mubr.bf16.gmra.mrb[4].mxu1 %v665_v48 }
  0xfa   : > { %v743_v50 = vpop.f32.mrb[0].mxu0  ;;  %v751_v51 = vpop.f32.mrb[0].mxu1 }
  0xfb   : > { %v470_v52 = vadd.f32 %v743_v50, %v674_v49  ;;  %v478_v53 = vadd.f32 %v751_v51, %v674_v49  ;;  %v398_v54 = vpop.f32.mrb[1].mxu0  ;;  %v430_v55 = vpop.f32.mrb[1].mxu1 }
  0xfc   : > { %v468_v56 = vadd.f32 %v674_v49, %v398_v54  ;;  %v476_v57 = vadd.f32 %v674_v49, %v430_v55  ;;  %v744_v58 = vpop.f32.mrb[2].mxu0  ;;  %v752_v59 = vpop.f32.mrb[2].mxu1 }
  0xfd   : > { %v695_v60 = vpack.c.bf16 %v470_v52, %v470_v52  ;;  %v703_v61 = vpack.c.bf16 %v478_v53, %v478_v53  ;;  %v471_v62 = vadd.f32 %v744_v58, %v674_v49  ;;  %v479_v63 = vadd.f32 %v752_v59, %v674_v49  ;;  %v401_v0 = vpop.f32.mrb[3].mxu0  ;;  %v433_v1 = vpop.f32.mrb[3].mxu1 }
  0xfe   : > { %v693_v2 = vpack.c.bf16 %v468_v56, %v468_v56  ;;  %v701_v3 = vpack.c.bf16 %v476_v57, %v476_v57  ;;  %v469_v4 = vadd.f32 %v674_v49, %v401_v0  ;;  %v477_v5 = vadd.f32 %v674_v49, %v433_v1 }
  0xff   : > { %551 = vst.msk [vmem:[%s943_s17 + $0x8] sm:$0xf] %vm548_vm0, %v695_v60  ;;  %559 = vst.msk [vmem:[%s943_s17 + $0x28] sm:$0xf] %vm548_vm0, %v703_v61  ;;  %v696_v6 = vpack.c.bf16 %v471_v62, %v471_v62  ;;  %v704_v7 = vpack.c.bf16 %v479_v63, %v479_v63 }
 0x100   : > { %549 = vst.msk [vmem:[%s943_s17] sm:$0xf] %vm548_vm0, %v693_v2  ;;  %557 = vst.msk [vmem:[%s943_s17 + $0x20] sm:$0xf] %vm548_vm0, %v701_v3  ;;  %v694_v8 = vpack.c.bf16 %v469_v4, %v469_v4  ;;  %v702_v9 = vpack.c.bf16 %v477_v5, %v477_v5 }
 0x101   : > { %552 = vst.msk [vmem:[%s943_s17 + $0xc] sm:$0xf] %vm548_vm0, %v696_v6  ;;  %560 = vst.msk [vmem:[%s943_s17 + $0x2c] sm:$0xf] %vm548_vm0, %v704_v7 }
 0x102   : > { %550 = vst.msk [vmem:[%s943_s17 + $0x4] sm:$0xf] %vm548_vm0, %v694_v8  ;;  %558 = vst.msk [vmem:[%s943_s17 + $0x24] sm:$0xf] %vm548_vm0, %v702_v9  ;;  %v747_v10 = vpop.f32.mrb[4].mxu0  ;;  %v755_v11 = vpop.f32.mrb[4].mxu1 }
 0x103   : > { %v474_v12 = vadd.f32 %v747_v10, %v674_v49  ;;  %v482_v13 = vadd.f32 %v755_v11, %v674_v49  ;;  %v414_v14 = vpop.f32.mrb[5].mxu0  ;;  %v446_v15 = vpop.f32.mrb[5].mxu1 }
 0x104   : > { %v472_v16 = vadd.f32 %v674_v49, %v414_v14  ;;  %v480_v17 = vadd.f32 %v674_v49, %v446_v15  ;;  %v748_v18 = vpop.f32.mrb[6].mxu0  ;;  %v756_v19 = vpop.f32.mrb[6].mxu1 }
 0x105   : > { %v699_v20 = vpack.c.bf16 %v474_v12, %v474_v12  ;;  %v707_v21 = vpack.c.bf16 %v482_v13, %v482_v13  ;;  %v475_v22 = vadd.f32 %v748_v18, %v674_v49  ;;  %v483_v23 = vadd.f32 %v756_v19, %v674_v49  ;;  %v417_v24 = vpop.f32.mrb[7].mxu0  ;;  %v449_v25 = vpop.f32.mrb[7].mxu1 }
 0x106   : > { %v697_v26 = vpack.c.bf16 %v472_v16, %v472_v16  ;;  %v705_v27 = vpack.c.bf16 %v480_v17, %v480_v17  ;;  %v473_v28 = vadd.f32 %v674_v49, %v417_v24  ;;  %v481_v29 = vadd.f32 %v674_v49, %v449_v25 }
 0x107   : > { %555 = vst.msk [vmem:[%s943_s17 + $0x18] sm:$0xf] %vm548_vm0, %v699_v20  ;;  %563 = vst.msk [vmem:[%s943_s17 + $0x38] sm:$0xf] %vm548_vm0, %v707_v21  ;;  %v700_v30 = vpack.c.bf16 %v475_v22, %v475_v22  ;;  %v708_v31 = vpack.c.bf16 %v483_v23, %v483_v23 }
 0x108   : > { %553 = vst.msk [vmem:[%s943_s17 + $0x10] sm:$0xf] %vm548_vm0, %v697_v26  ;;  %561 = vst.msk [vmem:[%s943_s17 + $0x30] sm:$0xf] %vm548_vm0, %v705_v27  ;;  %v698_v32 = vpack.c.bf16 %v473_v28, %v473_v28  ;;  %v706_v33 = vpack.c.bf16 %v481_v29, %v481_v29 }
 0x109   : > { %556 = vst.msk [vmem:[%s943_s17 + $0x1c] sm:$0xf] %vm548_vm0, %v700_v30  ;;  %564 = vst.msk [vmem:[%s943_s17 + $0x3c] sm:$0xf] %vm548_vm0, %v708_v31 }
 0x10a   : > { %554 = vst.msk [vmem:[%s943_s17 + $0x14] sm:$0xf] %vm548_vm0, %v698_v32  ;;  %562 = vst.msk [vmem:[%s943_s17 + $0x34] sm:$0xf] %vm548_vm0, %v706_v33 }
 0x10b PF: > { %s13_s14 = sadd.s32 1, %s828_s14   ;;  %s990_s12 = smov %s824_s13 }
 0x10c   : > { %p10_p5 = scmp.ge.s32.totalorder %s13_s14, 5   ;;  %s991_s13 = smov %s993_s15 }
 0x10e   :  { %12 = sbr.rel (!%p10_p5) target bundleno = 2 (0x2), region = 65 }

// kernel: _lambda_.52
= control target key start
LH: loop header
LB: loop body
LE: loop exit
PB: predicated region body
PF: predicated region fallthrough
CT: control target
= control target key end

     0   :  { %s851_s12 = smov 0   ;;  %s853_s13 = smov 0   ;;  %s986_s0 = inlined_call_operand.vmem [shape: bf16[384,128], index: 0, kind: input, shape index: {}]   ;;  %s987_s1 = inlined_call_operand.vmem [shape: bf16[128,128], index: 1, kind: input, shape index: {}]   ;;  %s988_s2 = inlined_call_operand.vmem [shape: f32[1,8], index: 2, kind: input, shape index: {}]   ;;  %s989_s3 = inlined_call_operand.vmem [shape: bf16[384,8], index: 3, kind: output, shape index: {}]  }
   0x1   :  { %s855_s14 = smov 0  }
   0x2 LB: > { %s25_s15 = sadd.s32 1, %s824_s13  ;;  %p653_p0 = scmp.ge.s32.totalorder %s828_s14, 1  ;;  %s828_s14 = sphi %s855_s14, %s13_s14   ;;  %s824_s13 = sphi %s853_s13, %s991_s13   ;;  %s820_s12 = sphi %s851_s12, %s990_s12  }
   0x3   : > { %p27_p1 = scmp.ge.s32.totalorder %s25_s15, 3  ;;  %p166_p2 = scmp.lt.s32.totalorder %s828_s14, 4 }
   0x5   : > { %s993_s15 = smov (%p27_p1, %s25_s15), 0  ;;  %p167_p3 = pnand %p653_p0, %p166_p2 }
   0x6   : > { %v798_v0 = vld [vmem:[%s987_s1] sm:$0xff] (!%p167_p3)   ;;  %s654_s18 = sshll.u32 (!%p167_p3), %s820_s12, 4  ;;  %v799_v1 = vld [vmem:[%s987_s1 + $0x8] sm:$0xff] (!%p167_p3)   ;;  %v800_v2 = vld [vmem:[%s987_s1 + $0x10] sm:$0xff] (!%p167_p3)   ;;  %v830_v7 = vmov (!%p167_p3), 0   ;;  %vm548_vm0 = vcmask (!%p167_p3), 60416  }
   0x7   : > { %170 = sbr.rel (%p167_p3) target bundleno = 267 (0x10b), region = 32  ;;  %p199_p4 = scmp.lt.s32.totalorder (!%p167_p3), %s654_s18, 47  ;;  %725 = vmatprep.subr.bf16.mxu0 (!%p167_p3), %v798_v0  ;;  %757 = vmatprep.subr.bf16.mxu1 (!%p167_p3), %v798_v0  ;;  %v801_v3 = vld [vmem:[%s987_s1 + $0x18] sm:$0xff] (!%p167_p3)   ;;  %v802_v14 = vld [vmem:[%s987_s1 + $0x20] sm:$0xff] (!%p167_p3)   ;;  %v803_v16 = vld [vmem:[%s987_s1 + $0x28] sm:$0xff] (!%p167_p3)  }
   0x8   : > { %726 = vmatpush3.bf16.msra.mxu0 (!%p167_p3), %v798_v0  ;;  %765 = vmatpush3.bf16.msra.mxu1 (!%p167_p3), %v798_v0  ;;  %v804_v17 = vld [vmem:[%s987_s1 + $0x30] sm:$0xff] (!%p167_p3)   ;;  %v805_v18 = vld [vmem:[%s987_s1 + $0x38] sm:$0xff] (!%p167_p3)   ;;  %v674_v49 = vld [vmem:[%s988_s2] ss:$0 sm:$0xff] (!%p167_p3) }
   0x9   : > { %727 = vmatprep.subr.bf16.mxu0 (!%p167_p3), %v799_v1  ;;  %758 = vmatprep.subr.bf16.mxu1 (!%p167_p3), %v799_v1 }
   0xc   : > { %728 = vmatpush3.bf16.msra.mxu0 (!%p167_p3), %v799_v1  ;;  %766 = vmatpush3.bf16.msra.mxu1 (!%p167_p3), %v799_v1 }
   0xd   : > { %729 = vmatprep.subr.bf16.mxu0 (!%p167_p3), %v800_v2  ;;  %759 = vmatprep.subr.bf16.mxu1 (!%p167_p3), %v800_v2 }
   0xe   : > { %s995_s18 = smov (!%p199_p4, %s654_s18), 47 }
   0xf   : > { %s655_s23 = sshll.u32 %s995_s18, 2 }
  0x10   : > { %s886_s26 = scalar_lea.vmem %s986_s0, %s655_s23  ;;  %730 = vmatpush3.bf16.msra.mxu0 %v800_v2  ;;  %767 = vmatpush3.bf16.msra.mxu1 %v800_v2  ;;  %s943_s17 = scalar_lea.vmem %s989_s3, %s655_s23 }
  0x11   : > { %v220_v4 = vld [vmem:[%s886_s26] sm:$0xf]  ;;  %v221_v5 = vld [vmem:[%s886_s26 + $0x4] sm:$0xf]  ;;  %731 = vmatprep.subr.bf16.mxu0 %v801_v3  ;;  %760 = vmatprep.subr.bf16.mxu1 %v801_v3  ;;  %v222_v19 = vld [vmem:[%s886_s26 + $0x8] sm:$0xf] }
  0x12   : > { %v228_v6 = vld [vmem:[%s886_s26 + $0x20] sm:$0xf]  ;;  %v236_v8 = vmax.bf16 %v830_v7, %v220_v4  ;;  %v237_v9 = vmax.bf16 %v830_v7, %v221_v5  ;;  %v229_v10 = vld [vmem:[%s886_s26 + $0x24] sm:$0xf]  ;;  %v223_v20 = vld [vmem:[%s886_s26 + $0xc] sm:$0xf]  ;;  %v238_v27 = vmax.bf16 %v830_v7, %v222_v19 }
  0x13   : > { %v244_v11 = vmax.bf16 %v830_v7, %v228_v6  ;;  %v245_v12 = vmax.bf16 %v830_v7, %v229_v10  ;;  %v230_v21 = vld [vmem:[%s886_s26 + $0x28] sm:$0xf]  ;;  %v231_v22 = vld [vmem:[%s886_s26 + $0x2c] sm:$0xf]  ;;  %v224_v23 = vld [vmem:[%s886_s26 + $0x10] sm:$0xf]  ;;  %v239_v28 = vmax.bf16 %v830_v7, %v223_v20 }
  0x14   : > { %v658_v13 = vcombine.low %v236_v8, %v237_v9  ;;  %732 = vmatpush3.bf16.msra.mxu0 %v801_v3  ;;  %768 = vmatpush3.bf16.msra.mxu1 %v801_v3  ;;  %v225_v24 = vld [vmem:[%s886_s26 + $0x14] sm:$0xf]  ;;  %v232_v25 = vld [vmem:[%s886_s26 + $0x30] sm:$0xf]  ;;  %v246_v29 = vmax.bf16 %v830_v7, %v230_v21  ;;  %v247_v30 = vmax.bf16 %v830_v7, %v231_v22  ;;  %v226_v37 = vld [vmem:[%s886_s26 + $0x18] sm:$0xf] }
  0x15   : > { %v662_v15 = vcombine.low %v244_v11, %v245_v12  ;;  %733 = vmatprep.subr.bf16.mxu0 %v802_v14  ;;  %761 = vmatprep.subr.bf16.mxu1 %v802_v14  ;;  %v233_v26 = vld [vmem:[%s886_s26 + $0x34] sm:$0xf]  ;;  %v240_v31 = vmax.bf16 %v830_v7, %v224_v23  ;;  %v241_v32 = vmax.bf16 %v830_v7, %v225_v24  ;;  %v227_v40 = vld [vmem:[%s886_s26 + $0x1c] sm:$0xf]  ;;  %v234_v41 = vld [vmem:[%s886_s26 + $0x38] sm:$0xf] }
  0x16   : > { %741 = vmatprep.mubr.bf16.mxu0 %v658_v13  ;;  %v248_v33 = vmax.bf16 %v830_v7, %v232_v25  ;;  %v249_v34 = vmax.bf16 %v830_v7, %v233_v26  ;;  %v659_v35 = vcombine.low %v238_v27, %v239_v28  ;;  %v663_v36 = vcombine.low %v246_v29, %v247_v30  ;;  %v235_v42 = vld [vmem:[%s886_s26 + $0x3c] sm:$0xf] }
  0x17   : > { %749 = vmatprep.mubr.bf16.mxu1 %v662_v15  ;;  %v660_v38 = vcombine.low %v240_v31, %v241_v32  ;;  %v242_v43 = vmax.bf16 %v830_v7, %v226_v37  ;;  %v243_v44 = vmax.bf16 %v830_v7, %v227_v40  ;;  %v250_v45 = vmax.bf16 %v830_v7, %v234_v41 }
  0x18   : > { %734 = vmatpush3.bf16.msra.mxu0 %v802_v14  ;;  %769 = vmatpush3.bf16.msra.mxu1 %v802_v14  ;;  %v664_v39 = vcombine.low %v248_v33, %v249_v34  ;;  %v251_v46 = vmax.bf16 %v830_v7, %v235_v42 }
  0x19   : > { %735 = vmatprep.subr.bf16.mxu0 %v803_v16  ;;  %762 = vmatprep.subr.bf16.mxu1 %v803_v16  ;;  %v661_v47 = vcombine.low %v242_v43, %v243_v44 }
  0x1a   : > { %v665_v48 = vcombine.low %v250_v45, %v251_v46 }
  0x1c   : > { %736 = vmatpush3.bf16.msra.mxu0 %v803_v16  ;;  %770 = vmatpush3.bf16.msra.mxu1 %v803_v16 }
  0x1d   : > { %737 = vmatprep.subr.bf16.mxu0 %v804_v17  ;;  %763 = vmatprep.subr.bf16.mxu1 %v804_v17 }
  0x20   : > { %738 = vmatpush3.bf16.msra.mxu0 %v804_v17  ;;  %771 = vmatpush3.bf16.msra.mxu1 %v804_v17 }
  0x21   : > { %739 = vmatprep.subr.bf16.mxu0 %v805_v18  ;;  %764 = vmatprep.subr.bf16.mxu1 %v805_v18 }
  0x24   : > { %740 = vmatpush3.bf16.msra.mxu0 %v805_v18  ;;  %772 = vmatpush3.bf16.msra.mxu1 %v805_v18 }
  0x27   : > { %742 = vmatmul.mubr.bf16.vlgmr.msra.gmra.mrb[0].mxu0 %v659_v35  ;;  %750 = vmatmul.mubr.bf16.vlgmr.msra.gmra.mrb[0].mxu1 %v663_v36 }
  0x28   : > { %745 = vmatprep.mubr.bf16.mxu0 %v660_v38  ;;  %753 = vmatprep.mubr.bf16.mxu1 %v664_v39 }
  0x2f   : > { %746 = vmatmul.mubr.bf16.gmra.mrb[4].mxu0 %v661_v47  ;;  %754 = vmatmul.mubr.bf16.gmra.mrb[4].mxu1 %v665_v48 }
  0xfa   : > { %v743_v50 = vpop.f32.mrb[0].mxu0  ;;  %v751_v51 = vpop.f32.mrb[0].mxu1 }
  0xfb   : > { %v470_v52 = vadd.f32 %v743_v50, %v674_v49  ;;  %v478_v53 = vadd.f32 %v751_v51, %v674_v49  ;;  %v398_v54 = vpop.f32.mrb[1].mxu0  ;;  %v430_v55 = vpop.f32.mrb[1].mxu1 }
  0xfc   : > { %v468_v56 = vadd.f32 %v674_v49, %v398_v54  ;;  %v476_v57 = vadd.f32 %v674_v49, %v430_v55  ;;  %v744_v58 = vpop.f32.mrb[2].mxu0  ;;  %v752_v59 = vpop.f32.mrb[2].mxu1 }
  0xfd   : > { %v695_v60 = vpack.c.bf16 %v470_v52, %v470_v52  ;;  %v703_v61 = vpack.c.bf16 %v478_v53, %v478_v53  ;;  %v471_v62 = vadd.f32 %v744_v58, %v674_v49  ;;  %v479_v63 = vadd.f32 %v752_v59, %v674_v49  ;;  %v401_v0 = vpop.f32.mrb[3].mxu0  ;;  %v433_v1 = vpop.f32.mrb[3].mxu1 }
  0xfe   : > { %v693_v2 = vpack.c.bf16 %v468_v56, %v468_v56  ;;  %v701_v3 = vpack.c.bf16 %v476_v57, %v476_v57  ;;  %v469_v4 = vadd.f32 %v674_v49, %v401_v0  ;;  %v477_v5 = vadd.f32 %v674_v49, %v433_v1 }
  0xff   : > { %551 = vst.msk [vmem:[%s943_s17 + $0x8] sm:$0xf] %vm548_vm0, %v695_v60  ;;  %559 = vst.msk [vmem:[%s943_s17 + $0x28] sm:$0xf] %vm548_vm0, %v703_v61  ;;  %v696_v6 = vpack.c.bf16 %v471_v62, %v471_v62  ;;  %v704_v7 = vpack.c.bf16 %v479_v63, %v479_v63 }
 0x100   : > { %549 = vst.msk [vmem:[%s943_s17] sm:$0xf] %vm548_vm0, %v693_v2  ;;  %557 = vst.msk [vmem:[%s943_s17 + $0x20] sm:$0xf] %vm548_vm0, %v701_v3  ;;  %v694_v8 = vpack.c.bf16 %v469_v4, %v469_v4  ;;  %v702_v9 = vpack.c.bf16 %v477_v5, %v477_v5 }
 0x101   : > { %552 = vst.msk [vmem:[%s943_s17 + $0xc] sm:$0xf] %vm548_vm0, %v696_v6  ;;  %560 = vst.msk [vmem:[%s943_s17 + $0x2c] sm:$0xf] %vm548_vm0, %v704_v7 }
 0x102   : > { %550 = vst.msk [vmem:[%s943_s17 + $0x4] sm:$0xf] %vm548_vm0, %v694_v8  ;;  %558 = vst.msk [vmem:[%s943_s17 + $0x24] sm:$0xf] %vm548_vm0, %v702_v9  ;;  %v747_v10 = vpop.f32.mrb[4].mxu0  ;;  %v755_v11 = vpop.f32.mrb[4].mxu1 }
 0x103   : > { %v474_v12 = vadd.f32 %v747_v10, %v674_v49  ;;  %v482_v13 = vadd.f32 %v755_v11, %v674_v49  ;;  %v414_v14 = vpop.f32.mrb[5].mxu0  ;;  %v446_v15 = vpop.f32.mrb[5].mxu1 }
 0x104   : > { %v472_v16 = vadd.f32 %v674_v49, %v414_v14  ;;  %v480_v17 = vadd.f32 %v674_v49, %v446_v15  ;;  %v748_v18 = vpop.f32.mrb[6].mxu0  ;;  %v756_v19 = vpop.f32.mrb[6].mxu1 }
 0x105   : > { %v699_v20 = vpack.c.bf16 %v474_v12, %v474_v12  ;;  %v707_v21 = vpack.c.bf16 %v482_v13, %v482_v13  ;;  %v475_v22 = vadd.f32 %v748_v18, %v674_v49  ;;  %v483_v23 = vadd.f32 %v756_v19, %v674_v49  ;;  %v417_v24 = vpop.f32.mrb[7].mxu0  ;;  %v449_v25 = vpop.f32.mrb[7].mxu1 }
 0x106   : > { %v697_v26 = vpack.c.bf16 %v472_v16, %v472_v16  ;;  %v705_v27 = vpack.c.bf16 %v480_v17, %v480_v17  ;;  %v473_v28 = vadd.f32 %v674_v49, %v417_v24  ;;  %v481_v29 = vadd.f32 %v674_v49, %v449_v25 }
 0x107   : > { %555 = vst.msk [vmem:[%s943_s17 + $0x18] sm:$0xf] %vm548_vm0, %v699_v20  ;;  %563 = vst.msk [vmem:[%s943_s17 + $0x38] sm:$0xf] %vm548_vm0, %v707_v21  ;;  %v700_v30 = vpack.c.bf16 %v475_v22, %v475_v22  ;;  %v708_v31 = vpack.c.bf16 %v483_v23, %v483_v23 }
 0x108   : > { %553 = vst.msk [vmem:[%s943_s17 + $0x10] sm:$0xf] %vm548_vm0, %v697_v26  ;;  %561 = vst.msk [vmem:[%s943_s17 + $0x30] sm:$0xf] %vm548_vm0, %v705_v27  ;;  %v698_v32 = vpack.c.bf16 %v473_v28, %v473_v28  ;;  %v706_v33 = vpack.c.bf16 %v481_v29, %v481_v29 }
 0x109   : > { %556 = vst.msk [vmem:[%s943_s17 + $0x1c] sm:$0xf] %vm548_vm0, %v700_v30  ;;  %564 = vst.msk [vmem:[%s943_s17 + $0x3c] sm:$0xf] %vm548_vm0, %v708_v31 }
 0x10a   : > { %554 = vst.msk [vmem:[%s943_s17 + $0x14] sm:$0xf] %vm548_vm0, %v698_v32  ;;  %562 = vst.msk [vmem:[%s943_s17 + $0x34] sm:$0xf] %vm548_vm0, %v706_v33 }
 0x10b PF: > { %s13_s14 = sadd.s32 1, %s828_s14   ;;  %s990_s12 = smov %s824_s13 }
 0x10c   : > { %p10_p5 = scmp.ge.s32.totalorder %s13_s14, 5   ;;  %s991_s13 = smov %s993_s15 }
 0x10e   :  { %12 = sbr.rel (!%p10_p5) target bundleno = 2 (0x2), region = 65 }

// kernel: _lambda_.56
= control target key start
LH: loop header
LB: loop body
LE: loop exit
PB: predicated region body
PF: predicated region fallthrough
CT: control target
= control target key end

     0   :  { %s1959_s15 = smov 0   ;;  %s1961_s16 = smov 0   ;;  %s2476_s0 = inlined_call_operand.vmem [shape: bf16[1536,128], index: 0, kind: input, shape index: {}]   ;;  %s2477_s1 = inlined_call_operand.vmem [shape: bf16[128,128], index: 1, kind: input, shape index: {}]   ;;  %s2478_s2 = inlined_call_operand.vmem [shape: f32[1,4], index: 2, kind: input, shape index: {}]   ;;  %s2479_s3 = inlined_call_operand.vmem [shape: f32[1536,4], index: 3, kind: input, shape index: {}]   ;;  %s2480_s4 = inlined_call_operand.vmem [shape: bf16[1536,4], index: 4, kind: output, shape index: {}]  }
   0x1   :  { %s1963_s17 = smov 0  }
   0x2 LB: > { %s26_s18 = sadd.s32 1, %s1927_s16  ;;  %p1562_p0 = scmp.ge.s32.totalorder %s1931_s17, 1  ;;  %s1931_s17 = sphi %s1963_s17, %s14_s17   ;;  %s1927_s16 = sphi %s1961_s16, %s2482_s16   ;;  %s1923_s15 = sphi %s1959_s15, %s2481_s15  }
   0x3   : > { %p28_p1 = scmp.ge.s32.totalorder %s26_s18, 3  ;;  %p202_p2 = scmp.lt.s32.totalorder %s1931_s17, 4 }
   0x5   : > { %s2484_s18 = smov (%p28_p1, %s26_s18), 0  ;;  %p203_p3 = pnand %p1562_p0, %p202_p2 }
   0x6   : > { %v1901_v0 = vld [vmem:[%s2477_s1] sm:$0xff] (!%p203_p3)   ;;  %s1563_s21 = sshll.u32 (!%p203_p3), %s1923_s15, 6  ;;  %v1902_v1 = vld [vmem:[%s2477_s1 + $0x8] sm:$0xff] (!%p203_p3)   ;;  %v1903_v2 = vld [vmem:[%s2477_s1 + $0x10] sm:$0xff] (!%p203_p3)   ;;  %v1933_v7 = vmov (!%p203_p3), 0   ;;  %vm1397_vm0 = vcmask (!%p203_p3), 27648  }
   0x7   : > { %206 = sbr.rel (%p203_p3) target bundleno = 317 (0x13d), region = 36  ;;  %p242_p4 = scmp.lt.s32.totalorder (!%p203_p3), %s1563_s21, 191  ;;  %1780 = vmatprep.subr.bf16.mxu0 (!%p203_p3), %v1901_v0  ;;  %1860 = vmatprep.subr.bf16.mxu1 (!%p203_p3), %v1901_v0  ;;  %v1904_v3 = vld [vmem:[%s2477_s1 + $0x18] sm:$0xff] (!%p203_p3)   ;;  %v1905_v14 = vld [vmem:[%s2477_s1 + $0x20] sm:$0xff] (!%p203_p3)   ;;  %v1906_v16 = vld [vmem:[%s2477_s1 + $0x28] sm:$0xff] (!%p203_p3)  }
   0x8   : > { %1781 = vmatpush3.bf16.msra.mxu0 (!%p203_p3), %v1901_v0  ;;  %1868 = vmatpush3.bf16.msra.mxu1 (!%p203_p3), %v1901_v0  ;;  %v1907_v17 = vld [vmem:[%s2477_s1 + $0x30] sm:$0xff] (!%p203_p3)   ;;  %v1908_v27 = vld [vmem:[%s2477_s1 + $0x38] sm:$0xff] (!%p203_p3)  }
   0x9   : > { %1782 = vmatprep.subr.bf16.mxu0 (!%p203_p3), %v1902_v1  ;;  %1861 = vmatprep.subr.bf16.mxu1 (!%p203_p3), %v1902_v1 }
   0xc   : > { %1783 = vmatpush3.bf16.msra.mxu0 (!%p203_p3), %v1902_v1  ;;  %1869 = vmatpush3.bf16.msra.mxu1 (!%p203_p3), %v1902_v1 }
   0xd   : > { %1784 = vmatprep.subr.bf16.mxu0 (!%p203_p3), %v1903_v2  ;;  %1862 = vmatprep.subr.bf16.mxu1 (!%p203_p3), %v1903_v2 }
   0xe   : > { %s2486_s21 = smov (!%p242_p4, %s1563_s21), 191 }
   0xf   : > { %s1564_s26 = sshll.u32 %s2486_s21, 2  ;;  %s1566_s14 = sshll.u32 %s2486_s21, 3 }
  0x10   : > { %s1994_s29 = scalar_lea.vmem %s2476_s0, %s1564_s26  ;;  %1785 = vmatpush3.bf16.msra.mxu0 %v1903_v2  ;;  %1870 = vmatpush3.bf16.msra.mxu1 %v1903_v2  ;;  %s2197_s20 = scalar_lea.vmem %s2479_s3, %s1566_s14 }
  0x11   : > { %v269_v4 = vld [vmem:[%s1994_s29] sm:$0xf]  ;;  %v270_v5 = vld [vmem:[%s1994_s29 + $0x4] sm:$0xf]  ;;  %1786 = vmatprep.subr.bf16.mxu0 %v1904_v3  ;;  %1863 = vmatprep.subr.bf16.mxu1 %v1904_v3  ;;  %v271_v18 = vld [vmem:[%s1994_s29 + $0x8] sm:$0xf]  ;;  %s2223_s27 = scalar_lea.vmem %s2480_s4, %s1564_s26 }
  0x12   : > { %v301_v6 = vld [vmem:[%s1994_s29 + $0x80] sm:$0xf]  ;;  %v333_v8 = vmax.bf16 %v1933_v7, %v269_v4  ;;  %v334_v9 = vmax.bf16 %v1933_v7, %v270_v5  ;;  %v302_v10 = vld [vmem:[%s1994_s29 + $0x84] sm:$0xf]  ;;  %v272_v19 = vld [vmem:[%s1994_s29 + $0xc] sm:$0xf]  ;;  %v335_v23 = vmax.bf16 %v1933_v7, %v271_v18 }
  0x13   : > { %v365_v11 = vmax.bf16 %v1933_v7, %v301_v6  ;;  %v366_v12 = vmax.bf16 %v1933_v7, %v302_v10  ;;  %v303_v20 = vld [vmem:[%s1994_s29 + $0x88] sm:$0xf]  ;;  %v304_v21 = vld [vmem:[%s1994_s29 + $0x8c] sm:$0xf]  ;;  %v273_v22 = vld [vmem:[%s1994_s29 + $0x10] sm:$0xf]  ;;  %v336_v28 = vmax.bf16 %v1933_v7, %v272_v19 }
  0x14   : > { %v1569_v13 = vcombine.low %v333_v8, %v334_v9  ;;  %1787 = vmatpush3.bf16.msra.mxu0 %v1904_v3  ;;  %1871 = vmatpush3.bf16.msra.mxu1 %v1904_v3  ;;  %v274_v24 = vld [vmem:[%s1994_s29 + $0x14] sm:$0xf]  ;;  %v305_v25 = vld [vmem:[%s1994_s29 + $0x90] sm:$0xf]  ;;  %v367_v29 = vmax.bf16 %v1933_v7, %v303_v20  ;;  %v368_v30 = vmax.bf16 %v1933_v7, %v304_v21  ;;  %v275_v31 = vld [vmem:[%s1994_s29 + $0x18] sm:$0xf] }
  0x15   : > { %v1585_v15 = vcombine.low %v365_v11, %v366_v12  ;;  %1788 = vmatprep.subr.bf16.mxu0 %v1905_v14  ;;  %1864 = vmatprep.subr.bf16.mxu1 %v1905_v14  ;;  %v306_v26 = vld [vmem:[%s1994_s29 + $0x94] sm:$0xf]  ;;  %v337_v32 = vmax.bf16 %v1933_v7, %v273_v22  ;;  %v338_v33 = vmax.bf16 %v1933_v7, %v274_v24  ;;  %v276_v36 = vld [vmem:[%s1994_s29 + $0x1c] sm:$0xf]  ;;  %v307_v37 = vld [vmem:[%s1994_s29 + $0x98] sm:$0xf] }
  0x16   : > { %1796 = vmatprep.mubr.bf16.mxu0 %v1569_v13  ;;  %v369_v34 = vmax.bf16 %v1933_v7, %v305_v25  ;;  %v370_v35 = vmax.bf16 %v1933_v7, %v306_v26  ;;  %v308_v38 = vld [vmem:[%s1994_s29 + $0x9c] sm:$0xf]  ;;  %v277_v39 = vld [vmem:[%s1994_s29 + $0x20] sm:$0xf]  ;;  %v278_v40 = vld [vmem:[%s1994_s29 + $0x24] sm:$0xf]  ;;  %v1570_v42 = vcombine.low %v335_v23, %v336_v28  ;;  %v1586_v43 = vcombine.low %v367_v29, %v368_v30 }
  0x17   : > { %1828 = vmatprep.mubr.bf16.mxu1 %v1585_v15  ;;  %v295_v41 = vld [vmem:[%s1994_s29 + $0x68] sm:$0xf]  ;;  %v309_v44 = vld [vmem:[%s1994_s29 + $0xa0] sm:$0xf]  ;;  %v310_v45 = vld [vmem:[%s1994_s29 + $0xa4] sm:$0xf]  ;;  %v339_v47 = vmax.bf16 %v1933_v7, %v275_v31  ;;  %v340_v48 = vmax.bf16 %v1933_v7, %v276_v36  ;;  %v371_v49 = vmax.bf16 %v1933_v7, %v307_v37  ;;  %v372_v50 = vmax.bf16 %v1933_v7, %v308_v38 }
  0x18   : > { %1789 = vmatpush3.bf16.msra.mxu0 %v1905_v14  ;;  %1872 = vmatpush3.bf16.msra.mxu1 %v1905_v14  ;;  %v296_v46 = vld [vmem:[%s1994_s29 + $0x6c] sm:$0xf]  ;;  %v327_v51 = vld [vmem:[%s1994_s29 + $0xe8] sm:$0xf]  ;;  %v297_v53 = vld [vmem:[%s1994_s29 + $0x70] sm:$0xf]  ;;  %v1571_v54 = vcombine.low %v337_v32, %v338_v33  ;;  %v1587_v55 = vcombine.low %v369_v34, %v370_v35  ;;  %v341_v56 = vmax.bf16 %v1933_v7, %v277_v39 }
  0x19   : > { %1790 = vmatprep.subr.bf16.mxu0 %v1906_v16  ;;  %1865 = vmatprep.subr.bf16.mxu1 %v1906_v16  ;;  %v328_v52 = vld [vmem:[%s1994_s29 + $0xec] sm:$0xf]  ;;  %v2054_v57 = vmax.bf16 %v1933_v7, %v295_v41  ;;  %v298_v58 = vld [vmem:[%s1994_s29 + $0x74] sm:$0xf]  ;;  %v329_v59 = vld [vmem:[%s1994_s29 + $0xf0] sm:$0xf]  ;;  %v342_v61 = vmax.bf16 %v1933_v7, %v278_v40  ;;  %v373_v62 = vmax.bf16 %v1933_v7, %v309_v44 }
  0x1a   : > { %v330_v60 = vld [vmem:[%s1994_s29 + $0xf4] sm:$0xf]  ;;  %v2062_v63 = vmax.bf16 %v1933_v7, %v296_v46  ;;  %v299_v0 = vld [vmem:[%s1994_s29 + $0x78] sm:$0xf]  ;;  %v300_v1 = vld [vmem:[%s1994_s29 + $0x7c] sm:$0xf]  ;;  %v374_v2 = vmax.bf16 %v1933_v7, %v310_v45  ;;  %v2068_v3 = vmax.bf16 %v1933_v7, %v327_v51  ;;  %v2071_v4 = vmax.bf16 %v1933_v7, %v328_v52 }
  0x1b   : > { %v2074_v5 = vmax.bf16 %v1933_v7, %v297_v53  ;;  %v331_v6 = vld [vmem:[%s1994_s29 + $0xf8] sm:$0xf]  ;;  %v2080_v9 = vmax.bf16 %v1933_v7, %v298_v58  ;;  %v2083_v10 = vmax.bf16 %v1933_v7, %v329_v59  ;;  %v2086_v11 = vmax.bf16 %v1933_v7, %v330_v60  ;;  %v332_v12 = vld [vmem:[%s1994_s29 + $0xfc] sm:$0xf]  ;;  %v279_v23 = vld [vmem:[%s1994_s29 + $0x28] sm:$0xf] }
  0x1c   : > { %1791 = vmatpush3.bf16.msra.mxu0 %v1906_v16  ;;  %1873 = vmatpush3.bf16.msra.mxu1 %v1906_v16  ;;  %v1582_v8 = vcombine.low %v2054_v57, %v2062_v63  ;;  %v1598_v13 = vcombine.low %v2068_v3, %v2071_v4  ;;  %v2092_v14 = vmax.bf16 %v1933_v7, %v299_v0  ;;  %v280_v24 = vld [vmem:[%s1994_s29 + $0x2c] sm:$0xf]  ;;  %v311_v28 = vld [vmem:[%s1994_s29 + $0xa8] sm:$0xf]  ;;  %v281_v30 = vld [vmem:[%s1994_s29 + $0x30] sm:$0xf] }
  0x1d   : > { %1792 = vmatprep.subr.bf16.mxu0 %v1907_v17  ;;  %1866 = vmatprep.subr.bf16.mxu1 %v1907_v17  ;;  %v2095_v15 = vmax.bf16 %v1933_v7, %v300_v1  ;;  %v1583_v16 = vcombine.low %v2074_v5, %v2080_v9  ;;  %v2102_v18 = vmax.bf16 %v1933_v7, %v331_v6  ;;  %v312_v29 = vld [vmem:[%s1994_s29 + $0xac] sm:$0xf]  ;;  %v282_v31 = vld [vmem:[%s1994_s29 + $0x34] sm:$0xf]  ;;  %v313_v32 = vld [vmem:[%s1994_s29 + $0xb0] sm:$0xf] }
  0x1e   : > { %v2107_v20 = vmax.bf16 %v1933_v7, %v332_v12  ;;  %v1572_v21 = vcombine.low %v339_v47, %v340_v48  ;;  %v1588_v22 = vcombine.low %v371_v49, %v372_v50  ;;  %v1573_v26 = vcombine.low %v341_v56, %v342_v61  ;;  %v314_v33 = vld [vmem:[%s1994_s29 + $0xb4] sm:$0xf]  ;;  %v283_v44 = vld [vmem:[%s1994_s29 + $0x38] sm:$0xf]  ;;  %v284_v45 = vld [vmem:[%s1994_s29 + $0x3c] sm:$0xf] }
  0x1f   : > { %v1584_v19 = vcombine.low %v2092_v14, %v2095_v15  ;;  %v343_v34 = vmax.bf16 %v1933_v7, %v279_v23  ;;  %v344_v35 = vmax.bf16 %v1933_v7, %v280_v24  ;;  %v375_v36 = vmax.bf16 %v1933_v7, %v311_v28  ;;  %v315_v48 = vld [vmem:[%s1994_s29 + $0xb8] sm:$0xf]  ;;  %v316_v49 = vld [vmem:[%s1994_s29 + $0xbc] sm:$0xf]  ;;  %v285_v50 = vld [vmem:[%s1994_s29 + $0x40] sm:$0xf] }
  0x20   : > { %1793 = vmatpush3.bf16.msra.mxu0 %v1907_v17  ;;  %1874 = vmatpush3.bf16.msra.mxu1 %v1907_v17  ;;  %v1599_v17 = vcombine.low %v2083_v10, %v2086_v11  ;;  %v1600_v25 = vcombine.low %v2102_v18, %v2107_v20  ;;  %v376_v37 = vmax.bf16 %v1933_v7, %v312_v29  ;;  %v286_v51 = vld [vmem:[%s1994_s29 + $0x44] sm:$0xf]  ;;  %v317_v52 = vld [vmem:[%s1994_s29 + $0xc0] sm:$0xf]  ;;  %v288_v6 = vld [vmem:[%s1994_s29 + $0x4c] sm:$0xf] }
  0x21   : > { %1794 = vmatprep.subr.bf16.mxu0 %v1908_v27  ;;  %1867 = vmatprep.subr.bf16.mxu1 %v1908_v27  ;;  %v345_v38 = vmax.bf16 %v1933_v7, %v281_v30  ;;  %v346_v39 = vmax.bf16 %v1933_v7, %v282_v31  ;;  %v377_v40 = vmax.bf16 %v1933_v7, %v313_v32  ;;  %v318_v53 = vld [vmem:[%s1994_s29 + $0xc4] sm:$0xf]  ;;  %v320_v23 = vld [vmem:[%s1994_s29 + $0xcc] sm:$0xf]  ;;  %v289_v24 = vld [vmem:[%s1994_s29 + $0x50] sm:$0xf] }
  0x22   : > { %v378_v41 = vmax.bf16 %v1933_v7, %v314_v33  ;;  %v379_v56 = vmax.bf16 %v1933_v7, %v315_v48  ;;  %v380_v58 = vmax.bf16 %v1933_v7, %v316_v49  ;;  %v349_v59 = vmax.bf16 %v1933_v7, %v285_v50  ;;  %v322_v28 = vld [vmem:[%s1994_s29 + $0xd4] sm:$0xf]  ;;  %v326_v48 = vld [vmem:[%s1994_s29 + $0xe4] sm:$0xf] }
  0x23   : > { %v1575_v46 = vcombine.low %v345_v38, %v346_v39  ;;  %v350_v60 = vmax.bf16 %v1933_v7, %v286_v51  ;;  %v381_v61 = vmax.bf16 %v1933_v7, %v317_v52  ;;  %v352_v30 = vmax.bf16 %v1933_v7, %v288_v6  ;;  %v291_v39 = vld [vmem:[%s1994_s29 + $0x58] sm:$0xf]  ;;  %v1015_v63 = vld [vmem:[%s2197_s20 + $0x10] sm:$0xff]  ;;  %v1013_v10 = vld [vmem:[%s2197_s20] sm:$0xff] }
  0x24   : > { %1795 = vmatpush3.bf16.msra.mxu0 %v1908_v27  ;;  %1875 = vmatpush3.bf16.msra.mxu1 %v1908_v27  ;;  %v1589_v27 = vcombine.low %v373_v62, %v374_v2  ;;  %v1591_v47 = vcombine.low %v377_v40, %v378_v41  ;;  %v382_v62 = vmax.bf16 %v1933_v7, %v318_v53  ;;  %v287_v2 = vld [vmem:[%s1994_s29 + $0x48] sm:$0xf]  ;;  %v292_v40 = vld [vmem:[%s1994_s29 + $0x5c] sm:$0xf]  ;;  %v1047_v4 = vld [vmem:[%s2197_s20 + $0x110] sm:$0xff] }
  0x25   : > { %v1592_v1 = vcombine.low %v379_v56, %v380_v58  ;;  %v1577_v12 = vcombine.low %v349_v59, %v350_v60  ;;  %v351_v29 = vmax.bf16 %v1933_v7, %v287_v2  ;;  %v384_v32 = vmax.bf16 %v1933_v7, %v320_v23  ;;  %v1014_v2 = vld [vmem:[%s2197_s20 + $0x8] sm:$0xff] }
  0x26   : > { %v353_v33 = vmax.bf16 %v1933_v7, %v289_v24  ;;  %v355_v49 = vmax.bf16 %v1933_v7, %v291_v39  ;;  %v356_v50 = vmax.bf16 %v1933_v7, %v292_v40  ;;  %v390_v56 = vmax.bf16 %v1933_v7, %v326_v48  ;;  %v1019_v39 = vld [vmem:[%s2197_s20 + $0x30] sm:$0xff] }
  0x27   : > { %1797 = vmatmul.mubr.bf16.vlgmr.msra.gmra.mrb[0].mxu0 %v1570_v42  ;;  %1829 = vmatmul.mubr.bf16.vlgmr.msra.gmra.mrb[0].mxu1 %v1586_v43  ;;  %v1574_v42 = vcombine.low %v343_v34, %v344_v35  ;;  %v1590_v43 = vcombine.low %v375_v36, %v376_v37  ;;  %v386_v36 = vmax.bf16 %v1933_v7, %v322_v28 }
  0x28   : > { %1800 = vmatprep.mubr.bf16.mxu0 %v1571_v54  ;;  %1832 = vmatprep.mubr.bf16.mxu1 %v1587_v55  ;;  %v347_v54 = vmax.bf16 %v1933_v7, %v283_v44  ;;  %v348_v55 = vmax.bf16 %v1933_v7, %v284_v45  ;;  %v1578_v37 = vcombine.low %v351_v29, %v352_v30  ;;  %v324_v44 = vld [vmem:[%s1994_s29 + $0xdc] sm:$0xf]  ;;  %v293_v45 = vld [vmem:[%s1994_s29 + $0x60] sm:$0xf] }
  0x29   : > { %v388_v52 = vmax.bf16 %v1933_v7, %v324_v44  ;;  %v357_v53 = vmax.bf16 %v1933_v7, %v293_v45  ;;  %v1580_v58 = vcombine.low %v355_v49, %v356_v50  ;;  %v1017_v45 = vld [vmem:[%s2197_s20 + $0x20] sm:$0xff] }
  0x2a   : > { %v1576_v0 = vcombine.low %v347_v54, %v348_v55 }
  0x2f   : > { %1801 = vmatmul.mubr.bf16.gmra.mrb[4].mxu0 %v1572_v21  ;;  %1833 = vmatmul.mubr.bf16.gmra.mrb[4].mxu1 %v1588_v22  ;;  %v1593_v21 = vcombine.low %v381_v61, %v382_v62  ;;  %v319_v22 = vld [vmem:[%s1994_s29 + $0xc8] sm:$0xf] }
  0x30   : > { %1804 = vmatprep.mubr.bf16.mxu0 %v1573_v26  ;;  %1836 = vmatprep.mubr.bf16.mxu1 %v1589_v27  ;;  %v290_v26 = vld [vmem:[%s1994_s29 + $0x54] sm:$0xf]  ;;  %v321_v27 = vld [vmem:[%s1994_s29 + $0xd0] sm:$0xf]  ;;  %v383_v31 = vmax.bf16 %v1933_v7, %v319_v22 }
  0x31   : > { %v354_v34 = vmax.bf16 %v1933_v7, %v290_v26  ;;  %v385_v35 = vmax.bf16 %v1933_v7, %v321_v27 }
  0x32   : > { %v1594_v38 = vcombine.low %v383_v31, %v384_v32 }
  0x33   : > { %v1579_v41 = vcombine.low %v353_v33, %v354_v34 }
  0x37   : > { %1805 = vmatmul.mubr.bf16.gmra.mrb[8].mxu0 %v1574_v42  ;;  %1837 = vmatmul.mubr.bf16.gmra.mrb[8].mxu1 %v1590_v43  ;;  %v1595_v42 = vcombine.low %v385_v35, %v386_v36  ;;  %v323_v43 = vld [vmem:[%s1994_s29 + $0xd8] sm:$0xf] }
  0x38   : > { %1808 = vmatprep.mubr.bf16.mxu0 %v1575_v46  ;;  %1840 = vmatprep.mubr.bf16.mxu1 %v1591_v47  ;;  %v294_v46 = vld [vmem:[%s1994_s29 + $0x64] sm:$0xf]  ;;  %v325_v47 = vld [vmem:[%s1994_s29 + $0xe0] sm:$0xf]  ;;  %v387_v51 = vmax.bf16 %v1933_v7, %v323_v43 }
  0x39   : > { %v358_v54 = vmax.bf16 %v1933_v7, %v294_v46  ;;  %v389_v55 = vmax.bf16 %v1933_v7, %v325_v47  ;;  %v2202_v7 = vld [vmem:[%s2478_s2] ss:$0 sm:$0xff] }
  0x3a   : > { %v1596_v59 = vcombine.low %v387_v51, %v388_v52  ;;  %v1049_v47 = vld [vmem:[%s2197_s20 + $0x120] sm:$0xff]  ;;  %v1020_v51 = vld [vmem:[%s2197_s20 + $0x38] sm:$0xff] }
  0x3b   : > { %v1581_v60 = vcombine.low %v357_v53, %v358_v54  ;;  %v1597_v61 = vcombine.low %v389_v55, %v390_v56  ;;  %v1052_v53 = vld [vmem:[%s2197_s20 + $0x138] sm:$0xff] }
  0x3f   : > { %1809 = vmatmul.mubr.bf16.gmra.mrb[12].mxu0 %v1576_v0  ;;  %1841 = vmatmul.mubr.bf16.gmra.mrb[12].mxu1 %v1592_v1 }
  0x40   : > { %1812 = vmatprep.mubr.bf16.mxu0 %v1577_v12  ;;  %1844 = vmatprep.mubr.bf16.mxu1 %v1593_v21  ;;  %v1046_v12 = vld [vmem:[%s2197_s20 + $0x108] sm:$0xff] }
  0x47   : > { %1813 = vmatmul.mubr.bf16.gmra.mrb[16].mxu0 %v1578_v37  ;;  %1845 = vmatmul.mubr.bf16.gmra.mrb[16].mxu1 %v1594_v38 }
  0x48   : > { %1816 = vmatprep.mubr.bf16.mxu0 %v1579_v41  ;;  %1848 = vmatprep.mubr.bf16.mxu1 %v1595_v42  ;;  %v1051_v41 = vld [vmem:[%s2197_s20 + $0x130] sm:$0xff] }
  0x4f   : > { %1817 = vmatmul.mubr.bf16.gmra.mrb[20].mxu0 %v1580_v58  ;;  %1849 = vmatmul.mubr.bf16.gmra.mrb[20].mxu1 %v1596_v59 }
  0x50   : > { %1820 = vmatprep.mubr.bf16.mxu0 %v1581_v60  ;;  %1852 = vmatprep.mubr.bf16.mxu1 %v1597_v61  ;;  %v1018_v60 = vld [vmem:[%s2197_s20 + $0x28] sm:$0xff] }
  0x57   : > { %1821 = vmatmul.mubr.bf16.gmra.mrb[24].mxu0 %v1582_v8  ;;  %1853 = vmatmul.mubr.bf16.gmra.mrb[24].mxu1 %v1598_v13  ;;  %v1045_v13 = vld [vmem:[%s2197_s20 + $0x100] sm:$0xff] }
  0x58   : > { %1824 = vmatprep.mubr.bf16.mxu0 %v1583_v16  ;;  %1856 = vmatprep.mubr.bf16.mxu1 %v1599_v17  ;;  %v1016_v17 = vld [vmem:[%s2197_s20 + $0x18] sm:$0xff] }
  0x5f   : > { %1825 = vmatmul.mubr.bf16.gmra.mrb[28].mxu0 %v1584_v19  ;;  %1857 = vmatmul.mubr.bf16.gmra.mrb[28].mxu1 %v1600_v25  ;;  %v1048_v19 = vld [vmem:[%s2197_s20 + $0x118] sm:$0xff] }
  0xfa   : > { %v1798_v57 = vpop.f32.mrb[0].mxu0  ;;  %v1830_v3 = vpop.f32.mrb[0].mxu1 }
  0xfb   : > { %v951_v5 = vadd.f32 %v1798_v57, %v2202_v7  ;;  %v983_v8 = vadd.f32 %v1830_v3, %v2202_v7  ;;  %v687_v9 = vpop.f32.mrb[1].mxu0  ;;  %v815_v11 = vpop.f32.mrb[1].mxu1  ;;  %v1050_v57 = vld [vmem:[%s2197_s20 + $0x128] sm:$0xff] }
  0xfc   : > { %v949_v14 = vadd.f32 %v2202_v7, %v687_v9  ;;  %v981_v15 = vadd.f32 %v2202_v7, %v815_v11  ;;  %v1799_v16 = vpop.f32.mrb[2].mxu0  ;;  %v1831_v18 = vpop.f32.mrb[2].mxu1 }
  0xfd   : > { %v1079_v20 = vadd.f32 %v1015_v63, %v951_v5  ;;  %v1111_v25 = vadd.f32 %v1047_v4, %v983_v8  ;;  %v952_v62 = vadd.f32 %v1799_v16, %v2202_v7  ;;  %v984_v0 = vadd.f32 %v1831_v18, %v2202_v7  ;;  %v690_v1 = vpop.f32.mrb[3].mxu0  ;;  %v818_v6 = vpop.f32.mrb[3].mxu1 }
  0xfe   : > { %v1077_v21 = vadd.f32 %v1013_v10, %v949_v14  ;;  %v1109_v22 = vadd.f32 %v1045_v13, %v981_v15  ;;  %v950_v23 = vadd.f32 %v2202_v7, %v690_v1  ;;  %v982_v24 = vadd.f32 %v2202_v7, %v818_v6  ;;  %v1055_v1 = vld [vmem:[%s2197_s20 + $0x150] sm:$0xff] }
  0xff   : > { %v1678_v26 = vpack.c.bf16 %v1079_v20, %v1079_v20  ;;  %v1710_v27 = vpack.c.bf16 %v1111_v25, %v1111_v25  ;;  %v1080_v28 = vadd.f32 %v1016_v17, %v952_v62  ;;  %v1112_v29 = vadd.f32 %v1048_v19, %v984_v0  ;;  %v1023_v62 = vld [vmem:[%s2197_s20 + $0x50] sm:$0xff] }
 0x100   : > { %v1676_v30 = vpack.c.bf16 %v1077_v21, %v1077_v21  ;;  %v1708_v31 = vpack.c.bf16 %v1109_v22, %v1109_v22  ;;  %v1078_v32 = vadd.f32 %v1014_v2, %v950_v23  ;;  %v1110_v33 = vadd.f32 %v1046_v12, %v982_v24  ;;  %v1021_v21 = vld [vmem:[%s2197_s20 + $0x40] sm:$0xff] }
 0x101   : > { %1400 = vst.msk [vmem:[%s2223_s27 + $0x8] sm:$0xf] %vm1397_vm0, %v1678_v26  ;;  %1432 = vst.msk [vmem:[%s2223_s27 + $0x88] sm:$0xf] %vm1397_vm0, %v1710_v27  ;;  %v1679_v34 = vpack.c.bf16 %v1080_v28, %v1080_v28  ;;  %v1711_v35 = vpack.c.bf16 %v1112_v29, %v1112_v29  ;;  %v1053_v23 = vld [vmem:[%s2197_s20 + $0x140] sm:$0xff]  ;;  %v1024_v28 = vld [vmem:[%s2197_s20 + $0x58] sm:$0xff] }
 0x102   : > { %1398 = vst.msk [vmem:[%s2223_s27] sm:$0xf] %vm1397_vm0, %v1676_v30  ;;  %1430 = vst.msk [vmem:[%s2223_s27 + $0x80] sm:$0xf] %vm1397_vm0, %v1708_v31  ;;  %v1677_v36 = vpack.c.bf16 %v1078_v32, %v1078_v32  ;;  %v1709_v37 = vpack.c.bf16 %v1110_v33, %v1110_v33  ;;  %v1802_v38 = vpop.f32.mrb[4].mxu0  ;;  %v1834_v40 = vpop.f32.mrb[4].mxu1 }
 0x103   : > { %1401 = vst.msk [vmem:[%s2223_s27 + $0xc] sm:$0xf] %vm1397_vm0, %v1679_v34  ;;  %1433 = vst.msk [vmem:[%s2223_s27 + $0x8c] sm:$0xf] %vm1397_vm0, %v1711_v35  ;;  %v955_v42 = vadd.f32 %v1802_v38, %v2202_v7  ;;  %v987_v43 = vadd.f32 %v1834_v40, %v2202_v7  ;;  %v703_v44 = vpop.f32.mrb[5].mxu0  ;;  %v831_v46 = vpop.f32.mrb[5].mxu1 }
 0x104   : > { %1399 = vst.msk [vmem:[%s2223_s27 + $0x4] sm:$0xf] %vm1397_vm0, %v1677_v36  ;;  %1431 = vst.msk [vmem:[%s2223_s27 + $0x84] sm:$0xf] %vm1397_vm0, %v1709_v37  ;;  %v953_v48 = vadd.f32 %v2202_v7, %v703_v44  ;;  %v985_v49 = vadd.f32 %v2202_v7, %v831_v46  ;;  %v1803_v50 = vpop.f32.mrb[6].mxu0  ;;  %v1835_v52 = vpop.f32.mrb[6].mxu1 }
 0x105   : > { %v1083_v54 = vadd.f32 %v1019_v39, %v955_v42  ;;  %v1115_v55 = vadd.f32 %v1051_v41, %v987_v43  ;;  %v956_v56 = vadd.f32 %v1803_v50, %v2202_v7  ;;  %v988_v58 = vadd.f32 %v1835_v52, %v2202_v7  ;;  %v706_v59 = vpop.f32.mrb[7].mxu0  ;;  %v834_v61 = vpop.f32.mrb[7].mxu1  ;;  %v1056_v30 = vld [vmem:[%s2197_s20 + $0x158] sm:$0xff]  ;;  %v1022_v36 = vld [vmem:[%s2197_s20 + $0x48] sm:$0xff] }
 0x106   : > { %v1081_v63 = vadd.f32 %v1017_v45, %v953_v48  ;;  %v1113_v3 = vadd.f32 %v1049_v47, %v985_v49  ;;  %v954_v4 = vadd.f32 %v2202_v7, %v706_v59  ;;  %v986_v5 = vadd.f32 %v2202_v7, %v834_v61  ;;  %v1054_v38 = vld [vmem:[%s2197_s20 + $0x148] sm:$0xff]  ;;  %v1059_v59 = vld [vmem:[%s2197_s20 + $0x170] sm:$0xff] }
 0x107   : > { %v1682_v8 = vpack.c.bf16 %v1083_v54, %v1083_v54  ;;  %v1714_v9 = vpack.c.bf16 %v1115_v55, %v1115_v55  ;;  %v1084_v10 = vadd.f32 %v1020_v51, %v956_v56  ;;  %v1116_v11 = vadd.f32 %v1052_v53, %v988_v58  ;;  %v1027_v56 = vld [vmem:[%s2197_s20 + $0x70] sm:$0xff] }
 0x108   : > { %v1680_v13 = vpack.c.bf16 %v1081_v63, %v1081_v63  ;;  %v1712_v14 = vpack.c.bf16 %v1113_v3, %v1113_v3  ;;  %v1082_v15 = vadd.f32 %v1018_v60, %v954_v4  ;;  %v1114_v16 = vadd.f32 %v1050_v57, %v986_v5  ;;  %v1025_v63 = vld [vmem:[%s2197_s20 + $0x60] sm:$0xff] }
 0x109   : > { %1404 = vst.msk [vmem:[%s2223_s27 + $0x18] sm:$0xf] %vm1397_vm0, %v1682_v8  ;;  %1436 = vst.msk [vmem:[%s2223_s27 + $0x98] sm:$0xf] %vm1397_vm0, %v1714_v9  ;;  %v1683_v17 = vpack.c.bf16 %v1084_v10, %v1084_v10  ;;  %v1715_v18 = vpack.c.bf16 %v1116_v11, %v1116_v11  ;;  %v1057_v4 = vld [vmem:[%s2197_s20 + $0x160] sm:$0xff]  ;;  %v1028_v10 = vld [vmem:[%s2197_s20 + $0x78] sm:$0xff] }
 0x10a   : > { %1402 = vst.msk [vmem:[%s2223_s27 + $0x10] sm:$0xf] %vm1397_vm0, %v1680_v13  ;;  %1434 = vst.msk [vmem:[%s2223_s27 + $0x90] sm:$0xf] %vm1397_vm0, %v1712_v14  ;;  %v1681_v19 = vpack.c.bf16 %v1082_v15, %v1082_v15  ;;  %v1713_v20 = vpack.c.bf16 %v1114_v16, %v1114_v16  ;;  %v1806_v25 = vpop.f32.mrb[8].mxu0  ;;  %v1838_v0 = vpop.f32.mrb[8].mxu1 }
 0x10b   : > { %1405 = vst.msk [vmem:[%s2223_s27 + $0x1c] sm:$0xf] %vm1397_vm0, %v1683_v17  ;;  %1437 = vst.msk [vmem:[%s2223_s27 + $0x9c] sm:$0xf] %vm1397_vm0, %v1715_v18  ;;  %v959_v2 = vadd.f32 %v1806_v25, %v2202_v7  ;;  %v991_v6 = vadd.f32 %v1838_v0, %v2202_v7  ;;  %v719_v12 = vpop.f32.mrb[9].mxu0  ;;  %v847_v22 = vpop.f32.mrb[9].mxu1 }
 0x10c   : > { %1403 = vst.msk [vmem:[%s2223_s27 + $0x14] sm:$0xf] %vm1397_vm0, %v1681_v19  ;;  %1435 = vst.msk [vmem:[%s2223_s27 + $0x94] sm:$0xf] %vm1397_vm0, %v1713_v20  ;;  %v957_v24 = vadd.f32 %v2202_v7, %v719_v12  ;;  %v989_v26 = vadd.f32 %v2202_v7, %v847_v22  ;;  %v1807_v27 = vpop.f32.mrb[10].mxu0  ;;  %v1839_v29 = vpop.f32.mrb[10].mxu1 }
 0x10d   : > { %v1087_v31 = vadd.f32 %v1023_v62, %v959_v2  ;;  %v1119_v32 = vadd.f32 %v1055_v1, %v991_v6  ;;  %v960_v33 = vadd.f32 %v1807_v27, %v2202_v7  ;;  %v992_v34 = vadd.f32 %v1839_v29, %v2202_v7  ;;  %v722_v35 = vpop.f32.mrb[11].mxu0  ;;  %v850_v37 = vpop.f32.mrb[11].mxu1  ;;  %v1060_v13 = vld [vmem:[%s2197_s20 + $0x178] sm:$0xff]  ;;  %v1026_v19 = vld [vmem:[%s2197_s20 + $0x68] sm:$0xff] }
 0x10e   : > { %v1085_v39 = vadd.f32 %v1021_v21, %v957_v24  ;;  %v1117_v40 = vadd.f32 %v1053_v23, %v989_v26  ;;  %v958_v41 = vadd.f32 %v2202_v7, %v722_v35  ;;  %v990_v42 = vadd.f32 %v2202_v7, %v850_v37  ;;  %v1058_v25 = vld [vmem:[%s2197_s20 + $0x168] sm:$0xff]  ;;  %v1063_v35 = vld [vmem:[%s2197_s20 + $0x190] sm:$0xff] }
 0x10f   : > { %v1686_v43 = vpack.c.bf16 %v1087_v31, %v1087_v31  ;;  %v1718_v44 = vpack.c.bf16 %v1119_v32, %v1119_v32  ;;  %v1088_v45 = vadd.f32 %v1024_v28, %v960_v33  ;;  %v1120_v46 = vadd.f32 %v1056_v30, %v992_v34  ;;  %v1031_v33 = vld [vmem:[%s2197_s20 + $0x90] sm:$0xff] }
 0x110   : > { %v1684_v47 = vpack.c.bf16 %v1085_v39, %v1085_v39  ;;  %v1716_v48 = vpack.c.bf16 %v1117_v40, %v1117_v40  ;;  %v1086_v49 = vadd.f32 %v1022_v36, %v958_v41  ;;  %v1118_v50 = vadd.f32 %v1054_v38, %v990_v42  ;;  %v1029_v39 = vld [vmem:[%s2197_s20 + $0x80] sm:$0xff] }
 0x111   : > { %1408 = vst.msk [vmem:[%s2223_s27 + $0x28] sm:$0xf] %vm1397_vm0, %v1686_v43  ;;  %1440 = vst.msk [vmem:[%s2223_s27 + $0xa8] sm:$0xf] %vm1397_vm0, %v1718_v44  ;;  %v1687_v51 = vpack.c.bf16 %v1088_v45, %v1088_v45  ;;  %v1719_v52 = vpack.c.bf16 %v1120_v46, %v1120_v46  ;;  %v1061_v41 = vld [vmem:[%s2197_s20 + $0x180] sm:$0xff]  ;;  %v1032_v45 = vld [vmem:[%s2197_s20 + $0x98] sm:$0xff] }
 0x112   : > { %1406 = vst.msk [vmem:[%s2223_s27 + $0x20] sm:$0xf] %vm1397_vm0, %v1684_v47  ;;  %1438 = vst.msk [vmem:[%s2223_s27 + $0xa0] sm:$0xf] %vm1397_vm0, %v1716_v48  ;;  %v1685_v53 = vpack.c.bf16 %v1086_v49, %v1086_v49  ;;  %v1717_v54 = vpack.c.bf16 %v1118_v50, %v1118_v50  ;;  %v1810_v55 = vpop.f32.mrb[12].mxu0  ;;  %v1842_v58 = vpop.f32.mrb[12].mxu1 }
 0x113   : > { %1409 = vst.msk [vmem:[%s2223_s27 + $0x2c] sm:$0xf] %vm1397_vm0, %v1687_v51  ;;  %1441 = vst.msk [vmem:[%s2223_s27 + $0xac] sm:$0xf] %vm1397_vm0, %v1719_v52  ;;  %v963_v60 = vadd.f32 %v1810_v55, %v2202_v7  ;;  %v995_v61 = vadd.f32 %v1842_v58, %v2202_v7  ;;  %v735_v57 = vpop.f32.mrb[13].mxu0  ;;  %v863_v3 = vpop.f32.mrb[13].mxu1 }
 0x114   : > { %1407 = vst.msk [vmem:[%s2223_s27 + $0x24] sm:$0xf] %vm1397_vm0, %v1685_v53  ;;  %1439 = vst.msk [vmem:[%s2223_s27 + $0xa4] sm:$0xf] %vm1397_vm0, %v1717_v54  ;;  %v961_v5 = vadd.f32 %v2202_v7, %v735_v57  ;;  %v993_v8 = vadd.f32 %v2202_v7, %v863_v3  ;;  %v1811_v9 = vpop.f32.mrb[14].mxu0  ;;  %v1843_v11 = vpop.f32.mrb[14].mxu1 }
 0x115   : > { %v1091_v14 = vadd.f32 %v1027_v56, %v963_v60  ;;  %v1123_v15 = vadd.f32 %v1059_v59, %v995_v61  ;;  %v964_v16 = vadd.f32 %v1811_v9, %v2202_v7  ;;  %v996_v17 = vadd.f32 %v1843_v11, %v2202_v7  ;;  %v738_v18 = vpop.f32.mrb[15].mxu0  ;;  %v866_v20 = vpop.f32.mrb[15].mxu1  ;;  %v1064_v47 = vld [vmem:[%s2197_s20 + $0x198] sm:$0xff]  ;;  %v1030_v53 = vld [vmem:[%s2197_s20 + $0x88] sm:$0xff] }
 0x116   : > { %v1089_v62 = vadd.f32 %v1025_v63, %v961_v5  ;;  %v1121_v0 = vadd.f32 %v1057_v4, %v993_v8  ;;  %v962_v1 = vadd.f32 %v2202_v7, %v738_v18  ;;  %v994_v2 = vadd.f32 %v2202_v7, %v866_v20  ;;  %v1062_v55 = vld [vmem:[%s2197_s20 + $0x188] sm:$0xff]  ;;  %v1067_v18 = vld [vmem:[%s2197_s20 + $0x1b0] sm:$0xff] }
 0x117   : > { %v1690_v6 = vpack.c.bf16 %v1091_v14, %v1091_v14  ;;  %v1722_v12 = vpack.c.bf16 %v1123_v15, %v1123_v15  ;;  %v1092_v21 = vadd.f32 %v1028_v10, %v964_v16  ;;  %v1124_v22 = vadd.f32 %v1060_v13, %v996_v17  ;;  %v1035_v16 = vld [vmem:[%s2197_s20 + $0xb0] sm:$0xff] }
 0x118   : > { %v1688_v23 = vpack.c.bf16 %v1089_v62, %v1089_v62  ;;  %v1720_v24 = vpack.c.bf16 %v1121_v0, %v1121_v0  ;;  %v1090_v26 = vadd.f32 %v1026_v19, %v962_v1  ;;  %v1122_v27 = vadd.f32 %v1058_v25, %v994_v2  ;;  %v1033_v62 = vld [vmem:[%s2197_s20 + $0xa0] sm:$0xff] }
 0x119   : > { %1412 = vst.msk [vmem:[%s2223_s27 + $0x38] sm:$0xf] %vm1397_vm0, %v1690_v6  ;;  %1444 = vst.msk [vmem:[%s2223_s27 + $0xb8] sm:$0xf] %vm1397_vm0, %v1722_v12  ;;  %v1691_v28 = vpack.c.bf16 %v1092_v21, %v1092_v21  ;;  %v1723_v29 = vpack.c.bf16 %v1124_v22, %v1124_v22  ;;  %v1065_v1 = vld [vmem:[%s2197_s20 + $0x1a0] sm:$0xff]  ;;  %v1036_v21 = vld [vmem:[%s2197_s20 + $0xb8] sm:$0xff] }
 0x11a   : > { %1410 = vst.msk [vmem:[%s2223_s27 + $0x30] sm:$0xf] %vm1397_vm0, %v1688_v23  ;;  %1442 = vst.msk [vmem:[%s2223_s27 + $0xb0] sm:$0xf] %vm1397_vm0, %v1720_v24  ;;  %v1689_v30 = vpack.c.bf16 %v1090_v26, %v1090_v26  ;;  %v1721_v31 = vpack.c.bf16 %v1122_v27, %v1122_v27  ;;  %v1814_v32 = vpop.f32.mrb[16].mxu0  ;;  %v1846_v34 = vpop.f32.mrb[16].mxu1 }
 0x11b   : > { %1413 = vst.msk [vmem:[%s2223_s27 + $0x3c] sm:$0xf] %vm1397_vm0, %v1691_v28  ;;  %1445 = vst.msk [vmem:[%s2223_s27 + $0xbc] sm:$0xf] %vm1397_vm0, %v1723_v29  ;;  %v967_v36 = vadd.f32 %v1814_v32, %v2202_v7  ;;  %v999_v37 = vadd.f32 %v1846_v34, %v2202_v7  ;;  %v751_v38 = vpop.f32.mrb[17].mxu0  ;;  %v879_v40 = vpop.f32.mrb[17].mxu1 }
 0x11c   : > { %1411 = vst.msk [vmem:[%s2223_s27 + $0x34] sm:$0xf] %vm1397_vm0, %v1689_v30  ;;  %1443 = vst.msk [vmem:[%s2223_s27 + $0xb4] sm:$0xf] %vm1397_vm0, %v1721_v31  ;;  %v965_v42 = vadd.f32 %v2202_v7, %v751_v38  ;;  %v997_v43 = vadd.f32 %v2202_v7, %v879_v40  ;;  %v1815_v44 = vpop.f32.mrb[18].mxu0  ;;  %v1847_v46 = vpop.f32.mrb[18].mxu1 }
 0x11d   : > { %v1095_v48 = vadd.f32 %v1031_v33, %v967_v36  ;;  %v1127_v49 = vadd.f32 %v1063_v35, %v999_v37  ;;  %v968_v50 = vadd.f32 %v1815_v44, %v2202_v7  ;;  %v1000_v51 = vadd.f32 %v1847_v46, %v2202_v7  ;;  %v754_v52 = vpop.f32.mrb[19].mxu0  ;;  %v882_v54 = vpop.f32.mrb[19].mxu1  ;;  %v1068_v23 = vld [vmem:[%s2197_s20 + $0x1b8] sm:$0xff]  ;;  %v1034_v30 = vld [vmem:[%s2197_s20 + $0xa8] sm:$0xff] }
 0x11e   : > { %v1093_v56 = vadd.f32 %v1029_v39, %v965_v42  ;;  %v1125_v58 = vadd.f32 %v1061_v41, %v997_v43  ;;  %v966_v59 = vadd.f32 %v2202_v7, %v754_v52  ;;  %v998_v60 = vadd.f32 %v2202_v7, %v882_v54  ;;  %v1066_v32 = vld [vmem:[%s2197_s20 + $0x1a8] sm:$0xff]  ;;  %v1071_v52 = vld [vmem:[%s2197_s20 + $0x1d0] sm:$0xff] }
 0x11f   : > { %v1694_v61 = vpack.c.bf16 %v1095_v48, %v1095_v48  ;;  %v1726_v57 = vpack.c.bf16 %v1127_v49, %v1127_v49  ;;  %v1096_v63 = vadd.f32 %v1032_v45, %v968_v50  ;;  %v1128_v3 = vadd.f32 %v1064_v47, %v1000_v51  ;;  %v1039_v50 = vld [vmem:[%s2197_s20 + $0xd0] sm:$0xff] }
 0x120   : > { %v1692_v4 = vpack.c.bf16 %v1093_v56, %v1093_v56  ;;  %v1724_v5 = vpack.c.bf16 %v1125_v58, %v1125_v58  ;;  %v1094_v8 = vadd.f32 %v1030_v53, %v966_v59  ;;  %v1126_v9 = vadd.f32 %v1062_v55, %v998_v60  ;;  %v1037_v56 = vld [vmem:[%s2197_s20 + $0xc0] sm:$0xff] }
 0x121   : > { %1416 = vst.msk [vmem:[%s2223_s27 + $0x48] sm:$0xf] %vm1397_vm0, %v1694_v61  ;;  %1448 = vst.msk [vmem:[%s2223_s27 + $0xc8] sm:$0xf] %vm1397_vm0, %v1726_v57  ;;  %v1695_v10 = vpack.c.bf16 %v1096_v63, %v1096_v63  ;;  %v1727_v11 = vpack.c.bf16 %v1128_v3, %v1128_v3  ;;  %v1069_v59 = vld [vmem:[%s2197_s20 + $0x1c0] sm:$0xff]  ;;  %v1040_v63 = vld [vmem:[%s2197_s20 + $0xd8] sm:$0xff] }
 0x122   : > { %1414 = vst.msk [vmem:[%s2223_s27 + $0x40] sm:$0xf] %vm1397_vm0, %v1692_v4  ;;  %1446 = vst.msk [vmem:[%s2223_s27 + $0xc0] sm:$0xf] %vm1397_vm0, %v1724_v5  ;;  %v1693_v13 = vpack.c.bf16 %v1094_v8, %v1094_v8  ;;  %v1725_v14 = vpack.c.bf16 %v1126_v9, %v1126_v9  ;;  %v1818_v15 = vpop.f32.mrb[20].mxu0  ;;  %v1850_v17 = vpop.f32.mrb[20].mxu1 }
 0x123   : > { %1417 = vst.msk [vmem:[%s2223_s27 + $0x4c] sm:$0xf] %vm1397_vm0, %v1695_v10  ;;  %1449 = vst.msk [vmem:[%s2223_s27 + $0xcc] sm:$0xf] %vm1397_vm0, %v1727_v11  ;;  %v971_v19 = vadd.f32 %v1818_v15, %v2202_v7  ;;  %v1003_v20 = vadd.f32 %v1850_v17, %v2202_v7  ;;  %v767_v25 = vpop.f32.mrb[21].mxu0  ;;  %v895_v0 = vpop.f32.mrb[21].mxu1 }
 0x124   : > { %1415 = vst.msk [vmem:[%s2223_s27 + $0x44] sm:$0xf] %vm1397_vm0, %v1693_v13  ;;  %1447 = vst.msk [vmem:[%s2223_s27 + $0xc4] sm:$0xf] %vm1397_vm0, %v1725_v14  ;;  %v969_v2 = vadd.f32 %v2202_v7, %v767_v25  ;;  %v1001_v6 = vadd.f32 %v2202_v7, %v895_v0  ;;  %v1819_v12 = vpop.f32.mrb[22].mxu0  ;;  %v1851_v22 = vpop.f32.mrb[22].mxu1 }
 0x125   : > { %v1099_v24 = vadd.f32 %v1035_v16, %v971_v19  ;;  %v1131_v26 = vadd.f32 %v1067_v18, %v1003_v20  ;;  %v972_v27 = vadd.f32 %v1819_v12, %v2202_v7  ;;  %v1004_v28 = vadd.f32 %v1851_v22, %v2202_v7  ;;  %v770_v29 = vpop.f32.mrb[23].mxu0  ;;  %v898_v31 = vpop.f32.mrb[23].mxu1  ;;  %v1072_v4 = vld [vmem:[%s2197_s20 + $0x1d8] sm:$0xff]  ;;  %v1038_v13 = vld [vmem:[%s2197_s20 + $0xc8] sm:$0xff] }
 0x126   : > { %v1097_v33 = vadd.f32 %v1033_v62, %v969_v2  ;;  %v1129_v34 = vadd.f32 %v1065_v1, %v1001_v6  ;;  %v970_v35 = vadd.f32 %v2202_v7, %v770_v29  ;;  %v1002_v36 = vadd.f32 %v2202_v7, %v898_v31  ;;  %v1070_v15 = vld [vmem:[%s2197_s20 + $0x1c8] sm:$0xff]  ;;  %v1075_v29 = vld [vmem:[%s2197_s20 + $0x1f0] sm:$0xff] }
 0x127   : > { %v1698_v37 = vpack.c.bf16 %v1099_v24, %v1099_v24  ;;  %v1730_v38 = vpack.c.bf16 %v1131_v26, %v1131_v26  ;;  %v1100_v39 = vadd.f32 %v1036_v21, %v972_v27  ;;  %v1132_v40 = vadd.f32 %v1068_v23, %v1004_v28  ;;  %v1043_v27 = vld [vmem:[%s2197_s20 + $0xf0] sm:$0xff] }
 0x128   : > { %v1696_v41 = vpack.c.bf16 %v1097_v33, %v1097_v33  ;;  %v1728_v42 = vpack.c.bf16 %v1129_v34, %v1129_v34  ;;  %v1098_v43 = vadd.f32 %v1034_v30, %v970_v35  ;;  %v1130_v44 = vadd.f32 %v1066_v32, %v1002_v36  ;;  %v1041_v33 = vld [vmem:[%s2197_s20 + $0xe0] sm:$0xff] }
 0x129   : > { %1420 = vst.msk [vmem:[%s2223_s27 + $0x58] sm:$0xf] %vm1397_vm0, %v1698_v37  ;;  %1452 = vst.msk [vmem:[%s2223_s27 + $0xd8] sm:$0xf] %vm1397_vm0, %v1730_v38  ;;  %v1699_v45 = vpack.c.bf16 %v1100_v39, %v1100_v39  ;;  %v1731_v46 = vpack.c.bf16 %v1132_v40, %v1132_v40  ;;  %v1073_v35 = vld [vmem:[%s2197_s20 + $0x1e0] sm:$0xff]  ;;  %v1044_v39 = vld [vmem:[%s2197_s20 + $0xf8] sm:$0xff] }
 0x12a   : > { %1418 = vst.msk [vmem:[%s2223_s27 + $0x50] sm:$0xf] %vm1397_vm0, %v1696_v41  ;;  %1450 = vst.msk [vmem:[%s2223_s27 + $0xd0] sm:$0xf] %vm1397_vm0, %v1728_v42  ;;  %v1697_v47 = vpack.c.bf16 %v1098_v43, %v1098_v43  ;;  %v1729_v48 = vpack.c.bf16 %v1130_v44, %v1130_v44  ;;  %v1822_v49 = vpop.f32.mrb[24].mxu0  ;;  %v1854_v51 = vpop.f32.mrb[24].mxu1 }
 0x12b   : > { %1421 = vst.msk [vmem:[%s2223_s27 + $0x5c] sm:$0xf] %vm1397_vm0, %v1699_v45  ;;  %1453 = vst.msk [vmem:[%s2223_s27 + $0xdc] sm:$0xf] %vm1397_vm0, %v1731_v46  ;;  %v975_v53 = vadd.f32 %v1822_v49, %v2202_v7  ;;  %v1007_v54 = vadd.f32 %v1854_v51, %v2202_v7  ;;  %v783_v55 = vpop.f32.mrb[25].mxu0  ;;  %v911_v58 = vpop.f32.mrb[25].mxu1 }
 0x12c   : > { %1419 = vst.msk [vmem:[%s2223_s27 + $0x54] sm:$0xf] %vm1397_vm0, %v1697_v47  ;;  %1451 = vst.msk [vmem:[%s2223_s27 + $0xd4] sm:$0xf] %vm1397_vm0, %v1729_v48  ;;  %v973_v60 = vadd.f32 %v2202_v7, %v783_v55  ;;  %v1005_v61 = vadd.f32 %v2202_v7, %v911_v58  ;;  %v1823_v57 = vpop.f32.mrb[26].mxu0  ;;  %v1855_v3 = vpop.f32.mrb[26].mxu1 }
 0x12d   : > { %v1103_v5 = vadd.f32 %v1039_v50, %v975_v53  ;;  %v1135_v8 = vadd.f32 %v1071_v52, %v1007_v54  ;;  %v976_v9 = vadd.f32 %v1823_v57, %v2202_v7  ;;  %v1008_v10 = vadd.f32 %v1855_v3, %v2202_v7  ;;  %v786_v11 = vpop.f32.mrb[27].mxu0  ;;  %v914_v14 = vpop.f32.mrb[27].mxu1  ;;  %v1076_v41 = vld [vmem:[%s2197_s20 + $0x1f8] sm:$0xff]  ;;  %v1042_v47 = vld [vmem:[%s2197_s20 + $0xe8] sm:$0xff] }
 0x12e   : > { %v1101_v16 = vadd.f32 %v1037_v56, %v973_v60  ;;  %v1133_v17 = vadd.f32 %v1069_v59, %v1005_v61  ;;  %v974_v18 = vadd.f32 %v2202_v7, %v786_v11  ;;  %v1006_v19 = vadd.f32 %v2202_v7, %v914_v14  ;;  %v1074_v49 = vld [vmem:[%s2197_s20 + $0x1e8] sm:$0xff] }
 0x12f   : > { %v1702_v20 = vpack.c.bf16 %v1103_v5, %v1103_v5  ;;  %v1734_v25 = vpack.c.bf16 %v1135_v8, %v1135_v8  ;;  %v1104_v62 = vadd.f32 %v1040_v63, %v976_v9  ;;  %v1136_v0 = vadd.f32 %v1072_v4, %v1008_v10 }
 0x130   : > { %v1700_v1 = vpack.c.bf16 %v1101_v16, %v1101_v16  ;;  %v1732_v2 = vpack.c.bf16 %v1133_v17, %v1133_v17  ;;  %v1102_v6 = vadd.f32 %v1038_v13, %v974_v18  ;;  %v1134_v12 = vadd.f32 %v1070_v15, %v1006_v19 }
 0x131   : > { %1424 = vst.msk [vmem:[%s2223_s27 + $0x68] sm:$0xf] %vm1397_vm0, %v1702_v20  ;;  %1456 = vst.msk [vmem:[%s2223_s27 + $0xe8] sm:$0xf] %vm1397_vm0, %v1734_v25  ;;  %v1703_v21 = vpack.c.bf16 %v1104_v62, %v1104_v62  ;;  %v1735_v22 = vpack.c.bf16 %v1136_v0, %v1136_v0 }
 0x132   : > { %1422 = vst.msk [vmem:[%s2223_s27 + $0x60] sm:$0xf] %vm1397_vm0, %v1700_v1  ;;  %1454 = vst.msk [vmem:[%s2223_s27 + $0xe0] sm:$0xf] %vm1397_vm0, %v1732_v2  ;;  %v1701_v23 = vpack.c.bf16 %v1102_v6, %v1102_v6  ;;  %v1733_v24 = vpack.c.bf16 %v1134_v12, %v1134_v12  ;;  %v1826_v26 = vpop.f32.mrb[28].mxu0  ;;  %v1858_v28 = vpop.f32.mrb[28].mxu1 }
 0x133   : > { %1425 = vst.msk [vmem:[%s2223_s27 + $0x6c] sm:$0xf] %vm1397_vm0, %v1703_v21  ;;  %1457 = vst.msk [vmem:[%s2223_s27 + $0xec] sm:$0xf] %vm1397_vm0, %v1735_v22  ;;  %v979_v30 = vadd.f32 %v1826_v26, %v2202_v7  ;;  %v1011_v31 = vadd.f32 %v1858_v28, %v2202_v7  ;;  %v799_v32 = vpop.f32.mrb[29].mxu0  ;;  %v927_v34 = vpop.f32.mrb[29].mxu1 }
 0x134   : > { %1423 = vst.msk [vmem:[%s2223_s27 + $0x64] sm:$0xf] %vm1397_vm0, %v1701_v23  ;;  %1455 = vst.msk [vmem:[%s2223_s27 + $0xe4] sm:$0xf] %vm1397_vm0, %v1733_v24  ;;  %v977_v36 = vadd.f32 %v2202_v7, %v799_v32  ;;  %v1009_v37 = vadd.f32 %v2202_v7, %v927_v34  ;;  %v1827_v38 = vpop.f32.mrb[30].mxu0  ;;  %v1859_v40 = vpop.f32.mrb[30].mxu1 }
 0x135   : > { %v1107_v42 = vadd.f32 %v1043_v27, %v979_v30  ;;  %v1139_v43 = vadd.f32 %v1075_v29, %v1011_v31  ;;  %v980_v44 = vadd.f32 %v1827_v38, %v2202_v7  ;;  %v1012_v45 = vadd.f32 %v1859_v40, %v2202_v7  ;;  %v802_v46 = vpop.f32.mrb[31].mxu0  ;;  %v930_v48 = vpop.f32.mrb[31].mxu1 }
 0x136   : > { %v1105_v50 = vadd.f32 %v1041_v33, %v977_v36  ;;  %v1137_v51 = vadd.f32 %v1073_v35, %v1009_v37  ;;  %v978_v52 = vadd.f32 %v2202_v7, %v802_v46  ;;  %v1010_v53 = vadd.f32 %v2202_v7, %v930_v48 }
 0x137   : > { %v1706_v54 = vpack.c.bf16 %v1107_v42, %v1107_v42  ;;  %v1738_v55 = vpack.c.bf16 %v1139_v43, %v1139_v43  ;;  %v1108_v56 = vadd.f32 %v1044_v39, %v980_v44  ;;  %v1140_v58 = vadd.f32 %v1076_v41, %v1012_v45 }
 0x138   : > { %v1704_v59 = vpack.c.bf16 %v1105_v50, %v1105_v50  ;;  %v1736_v60 = vpack.c.bf16 %v1137_v51, %v1137_v51  ;;  %v1106_v61 = vadd.f32 %v1042_v47, %v978_v52  ;;  %v1138_v57 = vadd.f32 %v1074_v49, %v1010_v53 }
 0x139   : > { %1428 = vst.msk [vmem:[%s2223_s27 + $0x78] sm:$0xf] %vm1397_vm0, %v1706_v54  ;;  %1460 = vst.msk [vmem:[%s2223_s27 + $0xf8] sm:$0xf] %vm1397_vm0, %v1738_v55  ;;  %v1707_v63 = vpack.c.bf16 %v1108_v56, %v1108_v56  ;;  %v1739_v3 = vpack.c.bf16 %v1140_v58, %v1140_v58 }
 0x13a   : > { %1426 = vst.msk [vmem:[%s2223_s27 + $0x70] sm:$0xf] %vm1397_vm0, %v1704_v59  ;;  %1458 = vst.msk [vmem:[%s2223_s27 + $0xf0] sm:$0xf] %vm1397_vm0, %v1736_v60  ;;  %v1705_v7 = vpack.c.bf16 %v1106_v61, %v1106_v61  ;;  %v1737_v4 = vpack.c.bf16 %v1138_v57, %v1138_v57 }
 0x13b   : > { %1429 = vst.msk [vmem:[%s2223_s27 + $0x7c] sm:$0xf] %vm1397_vm0, %v1707_v63  ;;  %1461 = vst.msk [vmem:[%s2223_s27 + $0xfc] sm:$0xf] %vm1397_vm0, %v1739_v3 }
 0x13c   : > { %1427 = vst.msk [vmem:[%s2223_s27 + $0x74] sm:$0xf] %vm1397_vm0, %v1705_v7  ;;  %1459 = vst.msk [vmem:[%s2223_s27 + $0xf4] sm:$0xf] %vm1397_vm0, %v1737_v4 }
 0x13d PF: > { %s14_s17 = sadd.s32 1, %s1931_s17   ;;  %s2481_s15 = smov %s1927_s16 }
 0x13e   : > { %p11_p5 = scmp.ge.s32.totalorder %s14_s17, 5   ;;  %s2482_s16 = smov %s2484_s18 }
 0x140   :  { %13 = sbr.rel (!%p11_p5) target bundleno = 2 (0x2), region = 72 }

// kernel: _lambda_.57
= control target key start
LH: loop header
LB: loop body
LE: loop exit
PB: predicated region body
PF: predicated region fallthrough
CT: control target
= control target key end

     0   :  { %s1379_s12 = smov 0   ;;  %s1381_s13 = smov 0   ;;  %s1823_s0 = inlined_call_operand.vmem [shape: bf16[1536,128], index: 0, kind: input, shape index: {}]   ;;  %s1824_s1 = inlined_call_operand.vmem [shape: bf16[128,128], index: 1, kind: input, shape index: {}]   ;;  %s1825_s2 = inlined_call_operand.vmem [shape: f32[1,4], index: 2, kind: input, shape index: {}]   ;;  %s1826_s3 = inlined_call_operand.vmem [shape: f32[1536,4], index: 3, kind: output, shape index: {}]  }
   0x1   :  { %s1383_s14 = smov 0  }
   0x2 LB: > { %s25_s15 = sadd.s32 1, %s1352_s13  ;;  %p1117_p0 = scmp.ge.s32.totalorder %s1356_s14, 1  ;;  %s1356_s14 = sphi %s1383_s14, %s13_s14   ;;  %s1352_s13 = sphi %s1381_s13, %s1828_s13   ;;  %s1348_s12 = sphi %s1379_s12, %s1827_s12  }
   0x3   : > { %p27_p1 = scmp.ge.s32.totalorder %s25_s15, 3  ;;  %p166_p2 = scmp.lt.s32.totalorder %s1356_s14, 4 }
   0x5   : > { %s1830_s15 = smov (%p27_p1, %s25_s15), 0  ;;  %p167_p3 = pnand %p1117_p0, %p166_p2 }
   0x6   : > { %v1326_v0 = vld [vmem:[%s1824_s1] sm:$0xff] (!%p167_p3)   ;;  %s1118_s18 = sshll.u32 (!%p167_p3), %s1348_s12, 6  ;;  %v1327_v1 = vld [vmem:[%s1824_s1 + $0x8] sm:$0xff] (!%p167_p3)   ;;  %v1328_v2 = vld [vmem:[%s1824_s1 + $0x10] sm:$0xff] (!%p167_p3)   ;;  %v1358_v7 = vmov (!%p167_p3), 0   ;;  %vm964_vm0 = vcmask (!%p167_p3), 31744  }
   0x7   : > { %170 = sbr.rel (%p167_p3) target bundleno = 313 (0x139), region = 32  ;;  %p199_p4 = scmp.lt.s32.totalorder (!%p167_p3), %s1118_s18, 191  ;;  %1205 = vmatprep.subr.bf16.mxu0 (!%p167_p3), %v1326_v0  ;;  %1285 = vmatprep.subr.bf16.mxu1 (!%p167_p3), %v1326_v0  ;;  %v1329_v3 = vld [vmem:[%s1824_s1 + $0x18] sm:$0xff] (!%p167_p3)   ;;  %v1330_v14 = vld [vmem:[%s1824_s1 + $0x20] sm:$0xff] (!%p167_p3)   ;;  %v1331_v16 = vld [vmem:[%s1824_s1 + $0x28] sm:$0xff] (!%p167_p3)  }
   0x8   : > { %1206 = vmatpush3.bf16.msra.mxu0 (!%p167_p3), %v1326_v0  ;;  %1293 = vmatpush3.bf16.msra.mxu1 (!%p167_p3), %v1326_v0  ;;  %v1332_v17 = vld [vmem:[%s1824_s1 + $0x30] sm:$0xff] (!%p167_p3)   ;;  %v1333_v27 = vld [vmem:[%s1824_s1 + $0x38] sm:$0xff] (!%p167_p3)  }
   0x9   : > { %1207 = vmatprep.subr.bf16.mxu0 (!%p167_p3), %v1327_v1  ;;  %1286 = vmatprep.subr.bf16.mxu1 (!%p167_p3), %v1327_v1 }
   0xc   : > { %1208 = vmatpush3.bf16.msra.mxu0 (!%p167_p3), %v1327_v1  ;;  %1294 = vmatpush3.bf16.msra.mxu1 (!%p167_p3), %v1327_v1 }
   0xd   : > { %1209 = vmatprep.subr.bf16.mxu0 (!%p167_p3), %v1328_v2  ;;  %1287 = vmatprep.subr.bf16.mxu1 (!%p167_p3), %v1328_v2 }
   0xe   : > { %s1832_s18 = smov (!%p199_p4, %s1118_s18), 191 }
   0xf   : > { %s1119_s23 = sshll.u32 %s1832_s18, 2  ;;  %s1121_s10 = sshll.u32 %s1832_s18, 3 }
  0x10   : > { %s1412_s26 = scalar_lea.vmem %s1823_s0, %s1119_s23  ;;  %1210 = vmatpush3.bf16.msra.mxu0 %v1328_v2  ;;  %1295 = vmatpush3.bf16.msra.mxu1 %v1328_v2  ;;  %s1620_s19 = scalar_lea.vmem %s1826_s3, %s1121_s10 }
  0x11   : > { %v220_v4 = vld [vmem:[%s1412_s26] sm:$0xf]  ;;  %v221_v5 = vld [vmem:[%s1412_s26 + $0x4] sm:$0xf]  ;;  %1211 = vmatprep.subr.bf16.mxu0 %v1329_v3  ;;  %1288 = vmatprep.subr.bf16.mxu1 %v1329_v3  ;;  %v222_v18 = vld [vmem:[%s1412_s26 + $0x8] sm:$0xf] }
  0x12   : > { %v252_v6 = vld [vmem:[%s1412_s26 + $0x80] sm:$0xf]  ;;  %v284_v8 = vmax.bf16 %v1358_v7, %v220_v4  ;;  %v285_v9 = vmax.bf16 %v1358_v7, %v221_v5  ;;  %v253_v10 = vld [vmem:[%s1412_s26 + $0x84] sm:$0xf]  ;;  %v223_v19 = vld [vmem:[%s1412_s26 + $0xc] sm:$0xf]  ;;  %v286_v23 = vmax.bf16 %v1358_v7, %v222_v18 }
  0x13   : > { %v316_v11 = vmax.bf16 %v1358_v7, %v252_v6  ;;  %v317_v12 = vmax.bf16 %v1358_v7, %v253_v10  ;;  %v254_v20 = vld [vmem:[%s1412_s26 + $0x88] sm:$0xf]  ;;  %v255_v21 = vld [vmem:[%s1412_s26 + $0x8c] sm:$0xf]  ;;  %v224_v22 = vld [vmem:[%s1412_s26 + $0x10] sm:$0xf]  ;;  %v287_v28 = vmax.bf16 %v1358_v7, %v223_v19 }
  0x14   : > { %v1122_v13 = vcombine.low %v284_v8, %v285_v9  ;;  %1212 = vmatpush3.bf16.msra.mxu0 %v1329_v3  ;;  %1296 = vmatpush3.bf16.msra.mxu1 %v1329_v3  ;;  %v225_v24 = vld [vmem:[%s1412_s26 + $0x14] sm:$0xf]  ;;  %v256_v25 = vld [vmem:[%s1412_s26 + $0x90] sm:$0xf]  ;;  %v318_v29 = vmax.bf16 %v1358_v7, %v254_v20  ;;  %v319_v30 = vmax.bf16 %v1358_v7, %v255_v21  ;;  %v226_v31 = vld [vmem:[%s1412_s26 + $0x18] sm:$0xf] }
  0x15   : > { %v1138_v15 = vcombine.low %v316_v11, %v317_v12  ;;  %1213 = vmatprep.subr.bf16.mxu0 %v1330_v14  ;;  %1289 = vmatprep.subr.bf16.mxu1 %v1330_v14  ;;  %v257_v26 = vld [vmem:[%s1412_s26 + $0x94] sm:$0xf]  ;;  %v288_v32 = vmax.bf16 %v1358_v7, %v224_v22  ;;  %v289_v33 = vmax.bf16 %v1358_v7, %v225_v24  ;;  %v227_v36 = vld [vmem:[%s1412_s26 + $0x1c] sm:$0xf]  ;;  %v258_v37 = vld [vmem:[%s1412_s26 + $0x98] sm:$0xf] }
  0x16   : > { %1221 = vmatprep.mubr.bf16.mxu0 %v1122_v13  ;;  %v320_v34 = vmax.bf16 %v1358_v7, %v256_v25  ;;  %v321_v35 = vmax.bf16 %v1358_v7, %v257_v26  ;;  %v259_v38 = vld [vmem:[%s1412_s26 + $0x9c] sm:$0xf]  ;;  %v228_v39 = vld [vmem:[%s1412_s26 + $0x20] sm:$0xf]  ;;  %v229_v40 = vld [vmem:[%s1412_s26 + $0x24] sm:$0xf]  ;;  %v1123_v42 = vcombine.low %v286_v23, %v287_v28  ;;  %v1139_v43 = vcombine.low %v318_v29, %v319_v30 }
  0x17   : > { %1253 = vmatprep.mubr.bf16.mxu1 %v1138_v15  ;;  %v246_v41 = vld [vmem:[%s1412_s26 + $0x68] sm:$0xf]  ;;  %v260_v44 = vld [vmem:[%s1412_s26 + $0xa0] sm:$0xf]  ;;  %v261_v45 = vld [vmem:[%s1412_s26 + $0xa4] sm:$0xf]  ;;  %v290_v47 = vmax.bf16 %v1358_v7, %v226_v31  ;;  %v291_v48 = vmax.bf16 %v1358_v7, %v227_v36  ;;  %v322_v49 = vmax.bf16 %v1358_v7, %v258_v37  ;;  %v323_v50 = vmax.bf16 %v1358_v7, %v259_v38 }
  0x18   : > { %1214 = vmatpush3.bf16.msra.mxu0 %v1330_v14  ;;  %1297 = vmatpush3.bf16.msra.mxu1 %v1330_v14  ;;  %v247_v46 = vld [vmem:[%s1412_s26 + $0x6c] sm:$0xf]  ;;  %v278_v51 = vld [vmem:[%s1412_s26 + $0xe8] sm:$0xf]  ;;  %v248_v53 = vld [vmem:[%s1412_s26 + $0x70] sm:$0xf]  ;;  %v1124_v54 = vcombine.low %v288_v32, %v289_v33  ;;  %v1140_v55 = vcombine.low %v320_v34, %v321_v35  ;;  %v292_v56 = vmax.bf16 %v1358_v7, %v228_v39 }
  0x19   : > { %1215 = vmatprep.subr.bf16.mxu0 %v1331_v16  ;;  %1290 = vmatprep.subr.bf16.mxu1 %v1331_v16  ;;  %v279_v52 = vld [vmem:[%s1412_s26 + $0xec] sm:$0xf]  ;;  %v1472_v57 = vmax.bf16 %v1358_v7, %v246_v41  ;;  %v249_v58 = vld [vmem:[%s1412_s26 + $0x74] sm:$0xf]  ;;  %v280_v59 = vld [vmem:[%s1412_s26 + $0xf0] sm:$0xf]  ;;  %v293_v61 = vmax.bf16 %v1358_v7, %v229_v40  ;;  %v324_v62 = vmax.bf16 %v1358_v7, %v260_v44 }
  0x1a   : > { %v281_v60 = vld [vmem:[%s1412_s26 + $0xf4] sm:$0xf]  ;;  %v1480_v63 = vmax.bf16 %v1358_v7, %v247_v46  ;;  %v250_v0 = vld [vmem:[%s1412_s26 + $0x78] sm:$0xf]  ;;  %v251_v1 = vld [vmem:[%s1412_s26 + $0x7c] sm:$0xf]  ;;  %v325_v2 = vmax.bf16 %v1358_v7, %v261_v45  ;;  %v1486_v3 = vmax.bf16 %v1358_v7, %v278_v51  ;;  %v1489_v4 = vmax.bf16 %v1358_v7, %v279_v52 }
  0x1b   : > { %v1492_v5 = vmax.bf16 %v1358_v7, %v248_v53  ;;  %v282_v6 = vld [vmem:[%s1412_s26 + $0xf8] sm:$0xf]  ;;  %v1498_v9 = vmax.bf16 %v1358_v7, %v249_v58  ;;  %v1501_v10 = vmax.bf16 %v1358_v7, %v280_v59  ;;  %v1504_v11 = vmax.bf16 %v1358_v7, %v281_v60  ;;  %v283_v12 = vld [vmem:[%s1412_s26 + $0xfc] sm:$0xf]  ;;  %v230_v23 = vld [vmem:[%s1412_s26 + $0x28] sm:$0xf] }
  0x1c   : > { %1216 = vmatpush3.bf16.msra.mxu0 %v1331_v16  ;;  %1298 = vmatpush3.bf16.msra.mxu1 %v1331_v16  ;;  %v1135_v8 = vcombine.low %v1472_v57, %v1480_v63  ;;  %v1151_v13 = vcombine.low %v1486_v3, %v1489_v4  ;;  %v1510_v14 = vmax.bf16 %v1358_v7, %v250_v0  ;;  %v231_v24 = vld [vmem:[%s1412_s26 + $0x2c] sm:$0xf]  ;;  %v262_v28 = vld [vmem:[%s1412_s26 + $0xa8] sm:$0xf]  ;;  %v232_v30 = vld [vmem:[%s1412_s26 + $0x30] sm:$0xf] }
  0x1d   : > { %1217 = vmatprep.subr.bf16.mxu0 %v1332_v17  ;;  %1291 = vmatprep.subr.bf16.mxu1 %v1332_v17  ;;  %v1513_v15 = vmax.bf16 %v1358_v7, %v251_v1  ;;  %v1136_v16 = vcombine.low %v1492_v5, %v1498_v9  ;;  %v1520_v18 = vmax.bf16 %v1358_v7, %v282_v6  ;;  %v263_v29 = vld [vmem:[%s1412_s26 + $0xac] sm:$0xf]  ;;  %v233_v31 = vld [vmem:[%s1412_s26 + $0x34] sm:$0xf]  ;;  %v264_v32 = vld [vmem:[%s1412_s26 + $0xb0] sm:$0xf] }
  0x1e   : > { %v1525_v20 = vmax.bf16 %v1358_v7, %v283_v12  ;;  %v1125_v21 = vcombine.low %v290_v47, %v291_v48  ;;  %v1141_v22 = vcombine.low %v322_v49, %v323_v50  ;;  %v1126_v26 = vcombine.low %v292_v56, %v293_v61  ;;  %v265_v33 = vld [vmem:[%s1412_s26 + $0xb4] sm:$0xf]  ;;  %v234_v44 = vld [vmem:[%s1412_s26 + $0x38] sm:$0xf]  ;;  %v235_v45 = vld [vmem:[%s1412_s26 + $0x3c] sm:$0xf] }
  0x1f   : > { %v1137_v19 = vcombine.low %v1510_v14, %v1513_v15  ;;  %v294_v34 = vmax.bf16 %v1358_v7, %v230_v23  ;;  %v295_v35 = vmax.bf16 %v1358_v7, %v231_v24  ;;  %v326_v36 = vmax.bf16 %v1358_v7, %v262_v28  ;;  %v266_v48 = vld [vmem:[%s1412_s26 + $0xb8] sm:$0xf]  ;;  %v267_v49 = vld [vmem:[%s1412_s26 + $0xbc] sm:$0xf]  ;;  %v236_v50 = vld [vmem:[%s1412_s26 + $0x40] sm:$0xf] }
  0x20   : > { %1218 = vmatpush3.bf16.msra.mxu0 %v1332_v17  ;;  %1299 = vmatpush3.bf16.msra.mxu1 %v1332_v17  ;;  %v1152_v17 = vcombine.low %v1501_v10, %v1504_v11  ;;  %v1153_v25 = vcombine.low %v1520_v18, %v1525_v20  ;;  %v327_v37 = vmax.bf16 %v1358_v7, %v263_v29  ;;  %v237_v51 = vld [vmem:[%s1412_s26 + $0x44] sm:$0xf]  ;;  %v268_v52 = vld [vmem:[%s1412_s26 + $0xc0] sm:$0xf]  ;;  %v239_v6 = vld [vmem:[%s1412_s26 + $0x4c] sm:$0xf] }
  0x21   : > { %1219 = vmatprep.subr.bf16.mxu0 %v1333_v27  ;;  %1292 = vmatprep.subr.bf16.mxu1 %v1333_v27  ;;  %v296_v38 = vmax.bf16 %v1358_v7, %v232_v30  ;;  %v297_v39 = vmax.bf16 %v1358_v7, %v233_v31  ;;  %v328_v40 = vmax.bf16 %v1358_v7, %v264_v32  ;;  %v269_v53 = vld [vmem:[%s1412_s26 + $0xc4] sm:$0xf]  ;;  %v271_v23 = vld [vmem:[%s1412_s26 + $0xcc] sm:$0xf]  ;;  %v240_v24 = vld [vmem:[%s1412_s26 + $0x50] sm:$0xf] }
  0x22   : > { %v329_v41 = vmax.bf16 %v1358_v7, %v265_v33  ;;  %v330_v56 = vmax.bf16 %v1358_v7, %v266_v48  ;;  %v331_v58 = vmax.bf16 %v1358_v7, %v267_v49  ;;  %v300_v59 = vmax.bf16 %v1358_v7, %v236_v50  ;;  %v273_v28 = vld [vmem:[%s1412_s26 + $0xd4] sm:$0xf]  ;;  %v277_v48 = vld [vmem:[%s1412_s26 + $0xe4] sm:$0xf] }
  0x23   : > { %v1128_v46 = vcombine.low %v296_v38, %v297_v39  ;;  %v301_v60 = vmax.bf16 %v1358_v7, %v237_v51  ;;  %v332_v61 = vmax.bf16 %v1358_v7, %v268_v52  ;;  %v303_v30 = vmax.bf16 %v1358_v7, %v239_v6  ;;  %v242_v39 = vld [vmem:[%s1412_s26 + $0x58] sm:$0xf] }
  0x24   : > { %1220 = vmatpush3.bf16.msra.mxu0 %v1333_v27  ;;  %1300 = vmatpush3.bf16.msra.mxu1 %v1333_v27  ;;  %v1142_v27 = vcombine.low %v324_v62, %v325_v2  ;;  %v1144_v47 = vcombine.low %v328_v40, %v329_v41  ;;  %v333_v62 = vmax.bf16 %v1358_v7, %v269_v53  ;;  %v238_v2 = vld [vmem:[%s1412_s26 + $0x48] sm:$0xf]  ;;  %v243_v40 = vld [vmem:[%s1412_s26 + $0x5c] sm:$0xf] }
  0x25   : > { %v1145_v1 = vcombine.low %v330_v56, %v331_v58  ;;  %v1130_v12 = vcombine.low %v300_v59, %v301_v60  ;;  %v302_v29 = vmax.bf16 %v1358_v7, %v238_v2  ;;  %v335_v32 = vmax.bf16 %v1358_v7, %v271_v23 }
  0x26   : > { %v304_v33 = vmax.bf16 %v1358_v7, %v240_v24  ;;  %v306_v49 = vmax.bf16 %v1358_v7, %v242_v39  ;;  %v307_v50 = vmax.bf16 %v1358_v7, %v243_v40  ;;  %v341_v56 = vmax.bf16 %v1358_v7, %v277_v48 }
  0x27   : > { %1222 = vmatmul.mubr.bf16.vlgmr.msra.gmra.mrb[0].mxu0 %v1123_v42  ;;  %1254 = vmatmul.mubr.bf16.vlgmr.msra.gmra.mrb[0].mxu1 %v1139_v43  ;;  %v1127_v42 = vcombine.low %v294_v34, %v295_v35  ;;  %v1143_v43 = vcombine.low %v326_v36, %v327_v37  ;;  %v337_v36 = vmax.bf16 %v1358_v7, %v273_v28 }
  0x28   : > { %1225 = vmatprep.mubr.bf16.mxu0 %v1124_v54  ;;  %1257 = vmatprep.mubr.bf16.mxu1 %v1140_v55  ;;  %v298_v54 = vmax.bf16 %v1358_v7, %v234_v44  ;;  %v299_v55 = vmax.bf16 %v1358_v7, %v235_v45  ;;  %v1131_v37 = vcombine.low %v302_v29, %v303_v30  ;;  %v275_v44 = vld [vmem:[%s1412_s26 + $0xdc] sm:$0xf]  ;;  %v244_v45 = vld [vmem:[%s1412_s26 + $0x60] sm:$0xf] }
  0x29   : > { %v339_v52 = vmax.bf16 %v1358_v7, %v275_v44  ;;  %v308_v53 = vmax.bf16 %v1358_v7, %v244_v45  ;;  %v1133_v58 = vcombine.low %v306_v49, %v307_v50 }
  0x2a   : > { %v1129_v0 = vcombine.low %v298_v54, %v299_v55 }
  0x2f   : > { %1226 = vmatmul.mubr.bf16.gmra.mrb[4].mxu0 %v1125_v21  ;;  %1258 = vmatmul.mubr.bf16.gmra.mrb[4].mxu1 %v1141_v22  ;;  %v1146_v21 = vcombine.low %v332_v61, %v333_v62  ;;  %v270_v22 = vld [vmem:[%s1412_s26 + $0xc8] sm:$0xf] }
  0x30   : > { %1229 = vmatprep.mubr.bf16.mxu0 %v1126_v26  ;;  %1261 = vmatprep.mubr.bf16.mxu1 %v1142_v27  ;;  %v241_v26 = vld [vmem:[%s1412_s26 + $0x54] sm:$0xf]  ;;  %v272_v27 = vld [vmem:[%s1412_s26 + $0xd0] sm:$0xf]  ;;  %v334_v31 = vmax.bf16 %v1358_v7, %v270_v22 }
  0x31   : > { %v305_v34 = vmax.bf16 %v1358_v7, %v241_v26  ;;  %v336_v35 = vmax.bf16 %v1358_v7, %v272_v27 }
  0x32   : > { %v1147_v38 = vcombine.low %v334_v31, %v335_v32 }
  0x33   : > { %v1132_v41 = vcombine.low %v304_v33, %v305_v34 }
  0x37   : > { %1230 = vmatmul.mubr.bf16.gmra.mrb[8].mxu0 %v1127_v42  ;;  %1262 = vmatmul.mubr.bf16.gmra.mrb[8].mxu1 %v1143_v43  ;;  %v1148_v42 = vcombine.low %v336_v35, %v337_v36  ;;  %v274_v43 = vld [vmem:[%s1412_s26 + $0xd8] sm:$0xf] }
  0x38   : > { %1233 = vmatprep.mubr.bf16.mxu0 %v1128_v46  ;;  %1265 = vmatprep.mubr.bf16.mxu1 %v1144_v47  ;;  %v245_v46 = vld [vmem:[%s1412_s26 + $0x64] sm:$0xf]  ;;  %v276_v47 = vld [vmem:[%s1412_s26 + $0xe0] sm:$0xf]  ;;  %v338_v51 = vmax.bf16 %v1358_v7, %v274_v43 }
  0x39   : > { %v309_v54 = vmax.bf16 %v1358_v7, %v245_v46  ;;  %v340_v55 = vmax.bf16 %v1358_v7, %v276_v47  ;;  %v1615_v7 = vld [vmem:[%s1825_s2] ss:$0 sm:$0xff] }
  0x3a   : > { %v1149_v59 = vcombine.low %v338_v51, %v339_v52 }
  0x3b   : > { %v1134_v60 = vcombine.low %v308_v53, %v309_v54  ;;  %v1150_v61 = vcombine.low %v340_v55, %v341_v56 }
  0x3f   : > { %1234 = vmatmul.mubr.bf16.gmra.mrb[12].mxu0 %v1129_v0  ;;  %1266 = vmatmul.mubr.bf16.gmra.mrb[12].mxu1 %v1145_v1 }
  0x40   : > { %1237 = vmatprep.mubr.bf16.mxu0 %v1130_v12  ;;  %1269 = vmatprep.mubr.bf16.mxu1 %v1146_v21 }
  0x47   : > { %1238 = vmatmul.mubr.bf16.gmra.mrb[16].mxu0 %v1131_v37  ;;  %1270 = vmatmul.mubr.bf16.gmra.mrb[16].mxu1 %v1147_v38 }
  0x48   : > { %1241 = vmatprep.mubr.bf16.mxu0 %v1132_v41  ;;  %1273 = vmatprep.mubr.bf16.mxu1 %v1148_v42 }
  0x4f   : > { %1242 = vmatmul.mubr.bf16.gmra.mrb[20].mxu0 %v1133_v58  ;;  %1274 = vmatmul.mubr.bf16.gmra.mrb[20].mxu1 %v1149_v59 }
  0x50   : > { %1245 = vmatprep.mubr.bf16.mxu0 %v1134_v60  ;;  %1277 = vmatprep.mubr.bf16.mxu1 %v1150_v61 }
  0x57   : > { %1246 = vmatmul.mubr.bf16.gmra.mrb[24].mxu0 %v1135_v8  ;;  %1278 = vmatmul.mubr.bf16.gmra.mrb[24].mxu1 %v1151_v13 }
  0x58   : > { %1249 = vmatprep.mubr.bf16.mxu0 %v1136_v16  ;;  %1281 = vmatprep.mubr.bf16.mxu1 %v1152_v17 }
  0x5f   : > { %1250 = vmatmul.mubr.bf16.gmra.mrb[28].mxu0 %v1137_v19  ;;  %1282 = vmatmul.mubr.bf16.gmra.mrb[28].mxu1 %v1153_v25 }
  0xfa   : > { %v1223_v57 = vpop.f32.mrb[0].mxu0  ;;  %v1255_v63 = vpop.f32.mrb[0].mxu1 }
  0xfb   : > { %v902_v3 = vadd.f32 %v1223_v57, %v1615_v7  ;;  %v934_v4 = vadd.f32 %v1255_v63, %v1615_v7  ;;  %v638_v5 = vpop.f32.mrb[1].mxu0  ;;  %v766_v8 = vpop.f32.mrb[1].mxu1 }
  0xfc   : > { %v900_v9 = vadd.f32 %v1615_v7, %v638_v5  ;;  %v932_v10 = vadd.f32 %v1615_v7, %v766_v8  ;;  %v1224_v11 = vpop.f32.mrb[2].mxu0  ;;  %v1256_v13 = vpop.f32.mrb[2].mxu1 }
  0xfd   : > { %967 = vst.msk [vmem:[%s1620_s19 + $0x10] sm:$0xff] %vm964_vm0, %v902_v3  ;;  %999 = vst.msk [vmem:[%s1620_s19 + $0x110] sm:$0xff] %vm964_vm0, %v934_v4  ;;  %v903_v14 = vadd.f32 %v1224_v11, %v1615_v7  ;;  %v935_v15 = vadd.f32 %v1256_v13, %v1615_v7  ;;  %v641_v16 = vpop.f32.mrb[3].mxu0  ;;  %v769_v17 = vpop.f32.mrb[3].mxu1 }
  0xfe   : > { %965 = vst.msk [vmem:[%s1620_s19] sm:$0xff] %vm964_vm0, %v900_v9  ;;  %997 = vst.msk [vmem:[%s1620_s19 + $0x100] sm:$0xff] %vm964_vm0, %v932_v10  ;;  %v901_v18 = vadd.f32 %v1615_v7, %v641_v16  ;;  %v933_v19 = vadd.f32 %v1615_v7, %v769_v17 }
  0xff   : > { %968 = vst.msk [vmem:[%s1620_s19 + $0x18] sm:$0xff] %vm964_vm0, %v903_v14  ;;  %1000 = vst.msk [vmem:[%s1620_s19 + $0x118] sm:$0xff] %vm964_vm0, %v935_v15 }
 0x100   : > { %966 = vst.msk [vmem:[%s1620_s19 + $0x8] sm:$0xff] %vm964_vm0, %v901_v18  ;;  %998 = vst.msk [vmem:[%s1620_s19 + $0x108] sm:$0xff] %vm964_vm0, %v933_v19 }
 0x102   : > { %v1227_v20 = vpop.f32.mrb[4].mxu0  ;;  %v1259_v25 = vpop.f32.mrb[4].mxu1 }
 0x103   : > { %v906_v62 = vadd.f32 %v1227_v20, %v1615_v7  ;;  %v938_v0 = vadd.f32 %v1259_v25, %v1615_v7  ;;  %v654_v1 = vpop.f32.mrb[5].mxu0  ;;  %v782_v2 = vpop.f32.mrb[5].mxu1 }
 0x104   : > { %v904_v6 = vadd.f32 %v1615_v7, %v654_v1  ;;  %v936_v12 = vadd.f32 %v1615_v7, %v782_v2  ;;  %v1228_v21 = vpop.f32.mrb[6].mxu0  ;;  %v1260_v22 = vpop.f32.mrb[6].mxu1 }
 0x105   : > { %971 = vst.msk [vmem:[%s1620_s19 + $0x30] sm:$0xff] %vm964_vm0, %v906_v62  ;;  %1003 = vst.msk [vmem:[%s1620_s19 + $0x130] sm:$0xff] %vm964_vm0, %v938_v0  ;;  %v907_v23 = vadd.f32 %v1228_v21, %v1615_v7  ;;  %v939_v24 = vadd.f32 %v1260_v22, %v1615_v7  ;;  %v657_v26 = vpop.f32.mrb[7].mxu0  ;;  %v785_v27 = vpop.f32.mrb[7].mxu1 }
 0x106   : > { %969 = vst.msk [vmem:[%s1620_s19 + $0x20] sm:$0xff] %vm964_vm0, %v904_v6  ;;  %1001 = vst.msk [vmem:[%s1620_s19 + $0x120] sm:$0xff] %vm964_vm0, %v936_v12  ;;  %v905_v28 = vadd.f32 %v1615_v7, %v657_v26  ;;  %v937_v29 = vadd.f32 %v1615_v7, %v785_v27 }
 0x107   : > { %972 = vst.msk [vmem:[%s1620_s19 + $0x38] sm:$0xff] %vm964_vm0, %v907_v23  ;;  %1004 = vst.msk [vmem:[%s1620_s19 + $0x138] sm:$0xff] %vm964_vm0, %v939_v24 }
 0x108   : > { %970 = vst.msk [vmem:[%s1620_s19 + $0x28] sm:$0xff] %vm964_vm0, %v905_v28  ;;  %1002 = vst.msk [vmem:[%s1620_s19 + $0x128] sm:$0xff] %vm964_vm0, %v937_v29 }
 0x10a   : > { %v1231_v30 = vpop.f32.mrb[8].mxu0  ;;  %v1263_v31 = vpop.f32.mrb[8].mxu1 }
 0x10b   : > { %v910_v32 = vadd.f32 %v1231_v30, %v1615_v7  ;;  %v942_v33 = vadd.f32 %v1263_v31, %v1615_v7  ;;  %v670_v34 = vpop.f32.mrb[9].mxu0  ;;  %v798_v35 = vpop.f32.mrb[9].mxu1 }
 0x10c   : > { %v908_v36 = vadd.f32 %v1615_v7, %v670_v34  ;;  %v940_v37 = vadd.f32 %v1615_v7, %v798_v35  ;;  %v1232_v38 = vpop.f32.mrb[10].mxu0  ;;  %v1264_v39 = vpop.f32.mrb[10].mxu1 }
 0x10d   : > { %975 = vst.msk [vmem:[%s1620_s19 + $0x50] sm:$0xff] %vm964_vm0, %v910_v32  ;;  %1007 = vst.msk [vmem:[%s1620_s19 + $0x150] sm:$0xff] %vm964_vm0, %v942_v33  ;;  %v911_v40 = vadd.f32 %v1232_v38, %v1615_v7  ;;  %v943_v41 = vadd.f32 %v1264_v39, %v1615_v7  ;;  %v673_v42 = vpop.f32.mrb[11].mxu0  ;;  %v801_v43 = vpop.f32.mrb[11].mxu1 }
 0x10e   : > { %973 = vst.msk [vmem:[%s1620_s19 + $0x40] sm:$0xff] %vm964_vm0, %v908_v36  ;;  %1005 = vst.msk [vmem:[%s1620_s19 + $0x140] sm:$0xff] %vm964_vm0, %v940_v37  ;;  %v909_v44 = vadd.f32 %v1615_v7, %v673_v42  ;;  %v941_v45 = vadd.f32 %v1615_v7, %v801_v43 }
 0x10f   : > { %976 = vst.msk [vmem:[%s1620_s19 + $0x58] sm:$0xff] %vm964_vm0, %v911_v40  ;;  %1008 = vst.msk [vmem:[%s1620_s19 + $0x158] sm:$0xff] %vm964_vm0, %v943_v41 }
 0x110   : > { %974 = vst.msk [vmem:[%s1620_s19 + $0x48] sm:$0xff] %vm964_vm0, %v909_v44  ;;  %1006 = vst.msk [vmem:[%s1620_s19 + $0x148] sm:$0xff] %vm964_vm0, %v941_v45 }
 0x112   : > { %v1235_v46 = vpop.f32.mrb[12].mxu0  ;;  %v1267_v47 = vpop.f32.mrb[12].mxu1 }
 0x113   : > { %v914_v48 = vadd.f32 %v1235_v46, %v1615_v7  ;;  %v946_v49 = vadd.f32 %v1267_v47, %v1615_v7  ;;  %v686_v50 = vpop.f32.mrb[13].mxu0  ;;  %v814_v51 = vpop.f32.mrb[13].mxu1 }
 0x114   : > { %v912_v52 = vadd.f32 %v1615_v7, %v686_v50  ;;  %v944_v53 = vadd.f32 %v1615_v7, %v814_v51  ;;  %v1236_v54 = vpop.f32.mrb[14].mxu0  ;;  %v1268_v55 = vpop.f32.mrb[14].mxu1 }
 0x115   : > { %979 = vst.msk [vmem:[%s1620_s19 + $0x70] sm:$0xff] %vm964_vm0, %v914_v48  ;;  %1011 = vst.msk [vmem:[%s1620_s19 + $0x170] sm:$0xff] %vm964_vm0, %v946_v49  ;;  %v915_v56 = vadd.f32 %v1236_v54, %v1615_v7  ;;  %v947_v58 = vadd.f32 %v1268_v55, %v1615_v7  ;;  %v689_v59 = vpop.f32.mrb[15].mxu0  ;;  %v817_v60 = vpop.f32.mrb[15].mxu1 }
 0x116   : > { %977 = vst.msk [vmem:[%s1620_s19 + $0x60] sm:$0xff] %vm964_vm0, %v912_v52  ;;  %1009 = vst.msk [vmem:[%s1620_s19 + $0x160] sm:$0xff] %vm964_vm0, %v944_v53  ;;  %v913_v61 = vadd.f32 %v1615_v7, %v689_v59  ;;  %v945_v57 = vadd.f32 %v1615_v7, %v817_v60 }
 0x117   : > { %980 = vst.msk [vmem:[%s1620_s19 + $0x78] sm:$0xff] %vm964_vm0, %v915_v56  ;;  %1012 = vst.msk [vmem:[%s1620_s19 + $0x178] sm:$0xff] %vm964_vm0, %v947_v58 }
 0x118   : > { %978 = vst.msk [vmem:[%s1620_s19 + $0x68] sm:$0xff] %vm964_vm0, %v913_v61  ;;  %1010 = vst.msk [vmem:[%s1620_s19 + $0x168] sm:$0xff] %vm964_vm0, %v945_v57 }
 0x11a   : > { %v1239_v63 = vpop.f32.mrb[16].mxu0  ;;  %v1271_v3 = vpop.f32.mrb[16].mxu1 }
 0x11b   : > { %v918_v4 = vadd.f32 %v1239_v63, %v1615_v7  ;;  %v950_v5 = vadd.f32 %v1271_v3, %v1615_v7  ;;  %v702_v8 = vpop.f32.mrb[17].mxu0  ;;  %v830_v9 = vpop.f32.mrb[17].mxu1 }
 0x11c   : > { %v916_v10 = vadd.f32 %v1615_v7, %v702_v8  ;;  %v948_v11 = vadd.f32 %v1615_v7, %v830_v9  ;;  %v1240_v13 = vpop.f32.mrb[18].mxu0  ;;  %v1272_v14 = vpop.f32.mrb[18].mxu1 }
 0x11d   : > { %983 = vst.msk [vmem:[%s1620_s19 + $0x90] sm:$0xff] %vm964_vm0, %v918_v4  ;;  %1015 = vst.msk [vmem:[%s1620_s19 + $0x190] sm:$0xff] %vm964_vm0, %v950_v5  ;;  %v919_v15 = vadd.f32 %v1240_v13, %v1615_v7  ;;  %v951_v16 = vadd.f32 %v1272_v14, %v1615_v7  ;;  %v705_v17 = vpop.f32.mrb[19].mxu0  ;;  %v833_v18 = vpop.f32.mrb[19].mxu1 }
 0x11e   : > { %981 = vst.msk [vmem:[%s1620_s19 + $0x80] sm:$0xff] %vm964_vm0, %v916_v10  ;;  %1013 = vst.msk [vmem:[%s1620_s19 + $0x180] sm:$0xff] %vm964_vm0, %v948_v11  ;;  %v917_v19 = vadd.f32 %v1615_v7, %v705_v17  ;;  %v949_v20 = vadd.f32 %v1615_v7, %v833_v18 }
 0x11f   : > { %984 = vst.msk [vmem:[%s1620_s19 + $0x98] sm:$0xff] %vm964_vm0, %v919_v15  ;;  %1016 = vst.msk [vmem:[%s1620_s19 + $0x198] sm:$0xff] %vm964_vm0, %v951_v16 }
 0x120   : > { %982 = vst.msk [vmem:[%s1620_s19 + $0x88] sm:$0xff] %vm964_vm0, %v917_v19  ;;  %1014 = vst.msk [vmem:[%s1620_s19 + $0x188] sm:$0xff] %vm964_vm0, %v949_v20 }
 0x122   : > { %v1243_v25 = vpop.f32.mrb[20].mxu0  ;;  %v1275_v62 = vpop.f32.mrb[20].mxu1 }
 0x123   : > { %v922_v0 = vadd.f32 %v1243_v25, %v1615_v7  ;;  %v954_v1 = vadd.f32 %v1275_v62, %v1615_v7  ;;  %v718_v2 = vpop.f32.mrb[21].mxu0  ;;  %v846_v6 = vpop.f32.mrb[21].mxu1 }
 0x124   : > { %v920_v12 = vadd.f32 %v1615_v7, %v718_v2  ;;  %v952_v21 = vadd.f32 %v1615_v7, %v846_v6  ;;  %v1244_v22 = vpop.f32.mrb[22].mxu0  ;;  %v1276_v23 = vpop.f32.mrb[22].mxu1 }
 0x125   : > { %987 = vst.msk [vmem:[%s1620_s19 + $0xb0] sm:$0xff] %vm964_vm0, %v922_v0  ;;  %1019 = vst.msk [vmem:[%s1620_s19 + $0x1b0] sm:$0xff] %vm964_vm0, %v954_v1  ;;  %v923_v24 = vadd.f32 %v1244_v22, %v1615_v7  ;;  %v955_v26 = vadd.f32 %v1276_v23, %v1615_v7  ;;  %v721_v27 = vpop.f32.mrb[23].mxu0  ;;  %v849_v28 = vpop.f32.mrb[23].mxu1 }
 0x126   : > { %985 = vst.msk [vmem:[%s1620_s19 + $0xa0] sm:$0xff] %vm964_vm0, %v920_v12  ;;  %1017 = vst.msk [vmem:[%s1620_s19 + $0x1a0] sm:$0xff] %vm964_vm0, %v952_v21  ;;  %v921_v29 = vadd.f32 %v1615_v7, %v721_v27  ;;  %v953_v30 = vadd.f32 %v1615_v7, %v849_v28 }
 0x127   : > { %988 = vst.msk [vmem:[%s1620_s19 + $0xb8] sm:$0xff] %vm964_vm0, %v923_v24  ;;  %1020 = vst.msk [vmem:[%s1620_s19 + $0x1b8] sm:$0xff] %vm964_vm0, %v955_v26 }
 0x128   : > { %986 = vst.msk [vmem:[%s1620_s19 + $0xa8] sm:$0xff] %vm964_vm0, %v921_v29  ;;  %1018 = vst.msk [vmem:[%s1620_s19 + $0x1a8] sm:$0xff] %vm964_vm0, %v953_v30 }
 0x12a   : > { %v1247_v31 = vpop.f32.mrb[24].mxu0  ;;  %v1279_v32 = vpop.f32.mrb[24].mxu1 }
 0x12b   : > { %v926_v33 = vadd.f32 %v1247_v31, %v1615_v7  ;;  %v958_v34 = vadd.f32 %v1279_v32, %v1615_v7  ;;  %v734_v35 = vpop.f32.mrb[25].mxu0  ;;  %v862_v36 = vpop.f32.mrb[25].mxu1 }
 0x12c   : > { %v924_v37 = vadd.f32 %v1615_v7, %v734_v35  ;;  %v956_v38 = vadd.f32 %v1615_v7, %v862_v36  ;;  %v1248_v39 = vpop.f32.mrb[26].mxu0  ;;  %v1280_v40 = vpop.f32.mrb[26].mxu1 }
 0x12d   : > { %991 = vst.msk [vmem:[%s1620_s19 + $0xd0] sm:$0xff] %vm964_vm0, %v926_v33  ;;  %1023 = vst.msk [vmem:[%s1620_s19 + $0x1d0] sm:$0xff] %vm964_vm0, %v958_v34  ;;  %v927_v41 = vadd.f32 %v1248_v39, %v1615_v7  ;;  %v959_v42 = vadd.f32 %v1280_v40, %v1615_v7  ;;  %v737_v43 = vpop.f32.mrb[27].mxu0  ;;  %v865_v44 = vpop.f32.mrb[27].mxu1 }
 0x12e   : > { %989 = vst.msk [vmem:[%s1620_s19 + $0xc0] sm:$0xff] %vm964_vm0, %v924_v37  ;;  %1021 = vst.msk [vmem:[%s1620_s19 + $0x1c0] sm:$0xff] %vm964_vm0, %v956_v38  ;;  %v925_v45 = vadd.f32 %v1615_v7, %v737_v43  ;;  %v957_v46 = vadd.f32 %v1615_v7, %v865_v44 }
 0x12f   : > { %992 = vst.msk [vmem:[%s1620_s19 + $0xd8] sm:$0xff] %vm964_vm0, %v927_v41  ;;  %1024 = vst.msk [vmem:[%s1620_s19 + $0x1d8] sm:$0xff] %vm964_vm0, %v959_v42 }
 0x130   : > { %990 = vst.msk [vmem:[%s1620_s19 + $0xc8] sm:$0xff] %vm964_vm0, %v925_v45  ;;  %1022 = vst.msk [vmem:[%s1620_s19 + $0x1c8] sm:$0xff] %vm964_vm0, %v957_v46 }
 0x132   : > { %v1251_v47 = vpop.f32.mrb[28].mxu0  ;;  %v1283_v48 = vpop.f32.mrb[28].mxu1 }
 0x133   : > { %v930_v49 = vadd.f32 %v1251_v47, %v1615_v7  ;;  %v962_v50 = vadd.f32 %v1283_v48, %v1615_v7  ;;  %v750_v51 = vpop.f32.mrb[29].mxu0  ;;  %v878_v52 = vpop.f32.mrb[29].mxu1 }
 0x134   : > { %v928_v53 = vadd.f32 %v1615_v7, %v750_v51  ;;  %v960_v54 = vadd.f32 %v1615_v7, %v878_v52  ;;  %v1252_v55 = vpop.f32.mrb[30].mxu0  ;;  %v1284_v56 = vpop.f32.mrb[30].mxu1 }
 0x135   : > { %995 = vst.msk [vmem:[%s1620_s19 + $0xf0] sm:$0xff] %vm964_vm0, %v930_v49  ;;  %1027 = vst.msk [vmem:[%s1620_s19 + $0x1f0] sm:$0xff] %vm964_vm0, %v962_v50  ;;  %v931_v58 = vadd.f32 %v1252_v55, %v1615_v7  ;;  %v963_v59 = vadd.f32 %v1284_v56, %v1615_v7  ;;  %v753_v60 = vpop.f32.mrb[31].mxu0  ;;  %v881_v61 = vpop.f32.mrb[31].mxu1 }
 0x136   : > { %993 = vst.msk [vmem:[%s1620_s19 + $0xe0] sm:$0xff] %vm964_vm0, %v928_v53  ;;  %1025 = vst.msk [vmem:[%s1620_s19 + $0x1e0] sm:$0xff] %vm964_vm0, %v960_v54  ;;  %v929_v57 = vadd.f32 %v1615_v7, %v753_v60  ;;  %v961_v63 = vadd.f32 %v1615_v7, %v881_v61 }
 0x137   : > { %996 = vst.msk [vmem:[%s1620_s19 + $0xf8] sm:$0xff] %vm964_vm0, %v931_v58  ;;  %1028 = vst.msk [vmem:[%s1620_s19 + $0x1f8] sm:$0xff] %vm964_vm0, %v963_v59 }
 0x138   : > { %994 = vst.msk [vmem:[%s1620_s19 + $0xe8] sm:$0xff] %vm964_vm0, %v929_v57  ;;  %1026 = vst.msk [vmem:[%s1620_s19 + $0x1e8] sm:$0xff] %vm964_vm0, %v961_v63 }
 0x139 PF: > { %s13_s14 = sadd.s32 1, %s1356_s14   ;;  %s1827_s12 = smov %s1352_s13 }
 0x13a   : > { %p10_p5 = scmp.ge.s32.totalorder %s13_s14, 5   ;;  %s1828_s13 = smov %s1830_s15 }
 0x13c   :  { %12 = sbr.rel (!%p10_p5) target bundleno = 2 (0x2), region = 65 }

</bundles_post_ra>
